<compile_context>
chip_gen: v7x
topology: tpu7x:2x2x1
jax: 0.10.0
libtpu: 0.0.40
codegen_flags: <defaults>
</compile_context>

<pallas_src>
import math
import functools

import jax
import jax.numpy as jnp
from jax import lax
from jax.experimental import pallas as pl
from jax.experimental.pallas import tpu as pltpu


# ----------------------------------------------------------------------------- config
class Config:
    train_type = "ksh"          # -> dac projection = audio_vocab_size * 9
    enc_d_model = 32
    dec_d_model = 32
    enc_num_heads = 4
    dec_num_heads = 4
    enc_num_layers = 2
    dec_num_layers = 2
    attn_dropout = 0.0
    embed_dropout = 0.0
    audio_vocab_size = 32
    midi_vocab_size = 16
    audio_rep_dim = 9
    dim_feedforward = 2048      # nn.TransformerEncoder/DecoderLayer default
    layer_norm_eps = 1e-5


FFN_CHUNK = 512                 # dim_feedforward processed in 4 chunks of 512


# ----------------------------------------------------------------------------- in-kernel helpers
def _ln(x, g, b, eps):
    """Pre-LN, biased variance (matches PyTorch LayerNorm). x:(M,E), g/b:(1,E), all f32."""
    mean = jnp.mean(x, axis=-1, keepdims=True)
    cent = x - mean
    var = jnp.mean(cent * cent, axis=-1, keepdims=True)
    return cent * lax.rsqrt(var + eps) * g + b


def _attention(q2, k2, v2, wo, bo, *, B, Sq, Sk, H, Dh):
    """Multi-head softmax attention on token-major 2D activations.

    q2:(B*Sq,E), k2/v2:(B*Sk,E), f32.  Heads are sliced in-register (static lane slices) and each
    per-head context is folded straight into the output projection (out += O_h @ wo[h*Dh:(h+1)*Dh]),
    so no concat/transpose is materialized.  3-D batched einsums only (Mosaic-safe).
    """
    E = H * Dh
    q3 = q2.reshape(B, Sq, E)
    k3 = k2.reshape(B, Sk, E)
    v3 = v2.reshape(B, Sk, E)
    scale = 1.0 / math.sqrt(Dh)

    out = None
    for h in range(H):
        lo, hi = h * Dh, (h + 1) * Dh
        qh = q3[:, :, lo:hi] * scale
        kh = k3[:, :, lo:hi]
        vh = v3[:, :, lo:hi]
        s = jnp.einsum("bqd,bkd->bqk", qh, kh, preferred_element_type=jnp.float32)  # (B,Sq,Sk)
        m = jnp.max(s, axis=-1, keepdims=True)
        p = jnp.exp(s - m)
        denom = jnp.sum(p, axis=-1, keepdims=True)
        p = p * pl.reciprocal(denom, approx=True)                                    # EUP slot
        oh = jnp.einsum("bqk,bkd->bqd", p, vh, preferred_element_type=jnp.float32)   # (B,Sq,Dh)
        contrib = jnp.dot(oh.reshape(B * Sq, Dh), wo[lo:hi, :],
                          preferred_element_type=jnp.float32)                        # (B*Sq,E)
        out = contrib if out is None else out + contrib
    return out + bo


def _ffn_chunked(h, w1_ref, b1_ref, w2_ref, b2, *, dff, chunk):
    """relu(h@w1+b1)@w2 + b2, chunked over dim_feedforward.

    w1/w2 are bf16 VMEM refs sliced per chunk so only (E,chunk)+(chunk,E) weights and a
    (M,chunk) bf16 relu intermediate are live at a time (no 64-vreg blowup / spills).
    """
    M, _E = h.shape
    hb = h.astype(jnp.bfloat16)
    n_chunks = dff // chunk

    def body(c, acc):
        start = pl.multiple_of(c * chunk, chunk)
        w1c = w1_ref[:, pl.ds(start, chunk)]            # (E, chunk)   bf16
        b1c = b1_ref[:, pl.ds(start, chunk)]            # (1, chunk)   f32
        w2c = w2_ref[pl.ds(start, chunk), :]            # (chunk, E)   bf16
        f = jnp.maximum(jnp.dot(hb, w1c, preferred_element_type=jnp.float32) + b1c, 0.0)
        return acc + jnp.dot(f.astype(jnp.bfloat16), w2c, preferred_element_type=jnp.float32)

    acc = lax.fori_loop(0, n_chunks, body, jnp.zeros((M, _E), jnp.float32), unroll=True)
    return acc + b2


# ----------------------------------------------------------------------------- fused stack kernels
def _encoder_stack_kernel(x_ref, wqkv_ref, wo_ref, w1_ref, w2_ref, vec_ref, b1_ref,
                          o_ref, act_ref, *, B, S, H, dff, eps, chunk):
    """One grid step == one pre-LN encoder layer; activation carried in VMEM scratch."""
    E = act_ref.shape[-1]
    Dh = E // H
    l = pl.program_id(0)

    @pl.when(l == 0)
    def _():
        act_ref[...] = x_ref[...]

    x = act_ref[...]                       # (B*S, E) f32, resident across all layers
    vec = vec_ref[...]                     # rows: ln1_g ln1_b bq bk bv bo ln2_g ln2_b b2

    # --- self-attention (pre-LN), fused QKV projection (one MXU push) ---
    h = _ln(x, vec[0:1], vec[1:2], eps)
    qkv = jnp.dot(h, wqkv_ref[...], preferred_element_type=jnp.float32)   # (M, 3E)
    q = qkv[:, 0 * E:1 * E] + vec[2:3]
    k = qkv[:, 1 * E:2 * E] + vec[3:4]
    v = qkv[:, 2 * E:3 * E] + vec[4:5]
    x = x + _attention(q, k, v, wo_ref[...], vec[5:6], B=B, Sq=S, Sk=S, H=H, Dh=Dh)

    # --- FFN (pre-LN, chunked over dff, bf16 MXU operands) ---
    h = _ln(x, vec[6:7], vec[7:8], eps)
    x = x + _ffn_chunked(h, w1_ref, b1_ref, w2_ref, vec[8:9], dff=dff, chunk=chunk)

    act_ref[...] = x

    @pl.when(l == pl.num_programs(0) - 1)
    def _():
        o_ref[...] = x


def _decoder_stack_kernel(y_ref, mem_ref, wqkv_ref, wos_ref, wqc_ref, wkvc_ref, woc_ref,
                          w1_ref, w2_ref, vec_ref, b1_ref, pw_ref, pb_ref,
                          o_ref, act_ref, *, B, S, Sm, H, dff, eps, chunk):
    """One grid step == one pre-LN decoder layer; final dac projection fused into last step."""
    E = act_ref.shape[-1]
    Dh = E // H
    l = pl.program_id(0)

    @pl.when(l == 0)
    def _():
        act_ref[...] = y_ref[...]

    x = act_ref[...]                       # (B*S, E)  f32
    mem = mem_ref[...]                     # (B*Sm, E) f32 encoder memory (VMEM-resident)
    vec = vec_ref[...]                     # rows: ln1g ln1b bq bk bv bo | ln2g ln2b cbq cbk cbv cbo | ln3g ln3b b2

    # --- self-attention (no tgt_mask, matching the reference) ---
    h = _ln(x, vec[0:1], vec[1:2], eps)
    qkv = jnp.dot(h, wqkv_ref[...], preferred_element_type=jnp.float32)
    q = qkv[:, 0 * E:1 * E] + vec[2:3]
    k = qkv[:, 1 * E:2 * E] + vec[3:4]
    v = qkv[:, 2 * E:3 * E] + vec[4:5]
    x = x + _attention(q, k, v, wos_ref[...], vec[5:6], B=B, Sq=S, Sk=S, H=H, Dh=Dh)

    # --- cross-attention against encoder memory (fused KV projection) ---
    h = _ln(x, vec[6:7], vec[7:8], eps)
    q = jnp.dot(h, wqc_ref[...], preferred_element_type=jnp.float32) + vec[8:9]
    kv = jnp.dot(mem, wkvc_ref[...], preferred_element_type=jnp.float32)
    k = kv[:, 0 * E:1 * E] + vec[9:10]
    v = kv[:, 1 * E:2 * E] + vec[10:11]
    x = x + _attention(q, k, v, woc_ref[...], vec[11:12], B=B, Sq=S, Sk=Sm, H=H, Dh=Dh)

    # --- FFN ---
    h = _ln(x, vec[12:13], vec[13:14], eps)
    x = x + _ffn_chunked(h, w1_ref, b1_ref, w2_ref, vec[14:15], dff=dff, chunk=chunk)

    act_ref[...] = x

    # --- fused dac projection, lane-dense padded output (288 -> 384), last layer only ---
    @pl.when(l == pl.num_programs(0) - 1)
    def _():
        o_ref[...] = jnp.dot(x.astype(jnp.bfloat16), pw_ref[...],
                             preferred_element_type=jnp.float32) + pb_ref[...]


# ----------------------------------------------------------------------------- specs / wrappers
def _rep_spec(shape):
    zeros = (0,) * len(shape)
    return pl.BlockSpec(shape, lambda l: zeros)              # same block every layer -> no re-DMA


def _layer_spec(shape):
    zeros = (0,) * len(shape)
    return pl.BlockSpec((None,) + shape, lambda l: (l,) + zeros)   # layer-indexed, squeezed dim


def run_encoder_stack(x2d, w, B, S, H, dff, eps):
    M, E = x2d.shape
    L = w["wqkv"].shape[0]
    grid_spec = pltpu.PrefetchScalarGridSpec(
        num_scalar_prefetch=0,
        grid=(L,),
        in_specs=[
            _rep_spec((M, E)),                 # x
            _layer_spec((E, 3 * E)),           # wqkv   f32
            _layer_spec((E, E)),               # wo     f32
            _layer_spec((E, dff)),             # w1     bf16
            _layer_spec((dff, E)),             # w2     bf16
            _layer_spec((9, E)),               # packed LN params + biases, f32
            _layer_spec((1, dff)),             # b1     f32
        ],
        out_specs=_rep_spec((M, E)),
        scratch_shapes=[pltpu.VMEM((M, E), jnp.float32)],
    )
    return pl.pallas_call(
        functools.partial(_encoder_stack_kernel, B=B, S=S, H=H, dff=dff, eps=eps, chunk=FFN_CHUNK),
        grid_spec=grid_spec,
        out_shape=jax.ShapeDtypeStruct((M, E), jnp.float32),
        compiler_params=pltpu.CompilerParams(
            dimension_semantics=("arbitrary",),           # layers are sequential (state carried)
            vmem_limit_bytes=32 * 1024 * 1024,
        ),
    )(x2d, w["wqkv"], w["wo"], w["w1"], w["w2"], w["vec"], w["b1"])


def run_decoder_stack(y2d, mem2d, w, proj_w_pad, proj_b_pad, B, S, Sm, H, dff, eps):
    Md, E = y2d.shape
    Mm = mem2d.shape[0]
    L = w["wqkv"].shape[0]
    P = proj_w_pad.shape[1]
    grid_spec = pltpu.PrefetchScalarGridSpec(
        num_scalar_prefetch=0,
        grid=(L,),
        in_specs=[
            _rep_spec((Md, E)),                # y
            _rep_spec((Mm, E)),                # encoder memory
            _layer_spec((E, 3 * E)),           # self-attn wqkv   f32
            _layer_spec((E, E)),               # self-attn wo     f32
            _layer_spec((E, E)),               # cross-attn wq    f32
            _layer_spec((E, 2 * E)),           # cross-attn wkv   f32
            _layer_spec((E, E)),               # cross-attn wo    f32
            _layer_spec((E, dff)),             # w1               bf16
            _layer_spec((dff, E)),             # w2               bf16
            _layer_spec((15, E)),              # packed LN params + biases, f32
            _layer_spec((1, dff)),             # b1               f32
            _rep_spec((E, P)),                 # padded projection weight, bf16
            _rep_spec((1, P)),                 # padded projection bias,   f32
        ],
        out_specs=_rep_spec((Md, P)),
        scratch_shapes=[pltpu.VMEM((Md, E), jnp.float32)],
    )
    return pl.pallas_call(
        functools.partial(_decoder_stack_kernel, B=B, S=S, Sm=Sm, H=H, dff=dff, eps=eps,
                          chunk=FFN_CHUNK),
        grid_spec=grid_spec,
        out_shape=jax.ShapeDtypeStruct((Md, P), jnp.float32),
        compiler_params=pltpu.CompilerParams(
            dimension_semantics=("arbitrary",),
            vmem_limit_bytes=32 * 1024 * 1024,
        ),
    )(y2d, mem2d, w["wqkv"], w["wo_s"], w["wq_c"], w["wkv_c"], w["wo_c"],
      w["w1"], w["w2"], w["vec"], w["b1"], proj_w_pad, proj_b_pad)


# ----------------------------------------------------------------------------- model glue (JAX)
def positional_encoding(max_len, d_model):
    pos = jnp.arange(max_len, dtype=jnp.float32)[:, None]
    div = jnp.exp(jnp.arange(0, d_model, 2, dtype=jnp.float32) * (-math.log(10000.0) / d_model))
    pe = jnp.zeros((max_len, d_model), jnp.float32)
    pe = pe.at[:, 0::2].set(jnp.sin(pos * div))
    pe = pe.at[:, 1::2].set(jnp.cos(pos * div))
    return pe


def _summed_audio_embedding(tokens, emb_tables, n_codebooks):
    # Reproduces the in-place "+=" bug: codebook 0 is counted twice.
    tok = emb_tables[0][tokens[:, :, 0]] * 2.0
    for i in range(1, n_codebooks):
        tok = tok + emb_tables[i][tokens[:, :, i]]
    return tok


def encoder_decoder_forward(params, x_tokens, y_tokens, cfg: Config):
    """x_tokens: (B, S_enc, C, 9) int32 (only channel 0 used); y_tokens: (B, S_dec, 9) int32."""
    pe = params["pe"]
    E = cfg.dec_d_model

    # --- encoder side ---
    x_l = x_tokens[:, :, 0, :]
    tok = _summed_audio_embedding(x_l, params["audio_emb"], cfg.audio_rep_dim)
    tok = tok + pe[: tok.shape[1], :]                  # dropout = identity (eval)
    B, Se, _ = tok.shape
    enc_out = run_encoder_stack(tok.reshape(B * Se, E), params["enc"], B, Se,
                                cfg.enc_num_heads, cfg.dim_feedforward, cfg.layer_norm_eps)

    # --- decoder side (train_type != 'kshm'), projection fused into the decoder stack ---
    tok = _summed_audio_embedding(y_tokens, params["audio_emb"], 9)
    tok = tok + pe[: tok.shape[1], :]
    Sd = tok.shape[1]
    logits_pad = run_decoder_stack(tok.reshape(B * Sd, E), enc_out, params["dec"],
                                   params["proj_w"], params["proj_b"],
                                   B, Sd, Se, cfg.dec_num_heads, cfg.dim_feedforward,
                                   cfg.layer_norm_eps)

    out_dim = cfg.audio_vocab_size * 9
    return logits_pad[:, :out_dim].reshape(B, Sd, out_dim)


# ----------------------------------------------------------------------------- deterministic init
def init_params(key, cfg: Config):
    E = cfg.dec_d_model
    dff = cfg.dim_feedforward
    scale = 0.02
    keys = jax.random.split(key, 14)

    def nrm(k, shape, dtype=jnp.float32):
        return (jax.random.normal(k, shape, jnp.float32) * scale).astype(dtype)

    audio_emb = [nrm(jax.random.fold_in(keys[0], i), (cfg.audio_vocab_size, E))
                 for i in range(9)]

    Le, Ld = cfg.enc_num_layers, cfg.dec_num_layers

    # encoder packed rows: 0 ln1_g, 1 ln1_b, 2 bq, 3 bk, 4 bv, 5 bo, 6 ln2_g, 7 ln2_b, 8 b2
    enc_vec = jnp.zeros((Le, 9, E), jnp.float32).at[:, 0, :].set(1.0).at[:, 6, :].set(1.0)
    enc = dict(
        wqkv=nrm(keys[1], (Le, E, 3 * E)),
        wo=nrm(keys[2], (Le, E, E)),
        w1=nrm(keys[3], (Le, E, dff), jnp.bfloat16),
        w2=nrm(keys[4], (Le, dff, E), jnp.bfloat16),
        vec=enc_vec,
        b1=jnp.zeros((Le, 1, dff), jnp.float32),
    )

    # decoder packed rows: 0 ln1g 1 ln1b 2 bq 3 bk 4 bv 5 bo | 6 ln2g 7 ln2b 8 cbq 9 cbk 10 cbv
    #                      11 cbo | 12 ln3g 13 ln3b 14 b2
    dec_vec = (jnp.zeros((Ld, 15, E), jnp.float32)
               .at[:, 0, :].set(1.0).at[:, 6, :].set(1.0).at[:, 12, :].set(1.0))
    dec = dict(
        wqkv=nrm(keys[5], (Ld, E, 3 * E)),
        wo_s=nrm(keys[6], (Ld, E, E)),
        wq_c=nrm(keys[7], (Ld, E, E)),
        wkv_c=nrm(keys[8], (Ld, E, 2 * E)),
        wo_c=nrm(keys[9], (Ld, E, E)),
        w1=nrm(keys[10], (Ld, E, dff), jnp.bfloat16),
        w2=nrm(keys[11], (Ld, dff, E), jnp.bfloat16),
        vec=dec_vec,
        b1=jnp.zeros((Ld, 1, dff), jnp.float32),
    )

    # final projection, padded once at init (288 -> 384 lanes) for a lane-dense writeback
    out_dim = cfg.audio_vocab_size * 9
    P = out_dim + ((-out_dim) % 128)
    proj_w = (jnp.zeros((E, P), jnp.float32)
              .at[:, :out_dim].set(jax.random.normal(keys[12], (E, out_dim), jnp.float32) * scale)
              .astype(jnp.bfloat16))
    proj_b = jnp.zeros((1, P), jnp.float32)

    return dict(audio_emb=audio_emb, enc=enc, dec=dec,
                proj_w=proj_w, proj_b=proj_b,
                pe=positional_encoding(5000, E))


# ----------------------------------------------------------------------------- main
if __name__ == "__main__":
    cfg = Config()
    key = jax.random.PRNGKey(0)
    k_param, k_x, k_y = jax.random.split(key, 3)

    params = init_params(k_param, cfg)

    B, S_enc, S_dec = 2, 16, 8
    # x: (B, S_enc, 2, 9) int tokens (only channel 0 is consumed, matching x[:, :, 0, :])
    x_tokens = jax.random.randint(k_x, (B, S_enc, 2, 9), 0, cfg.audio_vocab_size, dtype=jnp.int32)
    # y: (B, S_dec, 9) int tokens (teacher-forced decoder input)
    y_tokens = jax.random.randint(k_y, (B, S_dec, 9), 0, cfg.audio_vocab_size, dtype=jnp.int32)

    fwd = jax.jit(functools.partial(encoder_decoder_forward, cfg=cfg))
    logits = fwd(params, x_tokens, y_tokens)
    jax.block_until_ready(logits)

    expected = (B, S_dec, cfg.audio_vocab_size * 9)
    assert logits.shape == expected, f"bad shape {logits.shape} vs {expected}"
    assert bool(jnp.all(jnp.isfinite(logits))), "non-finite logits"

    # TODO(synk): autoregressive generate() / top-p multinomial sampling path (y=None) is a
    # data-dependent Python loop with early exit; not translated to a Pallas kernel.
    print("KERNEL_OK")
</pallas_src>

<mosaic_0001>
module attributes {stable_mosaic.version = 11 : i64} {
  func.func @_encoder_stack_kernel(%arg0: i32, %arg1: memref<32x32xf32, #tpu.memory_space<vmem>>, %arg2: memref<1x32x96xf32, #tpu.memory_space<vmem>>, %arg3: memref<1x32x32xf32, #tpu.memory_space<vmem>>, %arg4: memref<1x32x2048xbf16, #tpu.memory_space<vmem>>, %arg5: memref<1x2048x32xbf16, #tpu.memory_space<vmem>>, %arg6: memref<1x9x32xf32, #tpu.memory_space<vmem>>, %arg7: memref<1x1x2048xf32, #tpu.memory_space<vmem>>, %arg8: memref<32x32xf32, #tpu.memory_space<vmem>>, %arg9: memref<32x32xf32, #tpu.memory_space<vmem>>) attributes {dimension_semantics = [#tpu.dimension_semantics<arbitrary>], iteration_bounds = array<i64: 2>, scalar_prefetch = 0 : i64, scratch_operands = 1 : i64, tpu.core_type = #tpu.core_type<tc>, window_params = [{pipeline_mode = #tpu.pipeline_mode<synchronous>, transform_indices = @transform_0, window_bounds = array<i64: 32, 32>}, {transform_indices = @transform_1, window_bounds = array<i64: 1, 32, 96>}, {transform_indices = @transform_2, window_bounds = array<i64: 1, 32, 32>}, {transform_indices = @transform_3, window_bounds = array<i64: 1, 32, 2048>}, {transform_indices = @transform_4, window_bounds = array<i64: 1, 2048, 32>}, {transform_indices = @transform_5, window_bounds = array<i64: 1, 9, 32>}, {transform_indices = @transform_6, window_bounds = array<i64: 1, 1, 2048>}, {pipeline_mode = #tpu.pipeline_mode<synchronous>, transform_indices = @transform_7, window_bounds = array<i64: 32, 32>}]} {
    %c0_i32 = arith.constant 0 : i32
    %0 = arith.cmpi eq, %arg0, %c0_i32 : i32
    %1 = arith.extui %0 : i1 to i32
    %c0_i32_0 = arith.constant 0 : i32
    %2 = arith.cmpi ne, %1, %c0_i32_0 : i32
    scf.if %2 {
      %c0_90 = arith.constant 0 : index
      %c0_91 = arith.constant 0 : index
      %243 = vector.load %arg1[%c0_90, %c0_91] : memref<32x32xf32, #tpu.memory_space<vmem>>, vector<32x32xf32>
      %c0_92 = arith.constant 0 : index
      %c0_93 = arith.constant 0 : index
      %244 = vector.load %arg9[%c0_92, %c0_93] : memref<32x32xf32, #tpu.memory_space<vmem>>, vector<32x32xf32>
      tpu.vector_store %arg9[%c0_92, %c0_93], %243 {strides = array<i32>} : memref<32x32xf32, #tpu.memory_space<vmem>>, vector<32x32xf32>,
    } else {
    }
    %c0 = arith.constant 0 : index
    %c0_1 = arith.constant 0 : index
    %3 = vector.load %arg9[%c0, %c0_1] : memref<32x32xf32, #tpu.memory_space<vmem>>, vector<32x32xf32>
    %c0_2 = arith.constant 0 : index
    %c0_3 = arith.constant 0 : index
    %c0_4 = arith.constant 0 : index
    %4 = vector.load %arg6[%c0_2, %c0_3, %c0_4] : memref<1x9x32xf32, #tpu.memory_space<vmem>>, vector<1x9x32xf32>
    %5 = vector.shape_cast %4 : vector<1x9x32xf32> to vector<9x32xf32>
    %6 = vector.extract_strided_slice %5 {offsets = [0, 0], sizes = [1, 32], strides = [1, 1]} : vector<9x32xf32> to vector<1x32xf32>
    %7 = vector.extract_strided_slice %5 {offsets = [1, 0], sizes = [1, 32], strides = [1, 1]} : vector<9x32xf32> to vector<1x32xf32>
    %cst = arith.constant dense<0.000000e+00> : vector<32xf32>
    %8 = vector.multi_reduction <add>, %3, %cst [1] : vector<32x32xf32> to vector<32xf32>
    %9 = vector.shape_cast %8 : vector<32xf32> to vector<32x1xf32>
    %cst_5 = arith.constant 3.200000e+01 : f32
    %10 = vector.broadcast %cst_5 : f32 to vector<32x1xf32>
    %11 = arith.divf %9, %10 : vector<32x1xf32>
    %12 = vector.broadcast %11 : vector<32x1xf32> to vector<32x32xf32>
    %13 = arith.subf %3, %12 : vector<32x32xf32>
    %14 = arith.mulf %13, %13 : vector<32x32xf32>
    %cst_6 = arith.constant dense<0.000000e+00> : vector<32xf32>
    %15 = vector.multi_reduction <add>, %14, %cst_6 [1] : vector<32x32xf32> to vector<32xf32>
    %16 = vector.shape_cast %15 : vector<32xf32> to vector<32x1xf32>
    %cst_7 = arith.constant 3.200000e+01 : f32
    %17 = vector.broadcast %cst_7 : f32 to vector<32x1xf32>
    %18 = arith.divf %16, %17 : vector<32x1xf32>
    %cst_8 = arith.constant 9.99999974E-6 : f32
    %19 = vector.broadcast %cst_8 : f32 to vector<32x1xf32>
    %20 = arith.addf %18, %19 : vector<32x1xf32>
    %21 = math.rsqrt %20 : vector<32x1xf32>
    %22 = vector.broadcast %21 : vector<32x1xf32> to vector<32x32xf32>
    %23 = arith.mulf %13, %22 : vector<32x32xf32>
    %24 = vector.broadcast %6 : vector<1x32xf32> to vector<32x32xf32>
    %25 = arith.mulf %23, %24 : vector<32x32xf32>
    %26 = vector.broadcast %7 : vector<1x32xf32> to vector<32x32xf32>
    %27 = arith.addf %25, %26 : vector<32x32xf32>
    %c0_9 = arith.constant 0 : index
    %c0_10 = arith.constant 0 : index
    %c0_11 = arith.constant 0 : index
    %28 = vector.load %arg2[%c0_9, %c0_10, %c0_11] : memref<1x32x96xf32, #tpu.memory_space<vmem>>, vector<1x32x96xf32>
    %29 = vector.shape_cast %28 : vector<1x32x96xf32> to vector<32x96xf32>
    %cst_12 = arith.constant dense<0.000000e+00> : vector<32x96xf32>
    %30 = tpu.matmul %27, %29, %cst_12 {dimension_numbers = #tpu.dot_dimension_numbers<[1], [0], [0], [1], [0, 0, 1, 1], [], []>} : vector<32x32xf32>, vector<32x96xf32>, vector<32x96xf32> -> vector<32x96xf32>
    %31 = vector.extract_strided_slice %30 {offsets = [0, 0], sizes = [32, 32], strides = [1, 1]} : vector<32x96xf32> to vector<32x32xf32>
    %32 = vector.extract_strided_slice %5 {offsets = [2, 0], sizes = [1, 32], strides = [1, 1]} : vector<9x32xf32> to vector<1x32xf32>
    %33 = vector.broadcast %32 : vector<1x32xf32> to vector<32x32xf32>
    %34 = arith.addf %31, %33 : vector<32x32xf32>
    %35 = vector.extract_strided_slice %30 {offsets = [0, 32], sizes = [32, 32], strides = [1, 1]} : vector<32x96xf32> to vector<32x32xf32>
    %36 = vector.extract_strided_slice %5 {offsets = [3, 0], sizes = [1, 32], strides = [1, 1]} : vector<9x32xf32> to vector<1x32xf32>
    %37 = vector.broadcast %36 : vector<1x32xf32> to vector<32x32xf32>
    %38 = arith.addf %35, %37 : vector<32x32xf32>
    %39 = vector.extract_strided_slice %30 {offsets = [0, 64], sizes = [32, 32], strides = [1, 1]} : vector<32x96xf32> to vector<32x32xf32>
    %40 = vector.extract_strided_slice %5 {offsets = [4, 0], sizes = [1, 32], strides = [1, 1]} : vector<9x32xf32> to vector<1x32xf32>
    %41 = vector.broadcast %40 : vector<1x32xf32> to vector<32x32xf32>
    %42 = arith.addf %39, %41 : vector<32x32xf32>
    %c0_13 = arith.constant 0 : index
    %c0_14 = arith.constant 0 : index
    %c0_15 = arith.constant 0 : index
    %43 = vector.load %arg3[%c0_13, %c0_14, %c0_15] : memref<1x32x32xf32, #tpu.memory_space<vmem>>, vector<1x32x32xf32>
    %44 = vector.shape_cast %43 : vector<1x32x32xf32> to vector<32x32xf32>
    %45 = vector.extract_strided_slice %5 {offsets = [5, 0], sizes = [1, 32], strides = [1, 1]} : vector<9x32xf32> to vector<1x32xf32>
    %46 = vector.shape_cast %34 : vector<32x32xf32> to vector<2x16x32xf32>
    %47 = vector.shape_cast %38 : vector<32x32xf32> to vector<2x16x32xf32>
    %48 = vector.shape_cast %42 : vector<32x32xf32> to vector<2x16x32xf32>
    %49 = vector.extract_strided_slice %46 {offsets = [0, 0, 0], sizes = [2, 16, 8], strides = [1, 1, 1]} : vector<2x16x32xf32> to vector<2x16x8xf32>
    %cst_16 = arith.constant 0.353553385 : f32
    %50 = vector.broadcast %cst_16 : f32 to vector<2x16x8xf32>
    %51 = arith.mulf %49, %50 : vector<2x16x8xf32>
    %52 = vector.extract_strided_slice %47 {offsets = [0, 0, 0], sizes = [2, 16, 8], strides = [1, 1, 1]} : vector<2x16x32xf32> to vector<2x16x8xf32>
    %53 = vector.extract_strided_slice %48 {offsets = [0, 0, 0], sizes = [2, 16, 8], strides = [1, 1, 1]} : vector<2x16x32xf32> to vector<2x16x8xf32>
    "tpu.trace_start"() <{level = 10 : i32, message = "bqd,bkd->bqk"}> : () -> ()
    %cst_17 = arith.constant dense<0.000000e+00> : vector<2x16x16xf32>
    %54 = tpu.matmul %51, %52, %cst_17 {dimension_numbers = #tpu.dot_dimension_numbers<[2], [2], [1], [1], [0, 0, 0, 1, 1, 1], [0], [0]>} : vector<2x16x8xf32>, vector<2x16x8xf32>, vector<2x16x16xf32> -> vector<2x16x16xf32>
    "tpu.trace_stop"() : () -> ()
    %cst_18 = arith.constant dense<0xFF800000> : vector<2x16xf32>
    %55 = vector.multi_reduction <maximumf>, %54, %cst_18 [2] : vector<2x16x16xf32> to vector<2x16xf32>
    %56 = vector.shape_cast %55 : vector<2x16xf32> to vector<2x16x1xf32>
    %57 = vector.broadcast %56 : vector<2x16x1xf32> to vector<2x16x16xf32>
    %58 = arith.subf %54, %57 : vector<2x16x16xf32>
    %59 = math.exp %58 : vector<2x16x16xf32>
    %cst_19 = arith.constant dense<0.000000e+00> : vector<2x16xf32>
    %60 = vector.multi_reduction <add>, %59, %cst_19 [2] : vector<2x16x16xf32> to vector<2x16xf32>
    %61 = vector.shape_cast %60 : vector<2x16xf32> to vector<2x16x1xf32>
    %62 = tpu.reciprocal %61 {approx = true} : vector<2x16x1xf32> -> vector<2x16x1xf32>
    %63 = vector.broadcast %62 : vector<2x16x1xf32> to vector<2x16x16xf32>
    %64 = arith.mulf %59, %63 : vector<2x16x16xf32>
    "tpu.trace_start"() <{level = 10 : i32, message = "bqk,bkd->bqd"}> : () -> ()
    %cst_20 = arith.constant dense<0.000000e+00> : vector<2x16x8xf32>
    %65 = tpu.matmul %64, %53, %cst_20 {dimension_numbers = #tpu.dot_dimension_numbers<[2], [1], [1], [2], [0, 0, 0, 1, 1, 2], [0], [0]>} : vector<2x16x16xf32>, vector<2x16x8xf32>, vector<2x16x8xf32> -> vector<2x16x8xf32>
    "tpu.trace_stop"() : () -> ()
    %66 = vector.shape_cast %65 : vector<2x16x8xf32> to vector<32x8xf32>
    %67 = vector.extract_strided_slice %44 {offsets = [0, 0], sizes = [8, 32], strides = [1, 1]} : vector<32x32xf32> to vector<8x32xf32>
    %cst_21 = arith.constant dense<0.000000e+00> : vector<32x32xf32>
    %68 = tpu.matmul %66, %67, %cst_21 {dimension_numbers = #tpu.dot_dimension_numbers<[1], [0], [0], [1], [0, 0, 1, 1], [], []>} : vector<32x8xf32>, vector<8x32xf32>, vector<32x32xf32> -> vector<32x32xf32>
    %69 = vector.extract_strided_slice %46 {offsets = [0, 0, 8], sizes = [2, 16, 8], strides = [1, 1, 1]} : vector<2x16x32xf32> to vector<2x16x8xf32>
    %cst_22 = arith.constant 0.353553385 : f32
    %70 = vector.broadcast %cst_22 : f32 to vector<2x16x8xf32>
    %71 = arith.mulf %69, %70 : vector<2x16x8xf32>
    %72 = vector.extract_strided_slice %47 {offsets = [0, 0, 8], sizes = [2, 16, 8], strides = [1, 1, 1]} : vector<2x16x32xf32> to vector<2x16x8xf32>
    %73 = vector.extract_strided_slice %48 {offsets = [0, 0, 8], sizes = [2, 16, 8], strides = [1, 1, 1]} : vector<2x16x32xf32> to vector<2x16x8xf32>
    "tpu.trace_start"() <{level = 10 : i32, message = "bqd,bkd->bqk"}> : () -> ()
    %cst_23 = arith.constant dense<0.000000e+00> : vector<2x16x16xf32>
    %74 = tpu.matmul %71, %72, %cst_23 {dimension_numbers = #tpu.dot_dimension_numbers<[2], [2], [1], [1], [0, 0, 0, 1, 1, 1], [0], [0]>} : vector<2x16x8xf32>, vector<2x16x8xf32>, vector<2x16x16xf32> -> vector<2x16x16xf32>
    "tpu.trace_stop"() : () -> ()
    %cst_24 = arith.constant dense<0xFF800000> : vector<2x16xf32>
    %75 = vector.multi_reduction <maximumf>, %74, %cst_24 [2] : vector<2x16x16xf32> to vector<2x16xf32>
    %76 = vector.shape_cast %75 : vector<2x16xf32> to vector<2x16x1xf32>
    %77 = vector.broadcast %76 : vector<2x16x1xf32> to vector<2x16x16xf32>
    %78 = arith.subf %74, %77 : vector<2x16x16xf32>
    %79 = math.exp %78 : vector<2x16x16xf32>
    %cst_25 = arith.constant dense<0.000000e+00> : vector<2x16xf32>
    %80 = vector.multi_reduction <add>, %79, %cst_25 [2] : vector<2x16x16xf32> to vector<2x16xf32>
    %81 = vector.shape_cast %80 : vector<2x16xf32> to vector<2x16x1xf32>
    %82 = tpu.reciprocal %81 {approx = true} : vector<2x16x1xf32> -> vector<2x16x1xf32>
    %83 = vector.broadcast %82 : vector<2x16x1xf32> to vector<2x16x16xf32>
    %84 = arith.mulf %79, %83 : vector<2x16x16xf32>
    "tpu.trace_start"() <{level = 10 : i32, message = "bqk,bkd->bqd"}> : () -> ()
    %cst_26 = arith.constant dense<0.000000e+00> : vector<2x16x8xf32>
    %85 = tpu.matmul %84, %73, %cst_26 {dimension_numbers = #tpu.dot_dimension_numbers<[2], [1], [1], [2], [0, 0, 0, 1, 1, 2], [0], [0]>} : vector<2x16x16xf32>, vector<2x16x8xf32>, vector<2x16x8xf32> -> vector<2x16x8xf32>
    "tpu.trace_stop"() : () -> ()
    %86 = vector.shape_cast %85 : vector<2x16x8xf32> to vector<32x8xf32>
    %87 = vector.extract_strided_slice %44 {offsets = [8, 0], sizes = [8, 32], strides = [1, 1]} : vector<32x32xf32> to vector<8x32xf32>
    %cst_27 = arith.constant dense<0.000000e+00> : vector<32x32xf32>
    %88 = tpu.matmul %86, %87, %cst_27 {dimension_numbers = #tpu.dot_dimension_numbers<[1], [0], [0], [1], [0, 0, 1, 1], [], []>} : vector<32x8xf32>, vector<8x32xf32>, vector<32x32xf32> -> vector<32x32xf32>
    %89 = arith.addf %68, %88 : vector<32x32xf32>
    %90 = vector.extract_strided_slice %46 {offsets = [0, 0, 16], sizes = [2, 16, 8], strides = [1, 1, 1]} : vector<2x16x32xf32> to vector<2x16x8xf32>
    %cst_28 = arith.constant 0.353553385 : f32
    %91 = vector.broadcast %cst_28 : f32 to vector<2x16x8xf32>
    %92 = arith.mulf %90, %91 : vector<2x16x8xf32>
    %93 = vector.extract_strided_slice %47 {offsets = [0, 0, 16], sizes = [2, 16, 8], strides = [1, 1, 1]} : vector<2x16x32xf32> to vector<2x16x8xf32>
    %94 = vector.extract_strided_slice %48 {offsets = [0, 0, 16], sizes = [2, 16, 8], strides = [1, 1, 1]} : vector<2x16x32xf32> to vector<2x16x8xf32>
    "tpu.trace_start"() <{level = 10 : i32, message = "bqd,bkd->bqk"}> : () -> ()
    %cst_29 = arith.constant dense<0.000000e+00> : vector<2x16x16xf32>
    %95 = tpu.matmul %92, %93, %cst_29 {dimension_numbers = #tpu.dot_dimension_numbers<[2], [2], [1], [1], [0, 0, 0, 1, 1, 1], [0], [0]>} : vector<2x16x8xf32>, vector<2x16x8xf32>, vector<2x16x16xf32> -> vector<2x16x16xf32>
    "tpu.trace_stop"() : () -> ()
    %cst_30 = arith.constant dense<0xFF800000> : vector<2x16xf32>
    %96 = vector.multi_reduction <maximumf>, %95, %cst_30 [2] : vector<2x16x16xf32> to vector<2x16xf32>
    %97 = vector.shape_cast %96 : vector<2x16xf32> to vector<2x16x1xf32>
    %98 = vector.broadcast %97 : vector<2x16x1xf32> to vector<2x16x16xf32>
    %99 = arith.subf %95, %98 : vector<2x16x16xf32>
    %100 = math.exp %99 : vector<2x16x16xf32>
    %cst_31 = arith.constant dense<0.000000e+00> : vector<2x16xf32>
    %101 = vector.multi_reduction <add>, %100, %cst_31 [2] : vector<2x16x16xf32> to vector<2x16xf32>
    %102 = vector.shape_cast %101 : vector<2x16xf32> to vector<2x16x1xf32>
    %103 = tpu.reciprocal %102 {approx = true} : vector<2x16x1xf32> -> vector<2x16x1xf32>
    %104 = vector.broadcast %103 : vector<2x16x1xf32> to vector<2x16x16xf32>
    %105 = arith.mulf %100, %104 : vector<2x16x16xf32>
    "tpu.trace_start"() <{level = 10 : i32, message = "bqk,bkd->bqd"}> : () -> ()
    %cst_32 = arith.constant dense<0.000000e+00> : vector<2x16x8xf32>
    %106 = tpu.matmul %105, %94, %cst_32 {dimension_numbers = #tpu.dot_dimension_numbers<[2], [1], [1], [2], [0, 0, 0, 1, 1, 2], [0], [0]>} : vector<2x16x16xf32>, vector<2x16x8xf32>, vector<2x16x8xf32> -> vector<2x16x8xf32>
    "tpu.trace_stop"() : () -> ()
    %107 = vector.shape_cast %106 : vector<2x16x8xf32> to vector<32x8xf32>
    %108 = vector.extract_strided_slice %44 {offsets = [16, 0], sizes = [8, 32], strides = [1, 1]} : vector<32x32xf32> to vector<8x32xf32>
    %cst_33 = arith.constant dense<0.000000e+00> : vector<32x32xf32>
    %109 = tpu.matmul %107, %108, %cst_33 {dimension_numbers = #tpu.dot_dimension_numbers<[1], [0], [0], [1], [0, 0, 1, 1], [], []>} : vector<32x8xf32>, vector<8x32xf32>, vector<32x32xf32> -> vector<32x32xf32>
    %110 = arith.addf %89, %109 : vector<32x32xf32>
    %111 = vector.extract_strided_slice %46 {offsets = [0, 0, 24], sizes = [2, 16, 8], strides = [1, 1, 1]} : vector<2x16x32xf32> to vector<2x16x8xf32>
    %cst_34 = arith.constant 0.353553385 : f32
    %112 = vector.broadcast %cst_34 : f32 to vector<2x16x8xf32>
    %113 = arith.mulf %111, %112 : vector<2x16x8xf32>
    %114 = vector.extract_strided_slice %47 {offsets = [0, 0, 24], sizes = [2, 16, 8], strides = [1, 1, 1]} : vector<2x16x32xf32> to vector<2x16x8xf32>
    %115 = vector.extract_strided_slice %48 {offsets = [0, 0, 24], sizes = [2, 16, 8], strides = [1, 1, 1]} : vector<2x16x32xf32> to vector<2x16x8xf32>
    "tpu.trace_start"() <{level = 10 : i32, message = "bqd,bkd->bqk"}> : () -> ()
    %cst_35 = arith.constant dense<0.000000e+00> : vector<2x16x16xf32>
    %116 = tpu.matmul %113, %114, %cst_35 {dimension_numbers = #tpu.dot_dimension_numbers<[2], [2], [1], [1], [0, 0, 0, 1, 1, 1], [0], [0]>} : vector<2x16x8xf32>, vector<2x16x8xf32>, vector<2x16x16xf32> -> vector<2x16x16xf32>
    "tpu.trace_stop"() : () -> ()
    %cst_36 = arith.constant dense<0xFF800000> : vector<2x16xf32>
    %117 = vector.multi_reduction <maximumf>, %116, %cst_36 [2] : vector<2x16x16xf32> to vector<2x16xf32>
    %118 = vector.shape_cast %117 : vector<2x16xf32> to vector<2x16x1xf32>
    %119 = vector.broadcast %118 : vector<2x16x1xf32> to vector<2x16x16xf32>
    %120 = arith.subf %116, %119 : vector<2x16x16xf32>
    %121 = math.exp %120 : vector<2x16x16xf32>
    %cst_37 = arith.constant dense<0.000000e+00> : vector<2x16xf32>
    %122 = vector.multi_reduction <add>, %121, %cst_37 [2] : vector<2x16x16xf32> to vector<2x16xf32>
    %123 = vector.shape_cast %122 : vector<2x16xf32> to vector<2x16x1xf32>
    %124 = tpu.reciprocal %123 {approx = true} : vector<2x16x1xf32> -> vector<2x16x1xf32>
    %125 = vector.broadcast %124 : vector<2x16x1xf32> to vector<2x16x16xf32>
    %126 = arith.mulf %121, %125 : vector<2x16x16xf32>
    "tpu.trace_start"() <{level = 10 : i32, message = "bqk,bkd->bqd"}> : () -> ()
    %cst_38 = arith.constant dense<0.000000e+00> : vector<2x16x8xf32>
    %127 = tpu.matmul %126, %115, %cst_38 {dimension_numbers = #tpu.dot_dimension_numbers<[2], [1], [1], [2], [0, 0, 0, 1, 1, 2], [0], [0]>} : vector<2x16x16xf32>, vector<2x16x8xf32>, vector<2x16x8xf32> -> vector<2x16x8xf32>
    "tpu.trace_stop"() : () -> ()
    %128 = vector.shape_cast %127 : vector<2x16x8xf32> to vector<32x8xf32>
    %129 = vector.extract_strided_slice %44 {offsets = [24, 0], sizes = [8, 32], strides = [1, 1]} : vector<32x32xf32> to vector<8x32xf32>
    %cst_39 = arith.constant dense<0.000000e+00> : vector<32x32xf32>
    %130 = tpu.matmul %128, %129, %cst_39 {dimension_numbers = #tpu.dot_dimension_numbers<[1], [0], [0], [1], [0, 0, 1, 1], [], []>} : vector<32x8xf32>, vector<8x32xf32>, vector<32x32xf32> -> vector<32x32xf32>
    %131 = arith.addf %110, %130 : vector<32x32xf32>
    %132 = vector.broadcast %45 : vector<1x32xf32> to vector<32x32xf32>
    %133 = arith.addf %131, %132 : vector<32x32xf32>
    %134 = arith.addf %3, %133 : vector<32x32xf32>
    %135 = vector.extract_strided_slice %5 {offsets = [6, 0], sizes = [1, 32], strides = [1, 1]} : vector<9x32xf32> to vector<1x32xf32>
    %136 = vector.extract_strided_slice %5 {offsets = [7, 0], sizes = [1, 32], strides = [1, 1]} : vector<9x32xf32> to vector<1x32xf32>
    %cst_40 = arith.constant dense<0.000000e+00> : vector<32xf32>
    %137 = vector.multi_reduction <add>, %134, %cst_40 [1] : vector<32x32xf32> to vector<32xf32>
    %138 = vector.shape_cast %137 : vector<32xf32> to vector<32x1xf32>
    %cst_41 = arith.constant 3.200000e+01 : f32
    %139 = vector.broadcast %cst_41 : f32 to vector<32x1xf32>
    %140 = arith.divf %138, %139 : vector<32x1xf32>
    %141 = vector.broadcast %140 : vector<32x1xf32> to vector<32x32xf32>
    %142 = arith.subf %134, %141 : vector<32x32xf32>
    %143 = arith.mulf %142, %142 : vector<32x32xf32>
    %cst_42 = arith.constant dense<0.000000e+00> : vector<32xf32>
    %144 = vector.multi_reduction <add>, %143, %cst_42 [1] : vector<32x32xf32> to vector<32xf32>
    %145 = vector.shape_cast %144 : vector<32xf32> to vector<32x1xf32>
    %cst_43 = arith.constant 3.200000e+01 : f32
    %146 = vector.broadcast %cst_43 : f32 to vector<32x1xf32>
    %147 = arith.divf %145, %146 : vector<32x1xf32>
    %cst_44 = arith.constant 9.99999974E-6 : f32
    %148 = vector.broadcast %cst_44 : f32 to vector<32x1xf32>
    %149 = arith.addf %147, %148 : vector<32x1xf32>
    %150 = math.rsqrt %149 : vector<32x1xf32>
    %151 = vector.broadcast %150 : vector<32x1xf32> to vector<32x32xf32>
    %152 = arith.mulf %142, %151 : vector<32x32xf32>
    %153 = vector.broadcast %135 : vector<1x32xf32> to vector<32x32xf32>
    %154 = arith.mulf %152, %153 : vector<32x32xf32>
    %155 = vector.broadcast %136 : vector<1x32xf32> to vector<32x32xf32>
    %156 = arith.addf %154, %155 : vector<32x32xf32>
    %157 = vector.extract_strided_slice %5 {offsets = [8, 0], sizes = [1, 32], strides = [1, 1]} : vector<9x32xf32> to vector<1x32xf32>
    %158 = arith.truncf %156 : vector<32x32xf32> to vector<32x32xbf16>
    %cst_45 = arith.constant 0.000000e+00 : f32
    %159 = vector.broadcast %cst_45 : f32 to vector<32x32xf32>
    %c0_i32_46 = arith.constant 0 : i32
    %c512_i32 = arith.constant 512 : i32
    %160 = arith.muli %c0_i32_46, %c512_i32 : i32
    %161 = tpu.assume_multiple %160, 512 : i32
    %c0_47 = arith.constant 0 : index
    %c0_48 = arith.constant 0 : index
    %162 = arith.index_cast %161 : i32 to index
    %163 = vector.load %arg4[%c0_47, %c0_48, %162] : memref<1x32x2048xbf16, #tpu.memory_space<vmem>>, vector<1x32x512xbf16>
    %164 = vector.shape_cast %163 : vector<1x32x512xbf16> to vector<32x512xbf16>
    %c0_49 = arith.constant 0 : index
    %c0_50 = arith.constant 0 : index
    %165 = arith.index_cast %161 : i32 to index
    %166 = vector.load %arg7[%c0_49, %c0_50, %165] : memref<1x1x2048xf32, #tpu.memory_space<vmem>>, vector<1x1x512xf32>
    %167 = vector.shape_cast %166 : vector<1x1x512xf32> to vector<1x512xf32>
    %c0_51 = arith.constant 0 : index
    %168 = arith.index_cast %161 : i32 to index
    %c0_52 = arith.constant 0 : index
    %169 = vector.load %arg5[%c0_51, %168, %c0_52] : memref<1x2048x32xbf16, #tpu.memory_space<vmem>>, vector<1x512x32xbf16>
    %170 = vector.shape_cast %169 : vector<1x512x32xbf16> to vector<512x32xbf16>
    %cst_53 = arith.constant dense<0.000000e+00> : vector<32x512xf32>
    %171 = tpu.matmul %158, %164, %cst_53 {dimension_numbers = #tpu.dot_dimension_numbers<[1], [0], [0], [1], [0, 0, 1, 1], [], []>} : vector<32x32xbf16>, vector<32x512xbf16>, vector<32x512xf32> -> vector<32x512xf32>
    %172 = vector.broadcast %167 : vector<1x512xf32> to vector<32x512xf32>
    %173 = arith.addf %171, %172 : vector<32x512xf32>
    %cst_54 = arith.constant 0.000000e+00 : f32
    %174 = vector.broadcast %cst_54 : f32 to vector<32x512xf32>
    %175 = arith.maximumf %173, %174 : vector<32x512xf32>
    %176 = arith.truncf %175 : vector<32x512xf32> to vector<32x512xbf16>
    %cst_55 = arith.constant dense<0.000000e+00> : vector<32x32xf32>
    %177 = tpu.matmul %176, %170, %cst_55 {dimension_numbers = #tpu.dot_dimension_numbers<[1], [0], [0], [1], [0, 0, 1, 1], [], []>} : vector<32x512xbf16>, vector<512x32xbf16>, vector<32x32xf32> -> vector<32x32xf32>
    %178 = arith.addf %159, %177 : vector<32x32xf32>
    %c1_i32 = arith.constant 1 : i32
    %c512_i32_56 = arith.constant 512 : i32
    %179 = arith.muli %c1_i32, %c512_i32_56 : i32
    %180 = tpu.assume_multiple %179, 512 : i32
    %c0_57 = arith.constant 0 : index
    %c0_58 = arith.constant 0 : index
    %181 = arith.index_cast %180 : i32 to index
    %182 = vector.load %arg4[%c0_57, %c0_58, %181] : memref<1x32x2048xbf16, #tpu.memory_space<vmem>>, vector<1x32x512xbf16>
    %183 = vector.shape_cast %182 : vector<1x32x512xbf16> to vector<32x512xbf16>
    %c0_59 = arith.constant 0 : index
    %c0_60 = arith.constant 0 : index
    %184 = arith.index_cast %180 : i32 to index
    %185 = vector.load %arg7[%c0_59, %c0_60, %184] : memref<1x1x2048xf32, #tpu.memory_space<vmem>>, vector<1x1x512xf32>
    %186 = vector.shape_cast %185 : vector<1x1x512xf32> to vector<1x512xf32>
    %c0_61 = arith.constant 0 : index
    %187 = arith.index_cast %180 : i32 to index
    %c0_62 = arith.constant 0 : index
    %188 = vector.load %arg5[%c0_61, %187, %c0_62] : memref<1x2048x32xbf16, #tpu.memory_space<vmem>>, vector<1x512x32xbf16>
    %189 = vector.shape_cast %188 : vector<1x512x32xbf16> to vector<512x32xbf16>
    %cst_63 = arith.constant dense<0.000000e+00> : vector<32x512xf32>
    %190 = tpu.matmul %158, %183, %cst_63 {dimension_numbers = #tpu.dot_dimension_numbers<[1], [0], [0], [1], [0, 0, 1, 1], [], []>} : vector<32x32xbf16>, vector<32x512xbf16>, vector<32x512xf32> -> vector<32x512xf32>
    %191 = vector.broadcast %186 : vector<1x512xf32> to vector<32x512xf32>
    %192 = arith.addf %190, %191 : vector<32x512xf32>
    %cst_64 = arith.constant 0.000000e+00 : f32
    %193 = vector.broadcast %cst_64 : f32 to vector<32x512xf32>
    %194 = arith.maximumf %192, %193 : vector<32x512xf32>
    %195 = arith.truncf %194 : vector<32x512xf32> to vector<32x512xbf16>
    %cst_65 = arith.constant dense<0.000000e+00> : vector<32x32xf32>
    %196 = tpu.matmul %195, %189, %cst_65 {dimension_numbers = #tpu.dot_dimension_numbers<[1], [0], [0], [1], [0, 0, 1, 1], [], []>} : vector<32x512xbf16>, vector<512x32xbf16>, vector<32x32xf32> -> vector<32x32xf32>
    %197 = arith.addf %178, %196 : vector<32x32xf32>
    %c2_i32 = arith.constant 2 : i32
    %c512_i32_66 = arith.constant 512 : i32
    %198 = arith.muli %c2_i32, %c512_i32_66 : i32
    %199 = tpu.assume_multiple %198, 512 : i32
    %c0_67 = arith.constant 0 : index
    %c0_68 = arith.constant 0 : index
    %200 = arith.index_cast %199 : i32 to index
    %201 = vector.load %arg4[%c0_67, %c0_68, %200] : memref<1x32x2048xbf16, #tpu.memory_space<vmem>>, vector<1x32x512xbf16>
    %202 = vector.shape_cast %201 : vector<1x32x512xbf16> to vector<32x512xbf16>
    %c0_69 = arith.constant 0 : index
    %c0_70 = arith.constant 0 : index
    %203 = arith.index_cast %199 : i32 to index
    %204 = vector.load %arg7[%c0_69, %c0_70, %203] : memref<1x1x2048xf32, #tpu.memory_space<vmem>>, vector<1x1x512xf32>
    %205 = vector.shape_cast %204 : vector<1x1x512xf32> to vector<1x512xf32>
    %c0_71 = arith.constant 0 : index
    %206 = arith.index_cast %199 : i32 to index
    %c0_72 = arith.constant 0 : index
    %207 = vector.load %arg5[%c0_71, %206, %c0_72] : memref<1x2048x32xbf16, #tpu.memory_space<vmem>>, vector<1x512x32xbf16>
    %208 = vector.shape_cast %207 : vector<1x512x32xbf16> to vector<512x32xbf16>
    %cst_73 = arith.constant dense<0.000000e+00> : vector<32x512xf32>
    %209 = tpu.matmul %158, %202, %cst_73 {dimension_numbers = #tpu.dot_dimension_numbers<[1], [0], [0], [1], [0, 0, 1, 1], [], []>} : vector<32x32xbf16>, vector<32x512xbf16>, vector<32x512xf32> -> vector<32x512xf32>
    %210 = vector.broadcast %205 : vector<1x512xf32> to vector<32x512xf32>
    %211 = arith.addf %209, %210 : vector<32x512xf32>
    %cst_74 = arith.constant 0.000000e+00 : f32
    %212 = vector.broadcast %cst_74 : f32 to vector<32x512xf32>
    %213 = arith.maximumf %211, %212 : vector<32x512xf32>
    %214 = arith.truncf %213 : vector<32x512xf32> to vector<32x512xbf16>
    %cst_75 = arith.constant dense<0.000000e+00> : vector<32x32xf32>
    %215 = tpu.matmul %214, %208, %cst_75 {dimension_numbers = #tpu.dot_dimension_numbers<[1], [0], [0], [1], [0, 0, 1, 1], [], []>} : vector<32x512xbf16>, vector<512x32xbf16>, vector<32x32xf32> -> vector<32x32xf32>
    %216 = arith.addf %197, %215 : vector<32x32xf32>
    %c3_i32 = arith.constant 3 : i32
    %c512_i32_76 = arith.constant 512 : i32
    %217 = arith.muli %c3_i32, %c512_i32_76 : i32
    %218 = tpu.assume_multiple %217, 512 : i32
    %c0_77 = arith.constant 0 : index
    %c0_78 = arith.constant 0 : index
    %219 = arith.index_cast %218 : i32 to index
    %220 = vector.load %arg4[%c0_77, %c0_78, %219] : memref<1x32x2048xbf16, #tpu.memory_space<vmem>>, vector<1x32x512xbf16>
    %221 = vector.shape_cast %220 : vector<1x32x512xbf16> to vector<32x512xbf16>
    %c0_79 = arith.constant 0 : index
    %c0_80 = arith.constant 0 : index
    %222 = arith.index_cast %218 : i32 to index
    %223 = vector.load %arg7[%c0_79, %c0_80, %222] : memref<1x1x2048xf32, #tpu.memory_space<vmem>>, vector<1x1x512xf32>
    %224 = vector.shape_cast %223 : vector<1x1x512xf32> to vector<1x512xf32>
    %c0_81 = arith.constant 0 : index
    %225 = arith.index_cast %218 : i32 to index
    %c0_82 = arith.constant 0 : index
    %226 = vector.load %arg5[%c0_81, %225, %c0_82] : memref<1x2048x32xbf16, #tpu.memory_space<vmem>>, vector<1x512x32xbf16>
    %227 = vector.shape_cast %226 : vector<1x512x32xbf16> to vector<512x32xbf16>
    %cst_83 = arith.constant dense<0.000000e+00> : vector<32x512xf32>
    %228 = tpu.matmul %158, %221, %cst_83 {dimension_numbers = #tpu.dot_dimension_numbers<[1], [0], [0], [1], [0, 0, 1, 1], [], []>} : vector<32x32xbf16>, vector<32x512xbf16>, vector<32x512xf32> -> vector<32x512xf32>
    %229 = vector.broadcast %224 : vector<1x512xf32> to vector<32x512xf32>
    %230 = arith.addf %228, %229 : vector<32x512xf32>
    %cst_84 = arith.constant 0.000000e+00 : f32
    %231 = vector.broadcast %cst_84 : f32 to vector<32x512xf32>
    %232 = arith.maximumf %230, %231 : vector<32x512xf32>
    %233 = arith.truncf %232 : vector<32x512xf32> to vector<32x512xbf16>
    %cst_85 = arith.constant dense<0.000000e+00> : vector<32x32xf32>
    %234 = tpu.matmul %233, %227, %cst_85 {dimension_numbers = #tpu.dot_dimension_numbers<[1], [0], [0], [1], [0, 0, 1, 1], [], []>} : vector<32x512xbf16>, vector<512x32xbf16>, vector<32x32xf32> -> vector<32x32xf32>
    %235 = arith.addf %216, %234 : vector<32x32xf32>
    %c4_i32 = arith.constant 4 : i32
    %236 = vector.broadcast %157 : vector<1x32xf32> to vector<32x32xf32>
    %237 = arith.addf %235, %236 : vector<32x32xf32>
    %238 = arith.addf %134, %237 : vector<32x32xf32>
    %c0_86 = arith.constant 0 : index
    %c0_87 = arith.constant 0 : index
    %239 = vector.load %arg9[%c0_86, %c0_87] : memref<32x32xf32, #tpu.memory_space<vmem>>, vector<32x32xf32>
    tpu.vector_store %arg9[%c0_86, %c0_87], %238 {strides = array<i32>} : memref<32x32xf32, #tpu.memory_space<vmem>>, vector<32x32xf32>,
    %c1_i32_88 = arith.constant 1 : i32
    %240 = arith.cmpi eq, %arg0, %c1_i32_88 : i32
    %241 = arith.extui %240 : i1 to i32
    %c0_i32_89 = arith.constant 0 : i32
    %242 = arith.cmpi ne, %241, %c0_i32_89 : i32
    scf.if %242 {
      %c0_90 = arith.constant 0 : index
      %c0_91 = arith.constant 0 : index
      %243 = vector.load %arg8[%c0_90, %c0_91] : memref<32x32xf32, #tpu.memory_space<vmem>>, vector<32x32xf32>
      tpu.vector_store %arg8[%c0_90, %c0_91], %238 {strides = array<i32>} : memref<32x32xf32, #tpu.memory_space<vmem>>, vector<32x32xf32>,
    } else {
    }
    return
  }
  func.func @transform_0(%arg0: i32) -> (i32, i32) {
    %c0_i32 = arith.constant 0 : i32
    %c0_i32_0 = arith.constant 0 : i32
    %c0_i32_1 = arith.constant 0 : i32
    return %c0_i32, %c0_i32_0 : i32, i32
  }
  func.func @transform_1(%arg0: i32) -> (i32, i32, i32) {
    %c0_i32 = arith.constant 0 : i32
    %c0_i32_0 = arith.constant 0 : i32
    %c0_i32_1 = arith.constant 0 : i32
    return %arg0, %c0_i32, %c0_i32_0 : i32, i32, i32
  }
  func.func @transform_2(%arg0: i32) -> (i32, i32, i32) {
    %c0_i32 = arith.constant 0 : i32
    %c0_i32_0 = arith.constant 0 : i32
    %c0_i32_1 = arith.constant 0 : i32
    return %arg0, %c0_i32, %c0_i32_0 : i32, i32, i32
  }
  func.func @transform_3(%arg0: i32) -> (i32, i32, i32) {
    %c0_i32 = arith.constant 0 : i32
    %c0_i32_0 = arith.constant 0 : i32
    %c0_i32_1 = arith.constant 0 : i32
    return %arg0, %c0_i32, %c0_i32_0 : i32, i32, i32
  }
  func.func @transform_4(%arg0: i32) -> (i32, i32, i32) {
    %c0_i32 = arith.constant 0 : i32
    %c0_i32_0 = arith.constant 0 : i32
    %c0_i32_1 = arith.constant 0 : i32
    return %arg0, %c0_i32, %c0_i32_0 : i32, i32, i32
  }
  func.func @transform_5(%arg0: i32) -> (i32, i32, i32) {
    %c0_i32 = arith.constant 0 : i32
    %c0_i32_0 = arith.constant 0 : i32
    %c0_i32_1 = arith.constant 0 : i32
    return %arg0, %c0_i32, %c0_i32_0 : i32, i32, i32
  }
  func.func @transform_6(%arg0: i32) -> (i32, i32, i32) {
    %c0_i32 = arith.constant 0 : i32
    %c0_i32_0 = arith.constant 0 : i32
    %c0_i32_1 = arith.constant 0 : i32
    return %arg0, %c0_i32, %c0_i32_0 : i32, i32, i32
  }
  func.func @transform_7(%arg0: i32) -> (i32, i32) {
    %c0_i32 = arith.constant 0 : i32
    %c0_i32_0 = arith.constant 0 : i32
    %c0_i32_1 = arith.constant 0 : i32
    return %c0_i32, %c0_i32_0 : i32, i32
  }
}

module attributes {stable_mosaic.version = 11 : i64} {
  func.func @_decoder_stack_kernel(%arg0: i32, %arg1: memref<16x32xf32, #tpu.memory_space<vmem>>, %arg2: memref<32x32xf32, #tpu.memory_space<vmem>>, %arg3: memref<1x32x96xf32, #tpu.memory_space<vmem>>, %arg4: memref<1x32x32xf32, #tpu.memory_space<vmem>>, %arg5: memref<1x32x32xf32, #tpu.memory_space<vmem>>, %arg6: memref<1x32x64xf32, #tpu.memory_space<vmem>>, %arg7: memref<1x32x32xf32, #tpu.memory_space<vmem>>, %arg8: memref<1x32x2048xbf16, #tpu.memory_space<vmem>>, %arg9: memref<1x2048x32xbf16, #tpu.memory_space<vmem>>, %arg10: memref<1x15x32xf32, #tpu.memory_space<vmem>>, %arg11: memref<1x1x2048xf32, #tpu.memory_space<vmem>>, %arg12: memref<32x384xbf16, #tpu.memory_space<vmem>>, %arg13: memref<1x384xf32, #tpu.memory_space<vmem>>, %arg14: memref<16x384xf32, #tpu.memory_space<vmem>>, %arg15: memref<16x32xf32, #tpu.memory_space<vmem>>) attributes {dimension_semantics = [#tpu.dimension_semantics<arbitrary>], iteration_bounds = array<i64: 2>, scalar_prefetch = 0 : i64, scratch_operands = 1 : i64, tpu.core_type = #tpu.core_type<tc>, window_params = [{pipeline_mode = #tpu.pipeline_mode<synchronous>, transform_indices = @transform_0, window_bounds = array<i64: 16, 32>}, {pipeline_mode = #tpu.pipeline_mode<synchronous>, transform_indices = @transform_1, window_bounds = array<i64: 32, 32>}, {transform_indices = @transform_2, window_bounds = array<i64: 1, 32, 96>}, {transform_indices = @transform_3, window_bounds = array<i64: 1, 32, 32>}, {transform_indices = @transform_4, window_bounds = array<i64: 1, 32, 32>}, {transform_indices = @transform_5, window_bounds = array<i64: 1, 32, 64>}, {transform_indices = @transform_6, window_bounds = array<i64: 1, 32, 32>}, {transform_indices = @transform_7, window_bounds = array<i64: 1, 32, 2048>}, {transform_indices = @transform_8, window_bounds = array<i64: 1, 2048, 32>}, {transform_indices = @transform_9, window_bounds = array<i64: 1, 15, 32>}, {transform_indices = @transform_10, window_bounds = array<i64: 1, 1, 2048>}, {pipeline_mode = #tpu.pipeline_mode<synchronous>, transform_indices = @transform_11, window_bounds = array<i64: 32, 384>}, {pipeline_mode = #tpu.pipeline_mode<synchronous>, transform_indices = @transform_12, window_bounds = array<i64: 1, 384>}, {pipeline_mode = #tpu.pipeline_mode<synchronous>, transform_indices = @transform_13, window_bounds = array<i64: 16, 384>}]} {
    %c0_i32 = arith.constant 0 : i32
    %0 = arith.cmpi eq, %arg0, %c0_i32 : i32
    %1 = arith.extui %0 : i1 to i32
    %c0_i32_0 = arith.constant 0 : i32
    %2 = arith.cmpi ne, %1, %c0_i32_0 : i32
    scf.if %2 {
      %c0_132 = arith.constant 0 : index
      %c0_133 = arith.constant 0 : index
      %375 = vector.load %arg1[%c0_132, %c0_133] : memref<16x32xf32, #tpu.memory_space<vmem>>, vector<16x32xf32>
      %c0_134 = arith.constant 0 : index
      %c0_135 = arith.constant 0 : index
      %376 = vector.load %arg15[%c0_134, %c0_135] : memref<16x32xf32, #tpu.memory_space<vmem>>, vector<16x32xf32>
      tpu.vector_store %arg15[%c0_134, %c0_135], %375 {strides = array<i32>} : memref<16x32xf32, #tpu.memory_space<vmem>>, vector<16x32xf32>,
    } else {
    }
    %c0 = arith.constant 0 : index
    %c0_1 = arith.constant 0 : index
    %3 = vector.load %arg15[%c0, %c0_1] : memref<16x32xf32, #tpu.memory_space<vmem>>, vector<16x32xf32>
    %c0_2 = arith.constant 0 : index
    %c0_3 = arith.constant 0 : index
    %4 = vector.load %arg2[%c0_2, %c0_3] : memref<32x32xf32, #tpu.memory_space<vmem>>, vector<32x32xf32>
    %c0_4 = arith.constant 0 : index
    %c0_5 = arith.constant 0 : index
    %c0_6 = arith.constant 0 : index
    %5 = vector.load %arg10[%c0_4, %c0_5, %c0_6] : memref<1x15x32xf32, #tpu.memory_space<vmem>>, vector<1x15x32xf32>
    %6 = vector.shape_cast %5 : vector<1x15x32xf32> to vector<15x32xf32>
    %7 = vector.extract_strided_slice %6 {offsets = [0, 0], sizes = [1, 32], strides = [1, 1]} : vector<15x32xf32> to vector<1x32xf32>
    %8 = vector.extract_strided_slice %6 {offsets = [1, 0], sizes = [1, 32], strides = [1, 1]} : vector<15x32xf32> to vector<1x32xf32>
    %cst = arith.constant dense<0.000000e+00> : vector<16xf32>
    %9 = vector.multi_reduction <add>, %3, %cst [1] : vector<16x32xf32> to vector<16xf32>
    %10 = vector.shape_cast %9 : vector<16xf32> to vector<16x1xf32>
    %cst_7 = arith.constant 3.200000e+01 : f32
    %11 = vector.broadcast %cst_7 : f32 to vector<16x1xf32>
    %12 = arith.divf %10, %11 : vector<16x1xf32>
    %13 = vector.broadcast %12 : vector<16x1xf32> to vector<16x32xf32>
    %14 = arith.subf %3, %13 : vector<16x32xf32>
    %15 = arith.mulf %14, %14 : vector<16x32xf32>
    %cst_8 = arith.constant dense<0.000000e+00> : vector<16xf32>
    %16 = vector.multi_reduction <add>, %15, %cst_8 [1] : vector<16x32xf32> to vector<16xf32>
    %17 = vector.shape_cast %16 : vector<16xf32> to vector<16x1xf32>
    %cst_9 = arith.constant 3.200000e+01 : f32
    %18 = vector.broadcast %cst_9 : f32 to vector<16x1xf32>
    %19 = arith.divf %17, %18 : vector<16x1xf32>
    %cst_10 = arith.constant 9.99999974E-6 : f32
    %20 = vector.broadcast %cst_10 : f32 to vector<16x1xf32>
    %21 = arith.addf %19, %20 : vector<16x1xf32>
    %22 = math.rsqrt %21 : vector<16x1xf32>
    %23 = vector.broadcast %22 : vector<16x1xf32> to vector<16x32xf32>
    %24 = arith.mulf %14, %23 : vector<16x32xf32>
    %25 = vector.broadcast %7 : vector<1x32xf32> to vector<16x32xf32>
    %26 = arith.mulf %24, %25 : vector<16x32xf32>
    %27 = vector.broadcast %8 : vector<1x32xf32> to vector<16x32xf32>
    %28 = arith.addf %26, %27 : vector<16x32xf32>
    %c0_11 = arith.constant 0 : index
    %c0_12 = arith.constant 0 : index
    %c0_13 = arith.constant 0 : index
    %29 = vector.load %arg3[%c0_11, %c0_12, %c0_13] : memref<1x32x96xf32, #tpu.memory_space<vmem>>, vector<1x32x96xf32>
    %30 = vector.shape_cast %29 : vector<1x32x96xf32> to vector<32x96xf32>
    %cst_14 = arith.constant dense<0.000000e+00> : vector<16x96xf32>
    %31 = tpu.matmul %28, %30, %cst_14 {dimension_numbers = #tpu.dot_dimension_numbers<[1], [0], [0], [1], [0, 0, 1, 1], [], []>} : vector<16x32xf32>, vector<32x96xf32>, vector<16x96xf32> -> vector<16x96xf32>
    %32 = vector.extract_strided_slice %31 {offsets = [0, 0], sizes = [16, 32], strides = [1, 1]} : vector<16x96xf32> to vector<16x32xf32>
    %33 = vector.extract_strided_slice %6 {offsets = [2, 0], sizes = [1, 32], strides = [1, 1]} : vector<15x32xf32> to vector<1x32xf32>
    %34 = vector.broadcast %33 : vector<1x32xf32> to vector<16x32xf32>
    %35 = arith.addf %32, %34 : vector<16x32xf32>
    %36 = vector.extract_strided_slice %31 {offsets = [0, 32], sizes = [16, 32], strides = [1, 1]} : vector<16x96xf32> to vector<16x32xf32>
    %37 = vector.extract_strided_slice %6 {offsets = [3, 0], sizes = [1, 32], strides = [1, 1]} : vector<15x32xf32> to vector<1x32xf32>
    %38 = vector.broadcast %37 : vector<1x32xf32> to vector<16x32xf32>
    %39 = arith.addf %36, %38 : vector<16x32xf32>
    %40 = vector.extract_strided_slice %31 {offsets = [0, 64], sizes = [16, 32], strides = [1, 1]} : vector<16x96xf32> to vector<16x32xf32>
    %41 = vector.extract_strided_slice %6 {offsets = [4, 0], sizes = [1, 32], strides = [1, 1]} : vector<15x32xf32> to vector<1x32xf32>
    %42 = vector.broadcast %41 : vector<1x32xf32> to vector<16x32xf32>
    %43 = arith.addf %40, %42 : vector<16x32xf32>
    %c0_15 = arith.constant 0 : index
    %c0_16 = arith.constant 0 : index
    %c0_17 = arith.constant 0 : index
    %44 = vector.load %arg4[%c0_15, %c0_16, %c0_17] : memref<1x32x32xf32, #tpu.memory_space<vmem>>, vector<1x32x32xf32>
    %45 = vector.shape_cast %44 : vector<1x32x32xf32> to vector<32x32xf32>
    %46 = vector.extract_strided_slice %6 {offsets = [5, 0], sizes = [1, 32], strides = [1, 1]} : vector<15x32xf32> to vector<1x32xf32>
    %47 = vector.shape_cast %35 : vector<16x32xf32> to vector<2x8x32xf32>
    %48 = vector.shape_cast %39 : vector<16x32xf32> to vector<2x8x32xf32>
    %49 = vector.shape_cast %43 : vector<16x32xf32> to vector<2x8x32xf32>
    %50 = vector.extract_strided_slice %47 {offsets = [0, 0, 0], sizes = [2, 8, 8], strides = [1, 1, 1]} : vector<2x8x32xf32> to vector<2x8x8xf32>
    %cst_18 = arith.constant 0.353553385 : f32
    %51 = vector.broadcast %cst_18 : f32 to vector<2x8x8xf32>
    %52 = arith.mulf %50, %51 : vector<2x8x8xf32>
    %53 = vector.extract_strided_slice %48 {offsets = [0, 0, 0], sizes = [2, 8, 8], strides = [1, 1, 1]} : vector<2x8x32xf32> to vector<2x8x8xf32>
    %54 = vector.extract_strided_slice %49 {offsets = [0, 0, 0], sizes = [2, 8, 8], strides = [1, 1, 1]} : vector<2x8x32xf32> to vector<2x8x8xf32>
    "tpu.trace_start"() <{level = 10 : i32, message = "bqd,bkd->bqk"}> : () -> ()
    %cst_19 = arith.constant dense<0.000000e+00> : vector<2x8x8xf32>
    %55 = tpu.matmul %52, %53, %cst_19 {dimension_numbers = #tpu.dot_dimension_numbers<[2], [2], [1], [1], [0, 0, 0, 1, 1, 1], [0], [0]>} : vector<2x8x8xf32>, vector<2x8x8xf32>, vector<2x8x8xf32> -> vector<2x8x8xf32>
    "tpu.trace_stop"() : () -> ()
    %cst_20 = arith.constant dense<0xFF800000> : vector<2x8xf32>
    %56 = vector.multi_reduction <maximumf>, %55, %cst_20 [2] : vector<2x8x8xf32> to vector<2x8xf32>
    %57 = vector.shape_cast %56 : vector<2x8xf32> to vector<2x8x1xf32>
    %58 = vector.broadcast %57 : vector<2x8x1xf32> to vector<2x8x8xf32>
    %59 = arith.subf %55, %58 : vector<2x8x8xf32>
    %60 = math.exp %59 : vector<2x8x8xf32>
    %cst_21 = arith.constant dense<0.000000e+00> : vector<2x8xf32>
    %61 = vector.multi_reduction <add>, %60, %cst_21 [2] : vector<2x8x8xf32> to vector<2x8xf32>
    %62 = vector.shape_cast %61 : vector<2x8xf32> to vector<2x8x1xf32>
    %63 = tpu.reciprocal %62 {approx = true} : vector<2x8x1xf32> -> vector<2x8x1xf32>
    %64 = vector.broadcast %63 : vector<2x8x1xf32> to vector<2x8x8xf32>
    %65 = arith.mulf %60, %64 : vector<2x8x8xf32>
    "tpu.trace_start"() <{level = 10 : i32, message = "bqk,bkd->bqd"}> : () -> ()
    %cst_22 = arith.constant dense<0.000000e+00> : vector<2x8x8xf32>
    %66 = tpu.matmul %65, %54, %cst_22 {dimension_numbers = #tpu.dot_dimension_numbers<[2], [1], [1], [2], [0, 0, 0, 1, 1, 2], [0], [0]>} : vector<2x8x8xf32>, vector<2x8x8xf32>, vector<2x8x8xf32> -> vector<2x8x8xf32>
    "tpu.trace_stop"() : () -> ()
    %67 = vector.shape_cast %66 : vector<2x8x8xf32> to vector<16x8xf32>
    %68 = vector.extract_strided_slice %45 {offsets = [0, 0], sizes = [8, 32], strides = [1, 1]} : vector<32x32xf32> to vector<8x32xf32>
    %cst_23 = arith.constant dense<0.000000e+00> : vector<16x32xf32>
    %69 = tpu.matmul %67, %68, %cst_23 {dimension_numbers = #tpu.dot_dimension_numbers<[1], [0], [0], [1], [0, 0, 1, 1], [], []>} : vector<16x8xf32>, vector<8x32xf32>, vector<16x32xf32> -> vector<16x32xf32>
    %70 = vector.extract_strided_slice %47 {offsets = [0, 0, 8], sizes = [2, 8, 8], strides = [1, 1, 1]} : vector<2x8x32xf32> to vector<2x8x8xf32>
    %cst_24 = arith.constant 0.353553385 : f32
    %71 = vector.broadcast %cst_24 : f32 to vector<2x8x8xf32>
    %72 = arith.mulf %70, %71 : vector<2x8x8xf32>
    %73 = vector.extract_strided_slice %48 {offsets = [0, 0, 8], sizes = [2, 8, 8], strides = [1, 1, 1]} : vector<2x8x32xf32> to vector<2x8x8xf32>
    %74 = vector.extract_strided_slice %49 {offsets = [0, 0, 8], sizes = [2, 8, 8], strides = [1, 1, 1]} : vector<2x8x32xf32> to vector<2x8x8xf32>
    "tpu.trace_start"() <{level = 10 : i32, message = "bqd,bkd->bqk"}> : () -> ()
    %cst_25 = arith.constant dense<0.000000e+00> : vector<2x8x8xf32>
    %75 = tpu.matmul %72, %73, %cst_25 {dimension_numbers = #tpu.dot_dimension_numbers<[2], [2], [1], [1], [0, 0, 0, 1, 1, 1], [0], [0]>} : vector<2x8x8xf32>, vector<2x8x8xf32>, vector<2x8x8xf32> -> vector<2x8x8xf32>
    "tpu.trace_stop"() : () -> ()
    %cst_26 = arith.constant dense<0xFF800000> : vector<2x8xf32>
    %76 = vector.multi_reduction <maximumf>, %75, %cst_26 [2] : vector<2x8x8xf32> to vector<2x8xf32>
    %77 = vector.shape_cast %76 : vector<2x8xf32> to vector<2x8x1xf32>
    %78 = vector.broadcast %77 : vector<2x8x1xf32> to vector<2x8x8xf32>
    %79 = arith.subf %75, %78 : vector<2x8x8xf32>
    %80 = math.exp %79 : vector<2x8x8xf32>
    %cst_27 = arith.constant dense<0.000000e+00> : vector<2x8xf32>
    %81 = vector.multi_reduction <add>, %80, %cst_27 [2] : vector<2x8x8xf32> to vector<2x8xf32>
    %82 = vector.shape_cast %81 : vector<2x8xf32> to vector<2x8x1xf32>
    %83 = tpu.reciprocal %82 {approx = true} : vector<2x8x1xf32> -> vector<2x8x1xf32>
    %84 = vector.broadcast %83 : vector<2x8x1xf32> to vector<2x8x8xf32>
    %85 = arith.mulf %80, %84 : vector<2x8x8xf32>
    "tpu.trace_start"() <{level = 10 : i32, message = "bqk,bkd->bqd"}> : () -> ()
    %cst_28 = arith.constant dense<0.000000e+00> : vector<2x8x8xf32>
    %86 = tpu.matmul %85, %74, %cst_28 {dimension_numbers = #tpu.dot_dimension_numbers<[2], [1], [1], [2], [0, 0, 0, 1, 1, 2], [0], [0]>} : vector<2x8x8xf32>, vector<2x8x8xf32>, vector<2x8x8xf32> -> vector<2x8x8xf32>
    "tpu.trace_stop"() : () -> ()
    %87 = vector.shape_cast %86 : vector<2x8x8xf32> to vector<16x8xf32>
    %88 = vector.extract_strided_slice %45 {offsets = [8, 0], sizes = [8, 32], strides = [1, 1]} : vector<32x32xf32> to vector<8x32xf32>
    %cst_29 = arith.constant dense<0.000000e+00> : vector<16x32xf32>
    %89 = tpu.matmul %87, %88, %cst_29 {dimension_numbers = #tpu.dot_dimension_numbers<[1], [0], [0], [1], [0, 0, 1, 1], [], []>} : vector<16x8xf32>, vector<8x32xf32>, vector<16x32xf32> -> vector<16x32xf32>
    %90 = arith.addf %69, %89 : vector<16x32xf32>
    %91 = vector.extract_strided_slice %47 {offsets = [0, 0, 16], sizes = [2, 8, 8], strides = [1, 1, 1]} : vector<2x8x32xf32> to vector<2x8x8xf32>
    %cst_30 = arith.constant 0.353553385 : f32
    %92 = vector.broadcast %cst_30 : f32 to vector<2x8x8xf32>
    %93 = arith.mulf %91, %92 : vector<2x8x8xf32>
    %94 = vector.extract_strided_slice %48 {offsets = [0, 0, 16], sizes = [2, 8, 8], strides = [1, 1, 1]} : vector<2x8x32xf32> to vector<2x8x8xf32>
    %95 = vector.extract_strided_slice %49 {offsets = [0, 0, 16], sizes = [2, 8, 8], strides = [1, 1, 1]} : vector<2x8x32xf32> to vector<2x8x8xf32>
    "tpu.trace_start"() <{level = 10 : i32, message = "bqd,bkd->bqk"}> : () -> ()
    %cst_31 = arith.constant dense<0.000000e+00> : vector<2x8x8xf32>
    %96 = tpu.matmul %93, %94, %cst_31 {dimension_numbers = #tpu.dot_dimension_numbers<[2], [2], [1], [1], [0, 0, 0, 1, 1, 1], [0], [0]>} : vector<2x8x8xf32>, vector<2x8x8xf32>, vector<2x8x8xf32> -> vector<2x8x8xf32>
    "tpu.trace_stop"() : () -> ()
    %cst_32 = arith.constant dense<0xFF800000> : vector<2x8xf32>
    %97 = vector.multi_reduction <maximumf>, %96, %cst_32 [2] : vector<2x8x8xf32> to vector<2x8xf32>
    %98 = vector.shape_cast %97 : vector<2x8xf32> to vector<2x8x1xf32>
    %99 = vector.broadcast %98 : vector<2x8x1xf32> to vector<2x8x8xf32>
    %100 = arith.subf %96, %99 : vector<2x8x8xf32>
    %101 = math.exp %100 : vector<2x8x8xf32>
    %cst_33 = arith.constant dense<0.000000e+00> : vector<2x8xf32>
    %102 = vector.multi_reduction <add>, %101, %cst_33 [2] : vector<2x8x8xf32> to vector<2x8xf32>
    %103 = vector.shape_cast %102 : vector<2x8xf32> to vector<2x8x1xf32>
    %104 = tpu.reciprocal %103 {approx = true} : vector<2x8x1xf32> -> vector<2x8x1xf32>
    %105 = vector.broadcast %104 : vector<2x8x1xf32> to vector<2x8x8xf32>
    %106 = arith.mulf %101, %105 : vector<2x8x8xf32>
    "tpu.trace_start"() <{level = 10 : i32, message = "bqk,bkd->bqd"}> : () -> ()
    %cst_34 = arith.constant dense<0.000000e+00> : vector<2x8x8xf32>
    %107 = tpu.matmul %106, %95, %cst_34 {dimension_numbers = #tpu.dot_dimension_numbers<[2], [1], [1], [2], [0, 0, 0, 1, 1, 2], [0], [0]>} : vector<2x8x8xf32>, vector<2x8x8xf32>, vector<2x8x8xf32> -> vector<2x8x8xf32>
    "tpu.trace_stop"() : () -> ()
    %108 = vector.shape_cast %107 : vector<2x8x8xf32> to vector<16x8xf32>
    %109 = vector.extract_strided_slice %45 {offsets = [16, 0], sizes = [8, 32], strides = [1, 1]} : vector<32x32xf32> to vector<8x32xf32>
    %cst_35 = arith.constant dense<0.000000e+00> : vector<16x32xf32>
    %110 = tpu.matmul %108, %109, %cst_35 {dimension_numbers = #tpu.dot_dimension_numbers<[1], [0], [0], [1], [0, 0, 1, 1], [], []>} : vector<16x8xf32>, vector<8x32xf32>, vector<16x32xf32> -> vector<16x32xf32>
    %111 = arith.addf %90, %110 : vector<16x32xf32>
    %112 = vector.extract_strided_slice %47 {offsets = [0, 0, 24], sizes = [2, 8, 8], strides = [1, 1, 1]} : vector<2x8x32xf32> to vector<2x8x8xf32>
    %cst_36 = arith.constant 0.353553385 : f32
    %113 = vector.broadcast %cst_36 : f32 to vector<2x8x8xf32>
    %114 = arith.mulf %112, %113 : vector<2x8x8xf32>
    %115 = vector.extract_strided_slice %48 {offsets = [0, 0, 24], sizes = [2, 8, 8], strides = [1, 1, 1]} : vector<2x8x32xf32> to vector<2x8x8xf32>
    %116 = vector.extract_strided_slice %49 {offsets = [0, 0, 24], sizes = [2, 8, 8], strides = [1, 1, 1]} : vector<2x8x32xf32> to vector<2x8x8xf32>
    "tpu.trace_start"() <{level = 10 : i32, message = "bqd,bkd->bqk"}> : () -> ()
    %cst_37 = arith.constant dense<0.000000e+00> : vector<2x8x8xf32>
    %117 = tpu.matmul %114, %115, %cst_37 {dimension_numbers = #tpu.dot_dimension_numbers<[2], [2], [1], [1], [0, 0, 0, 1, 1, 1], [0], [0]>} : vector<2x8x8xf32>, vector<2x8x8xf32>, vector<2x8x8xf32> -> vector<2x8x8xf32>
    "tpu.trace_stop"() : () -> ()
    %cst_38 = arith.constant dense<0xFF800000> : vector<2x8xf32>
    %118 = vector.multi_reduction <maximumf>, %117, %cst_38 [2] : vector<2x8x8xf32> to vector<2x8xf32>
    %119 = vector.shape_cast %118 : vector<2x8xf32> to vector<2x8x1xf32>
    %120 = vector.broadcast %119 : vector<2x8x1xf32> to vector<2x8x8xf32>
    %121 = arith.subf %117, %120 : vector<2x8x8xf32>
    %122 = math.exp %121 : vector<2x8x8xf32>
    %cst_39 = arith.constant dense<0.000000e+00> : vector<2x8xf32>
    %123 = vector.multi_reduction <add>, %122, %cst_39 [2] : vector<2x8x8xf32> to vector<2x8xf32>
    %124 = vector.shape_cast %123 : vector<2x8xf32> to vector<2x8x1xf32>
    %125 = tpu.reciprocal %124 {approx = true} : vector<2x8x1xf32> -> vector<2x8x1xf32>
    %126 = vector.broadcast %125 : vector<2x8x1xf32> to vector<2x8x8xf32>
    %127 = arith.mulf %122, %126 : vector<2x8x8xf32>
    "tpu.trace_start"() <{level = 10 : i32, message = "bqk,bkd->bqd"}> : () -> ()
    %cst_40 = arith.constant dense<0.000000e+00> : vector<2x8x8xf32>
    %128 = tpu.matmul %127, %116, %cst_40 {dimension_numbers = #tpu.dot_dimension_numbers<[2], [1], [1], [2], [0, 0, 0, 1, 1, 2], [0], [0]>} : vector<2x8x8xf32>, vector<2x8x8xf32>, vector<2x8x8xf32> -> vector<2x8x8xf32>
    "tpu.trace_stop"() : () -> ()
    %129 = vector.shape_cast %128 : vector<2x8x8xf32> to vector<16x8xf32>
    %130 = vector.extract_strided_slice %45 {offsets = [24, 0], sizes = [8, 32], strides = [1, 1]} : vector<32x32xf32> to vector<8x32xf32>
    %cst_41 = arith.constant dense<0.000000e+00> : vector<16x32xf32>
    %131 = tpu.matmul %129, %130, %cst_41 {dimension_numbers = #tpu.dot_dimension_numbers<[1], [0], [0], [1], [0, 0, 1, 1], [], []>} : vector<16x8xf32>, vector<8x32xf32>, vector<16x32xf32> -> vector<16x32xf32>
    %132 = arith.addf %111, %131 : vector<16x32xf32>
    %133 = vector.broadcast %46 : vector<1x32xf32> to vector<16x32xf32>
    %134 = arith.addf %132, %133 : vector<16x32xf32>
    %135 = arith.addf %3, %134 : vector<16x32xf32>
    %136 = vector.extract_strided_slice %6 {offsets = [6, 0], sizes = [1, 32], strides = [1, 1]} : vector<15x32xf32> to vector<1x32xf32>
    %137 = vector.extract_strided_slice %6 {offsets = [7, 0], sizes = [1, 32], strides = [1, 1]} : vector<15x32xf32> to vector<1x32xf32>
    %cst_42 = arith.constant dense<0.000000e+00> : vector<16xf32>
    %138 = vector.multi_reduction <add>, %135, %cst_42 [1] : vector<16x32xf32> to vector<16xf32>
    %139 = vector.shape_cast %138 : vector<16xf32> to vector<16x1xf32>
    %cst_43 = arith.constant 3.200000e+01 : f32
    %140 = vector.broadcast %cst_43 : f32 to vector<16x1xf32>
    %141 = arith.divf %139, %140 : vector<16x1xf32>
    %142 = vector.broadcast %141 : vector<16x1xf32> to vector<16x32xf32>
    %143 = arith.subf %135, %142 : vector<16x32xf32>
    %144 = arith.mulf %143, %143 : vector<16x32xf32>
    %cst_44 = arith.constant dense<0.000000e+00> : vector<16xf32>
    %145 = vector.multi_reduction <add>, %144, %cst_44 [1] : vector<16x32xf32> to vector<16xf32>
    %146 = vector.shape_cast %145 : vector<16xf32> to vector<16x1xf32>
    %cst_45 = arith.constant 3.200000e+01 : f32
    %147 = vector.broadcast %cst_45 : f32 to vector<16x1xf32>
    %148 = arith.divf %146, %147 : vector<16x1xf32>
    %cst_46 = arith.constant 9.99999974E-6 : f32
    %149 = vector.broadcast %cst_46 : f32 to vector<16x1xf32>
    %150 = arith.addf %148, %149 : vector<16x1xf32>
    %151 = math.rsqrt %150 : vector<16x1xf32>
    %152 = vector.broadcast %151 : vector<16x1xf32> to vector<16x32xf32>
    %153 = arith.mulf %143, %152 : vector<16x32xf32>
    %154 = vector.broadcast %136 : vector<1x32xf32> to vector<16x32xf32>
    %155 = arith.mulf %153, %154 : vector<16x32xf32>
    %156 = vector.broadcast %137 : vector<1x32xf32> to vector<16x32xf32>
    %157 = arith.addf %155, %156 : vector<16x32xf32>
    %c0_47 = arith.constant 0 : index
    %c0_48 = arith.constant 0 : index
    %c0_49 = arith.constant 0 : index
    %158 = vector.load %arg5[%c0_47, %c0_48, %c0_49] : memref<1x32x32xf32, #tpu.memory_space<vmem>>, vector<1x32x32xf32>
    %159 = vector.shape_cast %158 : vector<1x32x32xf32> to vector<32x32xf32>
    %cst_50 = arith.constant dense<0.000000e+00> : vector<16x32xf32>
    %160 = tpu.matmul %157, %159, %cst_50 {dimension_numbers = #tpu.dot_dimension_numbers<[1], [0], [0], [1], [0, 0, 1, 1], [], []>} : vector<16x32xf32>, vector<32x32xf32>, vector<16x32xf32> -> vector<16x32xf32>
    %161 = vector.extract_strided_slice %6 {offsets = [8, 0], sizes = [1, 32], strides = [1, 1]} : vector<15x32xf32> to vector<1x32xf32>
    %162 = vector.broadcast %161 : vector<1x32xf32> to vector<16x32xf32>
    %163 = arith.addf %160, %162 : vector<16x32xf32>
    %c0_51 = arith.constant 0 : index
    %c0_52 = arith.constant 0 : index
    %c0_53 = arith.constant 0 : index
    %164 = vector.load %arg6[%c0_51, %c0_52, %c0_53] : memref<1x32x64xf32, #tpu.memory_space<vmem>>, vector<1x32x64xf32>
    %165 = vector.shape_cast %164 : vector<1x32x64xf32> to vector<32x64xf32>
    %cst_54 = arith.constant dense<0.000000e+00> : vector<32x64xf32>
    %166 = tpu.matmul %4, %165, %cst_54 {dimension_numbers = #tpu.dot_dimension_numbers<[1], [0], [0], [1], [0, 0, 1, 1], [], []>} : vector<32x32xf32>, vector<32x64xf32>, vector<32x64xf32> -> vector<32x64xf32>
    %167 = vector.extract_strided_slice %166 {offsets = [0, 0], sizes = [32, 32], strides = [1, 1]} : vector<32x64xf32> to vector<32x32xf32>
    %168 = vector.extract_strided_slice %6 {offsets = [9, 0], sizes = [1, 32], strides = [1, 1]} : vector<15x32xf32> to vector<1x32xf32>
    %169 = vector.broadcast %168 : vector<1x32xf32> to vector<32x32xf32>
    %170 = arith.addf %167, %169 : vector<32x32xf32>
    %171 = vector.extract_strided_slice %166 {offsets = [0, 32], sizes = [32, 32], strides = [1, 1]} : vector<32x64xf32> to vector<32x32xf32>
    %172 = vector.extract_strided_slice %6 {offsets = [10, 0], sizes = [1, 32], strides = [1, 1]} : vector<15x32xf32> to vector<1x32xf32>
    %173 = vector.broadcast %172 : vector<1x32xf32> to vector<32x32xf32>
    %174 = arith.addf %171, %173 : vector<32x32xf32>
    %c0_55 = arith.constant 0 : index
    %c0_56 = arith.constant 0 : index
    %c0_57 = arith.constant 0 : index
    %175 = vector.load %arg7[%c0_55, %c0_56, %c0_57] : memref<1x32x32xf32, #tpu.memory_space<vmem>>, vector<1x32x32xf32>
    %176 = vector.shape_cast %175 : vector<1x32x32xf32> to vector<32x32xf32>
    %177 = vector.extract_strided_slice %6 {offsets = [11, 0], sizes = [1, 32], strides = [1, 1]} : vector<15x32xf32> to vector<1x32xf32>
    %178 = vector.shape_cast %163 : vector<16x32xf32> to vector<2x8x32xf32>
    %179 = vector.shape_cast %170 : vector<32x32xf32> to vector<2x16x32xf32>
    %180 = vector.shape_cast %174 : vector<32x32xf32> to vector<2x16x32xf32>
    %181 = vector.extract_strided_slice %178 {offsets = [0, 0, 0], sizes = [2, 8, 8], strides = [1, 1, 1]} : vector<2x8x32xf32> to vector<2x8x8xf32>
    %cst_58 = arith.constant 0.353553385 : f32
    %182 = vector.broadcast %cst_58 : f32 to vector<2x8x8xf32>
    %183 = arith.mulf %181, %182 : vector<2x8x8xf32>
    %184 = vector.extract_strided_slice %179 {offsets = [0, 0, 0], sizes = [2, 16, 8], strides = [1, 1, 1]} : vector<2x16x32xf32> to vector<2x16x8xf32>
    %185 = vector.extract_strided_slice %180 {offsets = [0, 0, 0], sizes = [2, 16, 8], strides = [1, 1, 1]} : vector<2x16x32xf32> to vector<2x16x8xf32>
    "tpu.trace_start"() <{level = 10 : i32, message = "bqd,bkd->bqk"}> : () -> ()
    %cst_59 = arith.constant dense<0.000000e+00> : vector<2x8x16xf32>
    %186 = tpu.matmul %183, %184, %cst_59 {dimension_numbers = #tpu.dot_dimension_numbers<[2], [2], [1], [1], [0, 0, 0, 1, 1, 1], [0], [0]>} : vector<2x8x8xf32>, vector<2x16x8xf32>, vector<2x8x16xf32> -> vector<2x8x16xf32>
    "tpu.trace_stop"() : () -> ()
    %cst_60 = arith.constant dense<0xFF800000> : vector<2x8xf32>
    %187 = vector.multi_reduction <maximumf>, %186, %cst_60 [2] : vector<2x8x16xf32> to vector<2x8xf32>
    %188 = vector.shape_cast %187 : vector<2x8xf32> to vector<2x8x1xf32>
    %189 = vector.broadcast %188 : vector<2x8x1xf32> to vector<2x8x16xf32>
    %190 = arith.subf %186, %189 : vector<2x8x16xf32>
    %191 = math.exp %190 : vector<2x8x16xf32>
    %cst_61 = arith.constant dense<0.000000e+00> : vector<2x8xf32>
    %192 = vector.multi_reduction <add>, %191, %cst_61 [2] : vector<2x8x16xf32> to vector<2x8xf32>
    %193 = vector.shape_cast %192 : vector<2x8xf32> to vector<2x8x1xf32>
    %194 = tpu.reciprocal %193 {approx = true} : vector<2x8x1xf32> -> vector<2x8x1xf32>
    %195 = vector.broadcast %194 : vector<2x8x1xf32> to vector<2x8x16xf32>
    %196 = arith.mulf %191, %195 : vector<2x8x16xf32>
    "tpu.trace_start"() <{level = 10 : i32, message = "bqk,bkd->bqd"}> : () -> ()
    %cst_62 = arith.constant dense<0.000000e+00> : vector<2x8x8xf32>
    %197 = tpu.matmul %196, %185, %cst_62 {dimension_numbers = #tpu.dot_dimension_numbers<[2], [1], [1], [2], [0, 0, 0, 1, 1, 2], [0], [0]>} : vector<2x8x16xf32>, vector<2x16x8xf32>, vector<2x8x8xf32> -> vector<2x8x8xf32>
    "tpu.trace_stop"() : () -> ()
    %198 = vector.shape_cast %197 : vector<2x8x8xf32> to vector<16x8xf32>
    %199 = vector.extract_strided_slice %176 {offsets = [0, 0], sizes = [8, 32], strides = [1, 1]} : vector<32x32xf32> to vector<8x32xf32>
    %cst_63 = arith.constant dense<0.000000e+00> : vector<16x32xf32>
    %200 = tpu.matmul %198, %199, %cst_63 {dimension_numbers = #tpu.dot_dimension_numbers<[1], [0], [0], [1], [0, 0, 1, 1], [], []>} : vector<16x8xf32>, vector<8x32xf32>, vector<16x32xf32> -> vector<16x32xf32>
    %201 = vector.extract_strided_slice %178 {offsets = [0, 0, 8], sizes = [2, 8, 8], strides = [1, 1, 1]} : vector<2x8x32xf32> to vector<2x8x8xf32>
    %cst_64 = arith.constant 0.353553385 : f32
    %202 = vector.broadcast %cst_64 : f32 to vector<2x8x8xf32>
    %203 = arith.mulf %201, %202 : vector<2x8x8xf32>
    %204 = vector.extract_strided_slice %179 {offsets = [0, 0, 8], sizes = [2, 16, 8], strides = [1, 1, 1]} : vector<2x16x32xf32> to vector<2x16x8xf32>
    %205 = vector.extract_strided_slice %180 {offsets = [0, 0, 8], sizes = [2, 16, 8], strides = [1, 1, 1]} : vector<2x16x32xf32> to vector<2x16x8xf32>
    "tpu.trace_start"() <{level = 10 : i32, message = "bqd,bkd->bqk"}> : () -> ()
    %cst_65 = arith.constant dense<0.000000e+00> : vector<2x8x16xf32>
    %206 = tpu.matmul %203, %204, %cst_65 {dimension_numbers = #tpu.dot_dimension_numbers<[2], [2], [1], [1], [0, 0, 0, 1, 1, 1], [0], [0]>} : vector<2x8x8xf32>, vector<2x16x8xf32>, vector<2x8x16xf32> -> vector<2x8x16xf32>
    "tpu.trace_stop"() : () -> ()
    %cst_66 = arith.constant dense<0xFF800000> : vector<2x8xf32>
    %207 = vector.multi_reduction <maximumf>, %206, %cst_66 [2] : vector<2x8x16xf32> to vector<2x8xf32>
    %208 = vector.shape_cast %207 : vector<2x8xf32> to vector<2x8x1xf32>
    %209 = vector.broadcast %208 : vector<2x8x1xf32> to vector<2x8x16xf32>
    %210 = arith.subf %206, %209 : vector<2x8x16xf32>
    %211 = math.exp %210 : vector<2x8x16xf32>
    %cst_67 = arith.constant dense<0.000000e+00> : vector<2x8xf32>
    %212 = vector.multi_reduction <add>, %211, %cst_67 [2] : vector<2x8x16xf32> to vector<2x8xf32>
    %213 = vector.shape_cast %212 : vector<2x8xf32> to vector<2x8x1xf32>
    %214 = tpu.reciprocal %213 {approx = true} : vector<2x8x1xf32> -> vector<2x8x1xf32>
    %215 = vector.broadcast %214 : vector<2x8x1xf32> to vector<2x8x16xf32>
    %216 = arith.mulf %211, %215 : vector<2x8x16xf32>
    "tpu.trace_start"() <{level = 10 : i32, message = "bqk,bkd->bqd"}> : () -> ()
    %cst_68 = arith.constant dense<0.000000e+00> : vector<2x8x8xf32>
    %217 = tpu.matmul %216, %205, %cst_68 {dimension_numbers = #tpu.dot_dimension_numbers<[2], [1], [1], [2], [0, 0, 0, 1, 1, 2], [0], [0]>} : vector<2x8x16xf32>, vector<2x16x8xf32>, vector<2x8x8xf32> -> vector<2x8x8xf32>
    "tpu.trace_stop"() : () -> ()
    %218 = vector.shape_cast %217 : vector<2x8x8xf32> to vector<16x8xf32>
    %219 = vector.extract_strided_slice %176 {offsets = [8, 0], sizes = [8, 32], strides = [1, 1]} : vector<32x32xf32> to vector<8x32xf32>
    %cst_69 = arith.constant dense<0.000000e+00> : vector<16x32xf32>
    %220 = tpu.matmul %218, %219, %cst_69 {dimension_numbers = #tpu.dot_dimension_numbers<[1], [0], [0], [1], [0, 0, 1, 1], [], []>} : vector<16x8xf32>, vector<8x32xf32>, vector<16x32xf32> -> vector<16x32xf32>
    %221 = arith.addf %200, %220 : vector<16x32xf32>
    %222 = vector.extract_strided_slice %178 {offsets = [0, 0, 16], sizes = [2, 8, 8], strides = [1, 1, 1]} : vector<2x8x32xf32> to vector<2x8x8xf32>
    %cst_70 = arith.constant 0.353553385 : f32
    %223 = vector.broadcast %cst_70 : f32 to vector<2x8x8xf32>
    %224 = arith.mulf %222, %223 : vector<2x8x8xf32>
    %225 = vector.extract_strided_slice %179 {offsets = [0, 0, 16], sizes = [2, 16, 8], strides = [1, 1, 1]} : vector<2x16x32xf32> to vector<2x16x8xf32>
    %226 = vector.extract_strided_slice %180 {offsets = [0, 0, 16], sizes = [2, 16, 8], strides = [1, 1, 1]} : vector<2x16x32xf32> to vector<2x16x8xf32>
    "tpu.trace_start"() <{level = 10 : i32, message = "bqd,bkd->bqk"}> : () -> ()
    %cst_71 = arith.constant dense<0.000000e+00> : vector<2x8x16xf32>
    %227 = tpu.matmul %224, %225, %cst_71 {dimension_numbers = #tpu.dot_dimension_numbers<[2], [2], [1], [1], [0, 0, 0, 1, 1, 1], [0], [0]>} : vector<2x8x8xf32>, vector<2x16x8xf32>, vector<2x8x16xf32> -> vector<2x8x16xf32>
    "tpu.trace_stop"() : () -> ()
    %cst_72 = arith.constant dense<0xFF800000> : vector<2x8xf32>
    %228 = vector.multi_reduction <maximumf>, %227, %cst_72 [2] : vector<2x8x16xf32> to vector<2x8xf32>
    %229 = vector.shape_cast %228 : vector<2x8xf32> to vector<2x8x1xf32>
    %230 = vector.broadcast %229 : vector<2x8x1xf32> to vector<2x8x16xf32>
    %231 = arith.subf %227, %230 : vector<2x8x16xf32>
    %232 = math.exp %231 : vector<2x8x16xf32>
    %cst_73 = arith.constant dense<0.000000e+00> : vector<2x8xf32>
    %233 = vector.multi_reduction <add>, %232, %cst_73 [2] : vector<2x8x16xf32> to vector<2x8xf32>
    %234 = vector.shape_cast %233 : vector<2x8xf32> to vector<2x8x1xf32>
    %235 = tpu.reciprocal %234 {approx = true} : vector<2x8x1xf32> -> vector<2x8x1xf32>
    %236 = vector.broadcast %235 : vector<2x8x1xf32> to vector<2x8x16xf32>
    %237 = arith.mulf %232, %236 : vector<2x8x16xf32>
    "tpu.trace_start"() <{level = 10 : i32, message = "bqk,bkd->bqd"}> : () -> ()
    %cst_74 = arith.constant dense<0.000000e+00> : vector<2x8x8xf32>
    %238 = tpu.matmul %237, %226, %cst_74 {dimension_numbers = #tpu.dot_dimension_numbers<[2], [1], [1], [2], [0, 0, 0, 1, 1, 2], [0], [0]>} : vector<2x8x16xf32>, vector<2x16x8xf32>, vector<2x8x8xf32> -> vector<2x8x8xf32>
    "tpu.trace_stop"() : () -> ()
    %239 = vector.shape_cast %238 : vector<2x8x8xf32> to vector<16x8xf32>
    %240 = vector.extract_strided_slice %176 {offsets = [16, 0], sizes = [8, 32], strides = [1, 1]} : vector<32x32xf32> to vector<8x32xf32>
    %cst_75 = arith.constant dense<0.000000e+00> : vector<16x32xf32>
    %241 = tpu.matmul %239, %240, %cst_75 {dimension_numbers = #tpu.dot_dimension_numbers<[1], [0], [0], [1], [0, 0, 1, 1], [], []>} : vector<16x8xf32>, vector<8x32xf32>, vector<16x32xf32> -> vector<16x32xf32>
    %242 = arith.addf %221, %241 : vector<16x32xf32>
    %243 = vector.extract_strided_slice %178 {offsets = [0, 0, 24], sizes = [2, 8, 8], strides = [1, 1, 1]} : vector<2x8x32xf32> to vector<2x8x8xf32>
    %cst_76 = arith.constant 0.353553385 : f32
    %244 = vector.broadcast %cst_76 : f32 to vector<2x8x8xf32>
    %245 = arith.mulf %243, %244 : vector<2x8x8xf32>
    %246 = vector.extract_strided_slice %179 {offsets = [0, 0, 24], sizes = [2, 16, 8], strides = [1, 1, 1]} : vector<2x16x32xf32> to vector<2x16x8xf32>
    %247 = vector.extract_strided_slice %180 {offsets = [0, 0, 24], sizes = [2, 16, 8], strides = [1, 1, 1]} : vector<2x16x32xf32> to vector<2x16x8xf32>
    "tpu.trace_start"() <{level = 10 : i32, message = "bqd,bkd->bqk"}> : () -> ()
    %cst_77 = arith.constant dense<0.000000e+00> : vector<2x8x16xf32>
    %248 = tpu.matmul %245, %246, %cst_77 {dimension_numbers = #tpu.dot_dimension_numbers<[2], [2], [1], [1], [0, 0, 0, 1, 1, 1], [0], [0]>} : vector<2x8x8xf32>, vector<2x16x8xf32>, vector<2x8x16xf32> -> vector<2x8x16xf32>
    "tpu.trace_stop"() : () -> ()
    %cst_78 = arith.constant dense<0xFF800000> : vector<2x8xf32>
    %249 = vector.multi_reduction <maximumf>, %248, %cst_78 [2] : vector<2x8x16xf32> to vector<2x8xf32>
    %250 = vector.shape_cast %249 : vector<2x8xf32> to vector<2x8x1xf32>
    %251 = vector.broadcast %250 : vector<2x8x1xf32> to vector<2x8x16xf32>
    %252 = arith.subf %248, %251 : vector<2x8x16xf32>
    %253 = math.exp %252 : vector<2x8x16xf32>
    %cst_79 = arith.constant dense<0.000000e+00> : vector<2x8xf32>
    %254 = vector.multi_reduction <add>, %253, %cst_79 [2] : vector<2x8x16xf32> to vector<2x8xf32>
    %255 = vector.shape_cast %254 : vector<2x8xf32> to vector<2x8x1xf32>
    %256 = tpu.reciprocal %255 {approx = true} : vector<2x8x1xf32> -> vector<2x8x1xf32>
    %257 = vector.broadcast %256 : vector<2x8x1xf32> to vector<2x8x16xf32>
    %258 = arith.mulf %253, %257 : vector<2x8x16xf32>
    "tpu.trace_start"() <{level = 10 : i32, message = "bqk,bkd->bqd"}> : () -> ()
    %cst_80 = arith.constant dense<0.000000e+00> : vector<2x8x8xf32>
    %259 = tpu.matmul %258, %247, %cst_80 {dimension_numbers = #tpu.dot_dimension_numbers<[2], [1], [1], [2], [0, 0, 0, 1, 1, 2], [0], [0]>} : vector<2x8x16xf32>, vector<2x16x8xf32>, vector<2x8x8xf32> -> vector<2x8x8xf32>
    "tpu.trace_stop"() : () -> ()
    %260 = vector.shape_cast %259 : vector<2x8x8xf32> to vector<16x8xf32>
    %261 = vector.extract_strided_slice %176 {offsets = [24, 0], sizes = [8, 32], strides = [1, 1]} : vector<32x32xf32> to vector<8x32xf32>
    %cst_81 = arith.constant dense<0.000000e+00> : vector<16x32xf32>
    %262 = tpu.matmul %260, %261, %cst_81 {dimension_numbers = #tpu.dot_dimension_numbers<[1], [0], [0], [1], [0, 0, 1, 1], [], []>} : vector<16x8xf32>, vector<8x32xf32>, vector<16x32xf32> -> vector<16x32xf32>
    %263 = arith.addf %242, %262 : vector<16x32xf32>
    %264 = vector.broadcast %177 : vector<1x32xf32> to vector<16x32xf32>
    %265 = arith.addf %263, %264 : vector<16x32xf32>
    %266 = arith.addf %135, %265 : vector<16x32xf32>
    %267 = vector.extract_strided_slice %6 {offsets = [12, 0], sizes = [1, 32], strides = [1, 1]} : vector<15x32xf32> to vector<1x32xf32>
    %268 = vector.extract_strided_slice %6 {offsets = [13, 0], sizes = [1, 32], strides = [1, 1]} : vector<15x32xf32> to vector<1x32xf32>
    %cst_82 = arith.constant dense<0.000000e+00> : vector<16xf32>
    %269 = vector.multi_reduction <add>, %266, %cst_82 [1] : vector<16x32xf32> to vector<16xf32>
    %270 = vector.shape_cast %269 : vector<16xf32> to vector<16x1xf32>
    %cst_83 = arith.constant 3.200000e+01 : f32
    %271 = vector.broadcast %cst_83 : f32 to vector<16x1xf32>
    %272 = arith.divf %270, %271 : vector<16x1xf32>
    %273 = vector.broadcast %272 : vector<16x1xf32> to vector<16x32xf32>
    %274 = arith.subf %266, %273 : vector<16x32xf32>
    %275 = arith.mulf %274, %274 : vector<16x32xf32>
    %cst_84 = arith.constant dense<0.000000e+00> : vector<16xf32>
    %276 = vector.multi_reduction <add>, %275, %cst_84 [1] : vector<16x32xf32> to vector<16xf32>
    %277 = vector.shape_cast %276 : vector<16xf32> to vector<16x1xf32>
    %cst_85 = arith.constant 3.200000e+01 : f32
    %278 = vector.broadcast %cst_85 : f32 to vector<16x1xf32>
    %279 = arith.divf %277, %278 : vector<16x1xf32>
    %cst_86 = arith.constant 9.99999974E-6 : f32
    %280 = vector.broadcast %cst_86 : f32 to vector<16x1xf32>
    %281 = arith.addf %279, %280 : vector<16x1xf32>
    %282 = math.rsqrt %281 : vector<16x1xf32>
    %283 = vector.broadcast %282 : vector<16x1xf32> to vector<16x32xf32>
    %284 = arith.mulf %274, %283 : vector<16x32xf32>
    %285 = vector.broadcast %267 : vector<1x32xf32> to vector<16x32xf32>
    %286 = arith.mulf %284, %285 : vector<16x32xf32>
    %287 = vector.broadcast %268 : vector<1x32xf32> to vector<16x32xf32>
    %288 = arith.addf %286, %287 : vector<16x32xf32>
    %289 = vector.extract_strided_slice %6 {offsets = [14, 0], sizes = [1, 32], strides = [1, 1]} : vector<15x32xf32> to vector<1x32xf32>
    %290 = arith.truncf %288 : vector<16x32xf32> to vector<16x32xbf16>
    %cst_87 = arith.constant 0.000000e+00 : f32
    %291 = vector.broadcast %cst_87 : f32 to vector<16x32xf32>
    %c0_i32_88 = arith.constant 0 : i32
    %c512_i32 = arith.constant 512 : i32
    %292 = arith.muli %c0_i32_88, %c512_i32 : i32
    %293 = tpu.assume_multiple %292, 512 : i32
    %c0_89 = arith.constant 0 : index
    %c0_90 = arith.constant 0 : index
    %294 = arith.index_cast %293 : i32 to index
    %295 = vector.load %arg8[%c0_89, %c0_90, %294] : memref<1x32x2048xbf16, #tpu.memory_space<vmem>>, vector<1x32x512xbf16>
    %296 = vector.shape_cast %295 : vector<1x32x512xbf16> to vector<32x512xbf16>
    %c0_91 = arith.constant 0 : index
    %c0_92 = arith.constant 0 : index
    %297 = arith.index_cast %293 : i32 to index
    %298 = vector.load %arg11[%c0_91, %c0_92, %297] : memref<1x1x2048xf32, #tpu.memory_space<vmem>>, vector<1x1x512xf32>
    %299 = vector.shape_cast %298 : vector<1x1x512xf32> to vector<1x512xf32>
    %c0_93 = arith.constant 0 : index
    %300 = arith.index_cast %293 : i32 to index
    %c0_94 = arith.constant 0 : index
    %301 = vector.load %arg9[%c0_93, %300, %c0_94] : memref<1x2048x32xbf16, #tpu.memory_space<vmem>>, vector<1x512x32xbf16>
    %302 = vector.shape_cast %301 : vector<1x512x32xbf16> to vector<512x32xbf16>
    %cst_95 = arith.constant dense<0.000000e+00> : vector<16x512xf32>
    %303 = tpu.matmul %290, %296, %cst_95 {dimension_numbers = #tpu.dot_dimension_numbers<[1], [0], [0], [1], [0, 0, 1, 1], [], []>} : vector<16x32xbf16>, vector<32x512xbf16>, vector<16x512xf32> -> vector<16x512xf32>
    %304 = vector.broadcast %299 : vector<1x512xf32> to vector<16x512xf32>
    %305 = arith.addf %303, %304 : vector<16x512xf32>
    %cst_96 = arith.constant 0.000000e+00 : f32
    %306 = vector.broadcast %cst_96 : f32 to vector<16x512xf32>
    %307 = arith.maximumf %305, %306 : vector<16x512xf32>
    %308 = arith.truncf %307 : vector<16x512xf32> to vector<16x512xbf16>
    %cst_97 = arith.constant dense<0.000000e+00> : vector<16x32xf32>
    %309 = tpu.matmul %308, %302, %cst_97 {dimension_numbers = #tpu.dot_dimension_numbers<[1], [0], [0], [1], [0, 0, 1, 1], [], []>} : vector<16x512xbf16>, vector<512x32xbf16>, vector<16x32xf32> -> vector<16x32xf32>
    %310 = arith.addf %291, %309 : vector<16x32xf32>
    %c1_i32 = arith.constant 1 : i32
    %c512_i32_98 = arith.constant 512 : i32
    %311 = arith.muli %c1_i32, %c512_i32_98 : i32
    %312 = tpu.assume_multiple %311, 512 : i32
    %c0_99 = arith.constant 0 : index
    %c0_100 = arith.constant 0 : index
    %313 = arith.index_cast %312 : i32 to index
    %314 = vector.load %arg8[%c0_99, %c0_100, %313] : memref<1x32x2048xbf16, #tpu.memory_space<vmem>>, vector<1x32x512xbf16>
    %315 = vector.shape_cast %314 : vector<1x32x512xbf16> to vector<32x512xbf16>
    %c0_101 = arith.constant 0 : index
    %c0_102 = arith.constant 0 : index
    %316 = arith.index_cast %312 : i32 to index
    %317 = vector.load %arg11[%c0_101, %c0_102, %316] : memref<1x1x2048xf32, #tpu.memory_space<vmem>>, vector<1x1x512xf32>
    %318 = vector.shape_cast %317 : vector<1x1x512xf32> to vector<1x512xf32>
    %c0_103 = arith.constant 0 : index
    %319 = arith.index_cast %312 : i32 to index
    %c0_104 = arith.constant 0 : index
    %320 = vector.load %arg9[%c0_103, %319, %c0_104] : memref<1x2048x32xbf16, #tpu.memory_space<vmem>>, vector<1x512x32xbf16>
    %321 = vector.shape_cast %320 : vector<1x512x32xbf16> to vector<512x32xbf16>
    %cst_105 = arith.constant dense<0.000000e+00> : vector<16x512xf32>
    %322 = tpu.matmul %290, %315, %cst_105 {dimension_numbers = #tpu.dot_dimension_numbers<[1], [0], [0], [1], [0, 0, 1, 1], [], []>} : vector<16x32xbf16>, vector<32x512xbf16>, vector<16x512xf32> -> vector<16x512xf32>
    %323 = vector.broadcast %318 : vector<1x512xf32> to vector<16x512xf32>
    %324 = arith.addf %322, %323 : vector<16x512xf32>
    %cst_106 = arith.constant 0.000000e+00 : f32
    %325 = vector.broadcast %cst_106 : f32 to vector<16x512xf32>
    %326 = arith.maximumf %324, %325 : vector<16x512xf32>
    %327 = arith.truncf %326 : vector<16x512xf32> to vector<16x512xbf16>
    %cst_107 = arith.constant dense<0.000000e+00> : vector<16x32xf32>
    %328 = tpu.matmul %327, %321, %cst_107 {dimension_numbers = #tpu.dot_dimension_numbers<[1], [0], [0], [1], [0, 0, 1, 1], [], []>} : vector<16x512xbf16>, vector<512x32xbf16>, vector<16x32xf32> -> vector<16x32xf32>
    %329 = arith.addf %310, %328 : vector<16x32xf32>
    %c2_i32 = arith.constant 2 : i32
    %c512_i32_108 = arith.constant 512 : i32
    %330 = arith.muli %c2_i32, %c512_i32_108 : i32
    %331 = tpu.assume_multiple %330, 512 : i32
    %c0_109 = arith.constant 0 : index
    %c0_110 = arith.constant 0 : index
    %332 = arith.index_cast %331 : i32 to index
    %333 = vector.load %arg8[%c0_109, %c0_110, %332] : memref<1x32x2048xbf16, #tpu.memory_space<vmem>>, vector<1x32x512xbf16>
    %334 = vector.shape_cast %333 : vector<1x32x512xbf16> to vector<32x512xbf16>
    %c0_111 = arith.constant 0 : index
    %c0_112 = arith.constant 0 : index
    %335 = arith.index_cast %331 : i32 to index
    %336 = vector.load %arg11[%c0_111, %c0_112, %335] : memref<1x1x2048xf32, #tpu.memory_space<vmem>>, vector<1x1x512xf32>
    %337 = vector.shape_cast %336 : vector<1x1x512xf32> to vector<1x512xf32>
    %c0_113 = arith.constant 0 : index
    %338 = arith.index_cast %331 : i32 to index
    %c0_114 = arith.constant 0 : index
    %339 = vector.load %arg9[%c0_113, %338, %c0_114] : memref<1x2048x32xbf16, #tpu.memory_space<vmem>>, vector<1x512x32xbf16>
    %340 = vector.shape_cast %339 : vector<1x512x32xbf16> to vector<512x32xbf16>
    %cst_115 = arith.constant dense<0.000000e+00> : vector<16x512xf32>
    %341 = tpu.matmul %290, %334, %cst_115 {dimension_numbers = #tpu.dot_dimension_numbers<[1], [0], [0], [1], [0, 0, 1, 1], [], []>} : vector<16x32xbf16>, vector<32x512xbf16>, vector<16x512xf32> -> vector<16x512xf32>
    %342 = vector.broadcast %337 : vector<1x512xf32> to vector<16x512xf32>
    %343 = arith.addf %341, %342 : vector<16x512xf32>
    %cst_116 = arith.constant 0.000000e+00 : f32
    %344 = vector.broadcast %cst_116 : f32 to vector<16x512xf32>
    %345 = arith.maximumf %343, %344 : vector<16x512xf32>
    %346 = arith.truncf %345 : vector<16x512xf32> to vector<16x512xbf16>
    %cst_117 = arith.constant dense<0.000000e+00> : vector<16x32xf32>
    %347 = tpu.matmul %346, %340, %cst_117 {dimension_numbers = #tpu.dot_dimension_numbers<[1], [0], [0], [1], [0, 0, 1, 1], [], []>} : vector<16x512xbf16>, vector<512x32xbf16>, vector<16x32xf32> -> vector<16x32xf32>
    %348 = arith.addf %329, %347 : vector<16x32xf32>
    %c3_i32 = arith.constant 3 : i32
    %c512_i32_118 = arith.constant 512 : i32
    %349 = arith.muli %c3_i32, %c512_i32_118 : i32
    %350 = tpu.assume_multiple %349, 512 : i32
    %c0_119 = arith.constant 0 : index
    %c0_120 = arith.constant 0 : index
    %351 = arith.index_cast %350 : i32 to index
    %352 = vector.load %arg8[%c0_119, %c0_120, %351] : memref<1x32x2048xbf16, #tpu.memory_space<vmem>>, vector<1x32x512xbf16>
    %353 = vector.shape_cast %352 : vector<1x32x512xbf16> to vector<32x512xbf16>
    %c0_121 = arith.constant 0 : index
    %c0_122 = arith.constant 0 : index
    %354 = arith.index_cast %350 : i32 to index
    %355 = vector.load %arg11[%c0_121, %c0_122, %354] : memref<1x1x2048xf32, #tpu.memory_space<vmem>>, vector<1x1x512xf32>
    %356 = vector.shape_cast %355 : vector<1x1x512xf32> to vector<1x512xf32>
    %c0_123 = arith.constant 0 : index
    %357 = arith.index_cast %350 : i32 to index
    %c0_124 = arith.constant 0 : index
    %358 = vector.load %arg9[%c0_123, %357, %c0_124] : memref<1x2048x32xbf16, #tpu.memory_space<vmem>>, vector<1x512x32xbf16>
    %359 = vector.shape_cast %358 : vector<1x512x32xbf16> to vector<512x32xbf16>
    %cst_125 = arith.constant dense<0.000000e+00> : vector<16x512xf32>
    %360 = tpu.matmul %290, %353, %cst_125 {dimension_numbers = #tpu.dot_dimension_numbers<[1], [0], [0], [1], [0, 0, 1, 1], [], []>} : vector<16x32xbf16>, vector<32x512xbf16>, vector<16x512xf32> -> vector<16x512xf32>
    %361 = vector.broadcast %356 : vector<1x512xf32> to vector<16x512xf32>
    %362 = arith.addf %360, %361 : vector<16x512xf32>
    %cst_126 = arith.constant 0.000000e+00 : f32
    %363 = vector.broadcast %cst_126 : f32 to vector<16x512xf32>
    %364 = arith.maximumf %362, %363 : vector<16x512xf32>
    %365 = arith.truncf %364 : vector<16x512xf32> to vector<16x512xbf16>
    %cst_127 = arith.constant dense<0.000000e+00> : vector<16x32xf32>
    %366 = tpu.matmul %365, %359, %cst_127 {dimension_numbers = #tpu.dot_dimension_numbers<[1], [0], [0], [1], [0, 0, 1, 1], [], []>} : vector<16x512xbf16>, vector<512x32xbf16>, vector<16x32xf32> -> vector<16x32xf32>
    %367 = arith.addf %348, %366 : vector<16x32xf32>
    %c4_i32 = arith.constant 4 : i32
    %368 = vector.broadcast %289 : vector<1x32xf32> to vector<16x32xf32>
    %369 = arith.addf %367, %368 : vector<16x32xf32>
    %370 = arith.addf %266, %369 : vector<16x32xf32>
    %c0_128 = arith.constant 0 : index
    %c0_129 = arith.constant 0 : index
    %371 = vector.load %arg15[%c0_128, %c0_129] : memref<16x32xf32, #tpu.memory_space<vmem>>, vector<16x32xf32>
    tpu.vector_store %arg15[%c0_128, %c0_129], %370 {strides = array<i32>} : memref<16x32xf32, #tpu.memory_space<vmem>>, vector<16x32xf32>,
    %c1_i32_130 = arith.constant 1 : i32
    %372 = arith.cmpi eq, %arg0, %c1_i32_130 : i32
    %373 = arith.extui %372 : i1 to i32
    %c0_i32_131 = arith.constant 0 : i32
    %374 = arith.cmpi ne, %373, %c0_i32_131 : i32
    scf.if %374 {
      %375 = arith.truncf %370 : vector<16x32xf32> to vector<16x32xbf16>
      %c0_132 = arith.constant 0 : index
      %c0_133 = arith.constant 0 : index
      %376 = vector.load %arg12[%c0_132, %c0_133] : memref<32x384xbf16, #tpu.memory_space<vmem>>, vector<32x384xbf16>
      %cst_134 = arith.constant dense<0.000000e+00> : vector<16x384xf32>
      %377 = tpu.matmul %375, %376, %cst_134 {dimension_numbers = #tpu.dot_dimension_numbers<[1], [0], [0], [1], [0, 0, 1, 1], [], []>} : vector<16x32xbf16>, vector<32x384xbf16>, vector<16x384xf32> -> vector<16x384xf32>
      %c0_135 = arith.constant 0 : index
      %c0_136 = arith.constant 0 : index
      %378 = vector.load %arg13[%c0_135, %c0_136] : memref<1x384xf32, #tpu.memory_space<vmem>>, vector<1x384xf32>
      %379 = vector.broadcast %378 : vector<1x384xf32> to vector<16x384xf32>
      %380 = arith.addf %377, %379 : vector<16x384xf32>
      %c0_137 = arith.constant 0 : index
      %c0_138 = arith.constant 0 : index
      %381 = vector.load %arg14[%c0_137, %c0_138] : memref<16x384xf32, #tpu.memory_space<vmem>>, vector<16x384xf32>
      tpu.vector_store %arg14[%c0_137, %c0_138], %380 {strides = array<i32>} : memref<16x384xf32, #tpu.memory_space<vmem>>, vector<16x384xf32>,
    } else {
    }
    return
  }
  func.func @transform_0(%arg0: i32) -> (i32, i32) {
    %c0_i32 = arith.constant 0 : i32
    %c0_i32_0 = arith.constant 0 : i32
    %c0_i32_1 = arith.constant 0 : i32
    return %c0_i32, %c0_i32_0 : i32, i32
  }
  func.func @transform_1(%arg0: i32) -> (i32, i32) {
    %c0_i32 = arith.constant 0 : i32
    %c0_i32_0 = arith.constant 0 : i32
    %c0_i32_1 = arith.constant 0 : i32
    return %c0_i32, %c0_i32_0 : i32, i32
  }
  func.func @transform_2(%arg0: i32) -> (i32, i32, i32) {
    %c0_i32 = arith.constant 0 : i32
    %c0_i32_0 = arith.constant 0 : i32
    %c0_i32_1 = arith.constant 0 : i32
    return %arg0, %c0_i32, %c0_i32_0 : i32, i32, i32
  }
  func.func @transform_3(%arg0: i32) -> (i32, i32, i32) {
    %c0_i32 = arith.constant 0 : i32
    %c0_i32_0 = arith.constant 0 : i32
    %c0_i32_1 = arith.constant 0 : i32
    return %arg0, %c0_i32, %c0_i32_0 : i32, i32, i32
  }
  func.func @transform_4(%arg0: i32) -> (i32, i32, i32) {
    %c0_i32 = arith.constant 0 : i32
    %c0_i32_0 = arith.constant 0 : i32
    %c0_i32_1 = arith.constant 0 : i32
    return %arg0, %c0_i32, %c0_i32_0 : i32, i32, i32
  }
  func.func @transform_5(%arg0: i32) -> (i32, i32, i32) {
    %c0_i32 = arith.constant 0 : i32
    %c0_i32_0 = arith.constant 0 : i32
    %c0_i32_1 = arith.constant 0 : i32
    return %arg0, %c0_i32, %c0_i32_0 : i32, i32, i32
  }
  func.func @transform_6(%arg0: i32) -> (i32, i32, i32) {
    %c0_i32 = arith.constant 0 : i32
    %c0_i32_0 = arith.constant 0 : i32
    %c0_i32_1 = arith.constant 0 : i32
    return %arg0, %c0_i32, %c0_i32_0 : i32, i32, i32
  }
  func.func @transform_7(%arg0: i32) -> (i32, i32, i32) {
    %c0_i32 = arith.constant 0 : i32
    %c0_i32_0 = arith.constant 0 : i32
    %c0_i32_1 = arith.constant 0 : i32
    return %arg0, %c0_i32, %c0_i32_0 : i32, i32, i32
  }
  func.func @transform_8(%arg0: i32) -> (i32, i32, i32) {
    %c0_i32 = arith.constant 0 : i32
    %c0_i32_0 = arith.constant 0 : i32
    %c0_i32_1 = arith.constant 0 : i32
    return %arg0, %c0_i32, %c0_i32_0 : i32, i32, i32
  }
  func.func @transform_9(%arg0: i32) -> (i32, i32, i32) {
    %c0_i32 = arith.constant 0 : i32
    %c0_i32_0 = arith.constant 0 : i32
    %c0_i32_1 = arith.constant 0 : i32
    return %arg0, %c0_i32, %c0_i32_0 : i32, i32, i32
  }
  func.func @transform_10(%arg0: i32) -> (i32, i32, i32) {
    %c0_i32 = arith.constant 0 : i32
    %c0_i32_0 = arith.constant 0 : i32
    %c0_i32_1 = arith.constant 0 : i32
    return %arg0, %c0_i32, %c0_i32_0 : i32, i32, i32
  }
  func.func @transform_11(%arg0: i32) -> (i32, i32) {
    %c0_i32 = arith.constant 0 : i32
    %c0_i32_0 = arith.constant 0 : i32
    %c0_i32_1 = arith.constant 0 : i32
    return %c0_i32, %c0_i32_0 : i32, i32
  }
  func.func @transform_12(%arg0: i32) -> (i32, i32) {
    %c0_i32 = arith.constant 0 : i32
    %c0_i32_0 = arith.constant 0 : i32
    %c0_i32_1 = arith.constant 0 : i32
    return %c0_i32, %c0_i32_0 : i32, i32
  }
  func.func @transform_13(%arg0: i32) -> (i32, i32) {
    %c0_i32 = arith.constant 0 : i32
    %c0_i32_0 = arith.constant 0 : i32
    %c0_i32_1 = arith.constant 0 : i32
    return %c0_i32, %c0_i32_0 : i32, i32
  }
}

</mosaic_0001>

<bundles_post_ra>
// kernel: encoder_decoder_forward.2
= control target key start
LH: loop header
LB: loop body
LE: loop exit
PB: predicated region body
PF: predicated region fallthrough
CT: control target
= control target key end

     0   :  { %s6464_s24 = smov 0   ;;  %s7153_s0 = inlined_call_operand.vmem [shape: f32[32,32], index: 0, kind: input, shape index: {}]   ;;  %s7154_s1 = inlined_call_operand.vmem [shape: f32[2,32,96], index: 1, kind: input, shape index: {}]   ;;  %s7155_s2 = inlined_call_operand.vmem [shape: f32[2,32,32], index: 2, kind: input, shape index: {}]   ;;  %s7156_s3 = inlined_call_operand.vmem [shape: bf16[2,32,2048], index: 3, kind: input, shape index: {}]   ;;  %s7157_s4 = inlined_call_operand.vmem [shape: bf16[2,2048,32], index: 4, kind: input, shape index: {}]   ;;  %s7158_s5 = inlined_call_operand.vmem [shape: f32[2,9,32], index: 5, kind: input, shape index: {}]   ;;  %s7159_s6 = inlined_call_operand.vmem [shape: f32[2,1,2048], index: 6, kind: input, shape index: {}]   ;;  %s7160_s7 = inlined_call_operand.vmem [shape: f32[32,32], index: 7, kind: output, shape index: {}]  }
   0x1 LB: > { %s6470_s25 = sadd.s32 4294967295, %s6409_s24   ;;  %p5030_p0 = scmp.ge.s32.totalorder %s6409_s24, 1  ;;  %s6409_s24 = sphi %s6464_s24, %s17_s24  }
   0x2   : > { %p281_p1 = scmp.lt.s32.totalorder %s6409_s24, 3 }
   0x4   : > { %p282_p2 = pnand %p5030_p0, %p281_p1 }
   0x5   : > { %p332_p3 = scmp.lt.s32.totalorder (!%p282_p2), %s6470_s25, 1  ;;  %p5042_p4 = scmp.ne.s32.totalorder (!%p282_p2), %s6470_s25, 0 }
   0x6   : > { %285 = sbr.rel (%p282_p2) target bundleno = 4787 (0x12b3), region = 48 }
   0xd   : > { %s333_s26 = scalar_select %p332_p3, %s6470_s25, 1 }
   0xe   : > { %365 = sbr.rel (%p5042_p4) target bundleno = 21 (0x15), region = 52  ;;  %v366_v0 = vld [vmem:[%s7153_s0] sm:$0xff] (!%p5042_p4)  ;;  %vm370_vm0 = vcmask (!%p5042_p4), 261120   ;;  %v367_v1 = vld [vmem:[%s7153_s0 + $0x8] sm:$0xff] (!%p5042_p4)  ;;  %v368_v2 = vld [vmem:[%s7153_s0 + $0x10] sm:$0xff] (!%p5042_p4) }
   0xf   : > { %s5510_s27 = sshll.u32 %s333_s26, 5  ;;  %s5512_s28 = sshll.u32 %s333_s26, 8  ;;  %371 = vst.msk [vmem:[#allocation2] sm:$0xff] (!%p5042_p4), %vm370_vm0, %v366_v0  ;;  %372 = vst.msk [vmem:[#allocation2 + $0x8] sm:$0xff] (!%p5042_p4), %vm370_vm0, %v367_v1  ;;  %v369_v3 = vld [vmem:[%s7153_s0 + $0x18] sm:$0xff] (!%p5042_p4) }
  0x10   : > { %s6479_s8 = scalar_lea.vmem %s7154_s1, %s5510_s27  ;;  %s6484_s11 = scalar_lea.vmem %s7155_s2, %s5510_s27  ;;  %373 = vst.msk [vmem:[#allocation2 + $0x10] sm:$0xff] (!%p5042_p4), %vm370_vm0, %v368_v2  ;;  %374 = vst.msk [vmem:[#allocation2 + $0x18] sm:$0xff] (!%p5042_p4), %vm370_vm0, %v369_v3 }
  0x11   : > { %s6489_s14 = scalar_lea.vmem %s7156_s3, %s5512_s28  ;;  %s5513_s15 = sshll.u32 %s333_s26, 10 }
  0x12   : > { %s6494_s18 = scalar_lea.vmem %s7157_s4, %s5513_s15  ;;  %s5514_s19 = sshll.u32 %s333_s26, 4 }
  0x13   : > { %s6499_s22 = scalar_lea.vmem %s7158_s5, %s5514_s19  ;;  %s6504_s29 = scalar_lea.vmem %s7159_s6, %s5514_s19 }
  0x15 PF: > { %vm381_vm1 = vcmask 261120   ;;  %v451_v32 = vld [vmem:[%s6479_s8] sm:$0xff]  ;;  %v452_v33 = vld [vmem:[%s6479_s8 + $0x8] sm:$0xff]  ;;  %v453_v34 = vld [vmem:[%s6479_s8 + $0x10] sm:$0xff]  ;;  %v435_v38 = vlaneseq  ;;  %s6411_s16 = smov 32   ;;  %vm598_vm2 = vcmask 64512  }
  0x16   : > { %v375_v4 = vld [vmem:[#allocation2] sm:$0xff]  ;;  %v376_v6 = vld [vmem:[#allocation2 + $0x8] sm:$0xff]  ;;  %v5989_v35 = vpack.c.bf16 %v452_v33, %v451_v32  ;;  %v454_v36 = vld [vmem:[%s6479_s8 + $0x18] sm:$0xff]  ;;  %s6412_s8 = smov 96   ;;  %vm775_vm4 = vcmask 130048   ;;  %s6413_s17 = smov 64  }
  0x17   : > { %v377_v5 = vld [vmem:[#allocation2 + $0x10] sm:$0xff]  ;;  %v382_v7 = vsel %vm381_vm1, %v375_v4, 0.0  ;;  %v378_v9 = vld [vmem:[#allocation2 + $0x18] sm:$0xff]  ;;  %v385_v10 = vsel %vm381_vm1, %v376_v6, 0.0  ;;  %v5993_v37 = vpack.c.bf16 %v454_v36, %v453_v34  ;;  %v6535_v39 = vshrl.u32 %v435_v38, 7  ;;  %v6541_v41 = vld [vmem:[%s6499_s22] sm:$0xff] }
  0x18   : > { %v388_v8 = vsel %vm381_vm1, %v377_v5, 0.0  ;;  %383 = vadd.xlane.f32.xlu0 %v382_v7  ;;  %v391_v11 = vsel %vm381_vm1, %v378_v9, 0.0  ;;  %5990 = vmatprep.subr.bf16.mxu0 %v5989_v35  ;;  %vm6585_vm3 = vmpackc.low %vm598_vm2, %vm598_vm2  ;;  %s6414_s19 = smov 88   ;;  %s6415_s20 = smov 120  }
  0x19   : > { %389 = vadd.xlane.f32.xlu1 %v388_v8  ;;  %5992 = vmatpush3.bf16.msra.mxu0 %v5989_v35  ;;  %v6538_v40 = vsub.s32 3, %v6535_v39  ;;  %v6546_v54 = vsub.s32 0, %v6535_v39  ;;  %v6549_v56 = vsub.s32 1, %v6535_v39  ;;  %s6416_s21 = smov 56   ;;  %s6417_s23 = smov 80  }
  0x1a   : > { %5994 = vmatprep.subr.bf16.mxu0 %v5993_v37  ;;  %s6418_s27 = smov 112   ;;  %s6419_s28 = smov 48  }
  0x1b   : > { %v563_v42 = vrot.slane %v6541_v41, %v6538_v40  ;;  %v438_v57 = vrot.slane %v6541_v41, %v6546_v54  ;;  %v446_v60 = vrot.slane %v6541_v41, %v6549_v56  ;;  %s6420_s30 = smov 72   ;;  %s6421_s9 = smov 104  }
  0x1c   : > { %386 = vadd.xlane.f32.xlu0 %v385_v10  ;;  %s6422_s26 = smov 40   ;;  %p5507_p5 = scmp.ne.s32.totalorder %s6470_s25, 1 }
  0x1d   : > { %392 = vadd.xlane.f32.xlu1 %v391_v11  ;;  %5996 = vmatpush3.bf16.msra.mxu0 %v5993_v37  ;;  %v6561_v11 = vsub.s32 2, %v6535_v39 }
  0xa5   : > { %v384_v12 = vpop.xlane.xlu0 %383 }
  0xa6   : > { %v390_v13 = vpop.xlane.xlu1 %389  ;;  %v395_v14 = vmul.f32 0.03125, %v384_v12  ;;  %v555_v12 = vrot.slane %v6541_v41, %v6561_v11 }
  0xa7   : > { %v397_v15 = vmul.f32 0.03125, %v390_v13 }
  0xa8   : > { %v399_v16 = vsub.f32 %v375_v4, %v395_v14 }
  0xa9   : > { %v6523_v17 = vsub.f32 %v377_v5, %v397_v15  ;;  %v387_v18 = vpop.xlane.xlu0 %386 }
  0xaa   : > { %v393_v19 = vpop.xlane.xlu1 %392  ;;  %v396_v20 = vmul.f32 0.03125, %v387_v18  ;;  %v403_v22 = vmul.f32 %v399_v16, %v399_v16 }
  0xab   : > { %v398_v21 = vmul.f32 0.03125, %v393_v19  ;;  %v405_v23 = vmul.f32 %v6523_v17, %v6523_v17 }
  0xac   : > { %v400_v24 = vsub.f32 %v376_v6, %v396_v20  ;;  %v407_v26 = vsel %vm381_vm1, %v403_v22, 0.0 }
  0xad   : > { %v402_v25 = vsub.f32 %v378_v9, %v398_v21  ;;  %408 = vadd.xlane.f32.xlu0 %v407_v26  ;;  %v413_v27 = vsel %vm381_vm1, %v405_v23, 0.0 }
  0xae   : > { %v404_v28 = vmul.f32 %v400_v24, %v400_v24 }
  0xaf   : > { %v406_v29 = vmul.f32 %v402_v25, %v402_v25 }
  0xb0   : > { %v410_v30 = vsel %vm381_vm1, %v404_v28, 0.0 }
  0xb1   : > { %414 = vadd.xlane.f32.xlu0 %v413_v27  ;;  %411 = vadd.xlane.f32.xlu1 %v410_v30  ;;  %v416_v31 = vsel %vm381_vm1, %v406_v29, 0.0 }
  0xb5   : > { %417 = vadd.xlane.f32.xlu1 %v416_v31 }
  0xc7   : > { %565 = vrot.lane.b32.xlu0 %v563_v42, %s6411_s16 }
 0x13a   : > { %v409_v43 = vpop.xlane.xlu0 %408 }
 0x13b   : > { %v419_v44 = vmul.f32 0.03125, %v409_v43 }
 0x13d   : > { %v423_v45 = vadd.f32 1e-05, %v419_v44 }
 0x13e   : > { %v412_v46 = vpop.xlane.xlu1 %411  ;;  %v415_v47 = vpop.xlane.xlu0 %414 }
 0x13f   : > { %6318 = vrsqrt.f32 %v423_v45  ;;  %v420_v48 = vmul.f32 0.03125, %v412_v46  ;;  %v421_v49 = vmul.f32 0.03125, %v415_v47 }
 0x141   : > { %v424_v50 = vadd.f32 1e-05, %v420_v48  ;;  %v425_v51 = vadd.f32 1e-05, %v421_v49 }
 0x142   : > { %v418_v52 = vpop.xlane.xlu1 %417  ;;  %v566_v13 = vpop.permute.xlu0 %565 }
 0x143   : > { %6320 = vrsqrt.f32 %v424_v50  ;;  %v422_v53 = vmul.f32 0.03125, %v418_v52  ;;  %v574_v52 = vsub.s32 4, %v6535_v39 }
 0x144   : > { %6322 = vrsqrt.f32 %v425_v51 }
 0x145   : > { %v426_v55 = vadd.f32 1e-05, %v422_v53  ;;  %v575_v53 = vrot.slane %v6541_v41, %v574_v52 }
 0x147   : > { %6324 = vrsqrt.f32 %v426_v55 }
 0x149   : > { %v6319_v58 = vpop.eup %6318 }
 0x14a   : > { %v431_v59 = vmul.f32 %v6319_v58, %v399_v16 }
 0x14c   : > { %v439_v61 = vmul.f32 %v438_v57, %v431_v59 }
 0x14d   : > { %v6321_v62 = vpop.eup %6320 }
 0x14e   : > { %v6323_v63 = vpop.eup %6322  ;;  %v447_v0 = vadd.f32 %v446_v60, %v439_v61  ;;  %v432_v1 = vmul.f32 %v6321_v62, %v400_v24 }
 0x14f   : > { %v433_v2 = vmul.f32 %v6323_v63, %v6523_v17 }
 0x150   : > { %5839 = vmatprep.mubr.msk.f32.mxu0 %vm381_vm1, %v447_v0  ;;  %v440_v3 = vmul.f32 %v438_v57, %v432_v1 }
 0x151   : > { %v6325_v4 = vpop.eup %6324  ;;  %v441_v5 = vmul.f32 %v438_v57, %v433_v2 }
 0x152   : > { %v448_v6 = vadd.f32 %v446_v60, %v440_v3  ;;  %v434_v7 = vmul.f32 %v6325_v4, %v402_v25 }
 0x153   : > { %v449_v8 = vadd.f32 %v446_v60, %v441_v5 }
 0x154   : > { %5840 = vmatmul.mubr.msk.f32.vlgmr.msra.gmra.mrb[0].mxu0 %vm381_vm1, %v448_v6  ;;  %v442_v9 = vmul.f32 %v438_v57, %v434_v7 }
 0x155   : > { %5842 = vmatprep.mubr.msk.f32.mxu0 %vm381_vm1, %v449_v8 }
 0x156   : > { %v450_v10 = vadd.f32 %v446_v60, %v442_v9 }
 0x158   : > { %5843 = vmatmul.mubr.msk.f32.gmra.mrb[2].mxu0 %vm381_vm1, %v450_v10 }
 0x227   : > { %v6565_v14 = vpop.f32.mrb[0].mxu0 }
 0x228   : > { %v557_v15 = vadd.f32 %v6565_v14, %v555_v12  ;;  %v569_v16 = vadd.f32 %v6565_v14, %v566_v13  ;;  %v533_v17 = vpop.f32.mrb[1].mxu0 }
 0x229   : > { %v556_v18 = vadd.f32 %v555_v12, %v533_v17  ;;  %v568_v19 = vadd.f32 %v566_v13, %v533_v17 }
 0x22a   : > { %v6597_v42 = vmul.f32 0.35355338, %v557_v15 }
 0x22b   : > { %v6569_v20 = vmul.f32 0.35355338, %v556_v18  ;;  %v5844_v21 = vpop.f32.mrb[2].mxu0  ;;  %v6571_v22 = vpack.i.bf16 %v569_v16, %v568_v19 }
 0x22c   : > { %v559_v23 = vadd.f32 %v5844_v21, %v555_v12  ;;  %v571_v24 = vadd.f32 %v5844_v21, %v566_v13  ;;  %v543_v25 = vpop.f32.mrb[3].mxu0 }
 0x22d   : > { %v558_v26 = vadd.f32 %v555_v12, %v543_v25  ;;  %v570_v27 = vadd.f32 %v566_v13, %v543_v25  ;;  %5849 = vmatprep.mubr.msk.f32.mxu1 %vm598_vm2, %v6569_v20  ;;  %6111 = vrot.lane.b32.xlu1 %v6571_v22, %s6412_s8 }
 0x22e   : > { %v6601_v43 = vmul.f32 0.35355338, %v559_v23 }
 0x22f   : > { %v6576_v28 = vmul.f32 0.35355338, %v558_v26  ;;  %v6578_v29 = vpack.i.bf16 %v571_v24, %v570_v27 }
 0x231   : > { %5856 = vmatprep.mubr.msk.f32.mxu0 %vm598_vm2, %v6576_v28  ;;  %6116 = vrot.lane.b32.xlu1 %v6578_v29, %s6412_s8 }
 0x29f   : > { %v6112_v30 = vpop.permute.xlu1 %6111 }
 0x2a0   : > { %v6114_v31 = vunpack.i.h.bf16 %v6112_v30  ;;  %v6113_v32 = vunpack.i.l.bf16 %v6112_v30 }
 0x2a2   : > { %v5997_v34 = vpack.c.bf16 %v6114_v31, %v6113_v32 }
 0x2a3   : > { %v6117_v35 = vpop.permute.xlu1 %6116 }
 0x2a4   : > { %v6119_v36 = vunpack.i.h.bf16 %v6117_v35  ;;  %v6118_v37 = vunpack.i.l.bf16 %v6117_v35  ;;  %5999 = vmatprep.subr.msk.bf16.mxu1 %vm6585_vm3, %v5997_v34 }
 0x2a5   : > { %6002 = vmatpush3.bf16.xpose.msk.msra.mxu1 %vm6585_vm3, %v5997_v34 }
 0x2a6   : > { %v6003_v38 = vpack.c.bf16 %v6119_v36, %v6118_v37 }
 0x2a8   : > { %6005 = vmatprep.subr.msk.bf16.mxu0 %vm6585_vm3, %v6003_v38 }
 0x2a9   : > { %6008 = vmatpush3.bf16.xpose.msk.msra.mxu0 %vm6585_vm3, %v6003_v38 }
 0x2ac   : > { %5850 = vmatmul.mubr.msk.f32.vlgmr.msra.gmra.mrb[0].mxu1 %vm598_vm2, %v6597_v42 }
 0x2b0   : > { %5857 = vmatmul.mubr.msk.f32.vlgmr.msra.gmra.mrb[4].mxu0 %vm598_vm2, %v6601_v43 }
 0x37f   : > { %v5851_v44 = vpop.f32.mrb[0].mxu1 }
 0x380   : > { %v675_v45 = vpop.f32.mrb[1].mxu1  ;;  %v779_v46 = vsel %vm775_vm4, %v5851_v44, -inf }
 0x381   : > { %780 = vmax.xlane.f32.xlu0 %v779_v46  ;;  %v776_v47 = vsel %vm775_vm4, %v675_v45, -inf }
 0x382   : > { %777 = vmax.xlane.f32.xlu1 %v776_v47 }
 0x383   : > { %v5858_v48 = vpop.f32.mrb[4].mxu0 }
 0x384   : > { %v766_v49 = vpop.f32.mrb[5].mxu0  ;;  %v785_v51 = vsel %vm775_vm4, %v5858_v48, -inf }
 0x385   : > { %v782_v50 = vsel %vm775_vm4, %v766_v49, -inf }
 0x386   : > { %783 = vmax.xlane.f32.xlu0 %v782_v50 }
 0x38a   : > { %786 = vmax.xlane.f32.xlu0 %v785_v51 }
 0x393   : > { %577 = vrot.lane.b32.xlu1 %v575_v53, %s6413_s17 }
 0x40e   : > { %v781_v55 = vpop.xlane.xlu0 %780 }
 0x40f   : > { %v789_v57 = vsub.f32 %v5851_v44, %v781_v55  ;;  %v778_v58 = vpop.xlane.xlu1 %777 }
 0x410   : > { %v788_v59 = vsub.f32 %v675_v45, %v778_v58 }
 0x411   : > { %v794_v60 = vmul.f32 1.442695, %v789_v57 }
 0x412   : > { %v792_v61 = vmul.f32 1.442695, %v788_v59 }
 0x413   : > { %6326 = vpow2.f32 %v794_v60  ;;  %v784_v62 = vpop.xlane.xlu0 %783  ;;  %v578_v63 = vpop.permute.xlu1 %577 }
 0x414   : > { %v580_v0 = vadd.f32 %v578_v63, %v533_v17  ;;  %v581_v1 = vadd.f32 %v6565_v14, %v578_v63  ;;  %6328 = vpow2.f32 %v792_v61  ;;  %v582_v2 = vadd.f32 %v578_v63, %v543_v25 }
 0x415   : > { %v583_v3 = vadd.f32 %v5844_v21, %v578_v63  ;;  %v790_v4 = vsub.f32 %v766_v49, %v784_v62 }
 0x416   : > { %v6613_v41 = vpack.i.bf16 %v581_v1, %v580_v0 }
 0x417   : > { %v787_v5 = vpop.xlane.xlu0 %786  ;;  %v6615_v6 = vpack.i.bf16 %v583_v3, %v582_v2  ;;  %v796_v8 = vmul.f32 1.442695, %v790_v4 }
 0x418   : > { %v791_v7 = vsub.f32 %v5858_v48, %v787_v5  ;;  %6121 = vrot.lane.b32.xlu1 %v6613_v41, %s6413_s17 }
 0x41a   : > { %v798_v9 = vmul.f32 1.442695, %v791_v7 }
 0x41c   : > { %6330 = vpow2.f32 %v798_v9  ;;  %6131 = vrot.lane.b32.xlu1 %v6571_v22, %s6414_s19 }
 0x41d   : > { %v6327_v10 = vpop.eup %6326  ;;  %6332 = vpow2.f32 %v796_v8 }
 0x41e   : > { %v803_v12 = vsel %vm775_vm4, %v6327_v10, 0.0  ;;  %v6329_v13 = vpop.eup %6328 }
 0x41f   : > { %804 = vadd.xlane.f32.xlu0 %v803_v12  ;;  %v800_v14 = vsel %vm775_vm4, %v6329_v13, 0.0 }
 0x420   : > { %998 = vrot.lane.b32.xlu1 %v6569_v20, %s6415_s20 }
 0x423   : > { %801 = vadd.xlane.f32.xlu0 %v800_v14 }
 0x424   : > { %6136 = vrot.lane.b32.xlu1 %v6578_v29, %s6414_s19 }
 0x426   : > { %v6331_v15 = vpop.eup %6330 }
 0x427   : > { %v809_v16 = vsel %vm775_vm4, %v6331_v15, 0.0  ;;  %v6333_v17 = vpop.eup %6332 }
 0x428   : > { %810 = vadd.xlane.f32.xlu0 %v809_v16  ;;  %1000 = vrot.lane.b32.xlu1 %v6597_v42, %s6415_s20  ;;  %v806_v18 = vsel %vm775_vm4, %v6333_v17, 0.0 }
 0x42c   : > { %807 = vadd.xlane.f32.xlu0 %v806_v18  ;;  %1089 = vrot.lane.b32.xlu1 %v6576_v28, %s6415_s20 }
 0x430   : > { %1091 = vrot.lane.b32.xlu1 %v6601_v43, %s6415_s20 }
 0x442   : > { %6126 = vrot.lane.b32.xlu0 %v6615_v6, %s6413_s17 }
 0x48a   : > { %v6122_v19 = vpop.permute.xlu1 %6121 }
 0x48b   : > { %v6124_v21 = vunpack.i.h.bf16 %v6122_v19  ;;  %v6123_v23 = vunpack.i.l.bf16 %v6122_v19 }
 0x48d   : > { %v6009_v24 = vpack.c.bf16 %v6124_v21, %v6123_v23 }
 0x48e   : > { %v6132_v25 = vpop.permute.xlu1 %6131 }
 0x48f   : > { %v6134_v26 = vunpack.i.h.bf16 %v6132_v25  ;;  %v6133_v27 = vunpack.i.l.bf16 %v6132_v25  ;;  %6010 = vmatprep.subr.bf16.mxu1 %v6009_v24 }
 0x490   : > { %6012 = vmatpush3.bf16.msra.mxu1 %v6009_v24 }
 0x491   : > { %v6017_v30 = vpack.c.bf16 %v6134_v26, %v6133_v27 }
 0x492   : > { %v999_v31 = vpop.permute.xlu1 %998 }
 0x493   : > { %6019 = vmatprep.subr.msk.bf16.mxu0 %vm6585_vm3, %v6017_v30  ;;  %5877 = vmatprep.mubr.msk.f32.mxu0 %vm598_vm2, %v999_v31 }
 0x494   : > { %6022 = vmatpush3.bf16.xpose.msk.msra.mxu0 %vm6585_vm3, %v6017_v30 }
 0x496   : > { %v6137_v32 = vpop.permute.xlu1 %6136 }
 0x497   : > { %v6139_v49 = vunpack.i.h.bf16 %v6137_v32  ;;  %v6138_v50 = vunpack.i.l.bf16 %v6137_v32 }
 0x499   : > { %v6023_v55 = vpack.c.bf16 %v6139_v49, %v6138_v50 }
 0x49a   : > { %v1001_v34 = vpop.permute.xlu1 %1000 }
 0x49b   : > { %5878 = vmatmul.mubr.msk.f32.vlgmr.msra.gmra.mrb[6].mxu0 %vm598_vm2, %v1001_v34 }
 0x49e   : > { %v1090_v61 = vpop.permute.xlu1 %1089 }
 0x4a2   : > { %v1092_v62 = vpop.permute.xlu1 %1091 }
 0x4ac   : > { %v805_v35 = vpop.xlane.xlu0 %804 }
 0x4ad   : > { %6334 = vrcp.f32 %v805_v35 }
 0x4b0   : > { %v802_v36 = vpop.xlane.xlu0 %801 }
 0x4b1   : > { %6336 = vrcp.f32 %v802_v36 }
 0x4b5   : > { %v811_v37 = vpop.xlane.xlu0 %810 }
 0x4b6   : > { %6338 = vrcp.f32 %v811_v37 }
 0x4b7   : > { %v6335_v44 = vpop.eup %6334 }
 0x4b8   : > { %v817_v47 = vmul.f32 %v6335_v44, %v6327_v10 }
 0x4b9   : > { %v808_v38 = vpop.xlane.xlu0 %807 }
 0x4ba   : > { %6340 = vrcp.f32 %v808_v38 }
 0x4bb   : > { %v6337_v45 = vpop.eup %6336 }
 0x4bc   : > { %v816_v46 = vmul.f32 %v6337_v45, %v6329_v13 }
 0x4bd   : > { %v6127_v48 = vpop.permute.xlu0 %6126 }
 0x4be   : > { %v6129_v51 = vunpack.i.h.bf16 %v6127_v48  ;;  %v6128_v52 = vunpack.i.l.bf16 %v6127_v48  ;;  %5863 = vmatprep.mubr.msk.f32.mxu1 %vm775_vm4, %v816_v46 }
 0x4bf   : > { %5864 = vmatmul.mubr.msk.f32.vlgmr.msra.gmra.mrb[2].mxu1 %vm775_vm4, %v817_v47 }
 0x4c0   : > { %v6013_v53 = vpack.c.bf16 %v6129_v51, %v6128_v52  ;;  %v6339_v57 = vpop.eup %6338 }
 0x4c1   : > { %v819_v60 = vmul.f32 %v6339_v57, %v6331_v15 }
 0x4c2   : > { %6014 = vmatprep.subr.bf16.mxu1 %v6013_v53 }
 0x4c3   : > { %6016 = vmatpush3.bf16.msra.mxu1 %v6013_v53 }
 0x4c4   : > { %v6341_v58 = vpop.eup %6340  ;;  %6025 = vmatprep.subr.msk.bf16.mxu1 %vm6585_vm3, %v6023_v55 }
 0x4c5   : > { %v818_v59 = vmul.f32 %v6341_v58, %v6333_v17 }
 0x4c7   : > { %5870 = vmatprep.mubr.msk.f32.mxu1 %vm775_vm4, %v818_v59 }
 0x4c8   : > { %5871 = vmatmul.mubr.msk.f32.vlgmr.msra.gmra.mrb[4].mxu1 %vm775_vm4, %v819_v60 }
 0x4c9   : > { %5884 = vmatprep.mubr.msk.f32.mxu1 %vm598_vm2, %v1090_v61 }
 0x4cc   : > { %6028 = vmatpush3.bf16.xpose.msk.msra.mxu1 %vm6585_vm3, %v6023_v55 }
 0x4d3   : > { %5885 = vmatmul.mubr.msk.f32.vlgmr.msra.gmra.mrb[6].mxu1 %vm598_vm2, %v1092_v62 }
 0x56e   : > { %v5879_v63 = vpop.f32.mrb[6].mxu0 }
 0x56f   : > { %v1080_v0 = vpop.f32.mrb[7].mxu0  ;;  %v1183_v1 = vsel %vm775_vm4, %v5879_v63, -inf }
 0x570   : > { %1184 = vmax.xlane.f32.xlu1 %v1183_v1  ;;  %v1180_v2 = vsel %vm775_vm4, %v1080_v0, -inf }
 0x571   : > { %1181 = vmax.xlane.f32.xlu0 %v1180_v2 }
 0x592   : > { %v6649_v3 = vpop.f32.mrb[2].mxu1 }
 0x593   : > { %v6651_v4 = vpop.f32.mrb[3].mxu1 }
 0x59b   : > { %v6653_v5 = vpop.f32.mrb[4].mxu1 }
 0x59c   : > { %v6655_v7 = vpop.f32.mrb[5].mxu1 }
 0x5a6   : > { %v5886_v8 = vpop.f32.mrb[6].mxu1 }
 0x5a7   : > { %v1171_v9 = vpop.f32.mrb[7].mxu1  ;;  %v1189_v12 = vsel %vm775_vm4, %v5886_v8, -inf }
 0x5a8   : > { %v1186_v10 = vsel %vm775_vm4, %v1171_v9, -inf }
 0x5a9   : > { %1187 = vmax.xlane.f32.xlu0 %v1186_v10 }
 0x5ad   : > { %1190 = vmax.xlane.f32.xlu0 %v1189_v12 }
 0x5fd   : > { %v1185_v13 = vpop.xlane.xlu1 %1184 }
 0x5fe   : > { %v1193_v14 = vsub.f32 %v5879_v63, %v1185_v13  ;;  %v1182_v15 = vpop.xlane.xlu0 %1181 }
 0x5ff   : > { %v1192_v16 = vsub.f32 %v1080_v0, %v1182_v15 }
 0x600   : > { %v1198_v17 = vmul.f32 1.442695, %v1193_v14 }
 0x601   : > { %v1196_v18 = vmul.f32 1.442695, %v1192_v16 }
 0x602   : > { %6342 = vpow2.f32 %v1198_v17 }
 0x603   : > { %6344 = vpow2.f32 %v1196_v18 }
 0x60c   : > { %v6343_v19 = vpop.eup %6342 }
 0x60d   : > { %v6345_v21 = vpop.eup %6344  ;;  %v1207_v23 = vsel %vm775_vm4, %v6343_v19, 0.0 }
 0x60e   : > { %1208 = vadd.xlane.f32.xlu1 %v1207_v23  ;;  %v1204_v24 = vsel %vm775_vm4, %v6345_v21, 0.0 }
 0x60f   : > { %1205 = vadd.xlane.f32.xlu0 %v1204_v24 }
 0x636   : > { %v1188_v25 = vpop.xlane.xlu0 %1187 }
 0x637   : > { %v1194_v26 = vsub.f32 %v1171_v9, %v1188_v25 }
 0x639   : > { %v1200_v27 = vmul.f32 1.442695, %v1194_v26 }
 0x63a   : > { %v1191_v30 = vpop.xlane.xlu0 %1190 }
 0x63b   : > { %6346 = vpow2.f32 %v1200_v27  ;;  %v1195_v31 = vsub.f32 %v5886_v8, %v1191_v30 }
 0x63d   : > { %v1202_v32 = vmul.f32 1.442695, %v1195_v31 }
 0x63f   : > { %6348 = vpow2.f32 %v1202_v32 }
 0x645   : > { %v6347_v34 = vpop.eup %6346 }
 0x646   : > { %v1210_v35 = vsel %vm775_vm4, %v6347_v34, 0.0 }
 0x647   : > { %1211 = vadd.xlane.f32.xlu0 %v1210_v35 }
 0x649   : > { %v6349_v36 = vpop.eup %6348 }
 0x64a   : > { %v1213_v37 = vsel %vm775_vm4, %v6349_v36, 0.0 }
 0x64b   : > { %1214 = vadd.xlane.f32.xlu1 %v1213_v37 }
 0x65c   : > { %6146 = vrot.lane.b32.xlu1 %v6615_v6, %s6416_s21 }
 0x65d   : > { %6141 = vrot.lane.b32.xlu0 %v6613_v41, %s6416_s21 }
 0x660   : > { %6151 = vrot.lane.b32.xlu1 %v6571_v22, %s6417_s23 }
 0x661   : > { %1592 = vrot.lane.b32.xlu0 %v6569_v20, %s6418_s27 }
 0x664   : > { %6156 = vrot.lane.b32.xlu1 %v6578_v29, %s6417_s23 }
 0x665   : > { %1683 = vrot.lane.b32.xlu0 %v6576_v28, %s6418_s27 }
 0x668   : > { %1594 = vrot.lane.b32.xlu1 %v6597_v42, %s6418_s27 }
 0x66c   : > { %1685 = vrot.lane.b32.xlu1 %v6601_v43, %s6418_s27 }
 0x69b   : > { %v1209_v46 = vpop.xlane.xlu1 %1208 }
 0x69c   : > { %v1206_v38 = vpop.xlane.xlu0 %1205 }
 0x69d   : > { %6350 = vrcp.f32 %v1206_v38 }
 0x69e   : > { %6352 = vrcp.f32 %v1209_v46 }
 0x6a7   : > { %v6351_v44 = vpop.eup %6350 }
 0x6a8   : > { %v1220_v45 = vmul.f32 %v6351_v44, %v6345_v21  ;;  %v6353_v53 = vpop.eup %6352  ;;  %v584_v21 = vld [vmem:[%s6484_s11] sm:$0xff] }
 0x6a9   : > { %v1221_v60 = vmul.f32 %v6353_v53, %v6343_v19  ;;  %v585_v19 = vld [vmem:[%s6484_s11 + $0x8] sm:$0xff] }
 0x6aa   : > { %5891 = vmatprep.mubr.msk.f32.mxu1 %vm775_vm4, %v1220_v45  ;;  %5901 = vmatprep.subr.mxu0 %v585_v19 }
 0x6ab   : > { %5902 = vmatpush3.msra.mxu0 %v585_v19 }
 0x6ac   : > { %5909 = vmatprep.subr.mxu0 %v584_v21 }
 0x6d4   : > { %v1212_v47 = vpop.xlane.xlu0 %1211 }
 0x6d5   : > { %6354 = vrcp.f32 %v1212_v47 }
 0x6d8   : > { %v1215_v48 = vpop.xlane.xlu1 %1214  ;;  %v6142_v49 = vpop.permute.xlu0 %6141 }
 0x6d9   : > { %6356 = vrcp.f32 %v1215_v48  ;;  %v6144_v50 = vunpack.i.h.bf16 %v6142_v49  ;;  %v6143_v51 = vunpack.i.l.bf16 %v6142_v49 }
 0x6db   : > { %v6029_v52 = vpack.c.bf16 %v6144_v50, %v6143_v51 }
 0x6dc   : > { %v6147_v55 = vpop.permute.xlu1 %6146  ;;  %v1593_v12 = vpop.permute.xlu0 %1592 }
 0x6dd   : > { %v6149_v57 = vunpack.i.h.bf16 %v6147_v55  ;;  %v6148_v58 = vunpack.i.l.bf16 %v6147_v55  ;;  %6030 = vmatprep.subr.bf16.mxu1 %v6029_v52 }
 0x6de   : > { %6032 = vmatpush3.bf16.msra.mxu1 %v6029_v52 }
 0x6df   : > { %v6355_v59 = vpop.eup %6354  ;;  %v6033_v61 = vpack.c.bf16 %v6149_v57, %v6148_v58 }
 0x6e0   : > { %v6152_v62 = vpop.permute.xlu1 %6151  ;;  %v1222_v63 = vmul.f32 %v6355_v59, %v6347_v34  ;;  %v1684_v17 = vpop.permute.xlu0 %1683 }
 0x6e1   : > { %v6154_v0 = vunpack.i.h.bf16 %v6152_v62  ;;  %v6153_v1 = vunpack.i.l.bf16 %v6152_v62  ;;  %5892 = vmatmul.mubr.msk.f32.vlgmr.msra.gmra.mrb[8].mxu1 %vm775_vm4, %v1221_v60  ;;  %6034 = vmatprep.subr.bf16.mxu1 %v6033_v61 }
 0x6e2   : > { %6036 = vmatpush3.bf16.msra.mxu1 %v6033_v61  ;;  %5898 = vmatprep.mubr.msk.f32.mxu1 %vm775_vm4, %v1222_v63 }
 0x6e3   : > { %v6357_v2 = vpop.eup %6356  ;;  %v6037_v8 = vpack.c.bf16 %v6154_v0, %v6153_v1 }
 0x6e4   : > { %v1223_v9 = vmul.f32 %v6357_v2, %v6349_v36  ;;  %v6157_v10 = vpop.permute.xlu1 %6156 }
 0x6e5   : > { %6039 = vmatprep.subr.msk.bf16.mxu1 %vm6585_vm3, %v6037_v8  ;;  %v6159_v13 = vunpack.i.h.bf16 %v6157_v10  ;;  %v6158_v14 = vunpack.i.l.bf16 %v6157_v10 }
 0x6e6   : > { %5899 = vmatmul.mubr.msk.f32.vlgmr.msra.gmra.mrb[10].mxu1 %vm775_vm4, %v1223_v9 }
 0x6e7   : > { %5921 = vmatprep.mubr.msk.f32.mxu1 %vm598_vm2, %v1593_v12  ;;  %v6043_v15 = vpack.c.bf16 %v6159_v13, %v6158_v14 }
 0x6e8   : > { %v1595_v16 = vpop.permute.xlu1 %1594 }
 0x6eb   : > { %6042 = vmatpush3.bf16.xpose.msk.msra.mxu1 %vm6585_vm3, %v6037_v8 }
 0x6ec   : > { %6045 = vmatprep.subr.msk.bf16.mxu1 %vm6585_vm3, %v6043_v15  ;;  %v1686_v18 = vpop.permute.xlu1 %1685 }
 0x6f2   : > { %5922 = vmatmul.mubr.msk.f32.vlgmr.msra.gmra.mrb[12].mxu1 %vm598_vm2, %v1595_v16 }
 0x6f3   : > { %6048 = vmatpush3.bf16.xpose.msk.msra.mxu1 %vm6585_vm3, %v6043_v15  ;;  %5928 = vmatprep.mubr.msk.f32.mxu1 %vm598_vm2, %v1684_v17 }
 0x6fa   : > { %5929 = vmatmul.mubr.msk.f32.vlgmr.msra.gmra.mrb[14].mxu1 %vm598_vm2, %v1686_v18 }
 0x7b4   : > { %v5893_v23 = vpop.f32.mrb[8].mxu1 }
 0x7b5   : > { %v1302_v24 = vpop.f32.mrb[9].mxu1 }
 0x7b6   : > { %5903 = vmatprep.mubr.msk.f32.mxu0 %vm598_vm2, %v1302_v24 }
 0x7b7   : > { %5904 = vmatmul.mubr.msk.f32.vlgmr.msra.gmra.mrb[8].mxu0 %vm598_vm2, %v5893_v23 }
 0x7b8   : > { %5910 = vmatpush3.msra.mxu0 %v584_v21 }
 0x7b9   : > { %v5900_v25 = vpop.f32.mrb[10].mxu1 }
 0x7ba   : > { %v1389_v26 = vpop.f32.mrb[11].mxu1 }
 0x7bb   : > { %5906 = vmatprep.mubr.msk.f32.mxu0 %vm598_vm2, %v1389_v26 }
 0x7bc   : > { %5907 = vmatmul.mubr.msk.f32.gmra.mrb[10].mxu0 %vm598_vm2, %v5900_v25 }
 0x7bd   : > { %5911 = vmatprep.mubr.msk.f32.mxu0 %vm598_vm2, %v6651_v4 }
 0x7c0   : > { %5912 = vmatmul.mubr.msk.f32.vlgmr.msra.gmra.mrb[8].mxu0 %vm598_vm2, %v6649_v3 }
 0x7c1   : > { %5914 = vmatprep.mubr.msk.f32.mxu0 %vm598_vm2, %v6655_v7 }
 0x7c4   : > { %5915 = vmatmul.mubr.msk.f32.gmra.mrb[10].mxu0 %vm598_vm2, %v6653_v5 }
 0x7c5   : > { %v5923_v27 = vpop.f32.mrb[12].mxu1 }
 0x7c6   : > { %v1674_v30 = vpop.f32.mrb[13].mxu1  ;;  %v1777_v31 = vsel %vm775_vm4, %v5923_v27, -inf }
 0x7c7   : > { %1778 = vmax.xlane.f32.xlu1 %v1777_v31  ;;  %v1774_v32 = vsel %vm775_vm4, %v1674_v30, -inf }
 0x7c8   : > { %1775 = vmax.xlane.f32.xlu0 %v1774_v32 }
 0x7cd   : > { %v5930_v34 = vpop.f32.mrb[14].mxu1 }
 0x7ce   : > { %v1765_v35 = vpop.f32.mrb[15].mxu1  ;;  %v1783_v3 = vsel %vm775_vm4, %v5930_v34, -inf }
 0x7cf   : > { %v1780_v4 = vsel %vm775_vm4, %v1765_v35, -inf }
 0x7d0   : > { %1781 = vmax.xlane.f32.xlu0 %v1780_v4 }
 0x7d4   : > { %1784 = vmax.xlane.f32.xlu0 %v1783_v3 }
 0x854   : > { %v1779_v7 = vpop.xlane.xlu1 %1778 }
 0x855   : > { %v1787_v36 = vsub.f32 %v5923_v27, %v1779_v7  ;;  %v1776_v37 = vpop.xlane.xlu0 %1775 }
 0x856   : > { %v1786_v5 = vsub.f32 %v1674_v30, %v1776_v37 }
 0x857   : > { %v1792_v38 = vmul.f32 1.442695, %v1787_v36 }
 0x858   : > { %v1790_v44 = vmul.f32 1.442695, %v1786_v5 }
 0x859   : > { %6358 = vpow2.f32 %v1792_v38 }
 0x85a   : > { %6360 = vpow2.f32 %v1790_v44 }
 0x85d   : > { %v1782_v45 = vpop.xlane.xlu0 %1781 }
 0x85e   : > { %v1788_v46 = vsub.f32 %v1765_v35, %v1782_v45 }
 0x860   : > { %v1794_v47 = vmul.f32 1.442695, %v1788_v46 }
 0x861   : > { %v1785_v48 = vpop.xlane.xlu0 %1784 }
 0x862   : > { %6362 = vpow2.f32 %v1794_v47  ;;  %v1789_v49 = vsub.f32 %v5930_v34, %v1785_v48 }
 0x863   : > { %v6359_v50 = vpop.eup %6358 }
 0x864   : > { %v6361_v51 = vpop.eup %6360  ;;  %v1796_v52 = vmul.f32 1.442695, %v1789_v49  ;;  %v1801_v53 = vsel %vm775_vm4, %v6359_v50, 0.0 }
 0x865   : > { %1802 = vadd.xlane.f32.xlu1 %v1801_v53  ;;  %v1798_v55 = vsel %vm775_vm4, %v6361_v51, 0.0 }
 0x866   : > { %6364 = vpow2.f32 %v1796_v52  ;;  %1799 = vadd.xlane.f32.xlu0 %v1798_v55 }
 0x86c   : > { %v6363_v57 = vpop.eup %6362 }
 0x86d   : > { %v1804_v58 = vsel %vm775_vm4, %v6363_v57, 0.0 }
 0x86e   : > { %1805 = vadd.xlane.f32.xlu0 %v1804_v58 }
 0x870   : > { %v6365_v59 = vpop.eup %6364 }
 0x871   : > { %v1807_v60 = vsel %vm775_vm4, %v6365_v59, 0.0 }
 0x872   : > { %1808 = vadd.xlane.f32.xlu1 %v1807_v60 }
 0x883   : > { %6166 = vrot.lane.b32.xlu1 %v6615_v6, %s6419_s28 }
 0x884   : > { %6161 = vrot.lane.b32.xlu0 %v6613_v41, %s6419_s28 }
 0x887   : > { %6171 = vrot.lane.b32.xlu1 %v6571_v22, %s6420_s30 }
 0x888   : > { %2093 = vrot.lane.b32.xlu0 %v6569_v20, %s6421_s9 }
 0x88b   : > { %6176 = vrot.lane.b32.xlu1 %v6578_v29, %s6420_s30 }
 0x88c   : > { %2184 = vrot.lane.b32.xlu0 %v6576_v28, %s6421_s9 }
 0x88f   : > { %2095 = vrot.lane.b32.xlu1 %v6597_v42, %s6421_s9 }
 0x893   : > { %2186 = vrot.lane.b32.xlu1 %v6601_v43, %s6421_s9  ;;  %v586_v43 = vld [vmem:[%s6484_s11 + $0x10] sm:$0xff] }
 0x8f2   : > { %v1803_v62 = vpop.xlane.xlu1 %1802 }
 0x8f3   : > { %v1800_v61 = vpop.xlane.xlu0 %1799 }
 0x8f4   : > { %6366 = vrcp.f32 %v1800_v61 }
 0x8f5   : > { %6368 = vrcp.f32 %v1803_v62 }
 0x8fb   : > { %v1806_v63 = vpop.xlane.xlu0 %1805 }
 0x8fc   : > { %6370 = vrcp.f32 %v1806_v63 }
 0x8fe   : > { %v6367_v0 = vpop.eup %6366 }
 0x8ff   : > { %v1809_v22 = vpop.xlane.xlu1 %1808  ;;  %v6162_v1 = vpop.permute.xlu0 %6161  ;;  %v1814_v2 = vmul.f32 %v6367_v0, %v6361_v51 }
 0x900   : > { %6372 = vrcp.f32 %v1809_v22  ;;  %v6164_v20 = vunpack.i.h.bf16 %v6162_v1  ;;  %v6163_v29 = vunpack.i.l.bf16 %v6162_v1  ;;  %v6369_v42 = vpop.eup %6368 }
 0x901   : > { %5935 = vmatprep.mubr.msk.f32.mxu0 %vm775_vm4, %v1814_v2  ;;  %v1815_v13 = vmul.f32 %v6369_v42, %v6359_v50 }
 0x902   : > { %v6049_v28 = vpack.c.bf16 %v6164_v20, %v6163_v29 }
 0x903   : > { %v6167_v8 = vpop.permute.xlu1 %6166  ;;  %v2094_v27 = vpop.permute.xlu0 %2093 }
 0x904   : > { %v6169_v9 = vunpack.i.h.bf16 %v6167_v8  ;;  %v6168_v10 = vunpack.i.l.bf16 %v6167_v8  ;;  %6050 = vmatprep.subr.bf16.mxu0 %v6049_v28 }
 0x905   : > { %6052 = vmatpush3.bf16.msra.mxu0 %v6049_v28 }
 0x906   : > { %v6371_v12 = vpop.eup %6370  ;;  %v6053_v14 = vpack.c.bf16 %v6169_v9, %v6168_v10  ;;  %5945 = vmatprep.subr.mxu0 %v586_v43 }
 0x907   : > { %v6172_v15 = vpop.permute.xlu1 %6171  ;;  %v1816_v16 = vmul.f32 %v6371_v12, %v6363_v57  ;;  %v2185_v3 = vpop.permute.xlu0 %2184 }
 0x908   : > { %v6174_v17 = vunpack.i.h.bf16 %v6172_v15  ;;  %v6173_v18 = vunpack.i.l.bf16 %v6172_v15  ;;  %5936 = vmatmul.mubr.msk.f32.vlgmr.msra.gmra.mrb[12].mxu0 %vm775_vm4, %v1815_v13  ;;  %6054 = vmatprep.subr.bf16.mxu1 %v6053_v14 }
 0x909   : > { %6056 = vmatpush3.bf16.msra.mxu1 %v6053_v14  ;;  %5942 = vmatprep.mubr.msk.f32.mxu1 %vm775_vm4, %v1816_v16 }
 0x90a   : > { %v6373_v19 = vpop.eup %6372  ;;  %v6057_v21 = vpack.c.bf16 %v6174_v17, %v6173_v18  ;;  %5946 = vmatpush3.msra.mxu0 %v586_v43 }
 0x90b   : > { %v1817_v23 = vmul.f32 %v6373_v19, %v6365_v59  ;;  %v6177_v24 = vpop.permute.xlu1 %6176 }
 0x90c   : > { %v6179_v25 = vunpack.i.h.bf16 %v6177_v24  ;;  %v6178_v26 = vunpack.i.l.bf16 %v6177_v24  ;;  %6059 = vmatprep.subr.msk.bf16.mxu1 %vm6585_vm3, %v6057_v21 }
 0x90d   : > { %5943 = vmatmul.mubr.msk.f32.vlgmr.msra.gmra.mrb[16].mxu1 %vm775_vm4, %v1817_v23 }
 0x90e   : > { %v6063_v30 = vpack.c.bf16 %v6179_v25, %v6178_v26  ;;  %5957 = vmatprep.mubr.msk.f32.mxu1 %vm598_vm2, %v2094_v27  ;;  %v587_v25 = vld [vmem:[%s6484_s11 + $0x18] sm:$0xff] }
 0x90f   : > { %v2096_v31 = vpop.permute.xlu1 %2095 }
 0x910   : > { %6065 = vmatprep.subr.msk.bf16.mxu0 %vm6585_vm3, %v6063_v30 }
 0x912   : > { %6062 = vmatpush3.bf16.xpose.msk.msra.mxu1 %vm6585_vm3, %v6057_v21 }
 0x913   : > { %v2187_v7 = vpop.permute.xlu1 %2186 }
 0x919   : > { %5958 = vmatmul.mubr.msk.f32.vlgmr.msra.gmra.mrb[18].mxu1 %vm598_vm2, %v2096_v31 }
 0x9db   : > { %v5937_v32 = vpop.f32.mrb[12].mxu0 }
 0x9dc   : > { %v1896_v34 = vpop.f32.mrb[13].mxu0 }
 0x9dd   : > { %5947 = vmatprep.mubr.msk.f32.mxu0 %vm598_vm2, %v1896_v34  ;;  %v6759_v34 = vld [vmem:[%s6499_s22] sm:$0xff] }
 0x9de   : > { %5948 = vmatmul.mubr.msk.f32.vlgmr.msra.gmra.mrb[8].mxu0 %vm598_vm2, %v5937_v32  ;;  %v2596_v32 = vsub.s32 5, %v6535_v39 }
 0x9df   : > { %6068 = vmatpush3.bf16.xpose.msk.msra.mxu0 %vm6585_vm3, %v6063_v30 }
 0x9e0   : > { %v5944_v35 = vpop.f32.mrb[16].mxu1 }
 0x9e1   : > { %v1983_v4 = vpop.f32.mrb[17].mxu1 }
 0x9e2   : > { %5950 = vmatprep.mubr.msk.f32.mxu0 %vm598_vm2, %v1983_v4 }
 0x9e3   : > { %5951 = vmatmul.mubr.msk.f32.gmra.mrb[10].mxu0 %vm598_vm2, %v5944_v35  ;;  %v2597_v35 = vrot.slane %v6759_v34, %v2596_v32  ;;  %v6423_v32 = vmov 0  }
 0x9e4   : > { %5964 = vmatprep.mubr.msk.f32.mxu0 %vm598_vm2, %v2185_v3 }
 0x9e7   : > { %5965 = vmatmul.mubr.msk.f32.vlgmr.msra.gmra.mrb[14].mxu0 %vm598_vm2, %v2187_v7 }
 0x9ec   : > { %v5959_v36 = vpop.f32.mrb[18].mxu1 }
 0x9ed   : > { %v2175_v37 = vpop.f32.mrb[19].mxu1  ;;  %v2278_v5 = vsel %vm775_vm4, %v5959_v36, -inf }
 0x9ee   : > { %2279 = vmax.xlane.f32.xlu1 %v2278_v5  ;;  %v2275_v33 = vsel %vm775_vm4, %v2175_v37, -inf }
 0x9ef   : > { %2276 = vmax.xlane.f32.xlu0 %v2275_v33  ;;  %v6400_v33 = vld [vmem:[#allocation2] sm:$0xff] }
 0xa7b   : > { %v2280_v38 = vpop.xlane.xlu1 %2279 }
 0xa7c   : > { %v2288_v44 = vsub.f32 %v5959_v36, %v2280_v38  ;;  %v2277_v48 = vpop.xlane.xlu0 %2276 }
 0xa7d   : > { %v2287_v49 = vsub.f32 %v2175_v37, %v2277_v48  ;;  %v6399_v37 = vld [vmem:[#allocation2 + $0x8] sm:$0xff] }
 0xa7e   : > { %v2293_v45 = vmul.f32 1.442695, %v2288_v44 }
 0xa7f   : > { %v2291_v50 = vmul.f32 1.442695, %v2287_v49 }
 0xa80   : > { %6374 = vpow2.f32 %v2293_v45 }
 0xa81   : > { %6376 = vpow2.f32 %v2291_v50  ;;  %v6401_v50 = vld [vmem:[#allocation2 + $0x18] sm:$0xff] }
 0xa8a   : > { %v6375_v46 = vpop.eup %6374 }
 0xa8b   : > { %v2302_v47 = vsel %vm775_vm4, %v6375_v46, 0.0  ;;  %v6377_v57 = vpop.eup %6376 }
 0xa8c   : > { %2303 = vadd.xlane.f32.xlu1 %v2302_v47  ;;  %v2299_v58 = vsel %vm775_vm4, %v6377_v57, 0.0 }
 0xaba   : > { %v5966_v51 = vpop.f32.mrb[14].mxu0 }
 0xabb   : > { %v2266_v52 = vpop.f32.mrb[15].mxu0  ;;  %v2284_v55 = vsel %vm775_vm4, %v5966_v51, -inf }
 0xabc   : > { %v2281_v53 = vsel %vm775_vm4, %v2266_v52, -inf }
 0xabd   : > { %2282 = vmax.xlane.f32.xlu0 %v2281_v53 }
 0xac1   : > { %2285 = vmax.xlane.f32.xlu0 %v2284_v55 }
 0xac5   : > { %2300 = vadd.xlane.f32.xlu0 %v2299_v58 }
 0xb19   : > { %v2304_v8 = vpop.xlane.xlu1 %2303 }
 0xb4a   : > { %v2283_v59 = vpop.xlane.xlu0 %2282 }
 0xb4b   : > { %v2289_v60 = vsub.f32 %v2266_v52, %v2283_v59  ;;  %v6402_v52 = vld [vmem:[#allocation2 + $0x10] sm:$0xff] }
 0xb4d   : > { %v2295_v61 = vmul.f32 1.442695, %v2289_v60 }
 0xb4e   : > { %v2286_v62 = vpop.xlane.xlu0 %2285 }
 0xb4f   : > { %6378 = vpow2.f32 %v2295_v61  ;;  %v2290_v63 = vsub.f32 %v5966_v51, %v2286_v62 }
 0xb51   : > { %v2297_v0 = vmul.f32 1.442695, %v2290_v63 }
 0xb52   : > { %v2301_v22 = vpop.xlane.xlu0 %2300 }
 0xb53   : > { %6380 = vpow2.f32 %v2297_v0 }
 0xb54   : > { %6382 = vrcp.f32 %v2301_v22 }
 0xb55   : > { %6384 = vrcp.f32 %v2304_v8 }
 0xb59   : > { %v6379_v1 = vpop.eup %6378 }
 0xb5a   : > { %v2305_v2 = vsel %vm775_vm4, %v6379_v1, 0.0 }
 0xb5b   : > { %2306 = vadd.xlane.f32.xlu0 %v2305_v2 }
 0xb5d   : > { %v6381_v20 = vpop.eup %6380 }
 0xb5e   : > { %v6383_v29 = vpop.eup %6382  ;;  %v2308_v28 = vsel %vm775_vm4, %v6381_v20, 0.0 }
 0xb5f   : > { %2309 = vadd.xlane.f32.xlu1 %v2308_v28  ;;  %v2315_v42 = vmul.f32 %v6383_v29, %v6377_v57  ;;  %v6385_v15 = vpop.eup %6384 }
 0xb60   : > { %v2316_v19 = vmul.f32 %v6385_v15, %v6375_v46  ;;  %v2678_v15 = vld [vmem:[%s6489_s14 + $0x40] sm:$0xff] }
 0xb61   : > { %5971 = vmatprep.mubr.msk.f32.mxu1 %vm775_vm4, %v2315_v42 }
 0xb70   : > { %6186 = vrot.lane.b32.xlu1 %v6615_v6, %s6422_s26 }
 0xb71   : > { %6181 = vrot.lane.b32.xlu0 %v6613_v41, %s6422_s26 }
 0xbe8   : > { %v2307_v43 = vpop.xlane.xlu0 %2306 }
 0xbe9   : > { %6386 = vrcp.f32 %v2307_v43 }
 0xbec   : > { %v2310_v9 = vpop.xlane.xlu1 %2309  ;;  %v6182_v10 = vpop.permute.xlu0 %6181 }
 0xbed   : > { %6388 = vrcp.f32 %v2310_v9  ;;  %v6184_v12 = vunpack.i.h.bf16 %v6182_v10  ;;  %v6183_v13 = vunpack.i.l.bf16 %v6182_v10 }
 0xbef   : > { %v6069_v14 = vpack.c.bf16 %v6184_v12, %v6183_v13 }
 0xbf0   : > { %v6187_v16 = vpop.permute.xlu1 %6186 }
 0xbf1   : > { %v6189_v17 = vunpack.i.h.bf16 %v6187_v16  ;;  %v6188_v18 = vunpack.i.l.bf16 %v6187_v16  ;;  %6070 = vmatprep.subr.bf16.mxu1 %v6069_v14  ;;  %v2677_v16 = vld [vmem:[%s6489_s14 + $0x8] sm:$0xff] }
 0xbf2   : > { %6072 = vmatpush3.bf16.msra.mxu1 %v6069_v14  ;;  %v2676_v14 = vld [vmem:[%s6489_s14] sm:$0xff] }
 0xbf3   : > { %v6387_v6 = vpop.eup %6386  ;;  %v6073_v41 = vpack.c.bf16 %v6189_v17, %v6188_v18  ;;  %v5112_v17 = vcombine.high %v2676_v14, %v2678_v15  ;;  %v2679_v18 = vld [vmem:[%s6489_s14 + $0x48] sm:$0xff] }
 0xbf4   : > { %v2317_v21 = vmul.f32 %v6387_v6, %v6379_v1  ;;  %v5111_v6 = vcombine.low %v2676_v14, %v2678_v15 }
 0xbf5   : > { %5972 = vmatmul.mubr.msk.f32.vlgmr.msra.gmra.mrb[20].mxu1 %vm775_vm4, %v2316_v19  ;;  %6074 = vmatprep.subr.bf16.mxu0 %v6073_v41  ;;  %v5113_v19 = vcombine.low %v2677_v16, %v2679_v18 }
 0xbf6   : > { %6076 = vmatpush3.bf16.msra.mxu0 %v6073_v41  ;;  %5978 = vmatprep.mubr.msk.f32.mxu0 %vm775_vm4, %v2317_v21  ;;  %v5114_v41 = vcombine.high %v2677_v16, %v2679_v18  ;;  %v2680_v21 = vld [vmem:[%s6489_s14 + $0x80] sm:$0xff]  ;;  %v5129_v16 = vld [vmem:[%s6489_s14 + $0xd0] sm:$0xff]  ;;  %v5130_v18 = vld [vmem:[%s6489_s14 + $0xd8] sm:$0xff] }
 0xbf7   : > { %v6389_v23 = vpop.eup %6388  ;;  %5981 = vmatprep.subr.mxu0 %v587_v25  ;;  %2816 = vmatprep.subr.bf16.mxu1 %v5112_v17  ;;  %v5128_v17 = vld [vmem:[%s6489_s14 + $0x98] sm:$0xff] }
 0xbf8   : > { %v2318_v24 = vmul.f32 %v6389_v23, %v6381_v20  ;;  %2817 = vmatpush1.bf16.msra.mxu1 %v5111_v6  ;;  %v2682_v23 = vld [vmem:[%s6489_s14 + $0xc0] sm:$0xff]  ;;  %2848 = vmatprep.mubr.bf16.mxu1 %v6423_v32 }
 0xbfa   : > { %5979 = vmatmul.mubr.msk.f32.vlgmr.msra.gmra.mrb[16].mxu0 %vm775_vm4, %v2318_v24  ;;  %v2681_v24 = vld [vmem:[%s6489_s14 + $0x88] sm:$0xff] }
 0xbfb   : > { %5982 = vmatpush3.msra.mxu0 %v587_v25  ;;  %v5116_v25 = vcombine.high %v2680_v21, %v2682_v23 }
 0xbfc   : > { %2869 = vmatprep.subr.bf16.mxu0 %v5114_v41  ;;  %v5203_v41 = vcombine.high %v5128_v17, %v5130_v18 }
 0xbfd   : > { %2818 = vmatprep.subr.bf16.mxu1 %v5116_v25  ;;  %v6191_v25 = vld [vmem:[%s6494_s18 + $0x1c0] sm:$0xff]  }
 0xcc8   : > { %v5973_v26 = vpop.f32.mrb[20].mxu1 }
 0xcc9   : > { %v2397_v27 = vpop.f32.mrb[21].mxu1 }
 0xcca   : > { %5983 = vmatprep.mubr.msk.f32.mxu0 %vm598_vm2, %v2397_v27  ;;  %v5115_v27 = vcombine.low %v2680_v21, %v2682_v23  ;;  %v5202_v21 = vcombine.low %v5128_v17, %v5130_v18 }
 0xccb   : > { %5984 = vmatmul.mubr.msk.f32.vlgmr.msra.gmra.mrb[8].mxu0 %vm598_vm2, %v5973_v26  ;;  %v2683_v26 = vld [vmem:[%s6489_s14 + $0xc8] sm:$0xff] }
 0xccc   : > { %2870 = vmatpush1.bf16.msra.mxu0 %v5113_v19  ;;  %2819 = vmatpush1.bf16.msra.mxu1 %v5115_v27  ;;  %v6192_v27 = vld [vmem:[%s6494_s18 + $0x100] sm:$0xff]  }
 0xccd   : > { %v5980_v30 = vpop.f32.mrb[16].mxu0 }
 0xcce   : > { %v2484_v31 = vpop.f32.mrb[17].mxu0 }
 0xccf   : > { %5986 = vmatprep.mubr.msk.f32.mxu0 %vm598_vm2, %v2484_v31  ;;  %v5118_v31 = vcombine.high %v2681_v24, %v2683_v26 }
 0xcd0   : > { %5987 = vmatmul.mubr.msk.f32.gmra.mrb[10].mxu0 %vm598_vm2, %v5980_v30  ;;  %v5117_v30 = vcombine.low %v2681_v24, %v2683_v26  ;;  %v6190_v24 = vld [vmem:[%s6494_s18 + $0x140] sm:$0xff]  }
 0xcd1   : > { %2871 = vmatprep.subr.bf16.mxu0 %v5118_v31  ;;  %2901 = vmatprep.mubr.bf16.mxu0 %v6423_v32  ;;  %v6194_v31 = vld [vmem:[%s6494_s18 + $0x148] sm:$0xff]  }
 0xcd2   : > { %2872 = vmatpush1.bf16.msra.mxu0 %v5117_v30  ;;  %v6193_v30 = vld [vmem:[%s6494_s18 + $0x180] sm:$0xff]  }
 0xd9e   : > { %v5985_v4 = vpop.f32.mrb[8].mxu0 }
 0xd9f   : > { %v2599_v3 = vadd.f32 %v5985_v4, %v2597_v35  ;;  %v2571_v7 = vpop.f32.mrb[9].mxu0  ;;  %v5125_v4 = vld [vmem:[%s6489_s14 + $0x50] sm:$0xff] }
 0xda0   : > { %v2598_v36 = vadd.f32 %v2597_v35, %v2571_v7 }
 0xda1   : > { %v6762_v5 = vadd.f32 %v6399_v37, %v2599_v3  ;;  %v5124_v3 = vld [vmem:[%s6489_s14 + $0x18] sm:$0xff] }
 0xda2   : > { %v6764_v38 = vadd.f32 %v6400_v33, %v2598_v36  ;;  %v5126_v37 = vld [vmem:[%s6489_s14 + $0x58] sm:$0xff] }
 0xda3   : > { %v5988_v44 = vpop.f32.mrb[10].mxu0  ;;  %v2609_v45 = vsel %vm381_vm1, %v6762_v5, 0.0  ;;  %v5198_v33 = vcombine.low %v5124_v3, %v5126_v37 }
 0xda4   : > { %v2601_v46 = vadd.f32 %v5988_v44, %v2597_v35  ;;  %2610 = vadd.xlane.f32.xlu0 %v2609_v45  ;;  %v2581_v47 = vpop.f32.mrb[11].mxu0  ;;  %v2606_v48 = vsel %vm381_vm1, %v6764_v38, 0.0  ;;  %v5199_v44 = vcombine.high %v5124_v3, %v5126_v37  ;;  %v6197_v3 = vld [vmem:[%s6494_s18 + $0x188] sm:$0xff]   ;;  %v6200_v37 = vld [vmem:[%s6494_s18 + $0x110] sm:$0xff]  }
 0xda5   : > { %v2600_v49 = vadd.f32 %v2597_v35, %v2581_v47  ;;  %2607 = vadd.xlane.f32.xlu1 %v2606_v48  ;;  %v5123_v35 = vld [vmem:[%s6489_s14 + $0x10] sm:$0xff] }
 0xda6   : > { %v6770_v51 = vadd.f32 %v6401_v50, %v2601_v46  ;;  %v5196_v7 = vcombine.low %v5123_v35, %v5125_v4  ;;  %v5197_v36 = vcombine.high %v5123_v35, %v5125_v4  ;;  %3136 = vmatprep.subr.bf16.mxu0 %v5199_v44  ;;  %v6195_v35 = vld [vmem:[%s6494_s18 + $0x1c8] sm:$0xff]   ;;  %v6202_v44 = vld [vmem:[%s6494_s18 + $0x158] sm:$0xff]  }
 0xda7   : > { %v6772_v53 = vadd.f32 %v6402_v52, %v2600_v49  ;;  %v6196_v4 = vld [vmem:[%s6494_s18 + $0x108] sm:$0xff]  }
 0xda8   : > { %v2615_v55 = vsel %vm381_vm1, %v6770_v51, 0.0  ;;  %3083 = vmatprep.subr.bf16.mxu1 %v5197_v36  ;;  %v6199_v36 = vld [vmem:[%s6494_s18 + $0x1d0] sm:$0xff]  }
 0xda9   : > { %2616 = vadd.xlane.f32.xlu1 %v2615_v55  ;;  %v2612_v57 = vsel %vm381_vm1, %v6772_v53, 0.0 }
 0xdaa   : > { %2613 = vadd.xlane.f32.xlu0 %v2612_v57 }
 0xe31   : > { %v2611_v58 = vpop.xlane.xlu0 %2610 }
 0xe32   : > { %v2619_v59 = vmul.f32 0.03125, %v2611_v58  ;;  %v2608_v60 = vpop.xlane.xlu1 %2607 }
 0xe33   : > { %v2618_v61 = vmul.f32 0.03125, %v2608_v60 }
 0xe34   : > { %v6779_v62 = vsub.f32 %v6762_v5, %v2619_v59 }
 0xe35   : > { %v6782_v63 = vsub.f32 %v6764_v38, %v2618_v61  ;;  %v2660_v61 = vsub.s32 6, %v6535_v39 }
 0xe36   : > { %v2617_v0 = vpop.xlane.xlu1 %2616  ;;  %v2627_v22 = vmul.f32 %v6779_v62, %v6779_v62 }
 0xe37   : > { %v2621_v1 = vmul.f32 0.03125, %v2617_v0  ;;  %v2614_v2 = vpop.xlane.xlu0 %2613  ;;  %v2626_v20 = vmul.f32 %v6782_v63, %v6782_v63  ;;  %v2668_v0 = vsub.s32 7, %v6535_v39 }
 0xe38   : > { %v2620_v29 = vmul.f32 0.03125, %v2614_v2  ;;  %v2633_v28 = vsel %vm381_vm1, %v2627_v22, 0.0  ;;  %v2661_v22 = vrot.slane %v6759_v34, %v2660_v61  ;;  %v6215_v61 = vld [vmem:[%s6494_s18 + $0x1f0] sm:$0xff]  }
 0xe39   : > { %v6790_v42 = vsub.f32 %v6770_v51, %v2621_v1  ;;  %2634 = vadd.xlane.f32.xlu1 %v2633_v28  ;;  %v2630_v8 = vsel %vm381_vm1, %v2626_v20, 0.0  ;;  %v2669_v20 = vrot.slane %v6759_v34, %v2668_v0  ;;  %v6216_v0 = vld [vmem:[%s6494_s18 + $0x130] sm:$0xff]  }
 0xe3a   : > { %v6794_v43 = vsub.f32 %v6772_v53, %v2620_v29  ;;  %2631 = vadd.xlane.f32.xlu0 %v2630_v8 }
 0xe3b   : > { %v2629_v9 = vmul.f32 %v6790_v42, %v6790_v42 }
 0xe3c   : > { %v2628_v10 = vmul.f32 %v6794_v43, %v6794_v43 }
 0xe3d   : > { %v2639_v12 = vsel %vm381_vm1, %v2629_v9, 0.0 }
 0xe3e   : > { %2640 = vadd.xlane.f32.xlu1 %v2639_v12  ;;  %v2636_v13 = vsel %vm381_vm1, %v2628_v10, 0.0 }
 0xe3f   : > { %2637 = vadd.xlane.f32.xlu0 %v2636_v13  ;;  %v5127_v13 = vld [vmem:[%s6489_s14 + $0x90] sm:$0xff] }
 0xe40   : > { %v5201_v19 = vcombine.high %v5127_v13, %v5129_v16 }
 0xec6   : > { %v2635_v45 = vpop.xlane.xlu1 %2634 }
 0xec7   : > { %v2643_v46 = vmul.f32 0.03125, %v2635_v45  ;;  %v2632_v47 = vpop.xlane.xlu0 %2631  ;;  %v6203_v45 = vld [vmem:[%s6494_s18 + $0x1d8] sm:$0xff]  }
 0xec8   : > { %v2642_v48 = vmul.f32 0.03125, %v2632_v47  ;;  %v6205_v47 = vld [vmem:[%s6494_s18 + $0x198] sm:$0xff]  }
 0xec9   : > { %v2647_v49 = vadd.f32 1e-05, %v2643_v46  ;;  %v6204_v46 = vld [vmem:[%s6494_s18 + $0x118] sm:$0xff]  }
 0xeca   : > { %v2646_v50 = vadd.f32 1e-05, %v2642_v48  ;;  %v6206_v48 = vld [vmem:[%s6494_s18 + $0x160] sm:$0xff]  }
 0xecb   : > { %6390 = vrsqrt.f32 %v2647_v49  ;;  %v2641_v52 = vpop.xlane.xlu1 %2640  ;;  %v6207_v49 = vld [vmem:[%s6494_s18 + $0x1e0] sm:$0xff]  }
 0xecc   : > { %6392 = vrsqrt.f32 %v2646_v50  ;;  %v2645_v55 = vmul.f32 0.03125, %v2641_v52  ;;  %v2638_v57 = vpop.xlane.xlu0 %2637  ;;  %v6208_v50 = vld [vmem:[%s6494_s18 + $0x120] sm:$0xff]  }
 0xecd   : > { %v2644_v58 = vmul.f32 0.03125, %v2638_v57  ;;  %v6209_v52 = vld [vmem:[%s6494_s18 + $0x1a0] sm:$0xff]   ;;  %v6211_v57 = vld [vmem:[%s6494_s18 + $0x1e8] sm:$0xff]  }
 0xece   : > { %v2649_v59 = vadd.f32 1e-05, %v2645_v55  ;;  %v6210_v55 = vld [vmem:[%s6494_s18 + $0x168] sm:$0xff]  }
 0xecf   : > { %v2648_v60 = vadd.f32 1e-05, %v2644_v58  ;;  %v6212_v58 = vld [vmem:[%s6494_s18 + $0x128] sm:$0xff]  }
 0xed0   : > { %6394 = vrsqrt.f32 %v2649_v59  ;;  %v6213_v59 = vld [vmem:[%s6494_s18 + $0x1a8] sm:$0xff]  }
 0xed1   : > { %6396 = vrsqrt.f32 %v2648_v60  ;;  %v6214_v60 = vld [vmem:[%s6494_s18 + $0x170] sm:$0xff]  }
 0xed5   : > { %v6391_v1 = vpop.eup %6390 }
 0xed6   : > { %v6393_v2 = vpop.eup %6392  ;;  %v2655_v29 = vmul.f32 %v6391_v1, %v6779_v62  ;;  %v6218_v1 = vld [vmem:[%s6494_s18 + $0x178] sm:$0xff]  }
 0xed7   : > { %v2654_v28 = vmul.f32 %v6393_v2, %v6782_v63  ;;  %v6219_v2 = vld [vmem:[%s6494_s18 + $0x1f8] sm:$0xff]  }
 0xed8   : > { %v2663_v8 = vmul.f32 %v2661_v22, %v2655_v29  ;;  %v6221_v29 = vld [vmem:[%s6494_s18 + $0x1b8] sm:$0xff]  }
 0xed9   : > { %v2662_v9 = vmul.f32 %v2661_v22, %v2654_v28  ;;  %v6222_v28 = vld [vmem:[%s6494_s18 + $0x40] sm:$0xff]  }
 0xeda   : > { %v6395_v10 = vpop.eup %6394  ;;  %v2671_v12 = vadd.f32 %v2669_v20, %v2663_v8  ;;  %v6223_v8 = vld [vmem:[%s6494_s18 + $0xc0] sm:$0xff]  }
 0xedb   : > { %v6397_v14 = vpop.eup %6396  ;;  %v2670_v15 = vadd.f32 %v2669_v20, %v2662_v9  ;;  %v2657_v39 = vmul.f32 %v6395_v10, %v6790_v42  ;;  %v5200_v42 = vcombine.low %v5127_v13, %v5129_v16  ;;  %v2684_v9 = vld [vmem:[%s6504_s29] sm:$0xf] }
 0xedc   : > { %v2656_v6 = vmul.f32 %v6397_v14, %v6794_v43  ;;  %v2753_v10 = vrot.slane %v2684_v9, %v6546_v54  ;;  %v2757_v13 = vrot.slane %v2684_v9, %v6549_v56  ;;  %v2765_v14 = vrot.slane %v2684_v9, %v6538_v40 }
 0xedd   : > { %v6828_v34 = vpack.c.bf16 %v2671_v12, %v2670_v15  ;;  %v2665_v62 = vmul.f32 %v2661_v22, %v2657_v39  ;;  %v2761_v12 = vrot.slane %v2684_v9, %v6561_v11 }
 0xede   : > { %v2664_v63 = vmul.f32 %v2661_v22, %v2656_v6  ;;  %v6217_v22 = vld [vmem:[%s6494_s18 + $0x1b0] sm:$0xff]  }
 0xedf   : > { %5119 = vmatmul.mubr.msk.bf16.vlgmr.msra.gmra.mrb[24].mxu1 %vm381_vm1, %v6828_v34  ;;  %5121 = vmatmul.mubr.msk.bf16.vlgmr.msra.gmra.mrb[20].mxu0 %vm381_vm1, %v6828_v34  ;;  %v2673_v23 = vadd.f32 %v2669_v20, %v2665_v62 }
 0xee0   : > { %3084 = vmatpush1.bf16.msra.mxu1 %v5196_v7  ;;  %3137 = vmatpush1.bf16.msra.mxu0 %v5198_v33  ;;  %v2672_v43 = vadd.f32 %v2669_v20, %v2664_v63  ;;  %v6198_v7 = vld [vmem:[%s6494_s18 + $0x150] sm:$0xff]   ;;  %v6220_v20 = vld [vmem:[%s6494_s18 + $0x138] sm:$0xff]  }
 0xee1   : > { %2858 = vmatprep.mubr.bf16.mxu1 %v6423_v32  ;;  %2911 = vmatprep.mubr.bf16.mxu0 %v6423_v32  ;;  %v6201_v33 = vld [vmem:[%s6494_s18 + $0x190] sm:$0xff]  }
 0xee2   : > { %3085 = vmatprep.subr.bf16.mxu1 %v5201_v19  ;;  %3138 = vmatprep.subr.bf16.mxu0 %v5203_v41  ;;  %v6838_v26 = vpack.c.bf16 %v2673_v23, %v2672_v43 }
 0xee4   : > { %3086 = vmatpush1.bf16.msra.mxu1 %v5200_v42  ;;  %3139 = vmatpush1.bf16.msra.mxu0 %v5202_v21 }
 0xee5   : > { %5607 = vmatprep.subr.bf16.mxu1 %v6190_v24  ;;  %5635 = vmatprep.subr.bf16.mxu0 %v6191_v25 }
 0xee7   : > { %5120 = vmatmul.mubr.msk.bf16.gmra.mrb[28].mxu1 %vm381_vm1, %v6838_v26  ;;  %5122 = vmatmul.mubr.msk.bf16.gmra.mrb[24].mxu0 %vm381_vm1, %v6838_v26 }
 0xee8   : > { %3115 = vmatprep.mubr.bf16.mxu1 %v6423_v32  ;;  %3168 = vmatprep.mubr.bf16.mxu0 %v6423_v32 }
 0xeef   : > { %5204 = vmatmul.mubr.msk.bf16.vlgmr.msra.gmra.mrb[32].mxu1 %vm381_vm1, %v6828_v34  ;;  %5206 = vmatmul.mubr.msk.bf16.vlgmr.msra.gmra.mrb[28].mxu0 %vm381_vm1, %v6828_v34 }
 0xef0   : > { %3125 = vmatprep.mubr.bf16.mxu1 %v6423_v32  ;;  %3178 = vmatprep.mubr.bf16.mxu0 %v6423_v32 }
 0xef1   : > { %5608 = vmatpush3.bf16.msra.mxu1 %v6192_v27  ;;  %5636 = vmatpush3.bf16.msra.mxu0 %v6193_v30 }
 0xef2   : > { %5609 = vmatprep.subr.bf16.mxu1 %v6194_v31  ;;  %5637 = vmatprep.subr.bf16.mxu0 %v6195_v35 }
 0xef5   : > { %5610 = vmatpush3.bf16.msra.mxu1 %v6196_v4  ;;  %5638 = vmatpush3.bf16.msra.mxu0 %v6197_v3 }
 0xef6   : > { %5611 = vmatprep.subr.bf16.mxu1 %v6198_v7  ;;  %5639 = vmatprep.subr.bf16.mxu0 %v6199_v36 }
 0xef7   : > { %5205 = vmatmul.mubr.msk.bf16.gmra.mrb[36].mxu1 %vm381_vm1, %v6838_v26  ;;  %5207 = vmatmul.mubr.msk.bf16.gmra.mrb[32].mxu0 %vm381_vm1, %v6838_v26 }
 0xef9   : > { %5612 = vmatpush3.bf16.msra.mxu1 %v6200_v37  ;;  %5640 = vmatpush3.bf16.msra.mxu0 %v6201_v33 }
 0xefa   : > { %5613 = vmatprep.subr.bf16.mxu1 %v6202_v44  ;;  %5641 = vmatprep.subr.bf16.mxu0 %v6203_v45 }
 0xefd   : > { %5614 = vmatpush3.bf16.msra.mxu1 %v6204_v46  ;;  %5642 = vmatpush3.bf16.msra.mxu0 %v6205_v47 }
 0xefe   : > { %5615 = vmatprep.subr.bf16.mxu1 %v6206_v48  ;;  %5643 = vmatprep.subr.bf16.mxu0 %v6207_v49  ;;  %v5131_v48 = vld [vmem:[%s6504_s29 + $0x4] sm:$0xf] }
 0xeff   : > { %v6908_v9 = vrot.slane %v5131_v48, %v6538_v40 }
 0xf01   : > { %5616 = vmatpush3.bf16.msra.mxu1 %v6208_v50  ;;  %5644 = vmatpush3.bf16.msra.mxu0 %v6209_v52 }
 0xf02   : > { %5617 = vmatprep.subr.bf16.mxu1 %v6210_v55  ;;  %5645 = vmatprep.subr.bf16.mxu0 %v6211_v57 }
 0xf05   : > { %5618 = vmatpush3.bf16.msra.mxu1 %v6212_v58  ;;  %5646 = vmatpush3.bf16.msra.mxu0 %v6213_v59 }
 0xf06   : > { %5619 = vmatprep.subr.bf16.mxu1 %v6214_v60  ;;  %5647 = vmatprep.subr.bf16.mxu0 %v6215_v61 }
 0xf09   : > { %5620 = vmatpush3.bf16.msra.mxu1 %v6216_v0  ;;  %5648 = vmatpush3.bf16.msra.mxu0 %v6217_v22 }
 0xf0a   : > { %5621 = vmatprep.subr.bf16.mxu1 %v6218_v1  ;;  %5649 = vmatprep.subr.bf16.mxu0 %v6219_v2  ;;  %v3026_v2 = vrot.slane %v5131_v48, %v6546_v54 }
 0xf0d   : > { %5622 = vmatpush3.bf16.msra.mxu1 %v6220_v20  ;;  %5650 = vmatpush3.bf16.msra.mxu0 %v6221_v29  ;;  %v3034_v20 = vrot.slane %v5131_v48, %v6561_v11 }
 0xf0e   : > { %5663 = vmatprep.subr.bf16.mxu1 %v6222_v28  ;;  %5691 = vmatprep.subr.bf16.mxu0 %v6223_v8  ;;  %v6905_v8 = vrot.slane %v5131_v48, %v6549_v56 }
 0xfb2   : > { %v2850_v15 = vpop.f32.mrb[24].mxu1  ;;  %v2903_v39 = vpop.f32.mrb[20].mxu0 }
 0xfb3   : > { %v2851_v16 = vadd.f32 %v2850_v15, %v2753_v10  ;;  %v2904_v17 = vadd.f32 %v2903_v39, %v2761_v12  ;;  %v2852_v18 = vpop.f32.mrb[25].mxu1  ;;  %v2905_v6 = vpop.f32.mrb[21].mxu0 }
 0xfb4   : > { %v2853_v62 = vadd.f32 %v2852_v18, %v2757_v13  ;;  %v2906_v63 = vadd.f32 %v2905_v6, %v2765_v14  ;;  %v2854_v19 = vpop.f32.mrb[26].mxu1  ;;  %v2907_v41 = vpop.f32.mrb[22].mxu0 }
 0xfb5   : > { %v2855_v42 = vadd.f32 %v2854_v19, %v2753_v10  ;;  %v2908_v21 = vadd.f32 %v2907_v41, %v2761_v12  ;;  %v2856_v23 = vpop.f32.mrb[27].mxu1  ;;  %v2909_v43 = vpop.f32.mrb[23].mxu0  ;;  %v2922_v27 = vmax.f32 %v2851_v16, 0.0  ;;  %v2924_v30 = vmax.f32 %v2904_v17, 0.0 }
 0xfb6   : > { %v2857_v24 = vadd.f32 %v2856_v23, %v2757_v13  ;;  %v2910_v25 = vadd.f32 %v2909_v43, %v2765_v14  ;;  %v2923_v4 = vmax.f32 %v2853_v62, 0.0  ;;  %v2925_v3 = vmax.f32 %v2906_v63, 0.0 }
 0xfb7   : > { %v2926_v31 = vmax.f32 %v2855_v42, 0.0  ;;  %v2928_v35 = vmax.f32 %v2908_v21, 0.0 }
 0xfb8   : > { %v2927_v7 = vmax.f32 %v2857_v24, 0.0  ;;  %v2929_v36 = vmax.f32 %v2910_v25, 0.0 }
 0xfb9   : > { %v6893_v37 = vpack.c.bf16 %v2926_v31, %v2922_v27  ;;  %v6895_v33 = vpack.c.bf16 %v2928_v35, %v2924_v30 }
 0xfba   : > { %v6897_v44 = vpack.c.bf16 %v2927_v7, %v2923_v4  ;;  %v6899_v45 = vpack.c.bf16 %v2929_v36, %v2925_v3  ;;  %v2860_v46 = vpop.f32.mrb[28].mxu1  ;;  %v2913_v47 = vpop.f32.mrb[24].mxu0 }
 0xfbb   : > { %v2861_v49 = vadd.f32 %v2860_v46, %v2753_v10  ;;  %v2914_v50 = vadd.f32 %v2913_v47, %v2761_v12  ;;  %v2862_v52 = vpop.f32.mrb[29].mxu1  ;;  %v2915_v55 = vpop.f32.mrb[25].mxu0 }
 0xfbc   : > { %v2863_v57 = vadd.f32 %v2862_v52, %v2757_v13  ;;  %v2916_v58 = vadd.f32 %v2915_v55, %v2765_v14  ;;  %v2864_v59 = vpop.f32.mrb[30].mxu1  ;;  %v2917_v60 = vpop.f32.mrb[26].mxu0 }
 0xfbd   : > { %v2865_v61 = vadd.f32 %v2864_v59, %v2753_v10  ;;  %v2918_v0 = vadd.f32 %v2917_v60, %v2761_v12  ;;  %v2866_v22 = vpop.f32.mrb[31].mxu1  ;;  %v2919_v1 = vpop.f32.mrb[27].mxu0  ;;  %v2930_v15 = vmax.f32 %v2861_v49, 0.0  ;;  %v2932_v39 = vmax.f32 %v2914_v50, 0.0 }
 0xfbe   : > { %v2867_v29 = vadd.f32 %v2866_v22, %v2757_v13  ;;  %v2920_v28 = vadd.f32 %v2919_v1, %v2765_v14  ;;  %v2931_v10 = vmax.f32 %v2863_v57, 0.0  ;;  %v2933_v12 = vmax.f32 %v2916_v58, 0.0  ;;  %v6224_v1 = vld [vmem:[%s6494_s18] sm:$0xff]  }
 0xfbf   : > { %v2934_v16 = vmax.f32 %v2865_v61, 0.0  ;;  %v2936_v17 = vmax.f32 %v2918_v0, 0.0 }
 0xfc0   : > { %v2935_v18 = vmax.f32 %v2867_v29, 0.0  ;;  %v2937_v6 = vmax.f32 %v2920_v28, 0.0  ;;  %v6225_v29 = vld [vmem:[%s6494_s18 + $0x80] sm:$0xff]  }
 0xfc1   : > { %v6910_v62 = vpack.c.bf16 %v2934_v16, %v2930_v15  ;;  %v6912_v63 = vpack.c.bf16 %v2936_v17, %v2932_v39  ;;  %v6226_v17 = vld [vmem:[%s6494_s18 + $0x48] sm:$0xff]  }
 0xfc2   : > { %v6914_v13 = vpack.c.bf16 %v2935_v18, %v2931_v10  ;;  %v6916_v14 = vpack.c.bf16 %v2937_v6, %v2933_v12  ;;  %v3117_v19 = vpop.f32.mrb[32].mxu1  ;;  %v3170_v41 = vpop.f32.mrb[28].mxu0  ;;  %v6227_v10 = vld [vmem:[%s6494_s18 + $0xc8] sm:$0xff]  }
 0xfc3   : > { %v3118_v42 = vadd.f32 %v3117_v19, %v3026_v2  ;;  %v3171_v21 = vadd.f32 %v3170_v41, %v3034_v20  ;;  %v3119_v23 = vpop.f32.mrb[33].mxu1  ;;  %v3172_v43 = vpop.f32.mrb[29].mxu0 }
 0xfc4   : > { %v3120_v24 = vadd.f32 %v3119_v23, %v6905_v8  ;;  %v3173_v25 = vadd.f32 %v3172_v43, %v6908_v9  ;;  %v3121_v27 = vpop.f32.mrb[34].mxu1  ;;  %v3174_v30 = vpop.f32.mrb[30].mxu0 }
 0xfc5   : > { %v3122_v31 = vadd.f32 %v3121_v27, %v3026_v2  ;;  %v3175_v35 = vadd.f32 %v3174_v30, %v3034_v20  ;;  %v3123_v4 = vpop.f32.mrb[35].mxu1  ;;  %v3176_v3 = vpop.f32.mrb[31].mxu0  ;;  %v3189_v46 = vmax.f32 %v3118_v42, 0.0  ;;  %v3191_v47 = vmax.f32 %v3171_v21, 0.0  ;;  %v6229_v27 = vld [vmem:[%s6494_s18 + $0x88] sm:$0xff]  }
 0xfc6   : > { %v3124_v7 = vadd.f32 %v3123_v4, %v6905_v8  ;;  %v3177_v36 = vadd.f32 %v3176_v3, %v6908_v9  ;;  %v3190_v50 = vmax.f32 %v3120_v24, 0.0  ;;  %v3192_v52 = vmax.f32 %v3173_v25, 0.0  ;;  %v6228_v25 = vld [vmem:[%s6494_s18 + $0x8] sm:$0xff]   ;;  %v6231_v4 = vld [vmem:[%s6494_s18 + $0xd0] sm:$0xff]  }
 0xfc7   : > { %v3193_v48 = vmax.f32 %v3122_v31, 0.0  ;;  %v3195_v49 = vmax.f32 %v3175_v35, 0.0 }
 0xfc8   : > { %v3194_v55 = vmax.f32 %v3124_v7, 0.0  ;;  %v3196_v57 = vmax.f32 %v3177_v36, 0.0 }
 0xfc9   : > { %v3205_v58 = vpack.c.bf16 %v3193_v48, %v3189_v46  ;;  %v3207_v59 = vpack.c.bf16 %v3195_v49, %v3191_v47  ;;  %v6232_v49 = vld [vmem:[%s6494_s18 + $0x10] sm:$0xff]  }
 0xfca   : > { %v3206_v60 = vpack.c.bf16 %v3194_v55, %v3190_v50  ;;  %v3208_v61 = vpack.c.bf16 %v3196_v57, %v3192_v52  ;;  %v3127_v0 = vpop.f32.mrb[36].mxu1  ;;  %v3180_v22 = vpop.f32.mrb[32].mxu0  ;;  %v6233_v50 = vld [vmem:[%s6494_s18 + $0x90] sm:$0xff]   ;;  %v6234_v52 = vld [vmem:[%s6494_s18 + $0x58] sm:$0xff]  }
 0xfcb   : > { %v3128_v28 = vadd.f32 %v3127_v0, %v3026_v2  ;;  %v3181_v15 = vadd.f32 %v3180_v22, %v3034_v20  ;;  %v3129_v39 = vpop.f32.mrb[37].mxu1  ;;  %v3182_v16 = vpop.f32.mrb[33].mxu0  ;;  %v6235_v55 = vld [vmem:[%s6494_s18 + $0xd8] sm:$0xff]   ;;  %v6241_v0 = vld [vmem:[%s6494_s18 + $0xa0] sm:$0xff]   ;;  %v6242_v22 = vld [vmem:[%s6494_s18 + $0x68] sm:$0xff]  }
 0xfcc   : > { %v3130_v12 = vadd.f32 %v3129_v39, %v6905_v8  ;;  %v3183_v18 = vadd.f32 %v3182_v16, %v6908_v9  ;;  %v3131_v6 = vpop.f32.mrb[38].mxu1  ;;  %v3184_v19 = vpop.f32.mrb[34].mxu0  ;;  %3437 = vmatprep.mubr.bf16.mxu1 %v3206_v60  ;;  %3486 = vmatprep.mubr.bf16.mxu0 %v3208_v61  ;;  %v6236_v57 = vld [vmem:[%s6494_s18 + $0x18] sm:$0xff]   ;;  %v6239_v60 = vld [vmem:[%s6494_s18 + $0xe0] sm:$0xff]   ;;  %v6249_v39 = vld [vmem:[%s6494_s18 + $0xb0] sm:$0xff]  }
 0xfcd   : > { %v3132_v41 = vadd.f32 %v3131_v6, %v3026_v2  ;;  %v3185_v42 = vadd.f32 %v3184_v19, %v3034_v20  ;;  %v3133_v21 = vpop.f32.mrb[39].mxu1  ;;  %v3186_v23 = vpop.f32.mrb[35].mxu0  ;;  %3438 = vmatmul.mubr.bf16.vlgmr.msra.gmra.mrb[40].mxu1 %v3205_v58  ;;  %3487 = vmatmul.mubr.bf16.vlgmr.msra.gmra.mrb[36].mxu0 %v3207_v59  ;;  %v3197_v30 = vmax.f32 %v3128_v28, 0.0  ;;  %v3199_v31 = vmax.f32 %v3181_v15, 0.0  ;;  %v6230_v20 = vld [vmem:[%s6494_s18 + $0x50] sm:$0xff]   ;;  %v6237_v58 = vld [vmem:[%s6494_s18 + $0x98] sm:$0xff]  }
 0xfce   : > { %v3134_v43 = vadd.f32 %v3133_v21, %v6905_v8  ;;  %v3187_v24 = vadd.f32 %v3186_v23, %v6908_v9  ;;  %5664 = vmatpush3.bf16.msra.mxu1 %v6224_v1  ;;  %5692 = vmatpush3.bf16.msra.mxu0 %v6225_v29  ;;  %v3198_v3 = vmax.f32 %v3130_v12, 0.0  ;;  %v3200_v7 = vmax.f32 %v3183_v18, 0.0  ;;  %v6238_v59 = vld [vmem:[%s6494_s18 + $0x60] sm:$0xff]   ;;  %v6245_v1 = vld [vmem:[%s6494_s18 + $0xa8] sm:$0xff]   ;;  %v6246_v29 = vld [vmem:[%s6494_s18 + $0x70] sm:$0xff]  }
 0xfcf   : > { %v3201_v35 = vmax.f32 %v3132_v41, 0.0  ;;  %v3203_v2 = vmax.f32 %v3185_v42, 0.0  ;;  %5665 = vmatprep.subr.bf16.mxu1 %v6226_v17  ;;  %5693 = vmatprep.subr.bf16.mxu0 %v6227_v10  ;;  %v6240_v61 = vld [vmem:[%s6494_s18 + $0x20] sm:$0xff]   ;;  %v6247_v28 = vld [vmem:[%s6494_s18 + $0xf0] sm:$0xff]   ;;  %v6250_v16 = vld [vmem:[%s6494_s18 + $0x78] sm:$0xff]  }
 0xfd0   : > { %v3202_v8 = vmax.f32 %v3134_v43, 0.0  ;;  %v3204_v9 = vmax.f32 %v3187_v24, 0.0  ;;  %v6248_v15 = vld [vmem:[%s6494_s18 + $0x30] sm:$0xff]   ;;  %v6251_v17 = vld [vmem:[%s6494_s18 + $0xf8] sm:$0xff]   ;;  %v5272_v10 = vld [vmem:[%s6489_s14 + $0x20] sm:$0xff] }
 0xfd1   : > { %v3209_v36 = vpack.c.bf16 %v3201_v35, %v3197_v30  ;;  %v3211_v46 = vpack.c.bf16 %v3203_v2, %v3199_v31  ;;  %v5274_v12 = vld [vmem:[%s6489_s14 + $0x60] sm:$0xff]  ;;  %v5273_v18 = vld [vmem:[%s6489_s14 + $0x28] sm:$0xff]  ;;  %v6252_v19 = vld [vmem:[%s6494_s18 + $0x38] sm:$0xff]  }
 0xfd2   : > { %v3210_v47 = vpack.c.bf16 %v3202_v8, %v3198_v3  ;;  %v3212_v48 = vpack.c.bf16 %v3204_v9, %v3200_v7  ;;  %5666 = vmatpush3.bf16.msra.mxu1 %v6228_v25  ;;  %5694 = vmatpush3.bf16.msra.mxu0 %v6229_v27  ;;  %v5275_v6 = vld [vmem:[%s6489_s14 + $0x68] sm:$0xff]  ;;  %v6253_v41 = vld [vmem:[%s6494_s18 + $0xb8] sm:$0xff]   ;;  %v5346_v42 = vcombine.high %v5272_v10, %v5274_v12  ;;  %v5276_v23 = vld [vmem:[%s6489_s14 + $0xa0] sm:$0xff] }
 0xfd3   : > { %5667 = vmatprep.subr.bf16.mxu1 %v6230_v20  ;;  %5695 = vmatprep.subr.bf16.mxu0 %v6231_v4  ;;  %v5348_v21 = vcombine.high %v5273_v18, %v5275_v6  ;;  %v5278_v43 = vld [vmem:[%s6489_s14 + $0xe0] sm:$0xff]  ;;  %v5277_v24 = vld [vmem:[%s6489_s14 + $0xa8] sm:$0xff]  ;;  %v5345_v27 = vcombine.low %v5272_v10, %v5274_v12  ;;  %v5347_v30 = vcombine.low %v5273_v18, %v5275_v6  ;;  %v6262_v7 = vld [vmem:[%s6494_s18 + $0x250] sm:$0xff]  }
 0xfd4   : > { %3445 = vmatprep.mubr.bf16.mxu1 %v3210_v47  ;;  %3494 = vmatprep.mubr.bf16.mxu0 %v3212_v48  ;;  %v5279_v25 = vld [vmem:[%s6489_s14 + $0xe8] sm:$0xff]  ;;  %v5350_v31 = vcombine.high %v5276_v23, %v5278_v43  ;;  %v5349_v2 = vcombine.low %v5276_v23, %v5278_v43  ;;  %v6263_v8 = vld [vmem:[%s6494_s18 + $0x2d0] sm:$0xff]   ;;  %v6267_v47 = vld [vmem:[%s6494_s18 + $0x2d8] sm:$0xff]  }
 0xfd5   : > { %3446 = vmatmul.mubr.bf16.gmra.mrb[44].mxu1 %v3209_v36  ;;  %3495 = vmatmul.mubr.bf16.gmra.mrb[40].mxu0 %v3211_v46  ;;  %v5352_v35 = vcombine.high %v5277_v24, %v5279_v25  ;;  %v5351_v20 = vcombine.low %v5277_v24, %v5279_v25  ;;  %v6260_v4 = vld [vmem:[%s6494_s18 + $0x208] sm:$0xff]   ;;  %v6264_v9 = vld [vmem:[%s6494_s18 + $0x210] sm:$0xff]   ;;  %v6266_v46 = vld [vmem:[%s6494_s18 + $0x258] sm:$0xff]  }
 0xfd6   : > { %5668 = vmatpush3.bf16.msra.mxu1 %v6232_v49  ;;  %5696 = vmatpush3.bf16.msra.mxu0 %v6233_v50  ;;  %v6261_v3 = vld [vmem:[%s6494_s18 + $0x288] sm:$0xff]   ;;  %v6265_v36 = vld [vmem:[%s6494_s18 + $0x290] sm:$0xff]   ;;  %v6268_v48 = vld [vmem:[%s6494_s18 + $0x218] sm:$0xff]  }
 0xfd7   : > { %3727 = vmatprep.mubr.bf16.mxu1 %v6897_v44  ;;  %3776 = vmatprep.mubr.bf16.mxu0 %v6899_v45  ;;  %v6243_v44 = vld [vmem:[%s6494_s18 + $0xe8] sm:$0xff]   ;;  %v6269_v49 = vld [vmem:[%s6494_s18 + $0x298] sm:$0xff]   ;;  %v6270_v50 = vld [vmem:[%s6494_s18 + $0x260] sm:$0xff]  }
 0xfd8   : > { %5669 = vmatprep.subr.bf16.mxu1 %v6234_v52  ;;  %5697 = vmatprep.subr.bf16.mxu0 %v6235_v55  ;;  %v6244_v45 = vld [vmem:[%s6494_s18 + $0x28] sm:$0xff]   ;;  %v6271_v52 = vld [vmem:[%s6494_s18 + $0x2e0] sm:$0xff]   ;;  %v7030_v18 = vld [vmem:[%s6489_s14 + $0x78] sm:$0xff] }
 0xfd9   : > { %v6272_v55 = vld [vmem:[%s6494_s18 + $0x220] sm:$0xff]  }
 0xfda   : > { %5670 = vmatpush3.bf16.msra.mxu1 %v6236_v57  ;;  %5698 = vmatpush3.bf16.msra.mxu0 %v6237_v58  ;;  %v6273_v57 = vld [vmem:[%s6494_s18 + $0x2a0] sm:$0xff]   ;;  %v6274_v58 = vld [vmem:[%s6494_s18 + $0x268] sm:$0xff]  }
 0xfdb   : > { %5671 = vmatprep.subr.bf16.mxu1 %v6238_v59  ;;  %5699 = vmatprep.subr.bf16.mxu0 %v6239_v60  ;;  %v6275_v59 = vld [vmem:[%s6494_s18 + $0x2e8] sm:$0xff]  }
 0xfdc   : > { %v6276_v60 = vld [vmem:[%s6494_s18 + $0x228] sm:$0xff]  }
 0xfde   : > { %5672 = vmatpush3.bf16.msra.mxu1 %v6240_v61  ;;  %5700 = vmatpush3.bf16.msra.mxu0 %v6241_v0  ;;  %v6277_v61 = vld [vmem:[%s6494_s18 + $0x2a8] sm:$0xff]   ;;  %v6278_v0 = vld [vmem:[%s6494_s18 + $0x270] sm:$0xff]  }
 0xfdf   : > { %5673 = vmatprep.subr.bf16.mxu1 %v6242_v22  ;;  %5701 = vmatprep.subr.bf16.mxu0 %v6243_v44  ;;  %v6279_v22 = vld [vmem:[%s6494_s18 + $0x2f0] sm:$0xff]  }
 0xfe0   : > { %v6280_v44 = vld [vmem:[%s6494_s18 + $0x230] sm:$0xff]  }
 0xfe2   : > { %5674 = vmatpush3.bf16.msra.mxu1 %v6244_v45  ;;  %5702 = vmatpush3.bf16.msra.mxu0 %v6245_v1  ;;  %v6281_v45 = vld [vmem:[%s6494_s18 + $0x2b0] sm:$0xff]   ;;  %v6282_v1 = vld [vmem:[%s6494_s18 + $0x278] sm:$0xff]  }
 0xfe3   : > { %5675 = vmatprep.subr.bf16.mxu1 %v6246_v29  ;;  %5703 = vmatprep.subr.bf16.mxu0 %v6247_v28  ;;  %v6283_v29 = vld [vmem:[%s6494_s18 + $0x2f8] sm:$0xff]  }
 0xfe4   : > { %v6284_v28 = vld [vmem:[%s6494_s18 + $0x238] sm:$0xff]  }
 0xfe6   : > { %5676 = vmatpush3.bf16.msra.mxu1 %v6248_v15  ;;  %5704 = vmatpush3.bf16.msra.mxu0 %v6249_v39  ;;  %v6285_v15 = vld [vmem:[%s6494_s18 + $0x2b8] sm:$0xff]   ;;  %v7017_v39 = vld [vmem:[%s6489_s14 + $0x30] sm:$0xff] }
 0xfe7   : > { %5677 = vmatprep.subr.bf16.mxu1 %v6250_v16  ;;  %5705 = vmatprep.subr.bf16.mxu0 %v6251_v17  ;;  %v7020_v16 = vld [vmem:[%s6489_s14 + $0x70] sm:$0xff]  ;;  %v7023_v17 = vld [vmem:[%s6489_s14 + $0x38] sm:$0xff] }
 0xfe8   : > { %v5462_v10 = vcombine.low %v7017_v39, %v7020_v16  ;;  %v5463_v12 = vcombine.high %v7017_v39, %v7020_v16  ;;  %v5464_v6 = vcombine.low %v7023_v17, %v7030_v18 }
 0xfea   : > { %5678 = vmatpush3.bf16.msra.mxu1 %v6252_v19  ;;  %5706 = vmatpush3.bf16.msra.mxu0 %v6253_v41  ;;  %v5465_v19 = vcombine.high %v7023_v17, %v7030_v18  ;;  %v6288_v18 = vld [vmem:[%s6494_s18 + $0x300] sm:$0xff]  }
 0xfeb   : > { %3930 = vmatprep.subr.bf16.mxu1 %v5346_v42  ;;  %3983 = vmatprep.subr.bf16.mxu0 %v5348_v21 }
 0xfed   : > { %3728 = vmatmul.mubr.bf16.vlgmr.msra.gmra.mrb[48].mxu1 %v6893_v37  ;;  %3777 = vmatmul.mubr.bf16.vlgmr.msra.gmra.mrb[44].mxu0 %v6895_v33  ;;  %v6254_v37 = vld [vmem:[%s6494_s18 + $0x240] sm:$0xff]  }
 0xfee   : > { %3735 = vmatprep.mubr.bf16.mxu1 %v6914_v13  ;;  %3784 = vmatprep.mubr.bf16.mxu0 %v6916_v14  ;;  %v6255_v33 = vld [vmem:[%s6494_s18 + $0x2c0] sm:$0xff]   ;;  %v6258_v13 = vld [vmem:[%s6494_s18 + $0x248] sm:$0xff]  }
 0xfef   : > { %3931 = vmatpush1.bf16.msra.mxu1 %v5345_v27  ;;  %3984 = vmatpush1.bf16.msra.mxu0 %v5347_v30  ;;  %v6259_v14 = vld [vmem:[%s6494_s18 + $0x2c8] sm:$0xff]  }
 0xff0   : > { %3932 = vmatprep.subr.bf16.mxu1 %v5350_v31  ;;  %3985 = vmatprep.subr.bf16.mxu0 %v5352_v35 }
 0xff3   : > { %3933 = vmatpush1.bf16.msra.mxu1 %v5349_v2  ;;  %3986 = vmatpush1.bf16.msra.mxu0 %v5351_v20 }
 0xff4   : > { %5719 = vmatprep.subr.bf16.mxu1 %v6254_v37  ;;  %5747 = vmatprep.subr.bf16.mxu0 %v6255_v33 }
 0xff5   : > { %3736 = vmatmul.mubr.bf16.gmra.mrb[52].mxu1 %v6910_v62  ;;  %3785 = vmatmul.mubr.bf16.gmra.mrb[48].mxu0 %v6912_v63  ;;  %v6256_v62 = vld [vmem:[%s6494_s18 + $0x200] sm:$0xff]  }
 0xff6   : > { %3962 = vmatprep.mubr.bf16.mxu1 %v6423_v32  ;;  %4015 = vmatprep.mubr.bf16.mxu0 %v6423_v32  ;;  %v6257_v63 = vld [vmem:[%s6494_s18 + $0x280] sm:$0xff]  }
 0xffd   : > { %5353 = vmatmul.mubr.msk.bf16.vlgmr.msra.gmra.mrb[56].mxu1 %vm381_vm1, %v6828_v34  ;;  %5355 = vmatmul.mubr.msk.bf16.vlgmr.msra.gmra.mrb[52].mxu0 %vm381_vm1, %v6828_v34 }
 0xffe   : > { %3972 = vmatprep.mubr.bf16.mxu1 %v6423_v32  ;;  %4025 = vmatprep.mubr.bf16.mxu0 %v6423_v32 }
 0xfff   : > { %5720 = vmatpush3.bf16.msra.mxu1 %v6256_v62  ;;  %5748 = vmatpush3.bf16.msra.mxu0 %v6257_v63 }
0x1000   : > { %5721 = vmatprep.subr.bf16.mxu1 %v6258_v13  ;;  %5749 = vmatprep.subr.bf16.mxu0 %v6259_v14 }
0x1003   : > { %5722 = vmatpush3.bf16.msra.mxu1 %v6260_v4  ;;  %5750 = vmatpush3.bf16.msra.mxu0 %v6261_v3 }
0x1004   : > { %5723 = vmatprep.subr.bf16.mxu1 %v6262_v7  ;;  %5751 = vmatprep.subr.bf16.mxu0 %v6263_v8 }
0x1005   : > { %5354 = vmatmul.mubr.msk.bf16.gmra.mrb[60].mxu1 %vm381_vm1, %v6838_v26  ;;  %5356 = vmatmul.mubr.msk.bf16.gmra.mrb[56].mxu0 %vm381_vm1, %v6838_v26 }
0x1007   : > { %5724 = vmatpush3.bf16.msra.mxu1 %v6264_v9  ;;  %5752 = vmatpush3.bf16.msra.mxu0 %v6265_v36 }
0x1008   : > { %5725 = vmatprep.subr.bf16.mxu1 %v6266_v46  ;;  %5753 = vmatprep.subr.bf16.mxu0 %v6267_v47 }
0x100b   : > { %5726 = vmatpush3.bf16.msra.mxu1 %v6268_v48  ;;  %5754 = vmatpush3.bf16.msra.mxu0 %v6269_v49 }
0x100c   : > { %5727 = vmatprep.subr.bf16.mxu1 %v6270_v50  ;;  %5755 = vmatprep.subr.bf16.mxu0 %v6271_v52 }
0x100f   : > { %5728 = vmatpush3.bf16.msra.mxu1 %v6272_v55  ;;  %5756 = vmatpush3.bf16.msra.mxu0 %v6273_v57 }
0x1010   : > { %5729 = vmatprep.subr.bf16.mxu1 %v6274_v58  ;;  %5757 = vmatprep.subr.bf16.mxu0 %v6275_v59 }
0x1013   : > { %5730 = vmatpush3.bf16.msra.mxu1 %v6276_v60  ;;  %5758 = vmatpush3.bf16.msra.mxu0 %v6277_v61 }
0x1014   : > { %5731 = vmatprep.subr.bf16.mxu1 %v6278_v0  ;;  %5759 = vmatprep.subr.bf16.mxu0 %v6279_v22 }
0x1017   : > { %5732 = vmatpush3.bf16.msra.mxu1 %v6280_v44  ;;  %5760 = vmatpush3.bf16.msra.mxu0 %v6281_v45 }
0x1018   : > { %5733 = vmatprep.subr.bf16.mxu1 %v6282_v1  ;;  %5761 = vmatprep.subr.bf16.mxu0 %v6283_v29 }
0x101b   : > { %5734 = vmatpush3.bf16.msra.mxu1 %v6284_v28  ;;  %5762 = vmatpush3.bf16.msra.mxu0 %v6285_v15 }
0x101c   : > { %4491 = vmatprep.subr.bf16.mxu1 %v5463_v12  ;;  %4544 = vmatprep.subr.bf16.mxu0 %v5465_v19 }
0x10a0   : > { %v5623_v41 = vpop.f32.mrb[40].mxu1  ;;  %v5651_v42 = vpop.f32.mrb[36].mxu0 }
0x10a1   : > { %v5624_v21 = vpop.f32.mrb[41].mxu1  ;;  %v5652_v23 = vpop.f32.mrb[37].mxu0 }
0x10a2   : > { %v5625_v43 = vadd.f32 %v5624_v21, %v5623_v41  ;;  %v5653_v24 = vadd.f32 %v5652_v23, %v5651_v42  ;;  %v5626_v25 = vpop.f32.mrb[42].mxu1  ;;  %v5654_v27 = vpop.f32.mrb[38].mxu0 }
0x10a3   : > { %v5627_v30 = vpop.f32.mrb[43].mxu1  ;;  %v5655_v31 = vpop.f32.mrb[39].mxu0 }
0x10a4   : > { %v3489_v35 = vadd.f32 %v5653_v24, %v5625_v43  ;;  %v5628_v2 = vadd.f32 %v5627_v30, %v5626_v25  ;;  %v5656_v20 = vadd.f32 %v5655_v31, %v5654_v27  ;;  %v5280_v24 = vld [vmem:[%s6504_s29 + $0x8] sm:$0xf] }
0x10a6   : > { %v3492_v37 = vadd.f32 %v5656_v20, %v5628_v2  ;;  %v3873_v2 = vrot.slane %v5280_v24, %v6546_v54  ;;  %v3881_v20 = vrot.slane %v5280_v24, %v6561_v11 }
0x10a8   : > { %v5629_v33 = vpop.f32.mrb[44].mxu1  ;;  %v5657_v62 = vpop.f32.mrb[40].mxu0 }
0x10a9   : > { %v5630_v63 = vpop.f32.mrb[45].mxu1  ;;  %v5658_v13 = vpop.f32.mrb[41].mxu0 }
0x10aa   : > { %v5631_v14 = vadd.f32 %v5630_v63, %v5629_v33  ;;  %v5659_v4 = vadd.f32 %v5658_v13, %v5657_v62  ;;  %v5632_v3 = vpop.f32.mrb[46].mxu1  ;;  %v5660_v7 = vpop.f32.mrb[42].mxu0  ;;  %v3877_v62 = vrot.slane %v5280_v24, %v6549_v56  ;;  %v3885_v63 = vrot.slane %v5280_v24, %v6538_v40 }
0x10ab   : > { %v5633_v8 = vpop.f32.mrb[47].mxu1  ;;  %v5661_v9 = vpop.f32.mrb[43].mxu0 }
0x10ac   : > { %v3497_v36 = vadd.f32 %v5659_v4, %v5631_v14  ;;  %v5634_v46 = vadd.f32 %v5633_v8, %v5632_v3  ;;  %v5662_v47 = vadd.f32 %v5661_v9, %v5660_v7 }
0x10ae   : > { %v3500_v48 = vadd.f32 %v5662_v47, %v5634_v46 }
0x10c0   : > { %v5679_v49 = vpop.f32.mrb[48].mxu1  ;;  %v5707_v50 = vpop.f32.mrb[44].mxu0 }
0x10c1   : > { %v5680_v52 = vpop.f32.mrb[49].mxu1  ;;  %v5708_v55 = vpop.f32.mrb[45].mxu0 }
0x10c2   : > { %v5681_v57 = vadd.f32 %v5680_v52, %v5679_v49  ;;  %v5709_v58 = vadd.f32 %v5708_v55, %v5707_v50  ;;  %v5682_v59 = vpop.f32.mrb[50].mxu1  ;;  %v5710_v60 = vpop.f32.mrb[46].mxu0 }
0x10c3   : > { %v5683_v61 = vpop.f32.mrb[51].mxu1  ;;  %v5711_v0 = vpop.f32.mrb[47].mxu0 }
0x10c4   : > { %v3730_v22 = vadd.f32 %v5681_v57, %v3489_v35  ;;  %v5684_v44 = vadd.f32 %v5683_v61, %v5682_v59  ;;  %v5712_v45 = vadd.f32 %v5711_v0, %v5710_v60 }
0x10c6   : > { %v7036_v1 = vadd.f32 %v5709_v58, %v3730_v22  ;;  %v3733_v29 = vadd.f32 %v5684_v44, %v3492_v37  ;;  %v5393_v22 = vld [vmem:[%s6489_s14 + $0xb0] sm:$0xff] }
0x10c7   : > { %v5395_v44 = vld [vmem:[%s6489_s14 + $0xf0] sm:$0xff] }
0x10c8   : > { %v7038_v28 = vadd.f32 %v5712_v45, %v3733_v29  ;;  %v5685_v15 = vpop.f32.mrb[52].mxu1  ;;  %v5713_v12 = vpop.f32.mrb[48].mxu0 }
0x10c9   : > { %v5686_v19 = vpop.f32.mrb[53].mxu1  ;;  %v5714_v41 = vpop.f32.mrb[49].mxu0 }
0x10ca   : > { %v5687_v42 = vadd.f32 %v5686_v19, %v5685_v15  ;;  %v5715_v21 = vadd.f32 %v5714_v41, %v5713_v12  ;;  %v5688_v23 = vpop.f32.mrb[54].mxu1  ;;  %v5716_v43 = vpop.f32.mrb[50].mxu0  ;;  %v5394_v19 = vld [vmem:[%s6489_s14 + $0xb8] sm:$0xff] }
0x10cb   : > { %v5689_v25 = vpop.f32.mrb[55].mxu1  ;;  %v5717_v27 = vpop.f32.mrb[51].mxu0  ;;  %v5396_v41 = vld [vmem:[%s6489_s14 + $0xf8] sm:$0xff] }
0x10cc   : > { %v3738_v30 = vadd.f32 %v5687_v42, %v3497_v36  ;;  %v5690_v31 = vadd.f32 %v5689_v25, %v5688_v23  ;;  %v5718_v35 = vadd.f32 %v5717_v27, %v5716_v43 }
0x10ce   : > { %v7043_v37 = vadd.f32 %v5715_v21, %v3738_v30  ;;  %v3741_v33 = vadd.f32 %v5690_v31, %v3500_v48 }
0x10d0   : > { %v7047_v13 = vadd.f32 %v5718_v35, %v3741_v33  ;;  %v3964_v14 = vpop.f32.mrb[56].mxu1  ;;  %v4017_v4 = vpop.f32.mrb[52].mxu0  ;;  %v5467_v33 = vcombine.high %v5393_v22, %v5395_v44 }
0x10d1   : > { %v3965_v3 = vadd.f32 %v3964_v14, %v3873_v2  ;;  %v4018_v7 = vadd.f32 %v4017_v4, %v3881_v20  ;;  %v3966_v8 = vpop.f32.mrb[57].mxu1  ;;  %v4019_v9 = vpop.f32.mrb[53].mxu0  ;;  %v5469_v14 = vcombine.high %v5394_v19, %v5396_v41 }
0x10d2   : > { %v3967_v36 = vadd.f32 %v3966_v8, %v3877_v62  ;;  %v4020_v46 = vadd.f32 %v4019_v9, %v3885_v63  ;;  %v3968_v47 = vpop.f32.mrb[58].mxu1  ;;  %v4021_v49 = vpop.f32.mrb[54].mxu0 }
0x10d3   : > { %v3969_v50 = vadd.f32 %v3968_v47, %v3873_v2  ;;  %v4022_v48 = vadd.f32 %v4021_v49, %v3881_v20  ;;  %v3970_v52 = vpop.f32.mrb[59].mxu1  ;;  %v4023_v55 = vpop.f32.mrb[55].mxu0  ;;  %v4036_v59 = vmax.f32 %v3965_v3, 0.0  ;;  %v4038_v60 = vmax.f32 %v4018_v7, 0.0 }
0x10d4   : > { %v3971_v57 = vadd.f32 %v3970_v52, %v3877_v62  ;;  %v4024_v58 = vadd.f32 %v4023_v55, %v3885_v63  ;;  %v4037_v45 = vmax.f32 %v3967_v36, 0.0  ;;  %v4039_v29 = vmax.f32 %v4020_v46, 0.0 }
0x10d5   : > { %v4040_v61 = vmax.f32 %v3969_v50, 0.0  ;;  %v4042_v0 = vmax.f32 %v4022_v48, 0.0  ;;  %v5466_v49 = vcombine.low %v5393_v22, %v5395_v44  ;;  %v5468_v52 = vcombine.low %v5394_v19, %v5396_v41  ;;  %v6291_v22 = vld [vmem:[%s6494_s18 + $0x3c8] sm:$0xff]   ;;  %v6300_v19 = vld [vmem:[%s6494_s18 + $0x318] sm:$0xff]  }
0x10d6   : > { %v4041_v15 = vmax.f32 %v3971_v57, 0.0  ;;  %v4043_v12 = vmax.f32 %v4024_v58, 0.0  ;;  %v6286_v58 = vld [vmem:[%s6494_s18 + $0x340] sm:$0xff]   ;;  %v6293_v44 = vld [vmem:[%s6494_s18 + $0x388] sm:$0xff]   ;;  %v6301_v41 = vld [vmem:[%s6494_s18 + $0x398] sm:$0xff]  }
0x10d7   : > { %v4052_v42 = vpack.c.bf16 %v4040_v61, %v4036_v59  ;;  %v4054_v21 = vpack.c.bf16 %v4042_v0, %v4038_v60  ;;  %v6287_v59 = vld [vmem:[%s6494_s18 + $0x3c0] sm:$0xff]   ;;  %v6290_v0 = vld [vmem:[%s6494_s18 + $0x348] sm:$0xff]  }
0x10d8   : > { %v4053_v23 = vpack.c.bf16 %v4041_v15, %v4037_v45  ;;  %v4055_v43 = vpack.c.bf16 %v4043_v12, %v4039_v29  ;;  %v3974_v24 = vpop.f32.mrb[60].mxu1  ;;  %v4027_v25 = vpop.f32.mrb[56].mxu0  ;;  %v6294_v45 = vld [vmem:[%s6494_s18 + $0x350] sm:$0xff]   ;;  %v6298_v12 = vld [vmem:[%s6494_s18 + $0x358] sm:$0xff]  }
0x10d9   : > { %v3975_v27 = vadd.f32 %v3974_v24, %v3873_v2  ;;  %v4028_v30 = vadd.f32 %v4027_v25, %v3881_v20  ;;  %v3976_v31 = vpop.f32.mrb[61].mxu1  ;;  %v4029_v35 = vpop.f32.mrb[57].mxu0  ;;  %v6296_v29 = vld [vmem:[%s6494_s18 + $0x310] sm:$0xff]   ;;  %v6306_v24 = vld [vmem:[%s6494_s18 + $0x368] sm:$0xff]  }
0x10da   : > { %v3977_v4 = vadd.f32 %v3976_v31, %v3877_v62  ;;  %v4030_v3 = vadd.f32 %v4029_v35, %v3885_v63  ;;  %v3978_v7 = vpop.f32.mrb[62].mxu1  ;;  %v4031_v8 = vpop.f32.mrb[58].mxu0  ;;  %4284 = vmatprep.mubr.bf16.mxu1 %v4053_v23  ;;  %4333 = vmatprep.mubr.bf16.mxu0 %v4055_v43  ;;  %v6297_v15 = vld [vmem:[%s6494_s18 + $0x390] sm:$0xff]   ;;  %v6304_v23 = vld [vmem:[%s6494_s18 + $0x320] sm:$0xff]   ;;  %v6307_v25 = vld [vmem:[%s6494_s18 + $0x3e8] sm:$0xff]  }
0x10db   : > { %v3979_v9 = vadd.f32 %v3978_v7, %v3873_v2  ;;  %v4032_v36 = vadd.f32 %v4031_v8, %v3881_v20  ;;  %v3980_v46 = vpop.f32.mrb[63].mxu1  ;;  %v4033_v47 = vpop.f32.mrb[59].mxu0  ;;  %4285 = vmatmul.mubr.bf16.vlgmr.msra.gmra.mrb[64].mxu1 %v4052_v42  ;;  %4334 = vmatmul.mubr.bf16.vlgmr.msra.gmra.mrb[60].mxu0 %v4054_v21  ;;  %v4044_v2 = vmax.f32 %v3975_v27, 0.0  ;;  %v4046_v20 = vmax.f32 %v4028_v30, 0.0  ;;  %v6302_v42 = vld [vmem:[%s6494_s18 + $0x360] sm:$0xff]   ;;  %v6308_v27 = vld [vmem:[%s6494_s18 + $0x328] sm:$0xff]  }
0x10dc   : > { %v3981_v50 = vadd.f32 %v3980_v46, %v3877_v62  ;;  %v4034_v48 = vadd.f32 %v4033_v47, %v3885_v63  ;;  %4492 = vmatpush1.bf16.msra.mxu1 %v5462_v10  ;;  %4545 = vmatpush1.bf16.msra.mxu0 %v5464_v6  ;;  %v4045_v60 = vmax.f32 %v3977_v4, 0.0  ;;  %v4047_v62 = vmax.f32 %v4030_v3, 0.0  ;;  %v6289_v6 = vld [vmem:[%s6494_s18 + $0x380] sm:$0xff]   ;;  %v6309_v30 = vld [vmem:[%s6494_s18 + $0x3a8] sm:$0xff]   ;;  %v6310_v31 = vld [vmem:[%s6494_s18 + $0x370] sm:$0xff]  }
0x10dd   : > { %v4048_v55 = vmax.f32 %v3979_v9, 0.0  ;;  %v4050_v57 = vmax.f32 %v4032_v36, 0.0  ;;  %4493 = vmatprep.subr.bf16.mxu1 %v5467_v33  ;;  %4546 = vmatprep.subr.bf16.mxu0 %v5469_v14  ;;  %v6303_v21 = vld [vmem:[%s6494_s18 + $0x3e0] sm:$0xff]   ;;  %v6311_v35 = vld [vmem:[%s6494_s18 + $0x3f0] sm:$0xff]   ;;  %v6314_v4 = vld [vmem:[%s6494_s18 + $0x378] sm:$0xff]  }
0x10de   : > { %v4049_v63 = vmax.f32 %v3981_v50, 0.0  ;;  %v4051_v61 = vmax.f32 %v4034_v48, 0.0  ;;  %v6305_v43 = vld [vmem:[%s6494_s18 + $0x3a0] sm:$0xff]   ;;  %v6312_v33 = vld [vmem:[%s6494_s18 + $0x330] sm:$0xff]   ;;  %v6315_v3 = vld [vmem:[%s6494_s18 + $0x3f8] sm:$0xff]  }
0x10df   : > { %v4056_v39 = vpack.c.bf16 %v4048_v55, %v4044_v2  ;;  %v4058_v16 = vpack.c.bf16 %v4050_v57, %v4046_v20  ;;  %v6313_v14 = vld [vmem:[%s6494_s18 + $0x3b0] sm:$0xff]   ;;  %v6316_v7 = vld [vmem:[%s6494_s18 + $0x338] sm:$0xff]  }
0x10e0   : > { %v4057_v17 = vpack.c.bf16 %v4049_v63, %v4045_v60  ;;  %v4059_v10 = vpack.c.bf16 %v4051_v61, %v4047_v62  ;;  %4494 = vmatpush1.bf16.msra.mxu1 %v5466_v49  ;;  %4547 = vmatpush1.bf16.msra.mxu0 %v5468_v52  ;;  %v6317_v8 = vld [vmem:[%s6494_s18 + $0x3b8] sm:$0xff]  }
0x10e1   : > { %5775 = vmatprep.subr.bf16.mxu1 %v6286_v58  ;;  %5803 = vmatprep.subr.bf16.mxu0 %v6287_v59 }
0x10e2   : > { %4292 = vmatprep.mubr.bf16.mxu1 %v4057_v17  ;;  %4341 = vmatprep.mubr.bf16.mxu0 %v4059_v10 }
0x10e3   : > { %4293 = vmatmul.mubr.bf16.gmra.mrb[68].mxu1 %v4056_v39  ;;  %4342 = vmatmul.mubr.bf16.gmra.mrb[64].mxu0 %v4058_v16 }
0x10e4   : > { %4523 = vmatprep.mubr.bf16.mxu1 %v6423_v32  ;;  %4576 = vmatprep.mubr.bf16.mxu0 %v6423_v32 }
0x10eb   : > { %5470 = vmatmul.mubr.msk.bf16.vlgmr.msra.gmra.mrb[72].mxu1 %vm381_vm1, %v6828_v34  ;;  %5472 = vmatmul.mubr.msk.bf16.vlgmr.msra.gmra.mrb[68].mxu0 %vm381_vm1, %v6828_v34  ;;  %v6292_v34 = vld [vmem:[%s6494_s18 + $0x308] sm:$0xff]  }
0x10ec   : > { %4533 = vmatprep.mubr.bf16.mxu1 %v6423_v32  ;;  %4586 = vmatprep.mubr.bf16.mxu0 %v6423_v32  ;;  %v6295_v32 = vld [vmem:[%s6494_s18 + $0x3d0] sm:$0xff]  }
0x10ed   : > { %5776 = vmatpush3.bf16.msra.mxu1 %v6288_v18  ;;  %5804 = vmatpush3.bf16.msra.mxu0 %v6289_v6 }
0x10ee   : > { %5777 = vmatprep.subr.bf16.mxu1 %v6290_v0  ;;  %5805 = vmatprep.subr.bf16.mxu0 %v6291_v22  ;;  %v5397_v0 = vld [vmem:[%s6504_s29 + $0xc] sm:$0xf] }
0x10f1   : > { %5778 = vmatpush3.bf16.msra.mxu1 %v6292_v34  ;;  %5806 = vmatpush3.bf16.msra.mxu0 %v6293_v44 }
0x10f2   : > { %5779 = vmatprep.subr.bf16.mxu1 %v6294_v45  ;;  %5807 = vmatprep.subr.bf16.mxu0 %v6295_v32 }
0x10f3   : > { %5471 = vmatmul.mubr.msk.bf16.gmra.mrb[76].mxu1 %vm381_vm1, %v6838_v26  ;;  %5473 = vmatmul.mubr.msk.bf16.gmra.mrb[72].mxu0 %vm381_vm1, %v6838_v26  ;;  %v6299_v26 = vld [vmem:[%s6494_s18 + $0x3d8] sm:$0xff]  }
0x10f5   : > { %5780 = vmatpush3.bf16.msra.mxu1 %v6296_v29  ;;  %5808 = vmatpush3.bf16.msra.mxu0 %v6297_v15  ;;  %v4442_v29 = vrot.slane %v5397_v0, %v6561_v11 }
0x10f6   : > { %5781 = vmatprep.subr.bf16.mxu1 %v6298_v12  ;;  %5809 = vmatprep.subr.bf16.mxu0 %v6299_v26  ;;  %v4438_v12 = vrot.slane %v5397_v0, %v6549_v56  ;;  %v4446_v26 = vrot.slane %v5397_v0, %v6538_v40 }
0x10f9   : > { %5782 = vmatpush3.bf16.msra.mxu1 %v6300_v19  ;;  %5810 = vmatpush3.bf16.msra.mxu0 %v6301_v41 }
0x10fa   : > { %5783 = vmatprep.subr.bf16.mxu1 %v6302_v42  ;;  %5811 = vmatprep.subr.bf16.mxu0 %v6303_v21 }
0x10fd   : > { %5784 = vmatpush3.bf16.msra.mxu1 %v6304_v23  ;;  %5812 = vmatpush3.bf16.msra.mxu0 %v6305_v43 }
0x10fe   : > { %5785 = vmatprep.subr.bf16.mxu1 %v6306_v24  ;;  %5813 = vmatprep.subr.bf16.mxu0 %v6307_v25 }
0x1101   : > { %5786 = vmatpush3.bf16.msra.mxu1 %v6308_v27  ;;  %5814 = vmatpush3.bf16.msra.mxu0 %v6309_v30 }
0x1102   : > { %5787 = vmatprep.subr.bf16.mxu1 %v6310_v31  ;;  %5815 = vmatprep.subr.bf16.mxu0 %v6311_v35 }
0x1105   : > { %5788 = vmatpush3.bf16.msra.mxu1 %v6312_v33  ;;  %5816 = vmatpush3.bf16.msra.mxu0 %v6313_v14 }
0x1106   : > { %5789 = vmatprep.subr.bf16.mxu1 %v6314_v4  ;;  %5817 = vmatprep.subr.bf16.mxu0 %v6315_v3 }
0x1109   : > { %5790 = vmatpush3.bf16.msra.mxu1 %v6316_v7  ;;  %5818 = vmatpush3.bf16.msra.mxu0 %v6317_v8 }
0x11ae   : > { %v5735_v9 = vpop.f32.mrb[64].mxu1  ;;  %v5763_v36 = vpop.f32.mrb[60].mxu0 }
0x11af   : > { %v5736_v46 = vpop.f32.mrb[65].mxu1  ;;  %v5764_v47 = vpop.f32.mrb[61].mxu0 }
0x11b0   : > { %v5737_v49 = vadd.f32 %v5736_v46, %v5735_v9  ;;  %v5765_v50 = vadd.f32 %v5764_v47, %v5763_v36  ;;  %v5738_v48 = vpop.f32.mrb[66].mxu1  ;;  %v5766_v52 = vpop.f32.mrb[62].mxu0 }
0x11b1   : > { %v5739_v2 = vpop.f32.mrb[67].mxu1  ;;  %v5767_v20 = vpop.f32.mrb[63].mxu0 }
0x11b2   : > { %v4336_v55 = vadd.f32 %v5765_v50, %v5737_v49  ;;  %v5740_v57 = vadd.f32 %v5739_v2, %v5738_v48  ;;  %v5768_v58 = vadd.f32 %v5767_v20, %v5766_v52 }
0x11b4   : > { %v7104_v59 = vadd.f32 %v4336_v55, %v7036_v1  ;;  %v4339_v60 = vadd.f32 %v5768_v58, %v5740_v57  ;;  %v4434_v1 = vrot.slane %v5397_v0, %v6546_v54 }
0x11b6   : > { %v7107_v62 = vadd.f32 %v4339_v60, %v7038_v28  ;;  %v5741_v63 = vpop.f32.mrb[68].mxu1  ;;  %v5769_v61 = vpop.f32.mrb[64].mxu0 }
0x11b7   : > { %v5742_v39 = vpop.f32.mrb[69].mxu1  ;;  %v5770_v16 = vpop.f32.mrb[65].mxu0 }
0x11b8   : > { %v5743_v17 = vadd.f32 %v5742_v39, %v5741_v63  ;;  %v5771_v10 = vadd.f32 %v5770_v16, %v5769_v61  ;;  %v5744_v18 = vpop.f32.mrb[70].mxu1  ;;  %v5772_v6 = vpop.f32.mrb[66].mxu0 }
0x11b9   : > { %v5745_v22 = vpop.f32.mrb[71].mxu1  ;;  %v5773_v34 = vpop.f32.mrb[67].mxu0 }
0x11ba   : > { %v4344_v44 = vadd.f32 %v5771_v10, %v5743_v17  ;;  %v5746_v45 = vadd.f32 %v5745_v22, %v5744_v18  ;;  %v5774_v32 = vadd.f32 %v5773_v34, %v5772_v6 }
0x11bc   : > { %v7113_v28 = vadd.f32 %v4344_v44, %v7043_v37  ;;  %v4347_v15 = vadd.f32 %v5774_v32, %v5746_v45 }
0x11be   : > { %v7118_v19 = vadd.f32 %v4347_v15, %v7047_v13  ;;  %v4525_v41 = vpop.f32.mrb[72].mxu1  ;;  %v4578_v42 = vpop.f32.mrb[68].mxu0 }
0x11bf   : > { %v4526_v21 = vadd.f32 %v4525_v41, %v4434_v1  ;;  %v4579_v23 = vadd.f32 %v4578_v42, %v4442_v29  ;;  %v4527_v43 = vpop.f32.mrb[73].mxu1  ;;  %v4580_v24 = vpop.f32.mrb[69].mxu0 }
0x11c0   : > { %v4528_v54 = vadd.f32 %v4527_v43, %v4438_v12  ;;  %v4581_v25 = vadd.f32 %v4580_v24, %v4446_v26  ;;  %v4529_v11 = vpop.f32.mrb[74].mxu1  ;;  %v4582_v27 = vpop.f32.mrb[70].mxu0 }
0x11c1   : > { %v4530_v37 = vadd.f32 %v4529_v11, %v4434_v1  ;;  %v4583_v30 = vadd.f32 %v4582_v27, %v4442_v29  ;;  %v4531_v31 = vpop.f32.mrb[75].mxu1  ;;  %v4584_v35 = vpop.f32.mrb[71].mxu0  ;;  %v4597_v40 = vmax.f32 %v4526_v21, 0.0  ;;  %v4599_v14 = vmax.f32 %v4579_v23, 0.0 }
0x11c2   : > { %v4532_v56 = vadd.f32 %v4531_v31, %v4438_v12  ;;  %v4585_v33 = vadd.f32 %v4584_v35, %v4446_v26  ;;  %v4598_v3 = vmax.f32 %v4528_v54, 0.0  ;;  %v4600_v7 = vmax.f32 %v4581_v25, 0.0  ;;  %v5506_v35 = vld [vmem:[%s6499_s22 + $0x8] ss:$0 sm:$0xff] }
0x11c3   : > { %v4601_v13 = vmax.f32 %v4530_v37, 0.0  ;;  %v4603_v4 = vmax.f32 %v4583_v30, 0.0 }
0x11c4   : > { %v4602_v8 = vmax.f32 %v4532_v56, 0.0  ;;  %v4604_v9 = vmax.f32 %v4585_v33, 0.0 }
0x11c5   : > { %v4613_v36 = vpack.c.bf16 %v4601_v13, %v4597_v40  ;;  %v4615_v46 = vpack.c.bf16 %v4603_v4, %v4599_v14 }
0x11c6   : > { %v4614_v47 = vpack.c.bf16 %v4602_v8, %v4598_v3  ;;  %v4616_v49 = vpack.c.bf16 %v4604_v9, %v4600_v7  ;;  %v4535_v50 = vpop.f32.mrb[76].mxu1  ;;  %v4588_v48 = vpop.f32.mrb[72].mxu0 }
0x11c7   : > { %v4536_v52 = vadd.f32 %v4535_v50, %v4434_v1  ;;  %v4589_v2 = vadd.f32 %v4588_v48, %v4442_v29  ;;  %v4537_v20 = vpop.f32.mrb[77].mxu1  ;;  %v4590_v55 = vpop.f32.mrb[73].mxu0 }
0x11c8   : > { %v4538_v57 = vadd.f32 %v4537_v20, %v4438_v12  ;;  %v4591_v58 = vadd.f32 %v4590_v55, %v4446_v26  ;;  %v4539_v60 = vpop.f32.mrb[78].mxu1  ;;  %v4592_v63 = vpop.f32.mrb[74].mxu0  ;;  %4845 = vmatprep.mubr.bf16.mxu1 %v4614_v47  ;;  %4894 = vmatprep.mubr.bf16.mxu0 %v4616_v49 }
0x11c9   : > { %v4540_v61 = vadd.f32 %v4539_v60, %v4434_v1  ;;  %v4593_v39 = vadd.f32 %v4592_v63, %v4442_v29  ;;  %v4541_v16 = vpop.f32.mrb[79].mxu1  ;;  %v4594_v17 = vpop.f32.mrb[75].mxu0  ;;  %4846 = vmatmul.mubr.bf16.vlgmr.msra.gmra.mrb[80].mxu1 %v4613_v36  ;;  %4895 = vmatmul.mubr.bf16.vlgmr.msra.gmra.mrb[76].mxu0 %v4615_v46  ;;  %v4605_v6 = vmax.f32 %v4536_v52, 0.0  ;;  %v4607_v0 = vmax.f32 %v4589_v2, 0.0 }
0x11ca   : > { %v4542_v10 = vadd.f32 %v4541_v16, %v4438_v12  ;;  %v4595_v18 = vadd.f32 %v4594_v17, %v4446_v26  ;;  %v4606_v44 = vmax.f32 %v4538_v57, 0.0  ;;  %v4608_v45 = vmax.f32 %v4591_v58, 0.0 }
0x11cb   : > { %v4609_v22 = vmax.f32 %v4540_v61, 0.0  ;;  %v4611_v34 = vmax.f32 %v4593_v39, 0.0 }
0x11cc   : > { %v4610_v32 = vmax.f32 %v4542_v10, 0.0  ;;  %v4612_v15 = vmax.f32 %v4595_v18, 0.0 }
0x11cd   : > { %v4617_v41 = vpack.c.bf16 %v4609_v22, %v4605_v6  ;;  %v4619_v42 = vpack.c.bf16 %v4611_v34, %v4607_v0 }
0x11ce   : > { %v4618_v21 = vpack.c.bf16 %v4610_v32, %v4606_v44  ;;  %v4620_v23 = vpack.c.bf16 %v4612_v15, %v4608_v45 }
0x11d0   : > { %4853 = vmatprep.mubr.bf16.mxu1 %v4618_v21  ;;  %4902 = vmatprep.mubr.bf16.mxu0 %v4620_v23 }
0x11d1   : > { %4854 = vmatmul.mubr.bf16.gmra.mrb[84].mxu1 %v4617_v41  ;;  %4903 = vmatmul.mubr.bf16.gmra.mrb[80].mxu0 %v4619_v42 }
0x129c   : > { %v5791_v1 = vpop.f32.mrb[80].mxu1  ;;  %v5819_v29 = vpop.f32.mrb[76].mxu0 }
0x129d   : > { %v5792_v12 = vpop.f32.mrb[81].mxu1  ;;  %v5820_v26 = vpop.f32.mrb[77].mxu0 }
0x129e   : > { %v5793_v43 = vadd.f32 %v5792_v12, %v5791_v1  ;;  %v5821_v24 = vadd.f32 %v5820_v26, %v5819_v29  ;;  %v5794_v54 = vpop.f32.mrb[82].mxu1  ;;  %v5822_v25 = vpop.f32.mrb[78].mxu0 }
0x129f   : > { %v5795_v11 = vpop.f32.mrb[83].mxu1  ;;  %v5823_v27 = vpop.f32.mrb[79].mxu0 }
0x12a0   : > { %v4897_v37 = vadd.f32 %v5821_v24, %v5793_v43  ;;  %v5796_v30 = vadd.f32 %v5795_v11, %v5794_v54  ;;  %v5824_v31 = vadd.f32 %v5823_v27, %v5822_v25 }
0x12a2   : > { %v4911_v56 = vadd.f32 %v4897_v37, %v7104_v59  ;;  %v4900_v33 = vadd.f32 %v5824_v31, %v5796_v30 }
0x12a4   : > { %v4919_v40 = vadd.f32 %v5506_v35, %v4911_v56  ;;  %v4912_v14 = vadd.f32 %v4900_v33, %v7107_v62  ;;  %v5797_v13 = vpop.f32.mrb[84].mxu1  ;;  %v5825_v4 = vpop.f32.mrb[80].mxu0 }
0x12a5   : > { %v5798_v3 = vpop.f32.mrb[85].mxu1  ;;  %v5826_v7 = vpop.f32.mrb[81].mxu0 }
0x12a6   : > { %v4923_v8 = vadd.f32 %v4919_v40, %v6764_v38  ;;  %v4920_v9 = vadd.f32 %v5506_v35, %v4912_v14  ;;  %v5799_v36 = vadd.f32 %v5798_v3, %v5797_v13  ;;  %v5827_v46 = vadd.f32 %v5826_v7, %v5825_v4  ;;  %v5800_v47 = vpop.f32.mrb[86].mxu1  ;;  %v5828_v49 = vpop.f32.mrb[82].mxu0 }
0x12a7   : > { %v5801_v50 = vpop.f32.mrb[87].mxu1  ;;  %v5829_v48 = vpop.f32.mrb[83].mxu0 }
0x12a8   : > { %4927 = vst.msk [vmem:[#allocation2] sm:$0xff] %vm381_vm1, %v4923_v8  ;;  %v4924_v59 = vadd.f32 %v4920_v9, %v6762_v5  ;;  %v4905_v52 = vadd.f32 %v5827_v46, %v5799_v36  ;;  %v5802_v2 = vadd.f32 %v5801_v50, %v5800_v47  ;;  %v5830_v62 = vadd.f32 %v5829_v48, %v5828_v49 }
0x12a9   : > { %4935 = vst.msk [vmem:[%s7160_s7] sm:$0xff] (!%p5507_p5), %vm381_vm1, %v4923_v8 }
0x12aa   : > { %4928 = vst.msk [vmem:[#allocation2 + $0x8] sm:$0xff] %vm381_vm1, %v4924_v59  ;;  %v4913_v20 = vadd.f32 %v4905_v52, %v7113_v28  ;;  %v4908_v55 = vadd.f32 %v5830_v62, %v5802_v2  ;;  %4936 = vst.msk [vmem:[%s7160_s7 + $0x8] sm:$0xff] (!%p5507_p5), %vm381_vm1, %v4924_v59 }
0x12ac   : > { %v4921_v38 = vadd.f32 %v5506_v35, %v4913_v20  ;;  %v4914_v57 = vadd.f32 %v4908_v55, %v7118_v19  ;;  %4934 = sbr.rel (%p5507_p5) target bundleno = 4787 (0x12b3), region = 56 }
0x12ae   : > { %v4925_v58 = vadd.f32 %v4921_v38, %v6772_v53  ;;  %v4922_v60 = vadd.f32 %v5506_v35, %v4914_v57 }
0x12b0   : > { %4929 = vst.msk [vmem:[#allocation2 + $0x10] sm:$0xff] %vm381_vm1, %v4925_v58  ;;  %v4926_v63 = vadd.f32 %v4922_v60, %v6770_v51  ;;  %4937 = vst.msk [vmem:[%s7160_s7 + $0x10] sm:$0xff] (!%p5507_p5), %vm381_vm1, %v4925_v58 }
0x12b2   : > { %4930 = vst.msk [vmem:[#allocation2 + $0x18] sm:$0xff] %vm381_vm1, %v4926_v63  ;;  %4938 = vst.msk [vmem:[%s7160_s7 + $0x18] sm:$0xff] (!%p5507_p5), %vm381_vm1, %v4926_v63 }
0x12b3 PF: > { %s17_s24 = sadd.s32 1, %s6409_s24  }
0x12b4   : > { %p14_p6 = scmp.ge.s32.totalorder %s17_s24, 4  }
0x12b6   :  { %16 = sbr.rel (!%p14_p6) target bundleno = 1 (0x1), region = 106 }

// kernel: encoder_decoder_forward.3
= control target key start
LH: loop header
LB: loop body
LE: loop exit
PB: predicated region body
PF: predicated region fallthrough
CT: control target
= control target key end

     0   :  { %s8338_s25 = smov 0   ;;  %s9151_s0 = inlined_call_operand.vmem [shape: f32[16,32], index: 0, kind: input, shape index: {}]   ;;  %s9152_s1 = inlined_call_operand.vmem [shape: f32[32,32], index: 1, kind: input, shape index: {}]   ;;  %s9153_s2 = inlined_call_operand.vmem [shape: f32[2,32,96], index: 2, kind: input, shape index: {}]   ;;  %s9154_s3 = inlined_call_operand.vmem [shape: f32[2,32,32], index: 3, kind: input, shape index: {}]   ;;  %s9155_s4 = inlined_call_operand.vmem [shape: f32[2,32,32], index: 4, kind: input, shape index: {}]   ;;  %s9156_s5 = inlined_call_operand.vmem [shape: f32[2,32,64], index: 5, kind: input, shape index: {}]   ;;  %s9157_s6 = inlined_call_operand.vmem [shape: f32[2,32,32], index: 6, kind: input, shape index: {}]   ;;  %s9158_s7 = inlined_call_operand.vmem [shape: bf16[2,32,2048], index: 7, kind: input, shape index: {}]   ;;  %s9159_s8 = inlined_call_operand.vmem [shape: bf16[2,2048,32], index: 8, kind: input, shape index: {}]   ;;  %s9160_s9 = inlined_call_operand.vmem [shape: f32[2,15,32], index: 9, kind: input, shape index: {}]   ;;  %s9161_s10 = inlined_call_operand.vmem [shape: f32[2,1,2048], index: 10, kind: input, shape index: {}]   ;;  %s9162_s11 = inlined_call_operand.vmem [shape: bf16[32,384], index: 11, kind: input, shape index: {}]   ;;  %s9163_s12 = inlined_call_operand.vmem [shape: f32[1,384], index: 12, kind: input, shape index: {}]   ;;  %s9164_s13 = inlined_call_operand.vmem [shape: f32[16,384], index: 13, kind: output, shape index: {}]  }
   0x1   :  { %9167 = sst [smem:[#allocation4_spill]] %s9153_s2 }
   0x2   :  { %9168 = sst [smem:[#allocation5_spill]] %s9154_s3 }
   0x3   :  { %9169 = sst [smem:[#allocation6_spill]] %s9155_s4 }
   0x4   :  { %9170 = sst [smem:[#allocation7_spill]] %s9156_s5 }
   0x5   :  { %9171 = sst [smem:[#allocation8_spill]] %s9164_s13 }
   0x6 LB: > { %9172 = sst [smem:[#allocation3_spill]] %s8247_s25  ;;  %s8344_s26 = sadd.s32 4294967295, %s8247_s25   ;;  %s8247_s25 = sphi %s8338_s25, %s23_s25  }
   0x7   : > { %p6753_p0 = scmp.ge.s32.totalorder %s8247_s25, 1  ;;  %p461_p1 = scmp.lt.s32.totalorder %s8247_s25, 3 }
   0x9   : > { %p462_p2 = pnand %p6753_p0, %p461_p1 }
   0xa   : > { %p539_p3 = scmp.lt.s32.totalorder (!%p462_p2), %s8344_s26, 1  ;;  %s9173_s2 = sld [smem:[#allocation4_spill]] (!%p462_p2) }
   0xb   : > { %465 = sbr.rel (%p462_p2) target bundleno = 8529 (0x2151), region = 72  ;;  %s9174_s3 = sld [smem:[#allocation5_spill]] (!%p462_p2) }
   0xc   : > { %s9175_s4 = sld [smem:[#allocation6_spill]] (!%p462_p2)  ;;  %s9176_s5 = sld [smem:[#allocation7_spill]] (!%p462_p2) }
   0xd   : > { %p6771_p4 = scmp.ne.s32.totalorder (!%p462_p2), %s8344_s26, 0 }
  0x12   : > { %s540_s27 = scalar_select %p539_p3, %s8344_s26, 1 }
  0x13   : > { %v588_v0 = vld [vmem:[%s9151_s0] sm:$0xff] (!%p6771_p4)  ;;  %vm590_vm0 = vcmask (!%p6771_p4), 261120   ;;  %v589_v1 = vld [vmem:[%s9151_s0 + $0x8] sm:$0xff] (!%p6771_p4) }
  0x14   : > { %s7250_s28 = sshll.u32 %s540_s27, 5  ;;  %s7255_s29 = sshll.u32 %s540_s27, 8  ;;  %591 = vst.msk [vmem:[#allocation2] sm:$0xff] (!%p6771_p4), %vm590_vm0, %v588_v0  ;;  %592 = vst.msk [vmem:[#allocation2 + $0x8] sm:$0xff] (!%p6771_p4), %vm590_vm0, %v589_v1 }
  0x15   : > { %s8353_s15 = scalar_lea.vmem %s9173_s2, %s7250_s28  ;;  %s8358_s18 = scalar_lea.vmem %s9174_s3, %s7250_s28 }
  0x16   : > { %s8363_s21 = scalar_lea.vmem %s9175_s4, %s7250_s28  ;;  %s8368_s24 = scalar_lea.vmem %s9176_s5, %s7250_s28 }
  0x17   : > { %s8373_s30 = scalar_lea.vmem %s9157_s6, %s7250_s28  ;;  %s8378_s16 = scalar_lea.vmem %s9158_s7, %s7255_s29 }
  0x18   : > { %s7256_s17 = sshll.u32 %s540_s27, 10  ;;  %s7257_s3 = sshll.u32 %s540_s27, 4 }
  0x19   : > { %s8383_s4 = scalar_lea.vmem %s9159_s8, %s7256_s17  ;;  %s8388_s5 = scalar_lea.vmem %s9160_s9, %s7257_s3 }
  0x1a   : > { %s8393_s28 = scalar_lea.vmem %s9161_s10, %s7257_s3  ;;  %587 = sbr.rel (%p6771_p4) target bundleno = 33 (0x21), region = 76 }
  0x21 PF: > { %v593_v2 = vld [vmem:[#allocation2] sm:$0xff]  ;;  %vm601_vm1 = vcmask 261120   ;;  %v594_v3 = vld [vmem:[#allocation2 + $0x8] sm:$0xff]  ;;  %v643_v18 = vld [vmem:[%s8353_s15 + $0x10] sm:$0xff]  ;;  %v629_v22 = vlaneseq  ;;  %s8249_s3 = smov 32   ;;  %v8250_v45 = vmov 0.0  }
  0x22   : > { %v602_v4 = vsel %vm601_vm1, %v593_v2, 0.0  ;;  %v605_v5 = vsel %vm601_vm1, %v594_v3, 0.0  ;;  %v641_v16 = vld [vmem:[%s8353_s15] sm:$0xff]  ;;  %v642_v17 = vld [vmem:[%s8353_s15 + $0x8] sm:$0xff]  ;;  %v644_v20 = vld [vmem:[%s8353_s15 + $0x18] sm:$0xff]  ;;  %7572 = vmatprep.subr.mxu1 %v8250_v45  ;;  %vm8251_vm2 = vmmov 0  }
  0x23   : > { %603 = vadd.xlane.f32.xlu0 %v602_v4  ;;  %v7837_v19 = vpack.c.bf16 %v642_v17, %v641_v16  ;;  %v7841_v21 = vpack.c.bf16 %v644_v20, %v643_v18  ;;  %v8410_v23 = vshrl.u32 %v629_v22, 7  ;;  %v8416_v25 = vld [vmem:[%s8388_s5] sm:$0xff]  ;;  %7574 = vmatprep.mubr.msk.f32.mxu1 %vm8251_vm2, %v8250_v45  ;;  %s8252_s15 = smov 96   ;;  %vm761_vm3 = vcmask 64512   ;;  %s8253_s17 = smov 64  }
  0x24   : > { %s8254_s19 = smov 88   ;;  %s8255_s20 = smov 120   ;;  %vm8663_vm4 = vmpackc.low %vm761_vm3, %vm761_vm3  ;;  %vm2829_vm5 = vcmask 130048  }
  0x25   : > { %7838 = vmatprep.subr.bf16.mxu0 %v7837_v19  ;;  %v8413_v24 = vsub.s32 3, %v8410_v23  ;;  %v8422_v33 = vsub.s32 0, %v8410_v23  ;;  %v8425_v34 = vsub.s32 1, %v8410_v23  ;;  %v8448_v51 = vsub.s32 2, %v8410_v23  ;;  %s8256_s22 = smov 80   ;;  %s8257_s23 = smov 56  }
  0x26   : > { %7840 = vmatpush3.bf16.msra.mxu0 %v7837_v19  ;;  %v744_v1 = vsub.s32 4, %v8410_v23  ;;  %s8258_s13 = smov 112   ;;  %s8259_s25 = smov 48  }
  0x27   : > { %606 = vadd.xlane.f32.xlu0 %v605_v5  ;;  %7842 = vmatprep.subr.bf16.mxu0 %v7841_v21  ;;  %v735_v26 = vrot.slane %v8416_v25, %v8413_v24  ;;  %v632_v35 = vrot.slane %v8416_v25, %v8422_v33  ;;  %v638_v38 = vrot.slane %v8416_v25, %v8425_v34  ;;  %s8260_s2 = smov 72   ;;  %s8261_s27 = smov 104  }
  0x28   : > { %v729_v52 = vrot.slane %v8416_v25, %v8448_v51  ;;  %s8262_s29 = smov 40   ;;  %p7239_p5 = scmp.ne.s32.totalorder %s8344_s26, 1 }
  0x29   : > { %vm8266_vm6 = vmmov (!%p7239_p5), 0  }
  0x2a   : > { %7844 = vmatpush3.bf16.msra.mxu0 %v7841_v21 }
  0x2b   : > { %7592 = vmatprep.subr.mxu0 %v8250_v45 }
  0x3d   : > { %737 = vrot.lane.b32.xlu0 %v735_v26, %s8249_s3 }
  0xb0   : > { %v604_v6 = vpop.xlane.xlu0 %603 }
  0xb1   : > { %v609_v7 = vmul.f32 0.03125, %v604_v6 }
  0xb3   : > { %v611_v8 = vsub.f32 %v593_v2, %v609_v7  ;;  %v745_v2 = vrot.slane %v8416_v25, %v744_v1 }
  0xb4   : > { %v607_v9 = vpop.xlane.xlu0 %606 }
  0xb5   : > { %v610_v10 = vmul.f32 0.03125, %v607_v9  ;;  %v613_v11 = vmul.f32 %v611_v8, %v611_v8 }
  0xb7   : > { %v612_v12 = vsub.f32 %v594_v3, %v610_v10  ;;  %v615_v13 = vsel %vm601_vm1, %v613_v11, 0.0 }
  0xb8   : > { %616 = vadd.xlane.f32.xlu1 %v615_v13  ;;  %v738_v46 = vpop.permute.xlu0 %737 }
  0xb9   : > { %v614_v14 = vmul.f32 %v612_v12, %v612_v12 }
  0xbb   : > { %v618_v15 = vsel %vm601_vm1, %v614_v14, 0.0 }
  0xbc   : > { %619 = vadd.xlane.f32.xlu1 %v618_v15 }
 0x145   : > { %v617_v27 = vpop.xlane.xlu1 %616 }
 0x146   : > { %v621_v28 = vmul.f32 0.03125, %v617_v27 }
 0x148   : > { %v623_v29 = vadd.f32 1e-05, %v621_v28 }
 0x149   : > { %v620_v30 = vpop.xlane.xlu1 %619 }
 0x14a   : > { %8154 = vrsqrt.f32 %v623_v29  ;;  %v622_v31 = vmul.f32 0.03125, %v620_v30 }
 0x14c   : > { %v624_v32 = vadd.f32 1e-05, %v622_v31 }
 0x14e   : > { %8156 = vrsqrt.f32 %v624_v32 }
 0x154   : > { %v8155_v36 = vpop.eup %8154 }
 0x155   : > { %v627_v37 = vmul.f32 %v8155_v36, %v611_v8 }
 0x157   : > { %v633_v39 = vmul.f32 %v632_v35, %v627_v37 }
 0x158   : > { %v8157_v40 = vpop.eup %8156 }
 0x159   : > { %v628_v41 = vmul.f32 %v8157_v40, %v612_v12  ;;  %v639_v42 = vadd.f32 %v638_v38, %v633_v39 }
 0x15b   : > { %v634_v43 = vmul.f32 %v632_v35, %v628_v41  ;;  %7569 = vmatprep.mubr.msk.f32.mxu0 %vm601_vm1, %v639_v42 }
 0x15d   : > { %v640_v44 = vadd.f32 %v638_v38, %v634_v43 }
 0x15f   : > { %7570 = vmatmul.mubr.msk.f32.vlgmr.msra.gmra.mrb[0].mxu0 %vm601_vm1, %v640_v44 }
 0x160   : > { %7594 = vmatprep.mubr.msk.f32.mxu0 %vm8251_vm2, %v8250_v45 }
 0x232   : > { %v7571_v47 = vpop.f32.mrb[0].mxu0 }
 0x233   : > { %v717_v48 = vpop.f32.mrb[1].mxu0  ;;  %v8443_v50 = vadd.f32 %v7571_v47, %v738_v46  ;;  %v731_v55 = vadd.f32 %v7571_v47, %v729_v52 }
 0x234   : > { %v8439_v49 = vadd.f32 %v738_v46, %v717_v48  ;;  %v730_v53 = vadd.f32 %v729_v52, %v717_v48 }
 0x235   : > { %v8461_v58 = vmul.f32 0.35355338, %v731_v55 }
 0x236   : > { %759 = vrot.lane.b32.xlu1 %v8439_v49, %s8252_s15  ;;  %v8453_v56 = vmul.f32 0.35355338, %v730_v53 }
 0x23a   : > { %838 = vrot.lane.b32.xlu1 %v8443_v50, %s8252_s15 }
 0x2a8   : > { %v760_v54 = vpop.permute.xlu1 %759 }
 0x2a9   : > { %7573 = vmatpush3.xpose.msk.msra.mxu1 %vm761_vm3, %v760_v54 }
 0x2aa   : > { %7577 = vmatprep.subr.mxu1 %v8250_v45 }
 0x2ac   : > { %7575 = vmatmul.mubr.msk.f32.vlgmr.msra.gmra.mrb[0].mxu1 %vm761_vm3, %v8453_v56  ;;  %v839_v57 = vpop.permute.xlu1 %838 }
 0x2ad   : > { %7578 = vmatpush3.xpose.msk.msra.mxu1 %vm761_vm3, %v839_v57  ;;  %7579 = vmatprep.mubr.msk.f32.mxu1 %vm8251_vm2, %v8250_v45 }
 0x2ae   : > { %7582 = vmatprep.subr.mxu1 %v8250_v45 }
 0x2b0   : > { %7580 = vmatmul.mubr.msk.f32.vlgmr.msra.gmra.mrb[2].mxu1 %vm761_vm3, %v8461_v58 }
 0x2b1   : > { %7584 = vmatprep.mubr.msk.f32.mxu1 %vm8251_vm2, %v8250_v45 }
 0x37f   : > { %v833_v59 = vpop.f32.mrb[0].mxu1 }
 0x380   : > { %v7576_v60 = vpop.f32.mrb[1].mxu1  ;;  %v915_v61 = vsel %vm761_vm3, %v833_v59, -inf }
 0x381   : > { %916 = vmax.xlane.f32.xlu1 %v915_v61 }
 0x383   : > { %v911_v62 = vpop.f32.mrb[2].mxu1 }
 0x384   : > { %v7581_v63 = vpop.f32.mrb[3].mxu1  ;;  %v918_v0 = vsel %vm761_vm3, %v911_v62, -inf }
 0x385   : > { %919 = vmax.xlane.f32.xlu0 %v918_v0 }
 0x39b   : > { %747 = vrot.lane.b32.xlu0 %v745_v2, %s8253_s17 }
 0x40e   : > { %v917_v7 = vpop.xlane.xlu1 %916 }
 0x40f   : > { %v921_v8 = vsub.f32 %v833_v59, %v917_v7 }
 0x411   : > { %v923_v9 = vmul.f32 1.442695, %v921_v8 }
 0x412   : > { %v920_v3 = vpop.xlane.xlu0 %919 }
 0x413   : > { %v922_v10 = vsub.f32 %v911_v62, %v920_v3  ;;  %8158 = vpow2.f32 %v923_v9 }
 0x415   : > { %v925_v11 = vmul.f32 1.442695, %v922_v10 }
 0x416   : > { %v748_v4 = vpop.permute.xlu0 %747 }
 0x417   : > { %v8474_v5 = vadd.f32 %v748_v4, %v717_v48  ;;  %v8476_v6 = vadd.f32 %v7571_v47, %v748_v4  ;;  %8160 = vpow2.f32 %v925_v11 }
 0x419   : > { %1015 = vrot.lane.b32.xlu0 %v8476_v6, %s8253_s17  ;;  %938 = vrot.lane.b32.xlu1 %v8474_v5, %s8253_s17  ;;  %s9179_s17 = sld [smem:[#allocation8_spill]] (!%p7239_p5) }
 0x41d   : > { %1171 = vrot.lane.b32.xlu0 %v8443_v50, %s8254_s19  ;;  %v8159_v12 = vpop.eup %8158 }
 0x41e   : > { %v927_v13 = vsel %vm761_vm3, %v8159_v12, 0.0 }
 0x421   : > { %1093 = vrot.lane.b32.xlu0 %v8439_v49, %s8254_s19  ;;  %v8161_v14 = vpop.eup %8160 }
 0x422   : > { %v930_v15 = vsel %vm761_vm3, %v8161_v14, 0.0 }
 0x43d   : > { %928 = vadd.xlane.f32.xlu1 %v927_v13 }
 0x441   : > { %931 = vadd.xlane.f32.xlu1 %v930_v15 }
 0x452   : > { %1169 = vrot.lane.b32.xlu1 %v8461_v58, %s8255_s20 }
 0x456   : > { %1091 = vrot.lane.b32.xlu1 %v8453_v56, %s8255_s20 }
 0x45a   : > { %1585 = vrot.lane.b32.xlu1 %v8439_v49, %s8256_s22 }
 0x48b   : > { %v1016_v16 = vpop.permute.xlu0 %1015  ;;  %v939_v17 = vpop.permute.xlu1 %938 }
 0x48c   : > { %7583 = vmatpush3.msra.mxu1 %v939_v17  ;;  %v752_v17 = vld [vmem:[%s8358_s18] sm:$0xff] }
 0x48d   : > { %7587 = vmatprep.subr.mxu1 %v8250_v45 }
 0x48f   : > { %v1172_v18 = vpop.permute.xlu0 %1171 }
 0x493   : > { %v1094_v19 = vpop.permute.xlu0 %1093 }
 0x494   : > { %7593 = vmatpush3.xpose.msk.msra.mxu0 %vm761_vm3, %v1094_v19 }
 0x495   : > { %7602 = vmatprep.subr.mxu0 %v8250_v45 }
 0x4ca   : > { %v929_v20 = vpop.xlane.xlu1 %928 }
 0x4cb   : > { %8162 = vrcp.f32 %v929_v20 }
 0x4ce   : > { %v932_v21 = vpop.xlane.xlu1 %931 }
 0x4cf   : > { %8164 = vrcp.f32 %v932_v21 }
 0x4d2   : > { %v1170_v22 = vpop.permute.xlu1 %1169 }
 0x4d5   : > { %v8163_v26 = vpop.eup %8162 }
 0x4d6   : > { %v935_v27 = vmul.f32 %v8163_v26, %v8159_v12  ;;  %v1092_v28 = vpop.permute.xlu1 %1091 }
 0x4d7   : > { %7595 = vmatmul.mubr.msk.f32.vlgmr.msra.gmra.mrb[2].mxu0 %vm761_vm3, %v1092_v28 }
 0x4d8   : > { %7585 = vmatmul.mubr.msk.f32.vlgmr.msra.gmra.mrb[4].mxu1 %vm761_vm3, %v935_v27  ;;  %7604 = vmatprep.mubr.msk.f32.mxu0 %vm8251_vm2, %v8250_v45 }
 0x4d9   : > { %v8165_v29 = vpop.eup %8164  ;;  %7588 = vmatpush3.msra.mxu1 %v1016_v16  ;;  %7589 = vmatprep.mubr.msk.f32.mxu1 %vm8251_vm2, %v8250_v45  ;;  %v753_v16 = vld [vmem:[%s8358_s18 + $0x8] sm:$0xff] }
 0x4da   : > { %v936_v30 = vmul.f32 %v8165_v29, %v8161_v14  ;;  %7597 = vmatprep.subr.mxu1 %v8250_v45  ;;  %v1586_v53 = vpop.permute.xlu1 %1585 }
 0x4dc   : > { %7590 = vmatmul.mubr.msk.f32.vlgmr.msra.gmra.mrb[6].mxu1 %vm761_vm3, %v936_v30 }
 0x4dd   : > { %7599 = vmatprep.mubr.msk.f32.mxu1 %vm8251_vm2, %v8250_v45 }
 0x4e0   : > { %7598 = vmatpush3.xpose.msk.msra.mxu1 %vm761_vm3, %v1172_v18 }
 0x4e1   : > { %7607 = vmatprep.subr.mxu1 %v8250_v45 }
 0x4e3   : > { %7600 = vmatmul.mubr.msk.f32.vlgmr.msra.gmra.mrb[8].mxu1 %vm761_vm3, %v1170_v22 }
 0x4e4   : > { %7609 = vmatprep.mubr.msk.f32.mxu1 %vm8251_vm2, %v8250_v45 }
 0x5aa   : > { %v1165_v31 = vpop.f32.mrb[2].mxu0 }
 0x5ab   : > { %v8510_v32 = vpop.f32.mrb[4].mxu1  ;;  %v7596_v35 = vpop.f32.mrb[3].mxu0  ;;  %v1247_v52 = vsel %vm761_vm3, %v1165_v31, -inf }
 0x5ac   : > { %v7586_v36 = vpop.f32.mrb[5].mxu1 }
 0x5af   : > { %v8512_v37 = vpop.f32.mrb[6].mxu1 }
 0x5b0   : > { %v7591_v38 = vpop.f32.mrb[7].mxu1 }
 0x5b1   : > { %v754_v38 = vld [vmem:[%s8358_s18 + $0x10] sm:$0xff] }
 0x5b6   : > { %v1243_v39 = vpop.f32.mrb[8].mxu1 }
 0x5b7   : > { %v7601_v40 = vpop.f32.mrb[9].mxu1  ;;  %v1250_v41 = vsel %vm761_vm3, %v1243_v39, -inf }
 0x5b8   : > { %1251 = vmax.xlane.f32.xlu0 %v1250_v41 }
 0x5ce   : > { %1345 = vrot.lane.b32.xlu0 %v8476_v6, %s8257_s23 }
 0x5d2   : > { %1583 = vrot.lane.b32.xlu0 %v8453_v56, %s8258_s13 }
 0x5d6   : > { %1661 = vrot.lane.b32.xlu0 %v8461_v58, %s8258_s13 }
 0x645   : > { %v1252_v42 = vpop.xlane.xlu0 %1251 }
 0x646   : > { %v1254_v43 = vsub.f32 %v1243_v39, %v1252_v42 }
 0x648   : > { %v1257_v44 = vmul.f32 1.442695, %v1254_v43 }
 0x649   : > { %v1346_v46 = vpop.permute.xlu0 %1345 }
 0x64a   : > { %8166 = vpow2.f32 %v1257_v44  ;;  %7608 = vmatpush3.msra.mxu1 %v1346_v46 }
 0x64b   : > { %7622 = vmatprep.subr.mxu1 %v8250_v45 }
 0x64d   : > { %v1584_v59 = vpop.permute.xlu0 %1583 }
 0x651   : > { %v1662_v61 = vpop.permute.xlu0 %1661 }
 0x654   : > { %v8167_v47 = vpop.eup %8166 }
 0x655   : > { %v1262_v48 = vsel %vm761_vm3, %v8167_v47, 0.0 }
 0x656   : > { %1263 = vadd.xlane.f32.xlu1 %v1262_v48 }
 0x667   : > { %1663 = vrot.lane.b32.xlu1 %v8443_v50, %s8256_s22 }
 0x68b   : > { %1248 = vmax.xlane.f32.xlu1 %v1247_v52 }
 0x6e3   : > { %v1264_v54 = vpop.xlane.xlu1 %1263 }
 0x6e4   : > { %8168 = vrcp.f32 %v1264_v54 }
 0x6e7   : > { %v1664_v60 = vpop.permute.xlu1 %1663 }
 0x6ee   : > { %v8169_v55 = vpop.eup %8168 }
 0x6ef   : > { %v1268_v57 = vmul.f32 %v8169_v55, %v8167_v47 }
 0x6f1   : > { %7610 = vmatmul.mubr.msk.f32.vlgmr.msra.gmra.mrb[10].mxu1 %vm761_vm3, %v1268_v57 }
 0x6f2   : > { %7623 = vmatpush3.xpose.msk.msra.mxu1 %vm761_vm3, %v1586_v53  ;;  %7624 = vmatprep.mubr.msk.f32.mxu1 %vm8251_vm2, %v8250_v45 }
 0x6f3   : > { %7627 = vmatprep.subr.mxu1 %v8250_v45 }
 0x6f5   : > { %7625 = vmatmul.mubr.msk.f32.vlgmr.msra.gmra.mrb[12].mxu1 %vm761_vm3, %v1584_v59 }
 0x6f6   : > { %7628 = vmatpush3.xpose.msk.msra.mxu1 %vm761_vm3, %v1664_v60  ;;  %7629 = vmatprep.mubr.msk.f32.mxu1 %vm8251_vm2, %v8250_v45 }
 0x6f7   : > { %7637 = vmatprep.subr.mxu1 %v8250_v45 }
 0x6f9   : > { %7630 = vmatmul.mubr.msk.f32.vlgmr.msra.gmra.mrb[14].mxu1 %vm761_vm3, %v1662_v61 }
 0x6fa   : > { %7639 = vmatprep.mubr.msk.f32.mxu1 %vm8251_vm2, %v8250_v45 }
 0x718   : > { %v1249_v62 = vpop.xlane.xlu1 %1248 }
 0x719   : > { %v1253_v63 = vsub.f32 %v1165_v31, %v1249_v62 }
 0x71b   : > { %v1255_v0 = vmul.f32 1.442695, %v1253_v63 }
 0x71d   : > { %8170 = vpow2.f32 %v1255_v0 }
 0x727   : > { %v8171_v2 = vpop.eup %8170 }
 0x728   : > { %v1259_v3 = vsel %vm761_vm3, %v8171_v2, 0.0 }
 0x729   : > { %1260 = vadd.xlane.f32.xlu0 %v1259_v3 }
 0x73f   : > { %1269 = vrot.lane.b32.xlu0 %v8474_v5, %s8257_s23 }
 0x743   : > { %1837 = vrot.lane.b32.xlu0 %v8476_v6, %s8259_s25 }
 0x747   : > { %1998 = vrot.lane.b32.xlu0 %v8439_v49, %s8260_s2 }
 0x74b   : > { %2076 = vrot.lane.b32.xlu0 %v8443_v50, %s8260_s2 }
 0x74f   : > { %1996 = vrot.lane.b32.xlu0 %v8453_v56, %s8261_s27 }
 0x7b6   : > { %v1261_v4 = vpop.xlane.xlu0 %1260 }
 0x7b7   : > { %8172 = vrcp.f32 %v1261_v4 }
 0x7ba   : > { %v1270_v7 = vpop.permute.xlu0 %1269 }
 0x7bb   : > { %7603 = vmatpush3.msra.mxu0 %v1270_v7 }
 0x7bc   : > { %7612 = vmatprep.subr.mxu0 %v753_v16 }
 0x7be   : > { %v1838_v8 = vpop.permute.xlu0 %1837 }
 0x7bf   : > { %7638 = vmatpush3.msra.mxu1 %v1838_v8 }
 0x7c0   : > { %7647 = vmatprep.subr.mxu1 %v8250_v45 }
 0x7c1   : > { %v8173_v9 = vpop.eup %8172 }
 0x7c2   : > { %v1267_v10 = vmul.f32 %v8173_v9, %v8171_v2  ;;  %v1999_v40 = vpop.permute.xlu0 %1998 }
 0x7c4   : > { %7605 = vmatmul.mubr.msk.f32.vlgmr.msra.gmra.mrb[4].mxu0 %vm761_vm3, %v1267_v10  ;;  %v1417_v49 = vpop.f32.mrb[10].mxu1 }
 0x7c5   : > { %v7611_v50 = vpop.f32.mrb[11].mxu1  ;;  %7613 = vmatpush3.msra.mxu0 %v753_v16 }
 0x7c6   : > { %7617 = vmatprep.subr.mxu0 %v752_v17  ;;  %v2077_v43 = vpop.permute.xlu0 %2076 }
 0x7c8   : > { %v1657_v11 = vpop.f32.mrb[12].mxu1 }
 0x7c9   : > { %v7626_v12 = vpop.f32.mrb[13].mxu1  ;;  %v1739_v56 = vsel %vm761_vm3, %v1657_v11, -inf }
 0x7ca   : > { %1740 = vmax.xlane.f32.xlu1 %v1739_v56  ;;  %v1997_v44 = vpop.permute.xlu0 %1996 }
 0x7cc   : > { %v1735_v13 = vpop.f32.mrb[14].mxu1 }
 0x7cd   : > { %v7631_v14 = vpop.f32.mrb[15].mxu1  ;;  %v1742_v15 = vsel %vm761_vm3, %v1735_v13, -inf }
 0x7ce   : > { %1743 = vmax.xlane.f32.xlu1 %v1742_v15  ;;  %v755_v15 = vld [vmem:[%s8358_s18 + $0x18] sm:$0xff] }
 0x857   : > { %v1741_v18 = vpop.xlane.xlu1 %1740 }
 0x858   : > { %v1745_v19 = vsub.f32 %v1657_v11, %v1741_v18 }
 0x85a   : > { %v1747_v20 = vmul.f32 1.442695, %v1745_v19  ;;  %v2411_v19 = vsub.s32 5, %v8410_v23 }
 0x85b   : > { %v1744_v21 = vpop.xlane.xlu1 %1743 }
 0x85c   : > { %8174 = vpow2.f32 %v1747_v20  ;;  %v1746_v22 = vsub.f32 %v1735_v13, %v1744_v21  ;;  %v2412_v20 = vrot.slane %v8416_v25, %v2411_v19 }
 0x85e   : > { %v1749_v26 = vmul.f32 1.442695, %v1746_v22 }
 0x860   : > { %8176 = vpow2.f32 %v1749_v26 }
 0x866   : > { %v8175_v27 = vpop.eup %8174 }
 0x867   : > { %v1751_v28 = vsel %vm761_vm3, %v8175_v27, 0.0 }
 0x868   : > { %1752 = vadd.xlane.f32.xlu1 %v1751_v28  ;;  %v8230_v28 = vld [vmem:[#allocation2 + $0x8] sm:$0xff] }
 0x86a   : > { %v8177_v29 = vpop.eup %8176 }
 0x86b   : > { %v1754_v30 = vsel %vm761_vm3, %v8177_v29, 0.0 }
 0x86c   : > { %1755 = vadd.xlane.f32.xlu1 %v1754_v30  ;;  %v8231_v30 = vld [vmem:[#allocation2] sm:$0xff] }
 0x87d   : > { %1761 = vrot.lane.b32.xlu1 %v8474_v5, %s8259_s25 }
 0x881   : > { %2074 = vrot.lane.b32.xlu1 %v8461_v58, %s8261_s27 }
 0x897   : > { %v1341_v31 = vpop.f32.mrb[4].mxu0 }
 0x898   : > { %v7606_v35 = vpop.f32.mrb[5].mxu0  ;;  %7614 = vmatprep.mubr.msk.f32.mxu0 %vm761_vm3, %v1341_v31 }
 0x899   : > { %7615 = vmatmul.mubr.msk.f32.vlgmr.msra.gmra.mrb[6].mxu0 %vm761_vm3, %v1417_v49 }
 0x89a   : > { %7619 = vmatprep.mubr.msk.f32.mxu0 %vm761_vm3, %v8510_v32  ;;  %7618 = vmatpush3.msra.mxu0 %v752_v17 }
 0x89b   : > { %7632 = vmatprep.subr.mxu0 %v8250_v45 }
 0x8a1   : > { %7620 = vmatmul.mubr.msk.f32.vlgmr.msra.gmra.mrb[6].mxu0 %vm761_vm3, %v8512_v37 }
 0x8a2   : > { %7634 = vmatprep.mubr.msk.f32.mxu0 %vm8251_vm2, %v8250_v45 }
 0x8f5   : > { %v1753_v36 = vpop.xlane.xlu1 %1752 }
 0x8f6   : > { %8178 = vrcp.f32 %v1753_v36 }
 0x8f9   : > { %v1756_v58 = vpop.xlane.xlu1 %1755 }
 0x8fa   : > { %8180 = vrcp.f32 %v1756_v58 }
 0x8fd   : > { %v1762_v39 = vpop.permute.xlu1 %1761 }
 0x8fe   : > { %7633 = vmatpush3.msra.mxu0 %v1762_v39 }
 0x8ff   : > { %7642 = vmatprep.subr.mxu0 %v754_v38 }
 0x900   : > { %v8179_v41 = vpop.eup %8178 }
 0x901   : > { %v1759_v32 = vmul.f32 %v8179_v41, %v8175_v27  ;;  %v2075_v53 = vpop.permute.xlu1 %2074 }
 0x903   : > { %7635 = vmatmul.mubr.msk.f32.vlgmr.msra.gmra.mrb[8].mxu0 %vm761_vm3, %v1759_v32 }
 0x904   : > { %v8181_v42 = vpop.eup %8180  ;;  %7643 = vmatpush3.msra.mxu0 %v754_v38 }
 0x905   : > { %v1760_v37 = vmul.f32 %v8181_v42, %v8177_v29  ;;  %7652 = vmatprep.subr.mxu0 %v8250_v45 }
 0x907   : > { %7640 = vmatmul.mubr.msk.f32.vlgmr.msra.gmra.mrb[16].mxu1 %vm761_vm3, %v1760_v37 }
 0x908   : > { %7648 = vmatpush3.xpose.msk.msra.mxu1 %vm761_vm3, %v1999_v40  ;;  %7649 = vmatprep.mubr.msk.f32.mxu1 %vm8251_vm2, %v8250_v45 }
 0x909   : > { %7657 = vmatprep.subr.mxu1 %v8250_v45 }
 0x90b   : > { %7650 = vmatmul.mubr.msk.f32.vlgmr.msra.gmra.mrb[18].mxu1 %vm761_vm3, %v1997_v44 }
 0x90c   : > { %7659 = vmatprep.mubr.msk.f32.mxu1 %vm8251_vm2, %v8250_v45 }
 0x9d6   : > { %v1833_v46 = vpop.f32.mrb[8].mxu0 }
 0x9d7   : > { %v7636_v47 = vpop.f32.mrb[9].mxu0  ;;  %7644 = vmatprep.mubr.msk.f32.mxu0 %vm761_vm3, %v1833_v46  ;;  %v2544_v46 = vld [vmem:[%s8368_s24] sm:$0xff] }
 0x9d8   : > { %v2545_v47 = vld [vmem:[%s8368_s24 + $0x8] sm:$0xff] }
 0x9da   : > { %v1909_v48 = vpop.f32.mrb[16].mxu1 }
 0x9db   : > { %v7641_v52 = vpop.f32.mrb[17].mxu1  ;;  %7645 = vmatmul.mubr.msk.f32.vlgmr.msra.gmra.mrb[6].mxu0 %vm761_vm3, %v1909_v48  ;;  %v7853_v48 = vpack.c.bf16 %v2545_v47, %v2544_v46 }
 0x9dc   : > { %7653 = vmatpush3.xpose.msk.msra.mxu0 %vm761_vm3, %v2077_v43  ;;  %7654 = vmatprep.mubr.msk.f32.mxu0 %vm8251_vm2, %v8250_v45  ;;  %v2546_v52 = vld [vmem:[%s8368_s24 + $0x10] sm:$0xff] }
 0x9dd   : > { %7662 = vmatprep.subr.mxu0 %v8250_v45 }
 0x9de   : > { %v2070_v54 = vpop.f32.mrb[18].mxu1 }
 0x9df   : > { %v7651_v55 = vpop.f32.mrb[19].mxu1  ;;  %7655 = vmatmul.mubr.msk.f32.vlgmr.msra.gmra.mrb[10].mxu0 %vm761_vm3, %v2075_v53  ;;  %v2152_v57 = vsel %vm761_vm3, %v2070_v54, -inf  ;;  %v2547_v53 = vld [vmem:[%s8368_s24 + $0x18] sm:$0xff] }
 0x9e0   : > { %2153 = vmax.xlane.f32.xlu0 %v2152_v57  ;;  %7664 = vmatprep.mubr.msk.f32.mxu0 %vm8251_vm2, %v8250_v45  ;;  %v595_v55 = vld [vmem:[%s9152_s1] sm:$0xff]  ;;  %v596_v57 = vld [vmem:[%s9152_s1 + $0x8] sm:$0xff] }
 0xa6d   : > { %v2154_v59 = vpop.xlane.xlu0 %2153 }
 0xa6e   : > { %v2158_v60 = vsub.f32 %v2070_v54, %v2154_v59  ;;  %v7857_v54 = vpack.c.bf16 %v2547_v53, %v2546_v52  ;;  %v2455_v59 = vld [vmem:[%s8363_s21] sm:$0xff] }
 0xa70   : > { %v2160_v61 = vmul.f32 1.442695, %v2158_v60  ;;  %v2456_v60 = vld [vmem:[%s8363_s21 + $0x8] sm:$0xff] }
 0xa72   : > { %8182 = vpow2.f32 %v2160_v61  ;;  %v597_v61 = vld [vmem:[%s9152_s1 + $0x10] sm:$0xff] }
 0xa7c   : > { %v8183_v62 = vpop.eup %8182 }
 0xa7d   : > { %v2164_v63 = vsel %vm761_vm3, %v8183_v62, 0.0 }
 0xa7e   : > { %2165 = vadd.xlane.f32.xlu0 %v2164_v63  ;;  %v598_v63 = vld [vmem:[%s9152_s1 + $0x18] sm:$0xff] }
 0xab2   : > { %v2148_v0 = vpop.f32.mrb[10].mxu0 }
 0xab3   : > { %v7656_v2 = vpop.f32.mrb[11].mxu0  ;;  %v2155_v3 = vsel %vm761_vm3, %v2148_v0, -inf }
 0xab4   : > { %2156 = vmax.xlane.f32.xlu1 %v2155_v3  ;;  %v2458_v2 = vld [vmem:[%s8363_s21 + $0x18] sm:$0xff] }
 0xac5   : > { %2250 = vrot.lane.b32.xlu1 %v8476_v6, %s8262_s29 }
 0xb0b   : > { %v2166_v50 = vpop.xlane.xlu0 %2165 }
 0xb41   : > { %v2157_v4 = vpop.xlane.xlu1 %2156 }
 0xb42   : > { %v2159_v7 = vsub.f32 %v2148_v0, %v2157_v4  ;;  %v2457_v0 = vld [vmem:[%s8363_s21 + $0x10] sm:$0xff]  ;;  %v8263_v4 = vmov 0.0|0.0  }
 0xb43   : > { %v7849_v3 = vpack.c.bf16 %v2458_v2, %v2457_v0 }
 0xb44   : > { %v2162_v8 = vmul.f32 1.442695, %v2159_v7 }
 0xb45   : > { %v2251_v9 = vpop.permute.xlu1 %2250 }
 0xb46   : > { %8184 = vpow2.f32 %v2162_v8  ;;  %7663 = vmatpush3.msra.mxu0 %v2251_v9 }
 0xb47   : > { %8186 = vrcp.f32 %v2166_v50  ;;  %7667 = vmatprep.subr.mxu0 %v755_v15 }
 0xb50   : > { %v8185_v10 = vpop.eup %8184 }
 0xb51   : > { %v2167_v49 = vsel %vm761_vm3, %v8185_v10, 0.0  ;;  %v8187_v12 = vpop.eup %8186 }
 0xb52   : > { %2168 = vadd.xlane.f32.xlu0 %v2167_v49  ;;  %v2172_v56 = vmul.f32 %v8187_v12, %v8183_v62  ;;  %v7845_v62 = vpack.c.bf16 %v2456_v60, %v2455_v59  ;;  %v2451_v12 = vsub.s32 7, %v8410_v23 }
 0xb68   : > { %2174 = vrot.lane.b32.xlu0 %v8474_v5, %s8262_s29 }
 0xbdf   : > { %v2169_v11 = vpop.xlane.xlu0 %2168 }
 0xbe0   : > { %8188 = vrcp.f32 %v2169_v11  ;;  %v2445_v11 = vsub.s32 6, %v8410_v23  ;;  %v8233_v23 = vld [vmem:[%s9162_s11 + $0x4] ss:$12 sps:$4 sm:$0xff] (!%p7239_p5)  }
 0xbe3   : > { %v2175_v6 = vpop.permute.xlu0 %2174 }
 0xbe4   : > { %7658 = vmatpush3.msra.mxu1 %v2175_v6 }
 0xbe5   : > { %7660 = vmatmul.mubr.msk.f32.vlgmr.msra.gmra.mrb[20].mxu1 %vm761_vm3, %v2172_v56  ;;  %7846 = vmatprep.subr.bf16.mxu1 %v7845_v62  ;;  %v2446_v56 = vrot.slane %v8416_v25, %v2445_v11 }
 0xbe6   : > { %7848 = vmatpush3.bf16.msra.mxu1 %v7845_v62 }
 0xbe7   : > { %7850 = vmatprep.subr.bf16.mxu1 %v7849_v3 }
 0xbea   : > { %v8189_v13 = vpop.eup %8188  ;;  %7852 = vmatpush3.bf16.msra.mxu1 %v7849_v3 }
 0xbeb   : > { %v2173_v14 = vmul.f32 %v8189_v13, %v8185_v10  ;;  %7861 = vmatprep.subr.bf16.mxu1 %v8263_v4 }
 0xbed   : > { %7665 = vmatmul.mubr.msk.f32.vlgmr.msra.gmra.mrb[12].mxu0 %vm761_vm3, %v2173_v14 }
 0xbee   : > { %7668 = vmatpush3.msra.mxu0 %v755_v15 }
 0xbef   : > { %7854 = vmatprep.subr.bf16.mxu0 %v7853_v48 }
 0xcb8   : > { %v2246_v16 = vpop.f32.mrb[20].mxu1 }
 0xcb9   : > { %v7661_v17 = vpop.f32.mrb[21].mxu1  ;;  %7669 = vmatprep.mubr.msk.f32.mxu0 %vm761_vm3, %v2246_v16  ;;  %v2452_v16 = vrot.slane %v8416_v25, %v2451_v12 }
 0xcc0   : > { %v2322_v5 = vpop.f32.mrb[12].mxu0 }
 0xcc1   : > { %v7666_v18 = vpop.f32.mrb[13].mxu0  ;;  %7670 = vmatmul.mubr.msk.f32.vlgmr.msra.gmra.mrb[6].mxu0 %vm761_vm3, %v2322_v5 }
 0xcc2   : > { %7856 = vmatpush3.bf16.msra.mxu0 %v7853_v48  ;;  %7691 = vmatprep.mubr.msk.f32.mxu0 %vm601_vm1, %v595_v55 }
 0xcc3   : > { %7858 = vmatprep.subr.bf16.mxu0 %v7857_v54 }
 0xcc6   : > { %7860 = vmatpush3.bf16.msra.mxu0 %v7857_v54 }
 0xcc7   : > { %7865 = vmatprep.subr.bf16.mxu0 %v8263_v4 }
 0xcc9   : > { %7692 = vmatmul.mubr.msk.f32.vlgmr.msra.gmra.mrb[14].mxu0 %vm601_vm1, %v596_v57 }
 0xcca   : > { %7694 = vmatprep.mubr.msk.f32.mxu0 %vm601_vm1, %v597_v61 }
 0xccd   : > { %7695 = vmatmul.mubr.msk.f32.gmra.mrb[16].mxu0 %vm601_vm1, %v598_v63 }
 0xcce   : > { %7708 = vmatprep.mubr.msk.f32.mxu0 %vm8251_vm2, %v8250_v45 }
 0xd94   : > { %v7671_v21 = vpop.f32.mrb[6].mxu0 }
 0xd95   : > { %v2414_v22 = vadd.f32 %v7671_v21, %v2412_v20  ;;  %v2398_v26 = vpop.f32.mrb[7].mxu0  ;;  %v8657_v21 = vld [vmem:[%s8388_s5 + $0x8] sm:$0x7f] }
 0xd96   : > { %v2413_v27 = vadd.f32 %v2412_v20, %v2398_v26  ;;  %v2656_v60 = vrot.slane %v8657_v21, %v8448_v51 }
 0xd97   : > { %v8606_v29 = vadd.f32 %v8230_v28, %v2414_v22  ;;  %v2648_v22 = vrot.slane %v8657_v21, %v8425_v34 }
 0xd98   : > { %v8608_v31 = vadd.f32 %v8231_v30, %v2413_v27 }
 0xd99   : > { %v2420_v35 = vsel %vm601_vm1, %v8606_v29, 0.0 }
 0xd9a   : > { %2421 = vadd.xlane.f32.xlu0 %v2420_v35  ;;  %v2417_v36 = vsel %vm601_vm1, %v8608_v31, 0.0 }
 0xd9b   : > { %2418 = vadd.xlane.f32.xlu1 %v2417_v36 }
 0xd9c   : > { %v7693_v26 = vpop.f32.mrb[14].mxu0 }
 0xd9d   : > { %v2650_v27 = vadd.f32 %v7693_v26, %v2648_v22  ;;  %v2626_v28 = vpop.f32.mrb[15].mxu0 }
 0xd9e   : > { %v2649_v25 = vadd.f32 %v2648_v22, %v2626_v28 }
 0xda0   : > { %v7862_v35 = vpack.c.bf16 %v2650_v27, %v2649_v25  ;;  %v7696_v36 = vpop.f32.mrb[16].mxu0 }
 0xe27   : > { %v2422_v58 = vpop.xlane.xlu0 %2421 }
 0xe28   : > { %v2424_v38 = vmul.f32 0.03125, %v2422_v58  ;;  %v2419_v39 = vpop.xlane.xlu1 %2418  ;;  %v2652_v58 = vadd.f32 %v7696_v36, %v2648_v22 }
 0xe29   : > { %v2423_v40 = vmul.f32 0.03125, %v2419_v39 }
 0xe2a   : > { %v2426_v41 = vsub.f32 %v8606_v29, %v2424_v38  ;;  %v2636_v38 = vpop.f32.mrb[17].mxu0 }
 0xe2b   : > { %v2425_v32 = vsub.f32 %v8608_v31, %v2423_v40  ;;  %v2651_v39 = vadd.f32 %v2648_v22, %v2636_v38 }
 0xe2c   : > { %v2428_v42 = vmul.f32 %v2426_v41, %v2426_v41 }
 0xe2d   : > { %v2427_v43 = vmul.f32 %v2425_v32, %v2425_v32  ;;  %v7866_v40 = vpack.c.bf16 %v2652_v58, %v2651_v39 }
 0xe2e   : > { %v2432_v37 = vsel %vm601_vm1, %v2428_v42, 0.0  ;;  %v2462_v42 = vrot.slane %v8657_v21, %v8422_v33 }
 0xe2f   : > { %2433 = vadd.xlane.f32.xlu1 %v2432_v37  ;;  %v2429_v44 = vsel %vm601_vm1, %v2427_v43, 0.0  ;;  %7868 = vmatpush3.bf16.xpose.msk.msra.mxu0 %vm8663_vm4, %v7866_v40 }
 0xe30   : > { %2430 = vadd.xlane.f32.xlu0 %v2429_v44  ;;  %7875 = vmatprep.subr.bf16.mxu0 %v8263_v4 }
 0xebc   : > { %v2434_v7 = vpop.xlane.xlu1 %2433 }
 0xebd   : > { %v2436_v8 = vmul.f32 0.03125, %v2434_v7  ;;  %v2431_v9 = vpop.xlane.xlu0 %2430 }
 0xebe   : > { %v2435_v10 = vmul.f32 0.03125, %v2431_v9 }
 0xebf   : > { %v2438_v49 = vadd.f32 1e-05, %v2436_v8 }
 0xec0   : > { %v2437_v50 = vadd.f32 1e-05, %v2435_v10 }
 0xec1   : > { %8190 = vrsqrt.f32 %v2438_v49 }
 0xec2   : > { %8192 = vrsqrt.f32 %v2437_v50 }
 0xecb   : > { %v8191_v6 = vpop.eup %8190 }
 0xecc   : > { %v8193_v13 = vpop.eup %8192  ;;  %v2442_v14 = vmul.f32 %v8191_v6, %v2426_v41  ;;  %v8670_v41 = vpack.i.bf16 %v2650_v27, %v2649_v25 }
 0xecd   : > { %v2441_v15 = vmul.f32 %v8193_v13, %v2425_v32  ;;  %v8675_v32 = vpack.i.bf16 %v2652_v58, %v2651_v39 }
 0xece   : > { %v2448_v17 = vmul.f32 %v2446_v56, %v2442_v14 }
 0xecf   : > { %v2447_v5 = vmul.f32 %v2446_v56, %v2441_v15 }
 0xed0   : > { %v2454_v20 = vadd.f32 %v2452_v16, %v2448_v17 }
 0xed1   : > { %v2453_v18 = vadd.f32 %v2452_v16, %v2447_v5 }
 0xed3   : > { %7680 = vmatprep.mubr.msk.f32.mxu1 %vm601_vm1, %v2453_v18 }
 0xed4   : > { %7681 = vmatmul.mubr.msk.f32.vlgmr.msra.gmra.mrb[22].mxu1 %vm601_vm1, %v2454_v20 }
 0xed5   : > { %7701 = vmatprep.mubr.msk.f32.mxu1 %vm8251_vm2, %v8250_v45  ;;  %7864 = vmatpush3.bf16.xpose.msk.msra.mxu1 %vm8663_vm4, %v7862_v35 }
 0xed6   : > { %7869 = vmatprep.subr.bf16.mxu1 %v8263_v4 }
 0xfa7   : > { %v7682_v43 = vpop.f32.mrb[22].mxu1 }
 0xfa8   : > { %v2541_v37 = vadd.f32 %v7682_v43, %v2462_v42  ;;  %v2535_v44 = vpop.f32.mrb[23].mxu1 }
 0xfa9   : > { %v2536_v46 = vadd.f32 %v2535_v44, %v2462_v42 }
 0xfaa   : > { %v8679_v47 = vmul.f32 0.35355338, %v2541_v37 }
 0xfab   : > { %v8681_v48 = vmul.f32 0.35355338, %v2536_v46 }
 0xfac   : > { %7709 = vmatmul.mubr.msk.f32.vlgmr.msra.gmra.mrb[18].mxu0 %vm761_vm3, %v8679_v47 }
 0xfad   : > { %7702 = vmatmul.mubr.msk.f32.vlgmr.msra.gmra.mrb[24].mxu1 %vm761_vm3, %v8681_v48  ;;  %7729 = vmatprep.mubr.msk.f32.mxu0 %vm8251_vm2, %v8250_v45 }
 0xfae   : > { %7715 = vmatprep.mubr.msk.f32.mxu1 %vm8251_vm2, %v8250_v45 }
0x107f   : > { %v2825_v52 = vpop.f32.mrb[18].mxu0 }
0x1080   : > { %v2746_v53 = vpop.f32.mrb[24].mxu1  ;;  %v7710_v54 = vpop.f32.mrb[19].mxu0  ;;  %v2833_v55 = vsel %vm2829_vm5, %v2825_v52, -inf }
0x1081   : > { %2834 = vmax.xlane.f32.xlu1 %v2833_v55  ;;  %v7703_v57 = vpop.f32.mrb[25].mxu1  ;;  %v2830_v59 = vsel %vm2829_vm5, %v2746_v53, -inf }
0x1082   : > { %2831 = vmax.xlane.f32.xlu0 %v2830_v59 }
0x1098   : > { %2658 = vrot.lane.b32.xlu0 %v2656_v60, %s8249_s3 }
0x110e   : > { %v2835_v9 = vpop.xlane.xlu1 %2834 }
0x110f   : > { %v2832_v61 = vpop.xlane.xlu0 %2831  ;;  %v2837_v10 = vsub.f32 %v2825_v52, %v2835_v9 }
0x1110   : > { %v2836_v50 = vsub.f32 %v2746_v53, %v2832_v61 }
0x1111   : > { %v2840_v49 = vmul.f32 1.442695, %v2837_v10 }
0x1112   : > { %v2838_v12 = vmul.f32 1.442695, %v2836_v50 }
0x1113   : > { %v2659_v62 = vpop.permute.xlu0 %2658  ;;  %8194 = vpow2.f32 %v2840_v49 }
0x1114   : > { %v2661_v63 = vadd.f32 %v2659_v62, %v2626_v28  ;;  %v2662_v0 = vadd.f32 %v7693_v26, %v2659_v62  ;;  %v2663_v2 = vadd.f32 %v2659_v62, %v2636_v38  ;;  %v2664_v3 = vadd.f32 %v7696_v36, %v2659_v62 }
0x1115   : > { %8196 = vpow2.f32 %v2838_v12 }
0x1116   : > { %v8696_v7 = vpack.i.bf16 %v2662_v0, %v2661_v63  ;;  %v8698_v8 = vpack.i.bf16 %v2664_v3, %v2663_v2 }
0x1118   : > { %7957 = vrot.lane.b32.xlu1 %v8696_v7, %s8252_s15  ;;  %7962 = vrot.lane.b32.xlu0 %v8698_v8, %s8252_s15 }
0x111c   : > { %7972 = vrot.lane.b32.xlu0 %v8675_v32, %s8255_s20 }
0x111d   : > { %v8195_v56 = vpop.eup %8194 }
0x111e   : > { %v2845_v6 = vsel %vm2829_vm5, %v8195_v56, 0.0 }
0x111f   : > { %v8197_v13 = vpop.eup %8196 }
0x1120   : > { %3096 = vrot.lane.b32.xlu0 %v8679_v47, %s8255_s20  ;;  %v2842_v14 = vsel %vm2829_vm5, %v8197_v13, 0.0 }
0x113c   : > { %2846 = vadd.xlane.f32.xlu1 %v2845_v6 }
0x1140   : > { %2843 = vadd.xlane.f32.xlu1 %v2842_v14 }
0x1151   : > { %7967 = vrot.lane.b32.xlu1 %v8670_v41, %s8255_s20 }
0x1155   : > { %3014 = vrot.lane.b32.xlu1 %v8681_v48, %s8255_s20 }
0x118a   : > { %v7958_v15 = vpop.permute.xlu1 %7957  ;;  %v7963_v28 = vpop.permute.xlu0 %7962 }
0x118b   : > { %v7960_v16 = vunpack.i.h.bf16 %v7958_v15  ;;  %v7959_v17 = vunpack.i.l.bf16 %v7958_v15  ;;  %v7965_v35 = vunpack.i.h.bf16 %v7963_v28  ;;  %v7964_v36 = vunpack.i.l.bf16 %v7963_v28 }
0x118d   : > { %v7870_v5 = vpack.c.bf16 %v7960_v16, %v7959_v17  ;;  %v7873_v40 = vpack.c.bf16 %v7965_v35, %v7964_v36 }
0x118e   : > { %v7973_v42 = vpop.permute.xlu0 %7972 }
0x118f   : > { %7871 = vmatpush3.bf16.msra.mxu1 %v7870_v5  ;;  %v7975_v44 = vunpack.i.h.bf16 %v7973_v42  ;;  %v7974_v46 = vunpack.i.l.bf16 %v7973_v42 }
0x1190   : > { %7872 = vmatprep.subr.bf16.mxu1 %v8263_v4 }
0x1191   : > { %v7880_v52 = vpack.c.bf16 %v7975_v44, %v7974_v46  ;;  %v2666_v44 = vld [vmem:[%s8373_s30 + $0x8] sm:$0xff]  ;;  %v2665_v46 = vld [vmem:[%s8373_s30] sm:$0xff] }
0x1192   : > { %v3097_v53 = vpop.permute.xlu0 %3096 }
0x11c9   : > { %v2847_v18 = vpop.xlane.xlu1 %2846 }
0x11cd   : > { %v2844_v20 = vpop.xlane.xlu1 %2843 }
0x11ce   : > { %8198 = vrcp.f32 %v2844_v20 }
0x11cf   : > { %8200 = vrcp.f32 %v2847_v18 }
0x11d1   : > { %v7968_v22 = vpop.permute.xlu1 %7967 }
0x11d2   : > { %v7970_v26 = vunpack.i.h.bf16 %v7968_v22  ;;  %v7969_v27 = vunpack.i.l.bf16 %v7968_v22 }
0x11d4   : > { %v7876_v25 = vpack.c.bf16 %v7970_v26, %v7969_v27 }
0x11d5   : > { %v3015_v43 = vpop.permute.xlu1 %3014 }
0x11d6   : > { %7878 = vmatpush3.bf16.xpose.msk.msra.mxu0 %vm8663_vm4, %v7876_v25 }
0x11d7   : > { %7883 = vmatprep.subr.bf16.mxu0 %v8263_v4 }
0x11d8   : > { %v8199_v58 = vpop.eup %8198 }
0x11d9   : > { %v2850_v38 = vmul.f32 %v8199_v58, %v8197_v13  ;;  %v8201_v39 = vpop.eup %8200 }
0x11da   : > { %v2851_v37 = vmul.f32 %v8201_v39, %v8195_v56 }
0x11db   : > { %7716 = vmatmul.mubr.msk.f32.vlgmr.msra.gmra.mrb[26].mxu1 %vm2829_vm5, %v2850_v38 }
0x11dc   : > { %7874 = vmatpush3.bf16.msra.mxu1 %v7873_v40  ;;  %7722 = vmatprep.mubr.msk.f32.mxu1 %vm8251_vm2, %v8250_v45 }
0x11dd   : > { %7730 = vmatmul.mubr.msk.f32.vlgmr.msra.gmra.mrb[20].mxu0 %vm761_vm3, %v3015_v43  ;;  %7879 = vmatprep.subr.bf16.mxu1 %v8263_v4 }
0x11de   : > { %7743 = vmatprep.mubr.msk.f32.mxu0 %vm8251_vm2, %v8250_v45 }
0x11df   : > { %7723 = vmatmul.mubr.msk.f32.vlgmr.msra.gmra.mrb[28].mxu1 %vm2829_vm5, %v2851_v37 }
0x11e0   : > { %7736 = vmatprep.mubr.msk.f32.mxu1 %vm8251_vm2, %v8250_v45 }
0x11e5   : > { %7882 = vmatpush3.bf16.xpose.msk.msra.mxu1 %vm8663_vm4, %v7880_v52 }
0x11e6   : > { %7886 = vmatprep.subr.bf16.mxu1 %v8263_v4 }
0x11ec   : > { %7737 = vmatmul.mubr.msk.f32.vlgmr.msra.gmra.mrb[30].mxu1 %vm761_vm3, %v3097_v53 }
0x11ed   : > { %7750 = vmatprep.mubr.msk.f32.mxu1 %vm8251_vm2, %v8250_v45 }
0x12ae   : > { %v8734_v54 = vpop.f32.mrb[26].mxu1 }
0x12af   : > { %v7717_v55 = vpop.f32.mrb[27].mxu1 }
0x12b0   : > { %v3092_v57 = vpop.f32.mrb[20].mxu0 }
0x12b1   : > { %v7731_v59 = vpop.f32.mrb[21].mxu0  ;;  %v3178_v60 = vsel %vm2829_vm5, %v3092_v57, -inf }
0x12b2   : > { %3179 = vmax.xlane.f32.xlu1 %v3178_v60  ;;  %v8737_v61 = vpop.f32.mrb[28].mxu1 }
0x12b3   : > { %v7724_v62 = vpop.f32.mrb[29].mxu1 }
0x12bf   : > { %v3174_v63 = vpop.f32.mrb[30].mxu1 }
0x12c0   : > { %v7738_v0 = vpop.f32.mrb[31].mxu1  ;;  %v3181_v2 = vsel %vm2829_vm5, %v3174_v63, -inf }
0x12c1   : > { %3182 = vmax.xlane.f32.xlu0 %v3181_v2 }
0x12c3   : > { %7977 = vrot.lane.b32.xlu1 %v8696_v7, %s8254_s19 }
0x12c7   : > { %7987 = vrot.lane.b32.xlu1 %v8670_v41, %s8258_s13 }
0x12cb   : > { %7992 = vrot.lane.b32.xlu1 %v8675_v32, %s8258_s13 }
0x12cf   : > { %3520 = vrot.lane.b32.xlu1 %v8681_v48, %s8258_s13 }
0x133f   : > { %v3180_v3 = vpop.xlane.xlu1 %3179 }
0x1340   : > { %v3184_v9 = vsub.f32 %v3092_v57, %v3180_v3 }
0x1342   : > { %v3186_v10 = vmul.f32 1.442695, %v3184_v9 }
0x1343   : > { %v7978_v49 = vpop.permute.xlu1 %7977 }
0x1344   : > { %8202 = vpow2.f32 %v3186_v10  ;;  %v7980_v50 = vunpack.i.h.bf16 %v7978_v49  ;;  %v7979_v12 = vunpack.i.l.bf16 %v7978_v49 }
0x1346   : > { %v7884_v56 = vpack.c.bf16 %v7980_v50, %v7979_v12 }
0x1347   : > { %v7988_v36 = vpop.permute.xlu1 %7987 }
0x1348   : > { %7885 = vmatpush3.bf16.msra.mxu0 %v7884_v56  ;;  %v7990_v38 = vunpack.i.h.bf16 %v7988_v36  ;;  %v7989_v39 = vunpack.i.l.bf16 %v7988_v36 }
0x1349   : > { %7753 = vmatprep.subr.mxu0 %v2666_v44 }
0x134a   : > { %v7890_v42 = vpack.c.bf16 %v7990_v38, %v7989_v39 }
0x134b   : > { %v7993_v43 = vpop.permute.xlu1 %7992 }
0x134c   : > { %v7995_v59 = vunpack.i.h.bf16 %v7993_v43  ;;  %v7994_v60 = vunpack.i.l.bf16 %v7993_v43 }
0x134e   : > { %v8203_v6 = vpop.eup %8202  ;;  %v3183_v13 = vpop.xlane.xlu0 %3182  ;;  %v7894_v62 = vpack.c.bf16 %v7995_v59, %v7994_v60 }
0x134f   : > { %v3185_v14 = vsub.f32 %v3174_v63, %v3183_v13  ;;  %v3190_v15 = vsel %vm2829_vm5, %v8203_v6, 0.0  ;;  %v3521_v37 = vpop.permute.xlu1 %3520 }
0x1350   : > { %3191 = vadd.xlane.f32.xlu0 %v3190_v15 }
0x1351   : > { %v3188_v16 = vmul.f32 1.442695, %v3185_v14 }
0x1353   : > { %8204 = vpow2.f32 %v3188_v16 }
0x135d   : > { %v8205_v17 = vpop.eup %8204 }
0x135e   : > { %v3193_v5 = vsel %vm2829_vm5, %v8205_v17, 0.0 }
0x135f   : > { %3194 = vadd.xlane.f32.xlu0 %v3193_v5 }
0x1375   : > { %7982 = vrot.lane.b32.xlu0 %v8698_v8, %s8254_s19 }
0x1379   : > { %3602 = vrot.lane.b32.xlu0 %v8679_v47, %s8258_s13 }
0x13dd   : > { %v3192_v18 = vpop.xlane.xlu0 %3191 }
0x13de   : > { %8206 = vrcp.f32 %v3192_v18 }
0x13e8   : > { %v8207_v20 = vpop.eup %8206 }
0x13e9   : > { %v3198_v22 = vmul.f32 %v8207_v20, %v8203_v6 }
0x13eb   : > { %7744 = vmatmul.mubr.msk.f32.vlgmr.msra.gmra.mrb[22].mxu0 %vm2829_vm5, %v3198_v22  ;;  %v2667_v22 = vld [vmem:[%s8373_s30 + $0x10] sm:$0xff] }
0x13ec   : > { %v3195_v26 = vpop.xlane.xlu0 %3194  ;;  %7754 = vmatpush3.msra.mxu0 %v2666_v44 }
0x13ed   : > { %8208 = vrcp.f32 %v3195_v26  ;;  %7758 = vmatprep.subr.mxu0 %v2665_v46 }
0x13f0   : > { %v7983_v27 = vpop.permute.xlu0 %7982 }
0x13f1   : > { %v7985_v28 = vunpack.i.h.bf16 %v7983_v27  ;;  %v7984_v25 = vunpack.i.l.bf16 %v7983_v27 }
0x13f3   : > { %v7887_v35 = vpack.c.bf16 %v7985_v28, %v7984_v25 }
0x13f5   : > { %7888 = vmatpush3.bf16.msra.mxu1 %v7887_v35 }
0x13f6   : > { %7889 = vmatprep.subr.bf16.mxu1 %v8263_v4 }
0x13f7   : > { %v8209_v58 = vpop.eup %8208 }
0x13f8   : > { %v3199_v40 = vmul.f32 %v8209_v58, %v8205_v17 }
0x13fa   : > { %7751 = vmatmul.mubr.msk.f32.vlgmr.msra.gmra.mrb[32].mxu1 %vm2829_vm5, %v3199_v40 }
0x13fb   : > { %7767 = vmatprep.mubr.msk.f32.mxu1 %vm8251_vm2, %v8250_v45 }
0x13fe   : > { %7892 = vmatpush3.bf16.xpose.msk.msra.mxu1 %vm8663_vm4, %v7890_v42 }
0x13ff   : > { %7897 = vmatprep.subr.bf16.mxu1 %v8263_v4 }
0x1405   : > { %7768 = vmatmul.mubr.msk.f32.vlgmr.msra.gmra.mrb[34].mxu1 %vm761_vm3, %v3521_v37 }
0x1406   : > { %7781 = vmatprep.mubr.msk.f32.mxu1 %vm8251_vm2, %v8250_v45 }
0x14be   : > { %v3275_v52 = vpop.f32.mrb[22].mxu0 }
0x14bf   : > { %v7745_v53 = vpop.f32.mrb[23].mxu0  ;;  %7755 = vmatprep.mubr.msk.f32.mxu0 %vm761_vm3, %v3275_v52 }
0x14cd   : > { %v3354_v55 = vpop.f32.mrb[32].mxu1 }
0x14ce   : > { %v7752_v57 = vpop.f32.mrb[33].mxu1  ;;  %7756 = vmatmul.mubr.msk.f32.vlgmr.msra.gmra.mrb[24].mxu0 %vm761_vm3, %v3354_v55 }
0x14cf   : > { %7759 = vmatpush3.msra.mxu0 %v2665_v46  ;;  %7760 = vmatprep.mubr.msk.f32.mxu0 %vm761_vm3, %v8734_v54  ;;  %v3603_v54 = vpop.permute.xlu0 %3602 }
0x14d0   : > { %7893 = vmatprep.subr.bf16.mxu0 %v8263_v4 }
0x14d6   : > { %7761 = vmatmul.mubr.msk.f32.vlgmr.msra.gmra.mrb[24].mxu0 %vm761_vm3, %v8737_v61 }
0x14d7   : > { %7896 = vmatpush3.bf16.xpose.msk.msra.mxu0 %vm8663_vm4, %v7894_v62  ;;  %7774 = vmatprep.mubr.msk.f32.mxu0 %vm8251_vm2, %v8250_v45 }
0x14d8   : > { %v3598_v63 = vpop.f32.mrb[34].mxu1  ;;  %7791 = vmatprep.subr.mxu0 %v2667_v22 }
0x14d9   : > { %v7769_v0 = vpop.f32.mrb[35].mxu1  ;;  %v3684_v2 = vsel %vm2829_vm5, %v3598_v63, -inf }
0x14da   : > { %3685 = vmax.xlane.f32.xlu1 %v3684_v2 }
0x14de   : > { %7775 = vmatmul.mubr.msk.f32.vlgmr.msra.gmra.mrb[26].mxu0 %vm761_vm3, %v3603_v54 }
0x14df   : > { %7792 = vmatpush3.msra.mxu0 %v2667_v22 }
0x14e0   : > { %7907 = vmatprep.subr.bf16.mxu0 %v8263_v4 }
0x14eb   : > { %7997 = vrot.lane.b32.xlu1 %v8696_v7, %s8256_s22 }
0x14ef   : > { %8007 = vrot.lane.b32.xlu1 %v8670_v41, %s8261_s27 }
0x14f3   : > { %8012 = vrot.lane.b32.xlu1 %v8675_v32, %s8261_s27 }
0x14f7   : > { %3947 = vrot.lane.b32.xlu1 %v8681_v48, %s8261_s27 }
0x1567   : > { %v3686_v61 = vpop.xlane.xlu1 %3685 }
0x1568   : > { %v3690_v50 = vsub.f32 %v3598_v63, %v3686_v61 }
0x156a   : > { %v3692_v12 = vmul.f32 1.442695, %v3690_v50 }
0x156b   : > { %v7998_v3 = vpop.permute.xlu1 %7997 }
0x156c   : > { %v8000_v9 = vunpack.i.h.bf16 %v7998_v3  ;;  %v7999_v10 = vunpack.i.l.bf16 %v7998_v3  ;;  %8210 = vpow2.f32 %v3692_v12 }
0x156e   : > { %v7898_v49 = vpack.c.bf16 %v8000_v9, %v7999_v10 }
0x156f   : > { %v8008_v36 = vpop.permute.xlu1 %8007 }
0x1570   : > { %7899 = vmatpush3.bf16.msra.mxu1 %v7898_v49  ;;  %v8010_v38 = vunpack.i.h.bf16 %v8008_v36  ;;  %v8009_v39 = vunpack.i.l.bf16 %v8008_v36 }
0x1571   : > { %7900 = vmatprep.subr.bf16.mxu1 %v8263_v4 }
0x1573   : > { %v8013_v42 = vpop.permute.xlu1 %8012 }
0x1574   : > { %v8015_v46 = vunpack.i.h.bf16 %v8013_v42  ;;  %v8014_v52 = vunpack.i.l.bf16 %v8013_v42 }
0x1576   : > { %v8211_v13 = vpop.eup %8210  ;;  %v7908_v53 = vpack.c.bf16 %v8015_v46, %v8014_v52 }
0x1577   : > { %v3696_v32 = vsel %vm2829_vm5, %v8211_v13, 0.0  ;;  %v3948_v43 = vpop.permute.xlu1 %3947 }
0x15b1   : > { %v3680_v56 = vpop.f32.mrb[26].mxu0 }
0x15b2   : > { %v7776_v6 = vpop.f32.mrb[27].mxu0  ;;  %v3687_v41 = vsel %vm2829_vm5, %v3680_v56, -inf }
0x15b3   : > { %3688 = vmax.xlane.f32.xlu0 %v3687_v41 }
0x15b7   : > { %3697 = vadd.xlane.f32.xlu0 %v3696_v32 }
0x1640   : > { %v3689_v48 = vpop.xlane.xlu0 %3688 }
0x1641   : > { %v3691_v14 = vsub.f32 %v3680_v56, %v3689_v48 }
0x1643   : > { %v3694_v15 = vmul.f32 1.442695, %v3691_v14 }
0x1644   : > { %v3698_v16 = vpop.xlane.xlu0 %3697 }
0x1645   : > { %8212 = vpow2.f32 %v3694_v15 }
0x1646   : > { %8214 = vrcp.f32 %v3698_v16 }
0x164f   : > { %v8213_v17 = vpop.eup %8212 }
0x1650   : > { %v8215_v5 = vpop.eup %8214  ;;  %v3699_v18 = vsel %vm2829_vm5, %v8213_v17, 0.0 }
0x1651   : > { %v3704_v20 = vmul.f32 %v8215_v5, %v8211_v13  ;;  %3700 = vadd.xlane.f32.xlu0 %v3699_v18  ;;  %v2668_v18 = vld [vmem:[%s8373_s30 + $0x18] sm:$0xff] }
0x1653   : > { %7782 = vmatmul.mubr.msk.f32.vlgmr.msra.gmra.mrb[36].mxu1 %vm2829_vm5, %v3704_v20 }
0x1654   : > { %7788 = vmatprep.mubr.msk.f32.mxu1 %vm8251_vm2, %v8250_v45 }
0x1667   : > { %8002 = vrot.lane.b32.xlu0 %v8698_v8, %s8256_s22 }
0x166b   : > { %4029 = vrot.lane.b32.xlu0 %v8679_v47, %s8261_s27  ;;  %v7904_v47 = vpack.c.bf16 %v8010_v38, %v8009_v39 }
0x16de   : > { %v3701_v26 = vpop.xlane.xlu0 %3700 }
0x16df   : > { %8216 = vrcp.f32 %v3701_v26 }
0x16e2   : > { %v8003_v27 = vpop.permute.xlu0 %8002 }
0x16e3   : > { %v8005_v28 = vunpack.i.h.bf16 %v8003_v27  ;;  %v8004_v25 = vunpack.i.l.bf16 %v8003_v27 }
0x16e5   : > { %v7901_v35 = vpack.c.bf16 %v8005_v28, %v8004_v25  ;;  %v4377_v25 = vrot.slane %v8657_v21, %v8413_v24 }
0x16e6   : > { %v4030_v59 = vpop.permute.xlu0 %4029 }
0x16e7   : > { %7902 = vmatpush3.bf16.msra.mxu1 %v7901_v35 }
0x16e8   : > { %7903 = vmatprep.subr.bf16.mxu1 %v8263_v4 }
0x16e9   : > { %v8217_v58 = vpop.eup %8216 }
0x16ea   : > { %v3705_v40 = vmul.f32 %v8217_v58, %v8213_v17 }
0x16ec   : > { %7789 = vmatmul.mubr.msk.f32.vlgmr.msra.gmra.mrb[38].mxu1 %vm2829_vm5, %v3705_v40 }
0x16ed   : > { %7800 = vmatprep.mubr.msk.f32.mxu1 %vm8251_vm2, %v8250_v45 }
0x16f0   : > { %7906 = vmatpush3.bf16.xpose.msk.msra.mxu1 %vm8663_vm4, %v7904_v47 }
0x16f1   : > { %7911 = vmatprep.subr.bf16.mxu1 %v8263_v4 }
0x16f7   : > { %7801 = vmatmul.mubr.msk.f32.vlgmr.msra.gmra.mrb[40].mxu1 %vm761_vm3, %v3948_v43 }
0x16f8   : > { %7814 = vmatprep.mubr.msk.f32.mxu1 %vm8251_vm2, %v8250_v45 }
0x1726   : > { %v3781_v37 = vpop.f32.mrb[36].mxu1 }
0x1727   : > { %v7783_v44 = vpop.f32.mrb[37].mxu1  ;;  %7793 = vmatprep.mubr.msk.f32.mxu0 %vm761_vm3, %v3781_v37 }
0x17bf   : > { %v3860_v55 = vpop.f32.mrb[38].mxu1 }
0x17c0   : > { %v7790_v57 = vpop.f32.mrb[39].mxu1  ;;  %7794 = vmatmul.mubr.msk.f32.vlgmr.msra.gmra.mrb[24].mxu0 %vm761_vm3, %v3860_v55 }
0x17c1   : > { %7910 = vmatpush3.bf16.xpose.msk.msra.mxu0 %vm8663_vm4, %v7908_v53  ;;  %7807 = vmatprep.mubr.msk.f32.mxu0 %vm8251_vm2, %v8250_v45 }
0x17c2   : > { %7914 = vmatprep.subr.bf16.mxu0 %v8263_v4 }
0x17c8   : > { %7808 = vmatmul.mubr.msk.f32.vlgmr.msra.gmra.mrb[28].mxu0 %vm761_vm3, %v4030_v59  ;;  %v4421_v59 = vld [vmem:[%s8378_s16] sm:$0xff] }
0x17c9   : > { %7821 = vmatprep.mubr.msk.f32.mxu0 %vm8251_vm2, %v8250_v45 }
0x17ca   : > { %v4025_v60 = vpop.f32.mrb[40].mxu1 }
0x17cb   : > { %v7802_v62 = vpop.f32.mrb[41].mxu1  ;;  %v4111_v63 = vsel %vm2829_vm5, %v4025_v60, -inf }
0x17cc   : > { %4112 = vmax.xlane.f32.xlu1 %v4111_v63  ;;  %v4422_v62 = vld [vmem:[%s8378_s16 + $0x8] sm:$0xff] }
0x17dd   : > { %8017 = vrot.lane.b32.xlu1 %v8696_v7, %s8260_s2 }
0x1859   : > { %v4113_v30 = vpop.xlane.xlu1 %4112 }
0x185a   : > { %v4117_v4 = vsub.f32 %v4025_v60, %v4113_v30  ;;  %v4423_v60 = vld [vmem:[%s8378_s16 + $0x40] sm:$0xff]  ;;  %v4424_v30 = vld [vmem:[%s8378_s16 + $0x48] sm:$0xff] }
0x185b   : > { %v6853_v63 = vcombine.high %v4421_v59, %v4423_v60 }
0x185c   : > { %v4119_v3 = vmul.f32 1.442695, %v4117_v4  ;;  %v4427_v4 = vld [vmem:[%s8378_s16 + $0xc0] sm:$0xff] }
0x185d   : > { %v8018_v0 = vpop.permute.xlu1 %8017 }
0x185e   : > { %v8020_v2 = vunpack.i.h.bf16 %v8018_v0  ;;  %v8019_v54 = vunpack.i.l.bf16 %v8018_v0  ;;  %8218 = vpow2.f32 %v4119_v3  ;;  %v6852_v0 = vcombine.low %v4421_v59, %v4423_v60  ;;  %v4426_v3 = vld [vmem:[%s8378_s16 + $0x88] sm:$0xff] }
0x185f   : > { %v8032_v59 = vld [vmem:[%s8383_s4 + $0x108] sm:$0xff]  }
0x1860   : > { %v7912_v61 = vpack.c.bf16 %v8020_v2, %v8019_v54  ;;  %v6854_v2 = vcombine.low %v4422_v62, %v4424_v30  ;;  %v6855_v54 = vcombine.high %v4422_v62, %v4424_v30  ;;  %v8033_v60 = vld [vmem:[%s8383_s4 + $0x188] sm:$0xff]   ;;  %v8034_v62 = vld [vmem:[%s8383_s4 + $0x150] sm:$0xff]  }
0x1861   : > { %v8036_v30 = vld [vmem:[%s8383_s4 + $0x110] sm:$0xff]  }
0x1862   : > { %7913 = vmatpush3.bf16.msra.mxu1 %v7912_v61  ;;  %v4425_v61 = vld [vmem:[%s8378_s16 + $0x80] sm:$0xff] }
0x1863   : > { %4558 = vmatprep.subr.bf16.mxu1 %v6853_v63  ;;  %v8035_v63 = vld [vmem:[%s8383_s4 + $0x1d0] sm:$0xff]  }
0x1868   : > { %v8219_v49 = vpop.eup %8218 }
0x1869   : > { %v4123_v50 = vsel %vm2829_vm5, %v8219_v49, 0.0 }
0x189b   : > { %v4107_v9 = vpop.f32.mrb[28].mxu0 }
0x189c   : > { %v7809_v10 = vpop.f32.mrb[29].mxu0  ;;  %v4114_v45 = vsel %vm2829_vm5, %v4107_v9, -inf }
0x189d   : > { %4115 = vmax.xlane.f32.xlu0 %v4114_v45  ;;  %v4428_v10 = vld [vmem:[%s8378_s16 + $0xc8] sm:$0xff]  ;;  %v6856_v45 = vcombine.low %v4425_v61, %v4427_v4 }
0x18a1   : > { %4124 = vadd.xlane.f32.xlu0 %v4123_v50  ;;  %v6859_v50 = vcombine.high %v4426_v3, %v4428_v10 }
0x192a   : > { %v4116_v12 = vpop.xlane.xlu0 %4115 }
0x192b   : > { %v4118_v7 = vsub.f32 %v4107_v9, %v4116_v12  ;;  %v6857_v9 = vcombine.high %v4425_v61, %v4427_v4  ;;  %v6862_v12 = vld [vmem:[%s8378_s16 + $0x10] sm:$0xff]  ;;  %v8040_v61 = vld [vmem:[%s8383_s4 + $0x118] sm:$0xff]  }
0x192c   : > { %v8041_v4 = vld [vmem:[%s8383_s4 + $0x198] sm:$0xff]  }
0x192d   : > { %v4121_v56 = vmul.f32 1.442695, %v4118_v7  ;;  %v6864_v7 = vld [vmem:[%s8378_s16 + $0x50] sm:$0xff] }
0x192e   : > { %v4125_v6 = vpop.xlane.xlu0 %4124 }
0x192f   : > { %8220 = vpow2.f32 %v4121_v56  ;;  %v6863_v56 = vld [vmem:[%s8378_s16 + $0x18] sm:$0xff] }
0x1930   : > { %8222 = vrcp.f32 %v4125_v6  ;;  %v8264_v6 = vmov 0  }
0x1939   : > { %v8221_v41 = vpop.eup %8220 }
0x193a   : > { %v8223_v13 = vpop.eup %8222  ;;  %v4126_v32 = vsel %vm2829_vm5, %v8221_v41, 0.0 }
0x193b   : > { %v4131_v48 = vmul.f32 %v8223_v13, %v8219_v49  ;;  %4127 = vadd.xlane.f32.xlu0 %v4126_v32  ;;  %v6858_v49 = vcombine.low %v4426_v3, %v4428_v10  ;;  %v6865_v13 = vld [vmem:[%s8378_s16 + $0x58] sm:$0xff]  ;;  %v6935_v32 = vcombine.low %v6862_v12, %v6864_v7  ;;  %v8042_v3 = vld [vmem:[%s8383_s4 + $0x160] sm:$0xff]  }
0x193c   : > { %v8044_v10 = vld [vmem:[%s8383_s4 + $0x120] sm:$0xff]  }
0x193d   : > { %7815 = vmatmul.mubr.msk.f32.vlgmr.msra.gmra.mrb[42].mxu1 %vm2829_vm5, %v4131_v48  ;;  %v6937_v48 = vcombine.low %v6863_v56, %v6865_v13 }
0x193e   : > { %4559 = vmatpush1.bf16.msra.mxu1 %v6852_v0  ;;  %4590 = vmatprep.mubr.bf16.mxu1 %v8264_v6  ;;  %v8037_v0 = vld [vmem:[%s8383_s4 + $0x190] sm:$0xff]  }
0x193f   : > { %4560 = vmatprep.subr.bf16.mxu1 %v6857_v9  ;;  %v8043_v9 = vld [vmem:[%s8383_s4 + $0x1e0] sm:$0xff]  }
0x1942   : > { %4561 = vmatpush1.bf16.msra.mxu1 %v6856_v45  ;;  %v8045_v45 = vld [vmem:[%s8383_s4 + $0x1a0] sm:$0xff]  }
0x1951   : > { %8022 = vrot.lane.b32.xlu0 %v8698_v8, %s8260_s2 }
0x19c8   : > { %v4128_v14 = vpop.xlane.xlu0 %4127 }
0x19c9   : > { %8224 = vrcp.f32 %v4128_v14  ;;  %v6938_v14 = vcombine.high %v6863_v56, %v6865_v13  ;;  %v8050_v56 = vld [vmem:[%s8383_s4 + $0x170] sm:$0xff]  }
0x19ca   : > { %v8052_v13 = vld [vmem:[%s8383_s4 + $0x130] sm:$0xff]  }
0x19cc   : > { %v8023_v15 = vpop.permute.xlu0 %8022 }
0x19cd   : > { %v8025_v16 = vunpack.i.h.bf16 %v8023_v15  ;;  %v8024_v17 = vunpack.i.l.bf16 %v8023_v15 }
0x19cf   : > { %v7915_v5 = vpack.c.bf16 %v8025_v16, %v8024_v17 }
0x19d1   : > { %7916 = vmatpush3.bf16.msra.mxu0 %v7915_v5 }
0x19d2   : > { %7824 = vmatprep.subr.mxu0 %v2668_v18 }
0x19d3   : > { %v8225_v20 = vpop.eup %8224 }
0x19d4   : > { %v4132_v22 = vmul.f32 %v8225_v20, %v8221_v41  ;;  %v6936_v41 = vcombine.high %v6862_v12, %v6864_v7  ;;  %v8048_v12 = vld [vmem:[%s8383_s4 + $0x128] sm:$0xff]  }
0x19d5   : > { %v8049_v7 = vld [vmem:[%s8383_s4 + $0x1a8] sm:$0xff]  }
0x19d6   : > { %7822 = vmatmul.mubr.msk.f32.vlgmr.msra.gmra.mrb[30].mxu0 %vm2829_vm5, %v4132_v22  ;;  %4793 = vmatprep.subr.bf16.mxu1 %v6936_v41  ;;  %v4411_v22 = vrot.slane %v8657_v21, %v744_v1  ;;  %v8051_v41 = vld [vmem:[%s8383_s4 + $0x1f0] sm:$0xff]  }
0x19d7   : > { %7825 = vmatpush3.msra.mxu0 %v2668_v18 }
0x19d8   : > { %4601 = vmatprep.subr.bf16.mxu0 %v6855_v54  ;;  %v8039_v54 = vld [vmem:[%s8383_s4 + $0x1d8] sm:$0xff]  }
0x1a10   : > { %v4208_v26 = vpop.f32.mrb[42].mxu1 }
0x1a11   : > { %v7816_v27 = vpop.f32.mrb[43].mxu1  ;;  %7826 = vmatprep.mubr.msk.f32.mxu0 %vm761_vm3, %v4208_v26 }
0x1aa9   : > { %v4287_v28 = vpop.f32.mrb[30].mxu0 }
0x1aaa   : > { %v7823_v8 = vpop.f32.mrb[31].mxu0  ;;  %7827 = vmatmul.mubr.msk.f32.vlgmr.msra.gmra.mrb[24].mxu0 %vm761_vm3, %v4287_v28  ;;  %v4417_v28 = vrot.slane %v8657_v21, %v2411_v19 }
0x1aab   : > { %4602 = vmatpush1.bf16.msra.mxu0 %v6854_v2  ;;  %4633 = vmatprep.mubr.bf16.mxu0 %v8264_v6  ;;  %v8038_v2 = vld [vmem:[%s8383_s4 + $0x158] sm:$0xff]  }
0x1aac   : > { %4603 = vmatprep.subr.bf16.mxu0 %v6859_v50  ;;  %v8047_v50 = vld [vmem:[%s8383_s4 + $0x1e8] sm:$0xff]  }
0x1aaf   : > { %4604 = vmatpush1.bf16.msra.mxu0 %v6858_v49  ;;  %v8046_v49 = vld [vmem:[%s8383_s4 + $0x168] sm:$0xff]  }
0x1ab0   : > { %4836 = vmatprep.subr.bf16.mxu0 %v6938_v14  ;;  %v8055_v14 = vld [vmem:[%s8383_s4 + $0x1f8] sm:$0xff]  }
0x1b7d   : > { %v7828_v35 = vpop.f32.mrb[24].mxu0 }
0x1b7e   : > { %v4379_v36 = vadd.f32 %v7828_v35, %v4377_v25  ;;  %v4363_v58 = vpop.f32.mrb[25].mxu0 }
0x1b7f   : > { %v4378_v38 = vadd.f32 %v4377_v25, %v4363_v58  ;;  %v6866_v58 = vld [vmem:[%s8378_s16 + $0x90] sm:$0xff] }
0x1b80   : > { %v8837_v39 = vadd.f32 %v4379_v36, %v8606_v29 }
0x1b81   : > { %v8840_v40 = vadd.f32 %v4378_v38, %v8608_v31 }
0x1b82   : > { %v4385_v47 = vsel %vm601_vm1, %v8837_v39, 0.0 }
0x1b83   : > { %4386 = vadd.xlane.f32.xlu0 %v4385_v47  ;;  %v4382_v42 = vsel %vm601_vm1, %v8840_v40, 0.0  ;;  %v6868_v47 = vld [vmem:[%s8378_s16 + $0xd0] sm:$0xff] }
0x1b84   : > { %4383 = vadd.xlane.f32.xlu1 %v4382_v42  ;;  %v6867_v42 = vld [vmem:[%s8378_s16 + $0x98] sm:$0xff]  ;;  %v6940_v1 = vcombine.high %v6866_v58, %v6868_v47  ;;  %v6939_v19 = vcombine.low %v6866_v58, %v6868_v47 }
0x1c10   : > { %v4387_v43 = vpop.xlane.xlu0 %4386 }
0x1c11   : > { %v4389_v37 = vmul.f32 0.03125, %v4387_v43  ;;  %v4384_v44 = vpop.xlane.xlu1 %4383  ;;  %v6869_v43 = vld [vmem:[%s8378_s16 + $0xd8] sm:$0xff] }
0x1c12   : > { %v4388_v29 = vmul.f32 0.03125, %v4384_v44  ;;  %v6941_v21 = vcombine.low %v6867_v42, %v6869_v43 }
0x1c13   : > { %v4391_v46 = vsub.f32 %v8837_v39, %v4389_v37 }
0x1c14   : > { %v4390_v31 = vsub.f32 %v8840_v40, %v4388_v29  ;;  %v6942_v29 = vcombine.high %v6867_v42, %v6869_v43 }
0x1c15   : > { %v4393_v52 = vmul.f32 %v4391_v46, %v4391_v46 }
0x1c16   : > { %v4392_v53 = vmul.f32 %v4390_v31, %v4390_v31 }
0x1c17   : > { %v4397_v55 = vsel %vm601_vm1, %v4393_v52, 0.0  ;;  %v8028_v52 = vld [vmem:[%s8383_s4 + $0x100] sm:$0xff]  }
0x1c18   : > { %4398 = vadd.xlane.f32.xlu0 %v4397_v55  ;;  %v4394_v57 = vsel %vm601_vm1, %v4392_v53, 0.0  ;;  %v8029_v53 = vld [vmem:[%s8383_s4 + $0x180] sm:$0xff]   ;;  %v8030_v55 = vld [vmem:[%s8383_s4 + $0x148] sm:$0xff]  }
0x1c19   : > { %4395 = vadd.xlane.f32.xlu1 %v4394_v57  ;;  %v8031_v57 = vld [vmem:[%s8383_s4 + $0x1c8] sm:$0xff]  }
0x1ca5   : > { %v4399_v15 = vpop.xlane.xlu0 %4398 }
0x1ca6   : > { %v4401_v16 = vmul.f32 0.03125, %v4399_v15  ;;  %v4396_v17 = vpop.xlane.xlu1 %4395  ;;  %v8056_v15 = vld [vmem:[%s8383_s4 + $0x138] sm:$0xff]  }
0x1ca7   : > { %v4400_v5 = vmul.f32 0.03125, %v4396_v17  ;;  %v8058_v17 = vld [vmem:[%s8383_s4 + $0x40] sm:$0xff]  }
0x1ca8   : > { %v4403_v18 = vadd.f32 1e-05, %v4401_v16  ;;  %v8057_v16 = vld [vmem:[%s8383_s4 + $0x1b8] sm:$0xff]  }
0x1ca9   : > { %v4402_v20 = vadd.f32 1e-05, %v4400_v5  ;;  %v8059_v5 = vld [vmem:[%s8383_s4 + $0xc0] sm:$0xff]  }
0x1caa   : > { %8226 = vrsqrt.f32 %v4403_v18  ;;  %v4429_v18 = vld [vmem:[%s8393_s28] sm:$0xf] }
0x1cab   : > { %8228 = vrsqrt.f32 %v4402_v20  ;;  %v4498_v20 = vrot.slane %v4429_v18, %v8422_v33 }
0x1cb4   : > { %v8227_v26 = vpop.eup %8226 }
0x1cb5   : > { %v8229_v27 = vpop.eup %8228  ;;  %v4407_v8 = vmul.f32 %v8227_v26, %v4391_v46  ;;  %v8026_v46 = vld [vmem:[%s8383_s4 + $0x140] sm:$0xff]   ;;  %v4502_v26 = vrot.slane %v4429_v18, %v8425_v34 }
0x1cb6   : > { %v4406_v25 = vmul.f32 %v8229_v27, %v4390_v31  ;;  %v8027_v31 = vld [vmem:[%s8383_s4 + $0x1c0] sm:$0xff]   ;;  %v4510_v27 = vrot.slane %v4429_v18, %v8413_v24 }
0x1cb7   : > { %v4413_v35 = vmul.f32 %v4411_v22, %v4407_v8 }
0x1cb8   : > { %v4412_v36 = vmul.f32 %v4411_v22, %v4406_v25  ;;  %v4506_v22 = vrot.slane %v4429_v18, %v8448_v51  ;;  %v6870_v25 = vld [vmem:[%s8393_s28 + $0x4] sm:$0xf] }
0x1cb9   : > { %v4419_v38 = vadd.f32 %v4417_v28, %v4413_v35 }
0x1cba   : > { %v4418_v37 = vadd.f32 %v4417_v28, %v4412_v36 }
0x1cbc   : > { %v8874_v44 = vpack.c.bf16 %v4419_v38, %v4418_v37 }
0x1cbe   : > { %6860 = vmatmul.mubr.msk.bf16.vlgmr.msra.gmra.mrb[44].mxu1 %vm601_vm1, %v8874_v44  ;;  %6861 = vmatmul.mubr.msk.bf16.vlgmr.msra.gmra.mrb[32].mxu0 %vm601_vm1, %v8874_v44 }
0x1cbf   : > { %4794 = vmatpush1.bf16.msra.mxu1 %v6935_v32  ;;  %4837 = vmatpush1.bf16.msra.mxu0 %v6937_v48  ;;  %v8053_v32 = vld [vmem:[%s8383_s4 + $0x1b0] sm:$0xff]   ;;  %v8054_v48 = vld [vmem:[%s8383_s4 + $0x178] sm:$0xff]  }
0x1cc0   : > { %4795 = vmatprep.subr.bf16.mxu1 %v6940_v1  ;;  %4838 = vmatprep.subr.bf16.mxu0 %v6942_v29 }
0x1cc1   : > { %4825 = vmatprep.mubr.bf16.mxu1 %v8264_v6  ;;  %4868 = vmatprep.mubr.bf16.mxu0 %v8264_v6 }
0x1cc3   : > { %4796 = vmatpush1.bf16.msra.mxu1 %v6939_v19  ;;  %4839 = vmatpush1.bf16.msra.mxu0 %v6941_v21 }
0x1cc4   : > { %7382 = vmatprep.subr.bf16.mxu1 %v8026_v46  ;;  %7404 = vmatprep.subr.bf16.mxu0 %v8027_v31  ;;  %v4736_v46 = vrot.slane %v6870_v25, %v8422_v33  ;;  %v4744_v31 = vrot.slane %v6870_v25, %v8448_v51 }
0x1cc6   : > { %6943 = vmatmul.mubr.msk.bf16.vlgmr.msra.gmra.mrb[48].mxu1 %vm601_vm1, %v8874_v44  ;;  %6944 = vmatmul.mubr.msk.bf16.vlgmr.msra.gmra.mrb[36].mxu0 %vm601_vm1, %v8874_v44 }
0x1cc7   : > { %7383 = vmatpush3.bf16.msra.mxu1 %v8028_v52  ;;  %7405 = vmatpush3.bf16.msra.mxu0 %v8029_v53 }
0x1cc8   : > { %7384 = vmatprep.subr.bf16.mxu1 %v8030_v55  ;;  %7406 = vmatprep.subr.bf16.mxu0 %v8031_v57  ;;  %v4740_v55 = vrot.slane %v6870_v25, %v8425_v34  ;;  %v4748_v57 = vrot.slane %v6870_v25, %v8413_v24 }
0x1ccb   : > { %7385 = vmatpush3.bf16.msra.mxu1 %v8032_v59  ;;  %7407 = vmatpush3.bf16.msra.mxu0 %v8033_v60 }
0x1ccc   : > { %7386 = vmatprep.subr.bf16.mxu1 %v8034_v62  ;;  %7408 = vmatprep.subr.bf16.mxu0 %v8035_v63 }
0x1ccf   : > { %7387 = vmatpush3.bf16.msra.mxu1 %v8036_v30  ;;  %7409 = vmatpush3.bf16.msra.mxu0 %v8037_v0 }
0x1cd0   : > { %7388 = vmatprep.subr.bf16.mxu1 %v8038_v2  ;;  %7410 = vmatprep.subr.bf16.mxu0 %v8039_v54 }
0x1cd3   : > { %7389 = vmatpush3.bf16.msra.mxu1 %v8040_v61  ;;  %7411 = vmatpush3.bf16.msra.mxu0 %v8041_v4 }
0x1cd4   : > { %7390 = vmatprep.subr.bf16.mxu1 %v8042_v3  ;;  %7412 = vmatprep.subr.bf16.mxu0 %v8043_v9 }
0x1cd7   : > { %7391 = vmatpush3.bf16.msra.mxu1 %v8044_v10  ;;  %7413 = vmatpush3.bf16.msra.mxu0 %v8045_v45 }
0x1cd8   : > { %7392 = vmatprep.subr.bf16.mxu1 %v8046_v49  ;;  %7414 = vmatprep.subr.bf16.mxu0 %v8047_v50 }
0x1cdb   : > { %7393 = vmatpush3.bf16.msra.mxu1 %v8048_v12  ;;  %7415 = vmatpush3.bf16.msra.mxu0 %v8049_v7 }
0x1cdc   : > { %7394 = vmatprep.subr.bf16.mxu1 %v8050_v56  ;;  %7416 = vmatprep.subr.bf16.mxu0 %v8051_v41 }
0x1cdf   : > { %7395 = vmatpush3.bf16.msra.mxu1 %v8052_v13  ;;  %7417 = vmatpush3.bf16.msra.mxu0 %v8053_v32 }
0x1ce0   : > { %7396 = vmatprep.subr.bf16.mxu1 %v8054_v48  ;;  %7418 = vmatprep.subr.bf16.mxu0 %v8055_v14 }
0x1ce3   : > { %7397 = vmatpush3.bf16.msra.mxu1 %v8056_v15  ;;  %7419 = vmatpush3.bf16.msra.mxu0 %v8057_v16 }
0x1ce4   : > { %7426 = vmatprep.subr.bf16.mxu1 %v8058_v17  ;;  %7448 = vmatprep.subr.bf16.mxu0 %v8059_v5 }
0x1d91   : > { %v4592_v28 = vpop.f32.mrb[44].mxu1  ;;  %v4635_v8 = vpop.f32.mrb[32].mxu0 }
0x1d92   : > { %v4593_v35 = vadd.f32 %v4592_v28, %v4498_v20  ;;  %v4636_v36 = vadd.f32 %v4635_v8, %v4506_v22  ;;  %v4594_v58 = vpop.f32.mrb[45].mxu1  ;;  %v4637_v38 = vpop.f32.mrb[33].mxu0 }
0x1d93   : > { %v4595_v47 = vadd.f32 %v4594_v58, %v4502_v26  ;;  %v4638_v42 = vadd.f32 %v4637_v38, %v4510_v27  ;;  %v4596_v43 = vpop.f32.mrb[46].mxu1  ;;  %v4639_v37 = vpop.f32.mrb[34].mxu0 }
0x1d94   : > { %v4597_v1 = vadd.f32 %v4596_v43, %v4498_v20  ;;  %v4640_v29 = vadd.f32 %v4639_v37, %v4506_v22  ;;  %v4598_v19 = vpop.f32.mrb[47].mxu1  ;;  %v4641_v21 = vpop.f32.mrb[35].mxu0  ;;  %v4644_v59 = vmax.f32 %v4593_v35, 0.0  ;;  %v4646_v60 = vmax.f32 %v4636_v36, 0.0  ;;  %v8062_v43 = vld [vmem:[%s8383_s4 + $0x48] sm:$0xff]  }
0x1d95   : > { %v4599_v52 = vadd.f32 %v4598_v19, %v4502_v26  ;;  %v4642_v53 = vadd.f32 %v4641_v21, %v4510_v27  ;;  %v4645_v30 = vmax.f32 %v4595_v47, 0.0  ;;  %v4647_v0 = vmax.f32 %v4638_v42, 0.0  ;;  %v8060_v47 = vld [vmem:[%s8383_s4] sm:$0xff]   ;;  %v8063_v37 = vld [vmem:[%s8383_s4 + $0xc8] sm:$0xff]   ;;  %v8066_v19 = vld [vmem:[%s8383_s4 + $0x50] sm:$0xff]  }
0x1d96   : > { %v4648_v62 = vmax.f32 %v4597_v1, 0.0  ;;  %v4650_v63 = vmax.f32 %v4640_v29, 0.0  ;;  %v8061_v42 = vld [vmem:[%s8383_s4 + $0x80] sm:$0xff]   ;;  %v8064_v1 = vld [vmem:[%s8383_s4 + $0x8] sm:$0xff]   ;;  %v8067_v21 = vld [vmem:[%s8383_s4 + $0xd0] sm:$0xff]  }
0x1d97   : > { %v4649_v2 = vmax.f32 %v4599_v52, 0.0  ;;  %v4651_v54 = vmax.f32 %v4642_v53, 0.0  ;;  %v8065_v29 = vld [vmem:[%s8383_s4 + $0x88] sm:$0xff]   ;;  %v8070_v52 = vld [vmem:[%s8383_s4 + $0x58] sm:$0xff]  }
0x1d98   : > { %v8930_v61 = vpack.c.bf16 %v4648_v62, %v4644_v59  ;;  %v8932_v4 = vpack.c.bf16 %v4650_v63, %v4646_v60  ;;  %v8071_v53 = vld [vmem:[%s8383_s4 + $0xd8] sm:$0xff]   ;;  %v8074_v59 = vld [vmem:[%s8383_s4 + $0x60] sm:$0xff]  }
0x1d99   : > { %v4653_v3 = vpack.c.bf16 %v4649_v2, %v4645_v30  ;;  %v4655_v9 = vpack.c.bf16 %v4651_v54, %v4647_v0  ;;  %v4827_v10 = vpop.f32.mrb[48].mxu1  ;;  %v4870_v45 = vpop.f32.mrb[36].mxu0  ;;  %v8075_v60 = vld [vmem:[%s8383_s4 + $0xe0] sm:$0xff]   ;;  %v8078_v30 = vld [vmem:[%s8383_s4 + $0x68] sm:$0xff]  }
0x1d9a   : > { %v4828_v49 = vadd.f32 %v4827_v10, %v4736_v46  ;;  %v4871_v50 = vadd.f32 %v4870_v45, %v4744_v31  ;;  %v4829_v12 = vpop.f32.mrb[49].mxu1  ;;  %v4872_v7 = vpop.f32.mrb[37].mxu0  ;;  %v8076_v62 = vld [vmem:[%s8383_s4 + $0x20] sm:$0xff]   ;;  %v8079_v0 = vld [vmem:[%s8383_s4 + $0xe8] sm:$0xff]   ;;  %v8084_v10 = vld [vmem:[%s8383_s4 + $0x30] sm:$0xff]  }
0x1d9b   : > { %v4830_v56 = vadd.f32 %v4829_v12, %v4740_v55  ;;  %v4873_v41 = vadd.f32 %v4872_v7, %v4748_v57  ;;  %v4831_v13 = vpop.f32.mrb[50].mxu1  ;;  %v4874_v32 = vpop.f32.mrb[38].mxu0  ;;  %v8077_v63 = vld [vmem:[%s8383_s4 + $0xa0] sm:$0xff]   ;;  %v8080_v2 = vld [vmem:[%s8383_s4 + $0x28] sm:$0xff]   ;;  %v8085_v45 = vld [vmem:[%s8383_s4 + $0xb0] sm:$0xff]  }
0x1d9c   : > { %v4832_v48 = vadd.f32 %v4831_v13, %v4736_v46  ;;  %v4875_v14 = vadd.f32 %v4874_v32, %v4744_v31  ;;  %v4833_v15 = vpop.f32.mrb[51].mxu1  ;;  %v4876_v16 = vpop.f32.mrb[39].mxu0  ;;  %v4879_v18 = vmax.f32 %v4828_v49, 0.0  ;;  %v4881_v20 = vmax.f32 %v4871_v50, 0.0  ;;  %v8068_v46 = vld [vmem:[%s8383_s4 + $0x10] sm:$0xff]   ;;  %v8081_v54 = vld [vmem:[%s8383_s4 + $0xa8] sm:$0xff]  }
0x1d9d   : > { %v4834_v17 = vadd.f32 %v4833_v15, %v4740_v55  ;;  %v4877_v5 = vadd.f32 %v4876_v16, %v4748_v57  ;;  %v4880_v27 = vmax.f32 %v4830_v56, 0.0  ;;  %v4882_v28 = vmax.f32 %v4873_v41, 0.0  ;;  %v8069_v31 = vld [vmem:[%s8383_s4 + $0x90] sm:$0xff]   ;;  %v8072_v55 = vld [vmem:[%s8383_s4 + $0x18] sm:$0xff]   ;;  %v7009_v12 = vld [vmem:[%s8378_s16 + $0x20] sm:$0xff] }
0x1d9e   : > { %v4883_v22 = vmax.f32 %v4832_v48, 0.0  ;;  %v4885_v26 = vmax.f32 %v4875_v14, 0.0  ;;  %v8073_v57 = vld [vmem:[%s8383_s4 + $0x98] sm:$0xff]   ;;  %v7011_v7 = vld [vmem:[%s8378_s16 + $0x60] sm:$0xff]  ;;  %v7010_v56 = vld [vmem:[%s8378_s16 + $0x28] sm:$0xff] }
0x1d9f   : > { %v4884_v8 = vmax.f32 %v4834_v17, 0.0  ;;  %v4886_v25 = vmax.f32 %v4877_v5, 0.0  ;;  %v8086_v49 = vld [vmem:[%s8383_s4 + $0x78] sm:$0xff]   ;;  %v7012_v41 = vld [vmem:[%s8378_s16 + $0x68] sm:$0xff]  ;;  %v7083_v48 = vcombine.high %v7009_v12, %v7011_v7  ;;  %v7013_v15 = vld [vmem:[%s8378_s16 + $0xa0] sm:$0xff] }
0x1da0   : > { %v4887_v35 = vpack.c.bf16 %v4883_v22, %v4879_v18  ;;  %v4889_v36 = vpack.c.bf16 %v4885_v26, %v4881_v20  ;;  %v8087_v50 = vld [vmem:[%s8383_s4 + $0xf8] sm:$0xff]   ;;  %v7085_v14 = vcombine.high %v7010_v56, %v7012_v41  ;;  %v7015_v16 = vld [vmem:[%s8378_s16 + $0xe0] sm:$0xff]  ;;  %v7014_v17 = vld [vmem:[%s8378_s16 + $0xa8] sm:$0xff]  ;;  %v7082_v18 = vcombine.low %v7009_v12, %v7011_v7 }
0x1da1   : > { %v4888_v58 = vpack.c.bf16 %v4884_v8, %v4880_v27  ;;  %v4890_v38 = vpack.c.bf16 %v4886_v25, %v4882_v28  ;;  %v8088_v13 = vld [vmem:[%s8383_s4 + $0x38] sm:$0xff]   ;;  %v7016_v5 = vld [vmem:[%s8378_s16 + $0xe8] sm:$0xff]  ;;  %v7084_v20 = vcombine.low %v7010_v56, %v7012_v41  ;;  %v7087_v22 = vcombine.high %v7013_v15, %v7015_v16  ;;  %v8092_v8 = vld [vmem:[%s8383_s4 + $0x200] sm:$0xff]  }
0x1da2   : > { %v8089_v32 = vld [vmem:[%s8383_s4 + $0xb8] sm:$0xff]   ;;  %v7089_v26 = vcombine.high %v7014_v17, %v7016_v5  ;;  %v7086_v27 = vcombine.low %v7013_v15, %v7015_v16  ;;  %v7088_v28 = vcombine.low %v7014_v17, %v7016_v5  ;;  %v8093_v25 = vld [vmem:[%s8383_s4 + $0x280] sm:$0xff]  }
0x1da3   : > { %5115 = vmatprep.mubr.bf16.mxu1 %v4888_v58  ;;  %5156 = vmatprep.mubr.bf16.mxu0 %v4890_v38  ;;  %v8096_v58 = vld [vmem:[%s8383_s4 + $0x208] sm:$0xff]   ;;  %v9024_v12 = vld [vmem:[%s8378_s16 + $0x78] sm:$0xff] }
0x1da4   : > { %5116 = vmatmul.mubr.bf16.vlgmr.msra.gmra.mrb[52].mxu1 %v4887_v35  ;;  %5157 = vmatmul.mubr.bf16.vlgmr.msra.gmra.mrb[40].mxu0 %v4889_v36  ;;  %v8094_v35 = vld [vmem:[%s8383_s4 + $0x248] sm:$0xff]  }
0x1da5   : > { %7427 = vmatpush3.bf16.msra.mxu1 %v8060_v47  ;;  %7449 = vmatpush3.bf16.msra.mxu0 %v8061_v42  ;;  %v8095_v36 = vld [vmem:[%s8383_s4 + $0x2c8] sm:$0xff]   ;;  %v8098_v47 = vld [vmem:[%s8383_s4 + $0x250] sm:$0xff]  }
0x1da6   : > { %5389 = vmatprep.mubr.bf16.mxu1 %v4653_v3  ;;  %5430 = vmatprep.mubr.bf16.mxu0 %v4655_v9  ;;  %v8082_v3 = vld [vmem:[%s8383_s4 + $0x70] sm:$0xff]   ;;  %v8097_v38 = vld [vmem:[%s8383_s4 + $0x288] sm:$0xff]  }
0x1da7   : > { %7428 = vmatprep.subr.bf16.mxu1 %v8062_v43  ;;  %7450 = vmatprep.subr.bf16.mxu0 %v8063_v37  ;;  %v8083_v9 = vld [vmem:[%s8383_s4 + $0xf0] sm:$0xff]  }
0x1da8   : > { %v8099_v42 = vld [vmem:[%s8383_s4 + $0x2d0] sm:$0xff]  }
0x1da9   : > { %7429 = vmatpush3.bf16.msra.mxu1 %v8064_v1  ;;  %7451 = vmatpush3.bf16.msra.mxu0 %v8065_v29  ;;  %v8100_v43 = vld [vmem:[%s8383_s4 + $0x210] sm:$0xff]   ;;  %v8102_v1 = vld [vmem:[%s8383_s4 + $0x258] sm:$0xff]  }
0x1daa   : > { %7430 = vmatprep.subr.bf16.mxu1 %v8066_v19  ;;  %7452 = vmatprep.subr.bf16.mxu0 %v8067_v21  ;;  %v8101_v37 = vld [vmem:[%s8383_s4 + $0x290] sm:$0xff]   ;;  %v8103_v29 = vld [vmem:[%s8383_s4 + $0x2d8] sm:$0xff]  }
0x1dab   : > { %v8104_v19 = vld [vmem:[%s8383_s4 + $0x218] sm:$0xff]  }
0x1dac   : > { %v8105_v21 = vld [vmem:[%s8383_s4 + $0x298] sm:$0xff]  }
0x1dad   : > { %7431 = vmatpush3.bf16.msra.mxu1 %v8068_v46  ;;  %7453 = vmatpush3.bf16.msra.mxu0 %v8069_v31  ;;  %v8106_v46 = vld [vmem:[%s8383_s4 + $0x260] sm:$0xff]  }
0x1dae   : > { %7432 = vmatprep.subr.bf16.mxu1 %v8070_v52  ;;  %7454 = vmatprep.subr.bf16.mxu0 %v8071_v53  ;;  %v8107_v31 = vld [vmem:[%s8383_s4 + $0x2e0] sm:$0xff]  }
0x1daf   : > { %v8108_v52 = vld [vmem:[%s8383_s4 + $0x220] sm:$0xff]  }
0x1db0   : > { %v8109_v53 = vld [vmem:[%s8383_s4 + $0x2a0] sm:$0xff]  }
0x1db1   : > { %7433 = vmatpush3.bf16.msra.mxu1 %v8072_v55  ;;  %7455 = vmatpush3.bf16.msra.mxu0 %v8073_v57  ;;  %v8110_v55 = vld [vmem:[%s8383_s4 + $0x268] sm:$0xff]  }
0x1db2   : > { %7434 = vmatprep.subr.bf16.mxu1 %v8074_v59  ;;  %7456 = vmatprep.subr.bf16.mxu0 %v8075_v60  ;;  %v8111_v57 = vld [vmem:[%s8383_s4 + $0x2e8] sm:$0xff]  }
0x1db3   : > { %v8112_v59 = vld [vmem:[%s8383_s4 + $0x228] sm:$0xff]  }
0x1db4   : > { %v8113_v60 = vld [vmem:[%s8383_s4 + $0x2a8] sm:$0xff]  }
0x1db5   : > { %7435 = vmatpush3.bf16.msra.mxu1 %v8076_v62  ;;  %7457 = vmatpush3.bf16.msra.mxu0 %v8077_v63  ;;  %v8114_v62 = vld [vmem:[%s8383_s4 + $0x270] sm:$0xff]  }
0x1db6   : > { %7436 = vmatprep.subr.bf16.mxu1 %v8078_v30  ;;  %7458 = vmatprep.subr.bf16.mxu0 %v8079_v0  ;;  %v8115_v63 = vld [vmem:[%s8383_s4 + $0x2f0] sm:$0xff]  }
0x1db7   : > { %v8116_v30 = vld [vmem:[%s8383_s4 + $0x230] sm:$0xff]  }
0x1db8   : > { %v8117_v0 = vld [vmem:[%s8383_s4 + $0x2b0] sm:$0xff]  }
0x1db9   : > { %7437 = vmatpush3.bf16.msra.mxu1 %v8080_v2  ;;  %7459 = vmatpush3.bf16.msra.mxu0 %v8081_v54  ;;  %v8118_v2 = vld [vmem:[%s8383_s4 + $0x278] sm:$0xff]  }
0x1dba   : > { %7438 = vmatprep.subr.bf16.mxu1 %v8082_v3  ;;  %7460 = vmatprep.subr.bf16.mxu0 %v8083_v9  ;;  %v8119_v54 = vld [vmem:[%s8383_s4 + $0x2f8] sm:$0xff]  }
0x1dbb   : > { %v8120_v3 = vld [vmem:[%s8383_s4 + $0x238] sm:$0xff]  }
0x1dbc   : > { %v8121_v9 = vld [vmem:[%s8383_s4 + $0x2b8] sm:$0xff]  }
0x1dbd   : > { %7439 = vmatpush3.bf16.msra.mxu1 %v8084_v10  ;;  %7461 = vmatpush3.bf16.msra.mxu0 %v8085_v45  ;;  %v9013_v10 = vld [vmem:[%s8378_s16 + $0x30] sm:$0xff] }
0x1dbe   : > { %7440 = vmatprep.subr.bf16.mxu1 %v8086_v49  ;;  %7462 = vmatprep.subr.bf16.mxu0 %v8087_v50  ;;  %v9016_v45 = vld [vmem:[%s8378_s16 + $0x70] sm:$0xff]  ;;  %v9019_v49 = vld [vmem:[%s8378_s16 + $0x38] sm:$0xff] }
0x1dbf   : > { %v7198_v50 = vcombine.high %v9013_v10, %v9016_v45  ;;  %v7197_v7 = vcombine.low %v9013_v10, %v9016_v45  ;;  %v7199_v56 = vcombine.low %v9019_v49, %v9024_v12  ;;  %v7200_v41 = vcombine.high %v9019_v49, %v9024_v12  ;;  %v8124_v10 = vld [vmem:[%s8383_s4 + $0x300] sm:$0xff]   ;;  %v8126_v49 = vld [vmem:[%s8383_s4 + $0x348] sm:$0xff]  }
0x1dc0   : > { %v8125_v45 = vld [vmem:[%s8383_s4 + $0x380] sm:$0xff]   ;;  %v8127_v12 = vld [vmem:[%s8383_s4 + $0x3c8] sm:$0xff]  }
0x1dc1   : > { %7441 = vmatpush3.bf16.msra.mxu1 %v8088_v13  ;;  %7463 = vmatpush3.bf16.msra.mxu0 %v8089_v32 }
0x1dc2   : > { %5576 = vmatprep.subr.bf16.mxu1 %v7083_v48  ;;  %5619 = vmatprep.subr.bf16.mxu0 %v7085_v14 }
0x1dc4   : > { %5390 = vmatmul.mubr.bf16.vlgmr.msra.gmra.mrb[56].mxu1 %v8930_v61  ;;  %5431 = vmatmul.mubr.bf16.vlgmr.msra.gmra.mrb[44].mxu0 %v8932_v4  ;;  %v8090_v61 = vld [vmem:[%s8383_s4 + $0x240] sm:$0xff]  }
0x1dc5   : > { %5577 = vmatpush1.bf16.msra.mxu1 %v7082_v18  ;;  %5620 = vmatpush1.bf16.msra.mxu0 %v7084_v20  ;;  %v8091_v4 = vld [vmem:[%s8383_s4 + $0x2c0] sm:$0xff]  }
0x1dc6   : > { %5578 = vmatprep.subr.bf16.mxu1 %v7087_v22  ;;  %5621 = vmatprep.subr.bf16.mxu0 %v7089_v26 }
0x1dc7   : > { %5608 = vmatprep.mubr.bf16.mxu1 %v8264_v6  ;;  %5651 = vmatprep.mubr.bf16.mxu0 %v8264_v6 }
0x1dc9   : > { %5579 = vmatpush1.bf16.msra.mxu1 %v7086_v27  ;;  %5622 = vmatpush1.bf16.msra.mxu0 %v7088_v28 }
0x1dca   : > { %7470 = vmatprep.subr.bf16.mxu1 %v8090_v61  ;;  %7492 = vmatprep.subr.bf16.mxu0 %v8091_v4 }
0x1dcc   : > { %7090 = vmatmul.mubr.msk.bf16.vlgmr.msra.gmra.mrb[60].mxu1 %vm601_vm1, %v8874_v44  ;;  %7091 = vmatmul.mubr.msk.bf16.vlgmr.msra.gmra.mrb[48].mxu0 %vm601_vm1, %v8874_v44 }
0x1dcd   : > { %7471 = vmatpush3.bf16.msra.mxu1 %v8092_v8  ;;  %7493 = vmatpush3.bf16.msra.mxu0 %v8093_v25 }
0x1dce   : > { %7472 = vmatprep.subr.bf16.mxu1 %v8094_v35  ;;  %7494 = vmatprep.subr.bf16.mxu0 %v8095_v36 }
0x1dd1   : > { %7473 = vmatpush3.bf16.msra.mxu1 %v8096_v58  ;;  %7495 = vmatpush3.bf16.msra.mxu0 %v8097_v38 }
0x1dd2   : > { %7474 = vmatprep.subr.bf16.mxu1 %v8098_v47  ;;  %7496 = vmatprep.subr.bf16.mxu0 %v8099_v42  ;;  %v7017_v47 = vld [vmem:[%s8393_s28 + $0x8] sm:$0xf] }
0x1dd5   : > { %7475 = vmatpush3.bf16.msra.mxu1 %v8100_v43  ;;  %7497 = vmatpush3.bf16.msra.mxu0 %v8101_v37 }
0x1dd6   : > { %7476 = vmatprep.subr.bf16.mxu1 %v8102_v1  ;;  %7498 = vmatprep.subr.bf16.mxu0 %v8103_v29 }
0x1dd9   : > { %7477 = vmatpush3.bf16.msra.mxu1 %v8104_v19  ;;  %7499 = vmatpush3.bf16.msra.mxu0 %v8105_v21  ;;  %v5519_v19 = vrot.slane %v7017_v47, %v8422_v33  ;;  %v5527_v21 = vrot.slane %v7017_v47, %v8448_v51 }
0x1dda   : > { %7478 = vmatprep.subr.bf16.mxu1 %v8106_v46  ;;  %7500 = vmatprep.subr.bf16.mxu0 %v8107_v31 }
0x1ddd   : > { %7479 = vmatpush3.bf16.msra.mxu1 %v8108_v52  ;;  %7501 = vmatpush3.bf16.msra.mxu0 %v8109_v53  ;;  %v5523_v52 = vrot.slane %v7017_v47, %v8425_v34  ;;  %v5531_v53 = vrot.slane %v7017_v47, %v8413_v24 }
0x1dde   : > { %7480 = vmatprep.subr.bf16.mxu1 %v8110_v55  ;;  %7502 = vmatprep.subr.bf16.mxu0 %v8111_v57 }
0x1de1   : > { %7481 = vmatpush3.bf16.msra.mxu1 %v8112_v59  ;;  %7503 = vmatpush3.bf16.msra.mxu0 %v8113_v60 }
0x1de2   : > { %7482 = vmatprep.subr.bf16.mxu1 %v8114_v62  ;;  %7504 = vmatprep.subr.bf16.mxu0 %v8115_v63 }
0x1de5   : > { %7483 = vmatpush3.bf16.msra.mxu1 %v8116_v30  ;;  %7505 = vmatpush3.bf16.msra.mxu0 %v8117_v0 }
0x1de6   : > { %7484 = vmatprep.subr.bf16.mxu1 %v8118_v2  ;;  %7506 = vmatprep.subr.bf16.mxu0 %v8119_v54 }
0x1de9   : > { %7485 = vmatpush3.bf16.msra.mxu1 %v8120_v3  ;;  %7507 = vmatpush3.bf16.msra.mxu0 %v8121_v9 }
0x1dea   : > { %6087 = vmatprep.subr.bf16.mxu1 %v7198_v50  ;;  %6130 = vmatprep.subr.bf16.mxu0 %v7200_v41 }
0x1e77   : > { %v7398_v13 = vpop.f32.mrb[52].mxu1  ;;  %v7420_v32 = vpop.f32.mrb[40].mxu0 }
0x1e78   : > { %v7399_v48 = vpop.f32.mrb[53].mxu1  ;;  %v7421_v14 = vpop.f32.mrb[41].mxu0 }
0x1e79   : > { %v7400_v15 = vadd.f32 %v7399_v48, %v7398_v13  ;;  %v7422_v16 = vadd.f32 %v7421_v14, %v7420_v32  ;;  %v7401_v17 = vpop.f32.mrb[54].mxu1  ;;  %v7423_v5 = vpop.f32.mrb[42].mxu0 }
0x1e7a   : > { %v7402_v18 = vpop.f32.mrb[55].mxu1  ;;  %v7424_v20 = vpop.f32.mrb[43].mxu0 }
0x1e7b   : > { %v5159_v22 = vadd.f32 %v7422_v16, %v7400_v15  ;;  %v7403_v26 = vadd.f32 %v7402_v18, %v7401_v17  ;;  %v7425_v27 = vadd.f32 %v7424_v20, %v7423_v5  ;;  %v7128_v5 = vld [vmem:[%s8378_s16 + $0xb0] sm:$0xff] }
0x1e7c   : > { %v7130_v18 = vld [vmem:[%s8378_s16 + $0xf0] sm:$0xff] }
0x1e7d   : > { %v5162_v28 = vadd.f32 %v7425_v27, %v7403_v26 }
0x1e97   : > { %v7442_v61 = vpop.f32.mrb[56].mxu1  ;;  %v7464_v4 = vpop.f32.mrb[44].mxu0 }
0x1e98   : > { %v7443_v8 = vpop.f32.mrb[57].mxu1  ;;  %v7465_v25 = vpop.f32.mrb[45].mxu0 }
0x1e99   : > { %v7444_v35 = vadd.f32 %v7443_v8, %v7442_v61  ;;  %v7466_v36 = vadd.f32 %v7465_v25, %v7464_v4  ;;  %v7445_v58 = vpop.f32.mrb[58].mxu1  ;;  %v7467_v38 = vpop.f32.mrb[46].mxu0  ;;  %v7131_v61 = vld [vmem:[%s8378_s16 + $0xf8] sm:$0xff] }
0x1e9a   : > { %v7446_v42 = vpop.f32.mrb[59].mxu1  ;;  %v7468_v43 = vpop.f32.mrb[47].mxu0 }
0x1e9b   : > { %v5392_v37 = vadd.f32 %v7444_v35, %v5159_v22  ;;  %v7447_v1 = vadd.f32 %v7446_v42, %v7445_v58  ;;  %v7469_v29 = vadd.f32 %v7468_v43, %v7467_v38  ;;  %v7201_v38 = vcombine.low %v7128_v5, %v7130_v18  ;;  %v8122_v42 = vld [vmem:[%s8383_s4 + $0x340] sm:$0xff]  }
0x1e9c   : > { %v8123_v43 = vld [vmem:[%s8383_s4 + $0x3c0] sm:$0xff]  }
0x1e9d   : > { %v9035_v46 = vadd.f32 %v7466_v36, %v5392_v37  ;;  %v5395_v31 = vadd.f32 %v7447_v1, %v5162_v28  ;;  %v7129_v28 = vld [vmem:[%s8378_s16 + $0xb8] sm:$0xff]  ;;  %v7202_v36 = vcombine.high %v7128_v5, %v7130_v18  ;;  %v8131_v37 = vld [vmem:[%s8383_s4 + $0x3d0] sm:$0xff]  }
0x1e9e   : > { %v7204_v58 = vcombine.high %v7129_v28, %v7131_v61  ;;  %v7203_v47 = vcombine.low %v7129_v28, %v7131_v61  ;;  %v8132_v1 = vld [vmem:[%s8383_s4 + $0x310] sm:$0xff]  }
0x1e9f   : > { %v9039_v55 = vadd.f32 %v7469_v29, %v5395_v31  ;;  %v5610_v57 = vpop.f32.mrb[60].mxu1  ;;  %v5653_v59 = vpop.f32.mrb[48].mxu0  ;;  %v8133_v29 = vld [vmem:[%s8383_s4 + $0x390] sm:$0xff]   ;;  %v8137_v31 = vld [vmem:[%s8383_s4 + $0x398] sm:$0xff]  }
0x1ea0   : > { %v5611_v60 = vadd.f32 %v5610_v57, %v5519_v19  ;;  %v5654_v62 = vadd.f32 %v5653_v59, %v5527_v21  ;;  %v5612_v63 = vpop.f32.mrb[61].mxu1  ;;  %v5655_v30 = vpop.f32.mrb[49].mxu0  ;;  %v8140_v57 = vld [vmem:[%s8383_s4 + $0x320] sm:$0xff]  }
0x1ea1   : > { %v5613_v0 = vadd.f32 %v5612_v63, %v5523_v52  ;;  %v5656_v2 = vadd.f32 %v5655_v30, %v5531_v53  ;;  %v5614_v54 = vpop.f32.mrb[62].mxu1  ;;  %v5657_v3 = vpop.f32.mrb[50].mxu0  ;;  %v8141_v59 = vld [vmem:[%s8383_s4 + $0x3a0] sm:$0xff]   ;;  %v8144_v63 = vld [vmem:[%s8383_s4 + $0x328] sm:$0xff]  }
0x1ea2   : > { %v5615_v9 = vadd.f32 %v5614_v54, %v5519_v19  ;;  %v5658_v50 = vadd.f32 %v5657_v3, %v5527_v21  ;;  %v5616_v41 = vpop.f32.mrb[63].mxu1  ;;  %v5659_v13 = vpop.f32.mrb[51].mxu0  ;;  %v5662_v14 = vmax.f32 %v5611_v60, 0.0  ;;  %v5664_v15 = vmax.f32 %v5654_v62, 0.0  ;;  %v8135_v19 = vld [vmem:[%s8383_s4 + $0x3d8] sm:$0xff]   ;;  %v8142_v60 = vld [vmem:[%s8383_s4 + $0x368] sm:$0xff]  }
0x1ea3   : > { %v5617_v32 = vadd.f32 %v5616_v41, %v5523_v52  ;;  %v5660_v48 = vadd.f32 %v5659_v13, %v5531_v53  ;;  %v5663_v20 = vmax.f32 %v5613_v0, 0.0  ;;  %v5665_v22 = vmax.f32 %v5656_v2, 0.0  ;;  %v8136_v21 = vld [vmem:[%s8383_s4 + $0x318] sm:$0xff]   ;;  %v8138_v52 = vld [vmem:[%s8383_s4 + $0x360] sm:$0xff]   ;;  %v8143_v62 = vld [vmem:[%s8383_s4 + $0x3e8] sm:$0xff]  }
0x1ea4   : > { %v5666_v16 = vmax.f32 %v5615_v9, 0.0  ;;  %v5668_v17 = vmax.f32 %v5658_v50, 0.0  ;;  %v8139_v53 = vld [vmem:[%s8383_s4 + $0x3e0] sm:$0xff]   ;;  %v8145_v30 = vld [vmem:[%s8383_s4 + $0x3a8] sm:$0xff]   ;;  %v8146_v0 = vld [vmem:[%s8383_s4 + $0x370] sm:$0xff]  }
0x1ea5   : > { %v5667_v26 = vmax.f32 %v5617_v32, 0.0  ;;  %v5669_v27 = vmax.f32 %v5660_v48, 0.0  ;;  %v8147_v2 = vld [vmem:[%s8383_s4 + $0x3f0] sm:$0xff]   ;;  %v8150_v9 = vld [vmem:[%s8383_s4 + $0x378] sm:$0xff]  }
0x1ea6   : > { %v5670_v4 = vpack.c.bf16 %v5666_v16, %v5662_v14  ;;  %v5672_v8 = vpack.c.bf16 %v5668_v17, %v5664_v15  ;;  %v8148_v54 = vld [vmem:[%s8383_s4 + $0x330] sm:$0xff]   ;;  %v8151_v50 = vld [vmem:[%s8383_s4 + $0x3f8] sm:$0xff]  }
0x1ea7   : > { %v5671_v25 = vpack.c.bf16 %v5667_v26, %v5663_v20  ;;  %v5673_v35 = vpack.c.bf16 %v5669_v27, %v5665_v22  ;;  %v8149_v3 = vld [vmem:[%s8383_s4 + $0x3b0] sm:$0xff]   ;;  %v8152_v41 = vld [vmem:[%s8383_s4 + $0x338] sm:$0xff]   ;;  %v7132_v20 = vld [vmem:[%s8393_s28 + $0xc] sm:$0xf] }
0x1ea8   : > { %v8153_v13 = vld [vmem:[%s8383_s4 + $0x3b8] sm:$0xff]  }
0x1ea9   : > { %5898 = vmatprep.mubr.bf16.mxu1 %v5671_v25  ;;  %5939 = vmatprep.mubr.bf16.mxu0 %v5673_v35 }
0x1eaa   : > { %5899 = vmatmul.mubr.bf16.vlgmr.msra.gmra.mrb[64].mxu1 %v5670_v4  ;;  %5940 = vmatmul.mubr.bf16.vlgmr.msra.gmra.mrb[52].mxu0 %v5672_v8  ;;  %v6030_v4 = vrot.slane %v7132_v20, %v8422_v33  ;;  %v6038_v8 = vrot.slane %v7132_v20, %v8448_v51 }
0x1eab   : > { %6088 = vmatpush1.bf16.msra.mxu1 %v7197_v7  ;;  %6131 = vmatpush1.bf16.msra.mxu0 %v7199_v56  ;;  %v8129_v7 = vld [vmem:[%s8383_s4 + $0x388] sm:$0xff]   ;;  %v8130_v56 = vld [vmem:[%s8383_s4 + $0x350] sm:$0xff]  }
0x1eac   : > { %6089 = vmatprep.subr.bf16.mxu1 %v7202_v36  ;;  %6132 = vmatprep.subr.bf16.mxu0 %v7204_v58  ;;  %v6034_v36 = vrot.slane %v7132_v20, %v8425_v34  ;;  %v6042_v58 = vrot.slane %v7132_v20, %v8413_v24 }
0x1ead   : > { %6119 = vmatprep.mubr.bf16.mxu1 %v8264_v6  ;;  %6162 = vmatprep.mubr.bf16.mxu0 %v8264_v6  ;;  %v8128_v6 = vld [vmem:[%s8383_s4 + $0x308] sm:$0xff]  }
0x1eaf   : > { %6090 = vmatpush1.bf16.msra.mxu1 %v7201_v38  ;;  %6133 = vmatpush1.bf16.msra.mxu0 %v7203_v47 }
0x1eb0   : > { %7514 = vmatprep.subr.bf16.mxu1 %v8122_v42  ;;  %7536 = vmatprep.subr.bf16.mxu0 %v8123_v43 }
0x1eb2   : > { %7205 = vmatmul.mubr.msk.bf16.vlgmr.msra.gmra.mrb[68].mxu1 %vm601_vm1, %v8874_v44  ;;  %7206 = vmatmul.mubr.msk.bf16.vlgmr.msra.gmra.mrb[56].mxu0 %vm601_vm1, %v8874_v44  ;;  %v8134_v44 = vld [vmem:[%s8383_s4 + $0x358] sm:$0xff]  }
0x1eb3   : > { %7515 = vmatpush3.bf16.msra.mxu1 %v8124_v10  ;;  %7537 = vmatpush3.bf16.msra.mxu0 %v8125_v45 }
0x1eb4   : > { %7516 = vmatprep.subr.bf16.mxu1 %v8126_v49  ;;  %7538 = vmatprep.subr.bf16.mxu0 %v8127_v12 }
0x1eb7   : > { %7517 = vmatpush3.bf16.msra.mxu1 %v8128_v6  ;;  %7539 = vmatpush3.bf16.msra.mxu0 %v8129_v7 }
0x1eb8   : > { %7518 = vmatprep.subr.bf16.mxu1 %v8130_v56  ;;  %7540 = vmatprep.subr.bf16.mxu0 %v8131_v37 }
0x1ebb   : > { %7519 = vmatpush3.bf16.msra.mxu1 %v8132_v1  ;;  %7541 = vmatpush3.bf16.msra.mxu0 %v8133_v29 }
0x1ebc   : > { %7520 = vmatprep.subr.bf16.mxu1 %v8134_v44  ;;  %7542 = vmatprep.subr.bf16.mxu0 %v8135_v19 }
0x1ebf   : > { %7521 = vmatpush3.bf16.msra.mxu1 %v8136_v21  ;;  %7543 = vmatpush3.bf16.msra.mxu0 %v8137_v31 }
0x1ec0   : > { %7522 = vmatprep.subr.bf16.mxu1 %v8138_v52  ;;  %7544 = vmatprep.subr.bf16.mxu0 %v8139_v53 }
0x1ec3   : > { %7523 = vmatpush3.bf16.msra.mxu1 %v8140_v57  ;;  %7545 = vmatpush3.bf16.msra.mxu0 %v8141_v59 }
0x1ec4   : > { %7524 = vmatprep.subr.bf16.mxu1 %v8142_v60  ;;  %7546 = vmatprep.subr.bf16.mxu0 %v8143_v62 }
0x1ec7   : > { %7525 = vmatpush3.bf16.msra.mxu1 %v8144_v63  ;;  %7547 = vmatpush3.bf16.msra.mxu0 %v8145_v30 }
0x1ec8   : > { %7526 = vmatprep.subr.bf16.mxu1 %v8146_v0  ;;  %7548 = vmatprep.subr.bf16.mxu0 %v8147_v2 }
0x1ecb   : > { %7527 = vmatpush3.bf16.msra.mxu1 %v8148_v54  ;;  %7549 = vmatpush3.bf16.msra.mxu0 %v8149_v3 }
0x1ecc   : > { %7528 = vmatprep.subr.bf16.mxu1 %v8150_v9  ;;  %7550 = vmatprep.subr.bf16.mxu0 %v8151_v50 }
0x1ecf   : > { %7529 = vmatpush3.bf16.msra.mxu1 %v8152_v41  ;;  %7551 = vmatpush3.bf16.msra.mxu0 %v8153_v13 }
0x1ed0   : > { %6536 = vmatprep.subr.bf16.mxu0 (!%p7239_p5), %v8233_v23 }
0x1f7d   : > { %v7486_v32 = vpop.f32.mrb[64].mxu1  ;;  %v7508_v48 = vpop.f32.mrb[52].mxu0 }
0x1f7e   : > { %v7487_v14 = vpop.f32.mrb[65].mxu1  ;;  %v7509_v15 = vpop.f32.mrb[53].mxu0 }
0x1f7f   : > { %v7488_v16 = vadd.f32 %v7487_v14, %v7486_v32  ;;  %v7510_v17 = vadd.f32 %v7509_v15, %v7508_v48  ;;  %v7489_v5 = vpop.f32.mrb[66].mxu1  ;;  %v7511_v18 = vpop.f32.mrb[54].mxu0  ;;  %v8232_v15 = vld [vmem:[%s8388_s5 + $0x8] sm:$0x7f] }
0x1f80   : > { %v7490_v22 = vpop.f32.mrb[67].mxu1  ;;  %v7512_v26 = vpop.f32.mrb[55].mxu0 }
0x1f81   : > { %v5942_v27 = vadd.f32 %v7510_v17, %v7488_v16  ;;  %v7491_v28 = vadd.f32 %v7490_v22, %v7489_v5  ;;  %v7513_v61 = vadd.f32 %v7512_v26, %v7511_v18  ;;  %v6464_v16 = vrot.slane %v8232_v15, %v2445_v11 }
0x1f82   : > { %v8265_v11 = vmov (!%p7239_p5), 0.0  }
0x1f83   : > { %v5948_v25 = vadd.f32 %v5942_v27, %v9035_v46  ;;  %v5945_v35 = vadd.f32 %v7513_v61, %v7491_v28  ;;  %7829 = vmatprep.subr.bf16.mxu1 (!%p7239_p5), %v8265_v11 }
0x1f85   : > { %v5949_v38 = vadd.f32 %v5945_v35, %v9039_v55  ;;  %v6121_v47 = vpop.f32.mrb[68].mxu1  ;;  %v6164_v42 = vpop.f32.mrb[56].mxu0  ;;  %v8240_v35 = vld [vmem:[%s9162_s11 + $0x18] ss:$12 sps:$4 sm:$0xff] (!%p7239_p5)  }
0x1f86   : > { %v6122_v43 = vadd.f32 %v6121_v47, %v6030_v4  ;;  %v6165_v10 = vadd.f32 %v6164_v42, %v6038_v8  ;;  %v6123_v45 = vpop.f32.mrb[69].mxu1  ;;  %v6166_v49 = vpop.f32.mrb[57].mxu0 }
0x1f87   : > { %v6124_v12 = vadd.f32 %v6123_v45, %v6034_v36  ;;  %v6167_v6 = vadd.f32 %v6166_v49, %v6042_v58  ;;  %v6125_v7 = vpop.f32.mrb[70].mxu1  ;;  %v6168_v56 = vpop.f32.mrb[58].mxu0 }
0x1f88   : > { %v6126_v37 = vadd.f32 %v6125_v7, %v6030_v4  ;;  %v6169_v1 = vadd.f32 %v6168_v56, %v6038_v8  ;;  %v6127_v46 = vpop.f32.mrb[71].mxu1  ;;  %v6170_v29 = vpop.f32.mrb[59].mxu0  ;;  %v6173_v21 = vmax.f32 %v6122_v43, 0.0  ;;  %v6175_v24 = vmax.f32 %v6165_v10, 0.0  ;;  %v8237_v4 = vld [vmem:[%s9162_s11 + $0x1c] ss:$12 sps:$4 sm:$0xff] (!%p7239_p5)  }
0x1f89   : > { %v6128_v44 = vadd.f32 %v6127_v46, %v6034_v36  ;;  %v6171_v19 = vadd.f32 %v6170_v29, %v6042_v58  ;;  %v6174_v52 = vmax.f32 %v6124_v12, 0.0  ;;  %v6176_v53 = vmax.f32 %v6167_v6, 0.0  ;;  %v6484_v58 = vld [vmem:[%s9163_s12] sm:$0x7] (!%p7239_p5) }
0x1f8a   : > { %v6177_v31 = vmax.f32 %v6126_v37, 0.0  ;;  %v6179_v55 = vmax.f32 %v6169_v1, 0.0  ;;  %v8267_v8 = vmov (!%p7239_p5), 0   ;;  %v6489_v47 = vrot.slane (!%p7239_p5), %v6484_v58, %v8422_v33 }
0x1f8b   : > { %v6178_v57 = vmax.f32 %v6128_v44, 0.0  ;;  %v6180_v59 = vmax.f32 %v6171_v19, 0.0  ;;  %v6493_v42 = vrot.slane (!%p7239_p5), %v6484_v58, %v8425_v34 }
0x1f8c   : > { %v6181_v60 = vpack.c.bf16 %v6177_v31, %v6173_v21  ;;  %v6183_v62 = vpack.c.bf16 %v6179_v55, %v6175_v24 }
0x1f8d   : > { %v6182_v63 = vpack.c.bf16 %v6178_v57, %v6174_v52  ;;  %v6184_v30 = vpack.c.bf16 %v6180_v59, %v6176_v53 }
0x1f8f   : > { %6409 = vmatprep.mubr.bf16.mxu1 %v6182_v63  ;;  %6450 = vmatprep.mubr.bf16.mxu0 %v6184_v30 }
0x1f90   : > { %6410 = vmatmul.mubr.bf16.vlgmr.msra.gmra.mrb[72].mxu1 %v6181_v60  ;;  %6451 = vmatmul.mubr.bf16.vlgmr.msra.gmra.mrb[60].mxu0 %v6183_v62 }
0x1f91   : > { %7833 = vmatprep.mubr.msk.bf16.mxu1 (!%p7239_p5), %vm8266_vm6, %v8265_v11  ;;  %6568 = vmatprep.mubr.bf16.mxu0 (!%p7239_p5), %v8267_v8 }
0x2063   : > { %v7530_v0 = vpop.f32.mrb[72].mxu1  ;;  %v7552_v2 = vpop.f32.mrb[60].mxu0 }
0x2064   : > { %v7531_v54 = vpop.f32.mrb[73].mxu1  ;;  %v7553_v3 = vpop.f32.mrb[61].mxu0 }
0x2065   : > { %v7532_v9 = vadd.f32 %v7531_v54, %v7530_v0  ;;  %v7554_v50 = vadd.f32 %v7553_v3, %v7552_v2  ;;  %v7533_v41 = vpop.f32.mrb[74].mxu1  ;;  %v7555_v13 = vpop.f32.mrb[62].mxu0 }
0x2066   : > { %v7534_v32 = vpop.f32.mrb[75].mxu1  ;;  %v7556_v48 = vpop.f32.mrb[63].mxu0 }
0x2067   : > { %v6453_v14 = vadd.f32 %v7554_v50, %v7532_v9  ;;  %v7535_v17 = vadd.f32 %v7534_v32, %v7533_v41  ;;  %v7557_v5 = vadd.f32 %v7556_v48, %v7555_v13 }
0x2069   : > { %v6459_v18 = vadd.f32 %v6453_v14, %v5948_v25  ;;  %v6456_v20 = vadd.f32 %v7557_v5, %v7535_v17  ;;  %v8239_v25 = vld [vmem:[%s9162_s11 + $0x20] ss:$12 sps:$4 sm:$0xff] (!%p7239_p5)  }
0x206b   : > { %v6465_v22 = vadd.f32 %v6464_v16, %v6459_v18  ;;  %v6460_v26 = vadd.f32 %v6456_v20, %v5949_v38  ;;  %6474 = sbr.rel (%p7239_p5) target bundleno = 8529 (0x2151), region = 80  ;;  %v6497_v38 = vrot.slane (!%p7239_p5), %v6484_v58, %v8448_v51 }
0x206d   : > { %v6467_v27 = vadd.f32 %v6465_v22, %v8840_v40  ;;  %v6466_v28 = vadd.f32 %v6464_v16, %v6460_v26  ;;  %v8235_v40 = vld [vmem:[%s9162_s11 + $0x8] ss:$12 sps:$4 sm:$0xff] (!%p7239_p5)  }
0x206e   : > { %7830 = vmatpush3.bf16.msra.mxu1 (!%p7239_p5), %v8235_v40 }
0x206f   : > { %6469 = vst.msk [vmem:[#allocation2] sm:$0xff] %vm601_vm1, %v6467_v27  ;;  %v6468_v61 = vadd.f32 %v6466_v28, %v8837_v39  ;;  %v8236_v39 = vld [vmem:[%s9162_s11] ss:$12 sps:$4 sm:$0xff] (!%p7239_p5)   ;;  %7831 = vmatprep.subr.bf16.mxu1 (!%p7239_p5), %v8265_v11 }
0x2070   : > { %6537 = vmatpush1.bf16.msra.mxu0 (!%p7239_p5), %v8236_v39 }
0x2071   : > { %6470 = vst.msk [vmem:[#allocation2 + $0x8] sm:$0xff] %vm601_vm1, %v6468_v61  ;;  %6538 = vmatprep.subr.bf16.mxu0 (!%p7239_p5), %v8237_v4  ;;  %v6475_v36 = vpack.c.bf16 (!%p7239_p5), %v6468_v61, %v6467_v27 }
0x2072   : > { %7832 = vmatpush3.bf16.msra.mxu1 %v8239_v25 }
0x2074   : > { %6539 = vmatpush1.bf16.msra.mxu0 %v8240_v35 }
0x2075   : > { %7834 = vmatmul.mubr.msk.bf16.vlgmr.msra.gmra.mrb[0].mxu1 %vm601_vm1, %v6475_v36 }
0x2077   : > { %7246 = vmatmul.mubr.msk.bf16.vlgmr.msra.gmra.mrb[0].mxu0 %vm601_vm1, %v6475_v36 }
0x2148   : > { %v6613_v43 = vpop.f32.mrb[0].mxu1 }
0x2149   : > { %v6614_v10 = vadd.f32 %v6613_v43, %v6497_v38  ;;  %v7835_v49 = vpop.f32.mrb[1].mxu1 }
0x214a   : > { %v6570_v45 = vpop.f32.mrb[0].mxu0  ;;  %v6616_v7 = vpop.f32.mrb[2].mxu1 }
0x214b   : > { %v6571_v12 = vadd.f32 %v6570_v45, %v6489_v47  ;;  %v6572_v6 = vpop.f32.mrb[1].mxu0  ;;  %6622 = vst [vmem:[%s9179_s17 + $0x10] sm:$0xff] %v6614_v10  ;;  %v6617_v37 = vadd.f32 %v6616_v7, %v6497_v38  ;;  %v7836_v46 = vpop.f32.mrb[3].mxu1 }
0x214c   : > { %v6573_v56 = vadd.f32 %v6572_v6, %v6493_v42  ;;  %v6574_v1 = vpop.f32.mrb[2].mxu0 }
0x214d   : > { %6620 = vst [vmem:[%s9179_s17] sm:$0xff] %v6571_v12  ;;  %v6575_v33 = vadd.f32 %v6574_v1, %v6489_v47  ;;  %v6576_v34 = vpop.f32.mrb[3].mxu0  ;;  %6625 = vst [vmem:[%s9179_s17 + $0x28] sm:$0xff] %v6617_v37 }
0x214e   : > { %6621 = vst [vmem:[%s9179_s17 + $0x8] sm:$0xff] %v6573_v56  ;;  %v6577_v51 = vadd.f32 %v6576_v34, %v6493_v42 }
0x214f   : > { %6623 = vst [vmem:[%s9179_s17 + $0x18] sm:$0xff] %v6575_v33 }
0x2150   : > { %6624 = vst [vmem:[%s9179_s17 + $0x20] sm:$0xff] %v6577_v51 }
0x2151 PF: > { %s9180_s28 = sld [smem:[#allocation3_spill]] }
0x2157   : > { %s23_s25 = sadd.s32 1, %s9180_s28  }
0x2158   : > { %p20_p6 = scmp.ge.s32.totalorder %s23_s25, 4  }
0x215a   :  { %22 = sbr.rel (!%p20_p6) target bundleno = 6 (0x6), region = 139 }

</bundles_post_ra>
